<compile_context>
chip_gen: v6e
topology: v6e:2x2x1
jax: 0.10.0
libtpu: 0.0.40
codegen_flags: <defaults>
</compile_context>

<pallas_src>
import jax
import jax.numpy as jnp
from jax.experimental import pallas as pl
from jax.experimental.pallas import tpu as pltpu

# ---- static config (config dict of the PyTorch module) ----------------------
NODE_DIM = 8       # config['node_dim']
HIDDEN = 32        # config.get('hidden_dim', 64) -> small for the demo
TARGET_DIM = 4     # config['target_dim']
GCN_LAYERS = 4     # config.get('conv_layers', 4)
LIN_LAYERS = 4     # config.get('linear_layers', 4)
NEG_SLOPE = 0.01   # nn.LeakyReLU() default negative_slope

N_NODES = 16       # nodes per graph
B_GRAPHS = 32      # graphs in the batch


def _agc_network_kernel(x_ref, adjb_ref, w0_ref, w_gcn_ref, att_ref,
                        w_lin_ref, w_out_ref, pred_ref, score_ref):
    bt, n, nd = x_ref.shape          # (b_tile, N, NODE_DIM)
    bn = bt * n

    # Flat (bn, node_dim) slab: all graphs of this tile stacked -> full-width MXU.
    x2 = x_ref[...].reshape(bn, nd)                       # bf16
    adj = adjb_ref[0]                                     # (bn, bn) bf16 block-diag

    # ---- GCN layer 0: embedding fused into the first GCN weight -------------
    hw = jnp.dot(x2, w0_ref[...], preferred_element_type=jnp.float32)      # (bn, H)
    h = jnp.dot(adj, hw.astype(jnp.bfloat16),
                preferred_element_type=jnp.float32)                        # A_blk @ (x W0)
    h = jnp.where(h > 0.0, h, NEG_SLOPE * h)                               # LeakyReLU (f32)

    # ---- remaining GCN layers: h <- LeakyReLU( A_blk @ (h @ W_l) ) ----------
    for l in range(GCN_LAYERS - 1):
        hw = jnp.dot(h.astype(jnp.bfloat16), w_gcn_ref[l],
                     preferred_element_type=jnp.float32)                   # (bn, H)
        h = jnp.dot(adj, hw.astype(jnp.bfloat16),
                    preferred_element_type=jnp.float32)
        h = jnp.where(h > 0.0, h, NEG_SLOPE * h)

    # ---- attention readout: per-graph softmax over the node axis ------------
    att = att_ref[...].astype(jnp.float32)                # (1, H)
    h3 = h.reshape(bt, n, HIDDEN)                         # only reshape in the kernel
    logits = jnp.sum(h3 * att, axis=-1)                   # (bt, n)  VPU lane reduction
    logits = logits - jnp.max(logits, axis=-1, keepdims=True)
    e = jnp.exp(logits)
    denom = jnp.sum(e, axis=-1, keepdims=True)
    score = e * pl.reciprocal(denom, approx=False)        # exact; EUP cost identical here
    score_ref[...] = score[:, :, None].astype(score_ref.dtype)

    # ---- Linears: (linear_layers-1) x [Linear + ReLU] + Linear(h, target) ---
    for l in range(LIN_LAYERS - 1):
        h = jnp.dot(h.astype(jnp.bfloat16), w_lin_ref[l],
                    preferred_element_type=jnp.float32)
        h = jnp.maximum(h, 0.0)
    pred = jnp.dot(h.astype(jnp.bfloat16), w_out_ref[...],
                   preferred_element_type=jnp.float32)    # (bn, TARGET_DIM)
    pred_ref[...] = pred.reshape(bt, n, TARGET_DIM).astype(pred_ref.dtype)


def _default_b_tile(batch):
    """v7x has 2 TensorCores -> keep 2 parallel grid steps; v5e/v6e take 1 step."""
    kind = ""
    try:
        kind = jax.devices()[0].device_kind.lower()
    except Exception:
        pass
    if "v7" in kind and batch % 2 == 0:
        return batch // 2
    return batch


def agc_network_forward(r_node, adj, params, b_tile=None):
    """Full forward pass as one gridded Pallas kernel over the graph batch.

    r_node : (B, N, node_dim) float32
    adj    : (B, N, N) float32 row-normalized dense adjacency (per graph)
    returns (prediction (B, N, target_dim) f32, score (B, N, 1) f32)
    """
    B, N, _ = r_node.shape
    if b_tile is None:
        b_tile = _default_b_tile(B)
    assert B % b_tile == 0
    num_steps = B // b_tile
    bn = b_tile * N

    # --- weight prep: bf16 for the MXU, f32 accumulation kept in-kernel ------
    # fuse embedding into the first GCN weight (no nonlinearity between them)
    w0 = jnp.dot(params["w_emb"], params["w_gcn"][0]).astype(jnp.bfloat16)   # (node_dim, H)
    w_gcn_rest = params["w_gcn"][1:].astype(jnp.bfloat16)                    # (L-1, H, H)
    att = params["att"].astype(jnp.float32)                                  # VPU-only
    w_lin = params["w_lin"].astype(jnp.bfloat16)
    w_out = params["w_out"].astype(jnp.bfloat16)                             # (H, target)
    x_bf16 = r_node.astype(jnp.bfloat16)

    # --- block-diagonal adjacency per grid step (off-diag blocks exactly 0) --
    adj_r = adj.reshape(num_steps, b_tile, N, N)
    eye = jnp.eye(b_tile, dtype=adj.dtype)
    adj_blk = jnp.einsum('sipq,ij->sipjq', adj_r, eye).reshape(num_steps, bn, bn)
    adj_blk = adj_blk.astype(jnp.bfloat16)

    grid = (num_steps,)

    in_specs = [
        pl.BlockSpec((b_tile, N, NODE_DIM), lambda b: (b, 0, 0)),   # r_node tile
        pl.BlockSpec((1, bn, bn), lambda b: (b, 0, 0)),             # block-diag adjacency
        # weights: constant index_map -> fetched once, VMEM-resident across steps
        pl.BlockSpec(w0.shape, lambda b: (0, 0)),
        pl.BlockSpec(w_gcn_rest.shape, lambda b: (0, 0, 0)),
        pl.BlockSpec(att.shape, lambda b: (0, 0)),
        pl.BlockSpec(w_lin.shape, lambda b: (0, 0, 0)),
        pl.BlockSpec(w_out.shape, lambda b: (0, 0)),
    ]
    out_specs = (
        pl.BlockSpec((b_tile, N, TARGET_DIM), lambda b: (b, 0, 0)),  # prediction
        pl.BlockSpec((b_tile, N, 1), lambda b: (b, 0, 0)),           # score
    )
    out_shape = (
        jax.ShapeDtypeStruct((B, N, TARGET_DIM), jnp.float32),
        jax.ShapeDtypeStruct((B, N, 1), jnp.float32),
    )

    prediction, score = pl.pallas_call(
        _agc_network_kernel,
        out_shape=out_shape,
        grid=grid,
        in_specs=in_specs,
        out_specs=out_specs,
        compiler_params=pltpu.CompilerParams(
            dimension_semantics=("parallel",),       # shard batch across TCs (v7x)
            vmem_limit_bytes=32 * 1024 * 1024,       # safe on v5e/v6e/v7x
        ),
    )(x_bf16, adj_blk, w0, w_gcn_rest, att, w_lin, w_out)

    return prediction, score


# ---- reference (pure JAX, f32) ----------------------------------------------
def ref_forward(x, adj, p):
    h = jnp.einsum('bnd,dh->bnh', x, p["w_emb"])
    for l in range(GCN_LAYERS):
        hw = jnp.einsum('bnh,hk->bnk', h, p["w_gcn"][l])
        h = jnp.einsum('bij,bjh->bih', adj, hw)
        h = jnp.where(h > 0.0, h, NEG_SLOPE * h)
    logits = jnp.sum(h * p["att"][0], axis=-1)
    logits = logits - jnp.max(logits, axis=-1, keepdims=True)
    e = jnp.exp(logits)
    score = e / jnp.sum(e, axis=-1, keepdims=True)
    for l in range(LIN_LAYERS - 1):
        h = jnp.maximum(jnp.einsum('bnh,hk->bnk', h, p["w_lin"][l]), 0.0)
    pred = jnp.einsum('bnh,hk->bnk', h, p["w_out"])
    return pred, score


def init_params(key):
    ks = jax.random.split(key, 5)
    scale = 0.1
    return {
        "w_emb": scale * jax.random.normal(ks[0], (NODE_DIM, HIDDEN), jnp.float32),
        "w_gcn": scale * jax.random.normal(ks[1], (GCN_LAYERS, HIDDEN, HIDDEN), jnp.float32),
        "att":   scale * jax.random.normal(ks[2], (1, HIDDEN), jnp.float32),
        "w_lin": scale * jax.random.normal(ks[3], (LIN_LAYERS - 1, HIDDEN, HIDDEN), jnp.float32),
        "w_out": scale * jax.random.normal(ks[4], (HIDDEN, TARGET_DIM), jnp.float32),
    }


def make_graph(key, n):
    """Deterministic dense adjacency: random edges + self loops, row-normalized."""
    a = jax.random.bernoulli(key, p=0.3, shape=(n, n)).astype(jnp.float32)
    a = jnp.maximum(a, a.T)                       # symmetrize
    a = a + jnp.eye(n, dtype=jnp.float32)         # self loops
    deg = jnp.sum(a, axis=1, keepdims=True)
    return a / deg                                # row-normalize (D^-1 A)


if __name__ == "__main__":
    key = jax.random.PRNGKey(0)
    k_x, k_g, k_p = jax.random.split(key, 3)

    r_node = jax.random.normal(k_x, (B_GRAPHS, N_NODES, NODE_DIM), jnp.float32)
    adj = jax.vmap(lambda k: make_graph(k, N_NODES))(jax.random.split(k_g, B_GRAPHS))
    params = init_params(k_p)

    pred, score = agc_network_forward(r_node, adj, params)
    pred = jax.block_until_ready(pred)
    score = jax.block_until_ready(score)

    assert pred.shape == (B_GRAPHS, N_NODES, TARGET_DIM)
    assert score.shape == (B_GRAPHS, N_NODES, 1)
    assert bool(jnp.all(jnp.isfinite(pred)))
    assert bool(jnp.all(jnp.isfinite(score)))

    # per-graph segment softmax -> each graph's scores sum to 1
    row_sums = jnp.sum(score[..., 0], axis=-1)
    assert bool(jnp.all(jnp.abs(row_sums - 1.0) < 1e-2))

    # loose check vs the pure-f32 JAX reference (kernel uses bf16 matmuls and
    # the embedding fused into the first GCN weight)
    ref_pred, ref_score = ref_forward(r_node, adj, params)
    assert float(jnp.max(jnp.abs(pred - ref_pred))) < 5e-2
    assert float(jnp.max(jnp.abs(score[..., 0] - ref_score))) < 5e-2

    print("KERNEL_OK")
</pallas_src>

<mosaic_0001>
module attributes {stable_mosaic.version = 11 : i64} {
  func.func @_agc_network_kernel(%arg0: i32, %arg1: memref<32x16x8xbf16, #tpu.memory_space<vmem>>, %arg2: memref<1x512x512xbf16, #tpu.memory_space<vmem>>, %arg3: memref<8x32xbf16, #tpu.memory_space<vmem>>, %arg4: memref<3x32x32xbf16, #tpu.memory_space<vmem>>, %arg5: memref<1x32xf32, #tpu.memory_space<vmem>>, %arg6: memref<3x32x32xbf16, #tpu.memory_space<vmem>>, %arg7: memref<32x4xbf16, #tpu.memory_space<vmem>>, %arg8: memref<32x16x4xf32, #tpu.memory_space<vmem>>, %arg9: memref<32x16x1xf32, #tpu.memory_space<vmem>>) attributes {dimension_semantics = [#tpu.dimension_semantics<parallel>], iteration_bounds = array<i64: 1>, scalar_prefetch = 0 : i64, scratch_operands = 0 : i64, tpu.core_type = #tpu.core_type<tc>, window_params = [{transform_indices = @transform_0, window_bounds = array<i64: 32, 16, 8>}, {transform_indices = @transform_1, window_bounds = array<i64: 1, 512, 512>}, {pipeline_mode = #tpu.pipeline_mode<synchronous>, transform_indices = @transform_2, window_bounds = array<i64: 8, 32>}, {pipeline_mode = #tpu.pipeline_mode<synchronous>, transform_indices = @transform_3, window_bounds = array<i64: 3, 32, 32>}, {pipeline_mode = #tpu.pipeline_mode<synchronous>, transform_indices = @transform_4, window_bounds = array<i64: 1, 32>}, {pipeline_mode = #tpu.pipeline_mode<synchronous>, transform_indices = @transform_5, window_bounds = array<i64: 3, 32, 32>}, {pipeline_mode = #tpu.pipeline_mode<synchronous>, transform_indices = @transform_6, window_bounds = array<i64: 32, 4>}, {transform_indices = @transform_7, window_bounds = array<i64: 32, 16, 4>}, {transform_indices = @transform_8, window_bounds = array<i64: 32, 16, 1>}]} {
    %c0 = arith.constant 0 : index
    %c0_0 = arith.constant 0 : index
    %c0_1 = arith.constant 0 : index
    %0 = vector.load %arg1[%c0, %c0_0, %c0_1] : memref<32x16x8xbf16, #tpu.memory_space<vmem>>, vector<32x16x8xbf16>
    %1 = vector.shape_cast %0 : vector<32x16x8xbf16> to vector<512x8xbf16>
    %c0_2 = arith.constant 0 : index
    %c0_3 = arith.constant 0 : index
    %c0_4 = arith.constant 0 : index
    %2 = vector.load %arg2[%c0_2, %c0_3, %c0_4] : memref<1x512x512xbf16, #tpu.memory_space<vmem>>, vector<1x512x512xbf16>
    %3 = vector.shape_cast %2 : vector<1x512x512xbf16> to vector<512x512xbf16>
    %c0_5 = arith.constant 0 : index
    %c0_6 = arith.constant 0 : index
    %4 = vector.load %arg3[%c0_5, %c0_6] : memref<8x32xbf16, #tpu.memory_space<vmem>>, vector<8x32xbf16>
    %cst = arith.constant dense<0.000000e+00> : vector<512x32xf32>
    %5 = tpu.matmul %1, %4, %cst {dimension_numbers = #tpu.dot_dimension_numbers<[1], [0], [0], [1], [0, 0, 1, 1], [], []>} : vector<512x8xbf16>, vector<8x32xbf16>, vector<512x32xf32> -> vector<512x32xf32>
    %6 = arith.truncf %5 : vector<512x32xf32> to vector<512x32xbf16>
    %cst_7 = arith.constant dense<0.000000e+00> : vector<512x32xf32>
    %7 = tpu.matmul %3, %6, %cst_7 {dimension_numbers = #tpu.dot_dimension_numbers<[1], [0], [0], [1], [0, 0, 1, 1], [], []>} : vector<512x512xbf16>, vector<512x32xbf16>, vector<512x32xf32> -> vector<512x32xf32>
    %cst_8 = arith.constant 0.000000e+00 : f32
    %8 = vector.broadcast %cst_8 : f32 to vector<512x32xf32>
    %9 = arith.cmpf ogt, %7, %8 : vector<512x32xf32>
    %cst_9 = arith.constant 0.00999999977 : f32
    %10 = vector.broadcast %cst_9 : f32 to vector<512x32xf32>
    %11 = arith.mulf %10, %7 : vector<512x32xf32>
    %12 = arith.select %9, %7, %11 : vector<512x32xi1>, vector<512x32xf32>
    %13 = arith.truncf %12 : vector<512x32xf32> to vector<512x32xbf16>
    %c0_10 = arith.constant 0 : index
    %c0_11 = arith.constant 0 : index
    %c0_12 = arith.constant 0 : index
    %14 = vector.load %arg4[%c0_10, %c0_11, %c0_12] : memref<3x32x32xbf16, #tpu.memory_space<vmem>>, vector<1x32x32xbf16>
    %15 = vector.shape_cast %14 : vector<1x32x32xbf16> to vector<32x32xbf16>
    %cst_13 = arith.constant dense<0.000000e+00> : vector<512x32xf32>
    %16 = tpu.matmul %13, %15, %cst_13 {dimension_numbers = #tpu.dot_dimension_numbers<[1], [0], [0], [1], [0, 0, 1, 1], [], []>} : vector<512x32xbf16>, vector<32x32xbf16>, vector<512x32xf32> -> vector<512x32xf32>
    %17 = arith.truncf %16 : vector<512x32xf32> to vector<512x32xbf16>
    %cst_14 = arith.constant dense<0.000000e+00> : vector<512x32xf32>
    %18 = tpu.matmul %3, %17, %cst_14 {dimension_numbers = #tpu.dot_dimension_numbers<[1], [0], [0], [1], [0, 0, 1, 1], [], []>} : vector<512x512xbf16>, vector<512x32xbf16>, vector<512x32xf32> -> vector<512x32xf32>
    %cst_15 = arith.constant 0.000000e+00 : f32
    %19 = vector.broadcast %cst_15 : f32 to vector<512x32xf32>
    %20 = arith.cmpf ogt, %18, %19 : vector<512x32xf32>
    %cst_16 = arith.constant 0.00999999977 : f32
    %21 = vector.broadcast %cst_16 : f32 to vector<512x32xf32>
    %22 = arith.mulf %21, %18 : vector<512x32xf32>
    %23 = arith.select %20, %18, %22 : vector<512x32xi1>, vector<512x32xf32>
    %24 = arith.truncf %23 : vector<512x32xf32> to vector<512x32xbf16>
    %c1 = arith.constant 1 : index
    %c0_17 = arith.constant 0 : index
    %c0_18 = arith.constant 0 : index
    %25 = vector.load %arg4[%c1, %c0_17, %c0_18] : memref<3x32x32xbf16, #tpu.memory_space<vmem>>, vector<1x32x32xbf16>
    %26 = vector.shape_cast %25 : vector<1x32x32xbf16> to vector<32x32xbf16>
    %cst_19 = arith.constant dense<0.000000e+00> : vector<512x32xf32>
    %27 = tpu.matmul %24, %26, %cst_19 {dimension_numbers = #tpu.dot_dimension_numbers<[1], [0], [0], [1], [0, 0, 1, 1], [], []>} : vector<512x32xbf16>, vector<32x32xbf16>, vector<512x32xf32> -> vector<512x32xf32>
    %28 = arith.truncf %27 : vector<512x32xf32> to vector<512x32xbf16>
    %cst_20 = arith.constant dense<0.000000e+00> : vector<512x32xf32>
    %29 = tpu.matmul %3, %28, %cst_20 {dimension_numbers = #tpu.dot_dimension_numbers<[1], [0], [0], [1], [0, 0, 1, 1], [], []>} : vector<512x512xbf16>, vector<512x32xbf16>, vector<512x32xf32> -> vector<512x32xf32>
    %cst_21 = arith.constant 0.000000e+00 : f32
    %30 = vector.broadcast %cst_21 : f32 to vector<512x32xf32>
    %31 = arith.cmpf ogt, %29, %30 : vector<512x32xf32>
    %cst_22 = arith.constant 0.00999999977 : f32
    %32 = vector.broadcast %cst_22 : f32 to vector<512x32xf32>
    %33 = arith.mulf %32, %29 : vector<512x32xf32>
    %34 = arith.select %31, %29, %33 : vector<512x32xi1>, vector<512x32xf32>
    %35 = arith.truncf %34 : vector<512x32xf32> to vector<512x32xbf16>
    %c2 = arith.constant 2 : index
    %c0_23 = arith.constant 0 : index
    %c0_24 = arith.constant 0 : index
    %36 = vector.load %arg4[%c2, %c0_23, %c0_24] : memref<3x32x32xbf16, #tpu.memory_space<vmem>>, vector<1x32x32xbf16>
    %37 = vector.shape_cast %36 : vector<1x32x32xbf16> to vector<32x32xbf16>
    %cst_25 = arith.constant dense<0.000000e+00> : vector<512x32xf32>
    %38 = tpu.matmul %35, %37, %cst_25 {dimension_numbers = #tpu.dot_dimension_numbers<[1], [0], [0], [1], [0, 0, 1, 1], [], []>} : vector<512x32xbf16>, vector<32x32xbf16>, vector<512x32xf32> -> vector<512x32xf32>
    %39 = arith.truncf %38 : vector<512x32xf32> to vector<512x32xbf16>
    %cst_26 = arith.constant dense<0.000000e+00> : vector<512x32xf32>
    %40 = tpu.matmul %3, %39, %cst_26 {dimension_numbers = #tpu.dot_dimension_numbers<[1], [0], [0], [1], [0, 0, 1, 1], [], []>} : vector<512x512xbf16>, vector<512x32xbf16>, vector<512x32xf32> -> vector<512x32xf32>
    %cst_27 = arith.constant 0.000000e+00 : f32
    %41 = vector.broadcast %cst_27 : f32 to vector<512x32xf32>
    %42 = arith.cmpf ogt, %40, %41 : vector<512x32xf32>
    %cst_28 = arith.constant 0.00999999977 : f32
    %43 = vector.broadcast %cst_28 : f32 to vector<512x32xf32>
    %44 = arith.mulf %43, %40 : vector<512x32xf32>
    %45 = arith.select %42, %40, %44 : vector<512x32xi1>, vector<512x32xf32>
    %c0_29 = arith.constant 0 : index
    %c0_30 = arith.constant 0 : index
    %46 = vector.load %arg5[%c0_29, %c0_30] : memref<1x32xf32, #tpu.memory_space<vmem>>, vector<1x32xf32>
    %47 = vector.shape_cast %45 : vector<512x32xf32> to vector<32x16x32xf32>
    %48 = vector.shape_cast %46 : vector<1x32xf32> to vector<1x1x32xf32>
    %49 = vector.broadcast %48 : vector<1x1x32xf32> to vector<32x16x32xf32>
    %50 = arith.mulf %47, %49 : vector<32x16x32xf32>
    %cst_31 = arith.constant dense<0.000000e+00> : vector<32x16xf32>
    %51 = vector.multi_reduction <add>, %50, %cst_31 [2] : vector<32x16x32xf32> to vector<32x16xf32>
    %cst_32 = arith.constant dense<0xFF800000> : vector<32xf32>
    %52 = vector.multi_reduction <maximumf>, %51, %cst_32 [1] : vector<32x16xf32> to vector<32xf32>
    %53 = vector.shape_cast %52 : vector<32xf32> to vector<32x1xf32>
    %54 = vector.broadcast %53 : vector<32x1xf32> to vector<32x16xf32>
    %55 = arith.subf %51, %54 : vector<32x16xf32>
    %56 = math.exp %55 : vector<32x16xf32>
    %cst_33 = arith.constant dense<0.000000e+00> : vector<32xf32>
    %57 = vector.multi_reduction <add>, %56, %cst_33 [1] : vector<32x16xf32> to vector<32xf32>
    %58 = vector.shape_cast %57 : vector<32xf32> to vector<32x1xf32>
    %59 = tpu.reciprocal %58 : vector<32x1xf32> -> vector<32x1xf32>
    %60 = vector.broadcast %59 : vector<32x1xf32> to vector<32x16xf32>
    %61 = arith.mulf %56, %60 : vector<32x16xf32>
    %62 = vector.shape_cast %61 : vector<32x16xf32> to vector<32x16x1xf32>
    %c0_34 = arith.constant 0 : index
    %c0_35 = arith.constant 0 : index
    %c0_36 = arith.constant 0 : index
    %63 = vector.load %arg9[%c0_34, %c0_35, %c0_36] : memref<32x16x1xf32, #tpu.memory_space<vmem>>, vector<32x16x1xf32>
    tpu.vector_store %arg9[%c0_34, %c0_35, %c0_36], %62 {strides = array<i32>} : memref<32x16x1xf32, #tpu.memory_space<vmem>>, vector<32x16x1xf32>,
    %64 = arith.truncf %45 : vector<512x32xf32> to vector<512x32xbf16>
    %c0_37 = arith.constant 0 : index
    %c0_38 = arith.constant 0 : index
    %c0_39 = arith.constant 0 : index
    %65 = vector.load %arg6[%c0_37, %c0_38, %c0_39] : memref<3x32x32xbf16, #tpu.memory_space<vmem>>, vector<1x32x32xbf16>
    %66 = vector.shape_cast %65 : vector<1x32x32xbf16> to vector<32x32xbf16>
    %cst_40 = arith.constant dense<0.000000e+00> : vector<512x32xf32>
    %67 = tpu.matmul %64, %66, %cst_40 {dimension_numbers = #tpu.dot_dimension_numbers<[1], [0], [0], [1], [0, 0, 1, 1], [], []>} : vector<512x32xbf16>, vector<32x32xbf16>, vector<512x32xf32> -> vector<512x32xf32>
    %cst_41 = arith.constant 0.000000e+00 : f32
    %68 = vector.broadcast %cst_41 : f32 to vector<512x32xf32>
    %69 = arith.maximumf %67, %68 : vector<512x32xf32>
    %70 = arith.truncf %69 : vector<512x32xf32> to vector<512x32xbf16>
    %c1_42 = arith.constant 1 : index
    %c0_43 = arith.constant 0 : index
    %c0_44 = arith.constant 0 : index
    %71 = vector.load %arg6[%c1_42, %c0_43, %c0_44] : memref<3x32x32xbf16, #tpu.memory_space<vmem>>, vector<1x32x32xbf16>
    %72 = vector.shape_cast %71 : vector<1x32x32xbf16> to vector<32x32xbf16>
    %cst_45 = arith.constant dense<0.000000e+00> : vector<512x32xf32>
    %73 = tpu.matmul %70, %72, %cst_45 {dimension_numbers = #tpu.dot_dimension_numbers<[1], [0], [0], [1], [0, 0, 1, 1], [], []>} : vector<512x32xbf16>, vector<32x32xbf16>, vector<512x32xf32> -> vector<512x32xf32>
    %cst_46 = arith.constant 0.000000e+00 : f32
    %74 = vector.broadcast %cst_46 : f32 to vector<512x32xf32>
    %75 = arith.maximumf %73, %74 : vector<512x32xf32>
    %76 = arith.truncf %75 : vector<512x32xf32> to vector<512x32xbf16>
    %c2_47 = arith.constant 2 : index
    %c0_48 = arith.constant 0 : index
    %c0_49 = arith.constant 0 : index
    %77 = vector.load %arg6[%c2_47, %c0_48, %c0_49] : memref<3x32x32xbf16, #tpu.memory_space<vmem>>, vector<1x32x32xbf16>
    %78 = vector.shape_cast %77 : vector<1x32x32xbf16> to vector<32x32xbf16>
    %cst_50 = arith.constant dense<0.000000e+00> : vector<512x32xf32>
    %79 = tpu.matmul %76, %78, %cst_50 {dimension_numbers = #tpu.dot_dimension_numbers<[1], [0], [0], [1], [0, 0, 1, 1], [], []>} : vector<512x32xbf16>, vector<32x32xbf16>, vector<512x32xf32> -> vector<512x32xf32>
    %cst_51 = arith.constant 0.000000e+00 : f32
    %80 = vector.broadcast %cst_51 : f32 to vector<512x32xf32>
    %81 = arith.maximumf %79, %80 : vector<512x32xf32>
    %82 = arith.truncf %81 : vector<512x32xf32> to vector<512x32xbf16>
    %c0_52 = arith.constant 0 : index
    %c0_53 = arith.constant 0 : index
    %83 = vector.load %arg7[%c0_52, %c0_53] : memref<32x4xbf16, #tpu.memory_space<vmem>>, vector<32x4xbf16>
    %cst_54 = arith.constant dense<0.000000e+00> : vector<512x4xf32>
    %84 = tpu.matmul %82, %83, %cst_54 {dimension_numbers = #tpu.dot_dimension_numbers<[1], [0], [0], [1], [0, 0, 1, 1], [], []>} : vector<512x32xbf16>, vector<32x4xbf16>, vector<512x4xf32> -> vector<512x4xf32>
    %85 = vector.shape_cast %84 : vector<512x4xf32> to vector<32x16x4xf32>
    %c0_55 = arith.constant 0 : index
    %c0_56 = arith.constant 0 : index
    %c0_57 = arith.constant 0 : index
    %86 = vector.load %arg8[%c0_55, %c0_56, %c0_57] : memref<32x16x4xf32, #tpu.memory_space<vmem>>, vector<32x16x4xf32>
    tpu.vector_store %arg8[%c0_55, %c0_56, %c0_57], %85 {strides = array<i32>} : memref<32x16x4xf32, #tpu.memory_space<vmem>>, vector<32x16x4xf32>,
    return
  }
  func.func @transform_0(%arg0: i32) -> (i32, i32, i32) {
    %c0_i32 = arith.constant 0 : i32
    %c0_i32_0 = arith.constant 0 : i32
    %c0_i32_1 = arith.constant 0 : i32
    return %arg0, %c0_i32, %c0_i32_0 : i32, i32, i32
  }
  func.func @transform_1(%arg0: i32) -> (i32, i32, i32) {
    %c0_i32 = arith.constant 0 : i32
    %c0_i32_0 = arith.constant 0 : i32
    %c0_i32_1 = arith.constant 0 : i32
    return %arg0, %c0_i32, %c0_i32_0 : i32, i32, i32
  }
  func.func @transform_2(%arg0: i32) -> (i32, i32) {
    %c0_i32 = arith.constant 0 : i32
    %c0_i32_0 = arith.constant 0 : i32
    %c0_i32_1 = arith.constant 0 : i32
    return %c0_i32, %c0_i32_0 : i32, i32
  }
  func.func @transform_3(%arg0: i32) -> (i32, i32, i32) {
    %c0_i32 = arith.constant 0 : i32
    %c0_i32_0 = arith.constant 0 : i32
    %c0_i32_1 = arith.constant 0 : i32
    %c0_i32_2 = arith.constant 0 : i32
    return %c0_i32, %c0_i32_0, %c0_i32_1 : i32, i32, i32
  }
  func.func @transform_4(%arg0: i32) -> (i32, i32) {
    %c0_i32 = arith.constant 0 : i32
    %c0_i32_0 = arith.constant 0 : i32
    %c0_i32_1 = arith.constant 0 : i32
    return %c0_i32, %c0_i32_0 : i32, i32
  }
  func.func @transform_5(%arg0: i32) -> (i32, i32, i32) {
    %c0_i32 = arith.constant 0 : i32
    %c0_i32_0 = arith.constant 0 : i32
    %c0_i32_1 = arith.constant 0 : i32
    %c0_i32_2 = arith.constant 0 : i32
    return %c0_i32, %c0_i32_0, %c0_i32_1 : i32, i32, i32
  }
  func.func @transform_6(%arg0: i32) -> (i32, i32) {
    %c0_i32 = arith.constant 0 : i32
    %c0_i32_0 = arith.constant 0 : i32
    %c0_i32_1 = arith.constant 0 : i32
    return %c0_i32, %c0_i32_0 : i32, i32
  }
  func.func @transform_7(%arg0: i32) -> (i32, i32, i32) {
    %c0_i32 = arith.constant 0 : i32
    %c0_i32_0 = arith.constant 0 : i32
    %c0_i32_1 = arith.constant 0 : i32
    return %arg0, %c0_i32, %c0_i32_0 : i32, i32, i32
  }
  func.func @transform_8(%arg0: i32) -> (i32, i32, i32) {
    %c0_i32 = arith.constant 0 : i32
    %c0_i32_0 = arith.constant 0 : i32
    %c0_i32_1 = arith.constant 0 : i32
    return %arg0, %c0_i32, %c0_i32_0 : i32, i32, i32
  }
}

</mosaic_0001>

<bundles_post_ra>
// kernel: tpu_custom_call.1
= control target key start
LH: loop header
LB: loop body
LE: loop exit
PB: predicated region body
PF: predicated region fallthrough
CT: control target
= control target key end

     0   :  { %14 = vsyncpa [#allocation3], 0  ;;  %s11928_s27 = smov [#allocation2]   ;;  %s15400_s0 = inlined_call_operand.vmem [shape: bf16[32,16,8], index: 0, kind: input, shape index: {}]   ;;  %s15401_s1 = inlined_call_operand.hbm [shape: bf16[1,512,512], index: 1, kind: input, shape index: {}]   ;;  %s15402_s2 = inlined_call_operand.vmem [shape: bf16[8,32], index: 2, kind: input, shape index: {}]   ;;  %s15403_s3 = inlined_call_operand.vmem [shape: bf16[3,32,32], index: 3, kind: input, shape index: {}]   ;;  %s15404_s4 = inlined_call_operand.vmem [shape: f32[1,32], index: 4, kind: input, shape index: {}]   ;;  %s15405_s5 = inlined_call_operand.vmem [shape: bf16[3,32,32], index: 5, kind: input, shape index: {}]   ;;  %s15406_s6 = inlined_call_operand.vmem [shape: bf16[32,4], index: 6, kind: input, shape index: {}]   ;;  %s15407_s7 = inlined_call_operand.vmem [shape: f32[32,16,4], index: 7, kind: output, shape index: {0}]   ;;  %s15408_s8 = inlined_call_operand.vmem [shape: f32[32,16,1], index: 8, kind: output, shape index: {1}]  }
   0x1   :  { %s22_s28 = sshll.u32 %s11928_s27, 4  ;;  %s23_s28 = int_to_ptr.vmem [resolvable:$true] %s22_s28 }
   0x2   :  { %s11914_s29 = scalar_lea.vmem %s23_s28, 16384  ;;  %p11919_p1 = scmp.lt.s32.totalorder %s23_s28, %s23_s28 }
   0x3   :  { %p11915_p0 = scmp.ne.s32.totalorder %s23_s28, %s11914_s29  ;;  %p11920_p2 = scmp.lt.s32.totalorder %s11914_s29, %s11914_s29 }
   0x5   :  { %p11921_p3 = por %p11920_p2, %p11919_p1 }
   0x7   :  { %p11922_p4 = pnand %p11921_p3, %p11915_p0 }
   0x9   :  { %11925 = shalt.err (!%p11922_p4)
}
   0xa   :  { %s11929_s30 = smov 256   ;;  %s11930_s9 = smov 16  }
   0xb   :  { %28 = dma.hbm_to_vmem [thread:$0]  %s15401_s1, 16384, %s23_s28, [#allocation3], %s11929_s30, %s11929_s30, %s11930_s9  }
   0xc   :  { %11926 = dma.done.wait [#allocation3], 16384  }
   0xd   :  { %11927 = vsyncadd [#allocation3], 4294950912  ;;  %vm493_vm0 = vcmask 1043456   ;;  %vm396_vm1 = vcmask 64512   ;;  %v235_v0 = vld [vmem:[%s15402_s2] sm:$0xf] }
   0xe   :  { %11140 = vmatprep.subr.msk.bf16.mxu0 %vm493_vm0, %v235_v0  ;;  %v495_v1 = vsel %vm493_vm0, %v235_v0, 0  ;;  %v11147_v2 = vld [vmem:[%s15400_s0] sm:$0xff]   ;;  %v11148_v3 = vld [vmem:[%s15400_s0 + $0x8] sm:$0xff]   ;;  %v11149_v4 = vld [vmem:[%s15400_s0 + $0x10] sm:$0xff]   ;;  %v15409_v29 = vmov 0   ;;  %vm2276_vm4 = vcmask 261120  }
   0xf   :  { %10567 = vmatpush3.bf16.msra.mxu0 %v495_v1  ;;  %10568 = vmatprep.mubr.msk.bf16.mxu0 %vm396_vm1, %v11147_v2  ;;  %v11150_v5 = vld [vmem:[%s15400_s0 + $0x18] sm:$0xff]   ;;  %v11151_v6 = vld [vmem:[%s15400_s0 + $0x20] sm:$0xff]   ;;  %v11152_v7 = vld [vmem:[%s15400_s0 + $0x28] sm:$0xff]  }
  0x10   :  { %v11153_v8 = vld [vmem:[%s15400_s0 + $0x30] sm:$0xff]   ;;  %v11154_v9 = vld [vmem:[%s15400_s0 + $0x38] sm:$0xff]   ;;  %v11155_v10 = vld [vmem:[%s15400_s0 + $0x40] sm:$0xff]   ;;  %1458 = vmatprep.subr.bf16.mxu1 %v15409_v29  ;;  %1747 = vmatprep.subr.bf16.mxu0 %v15409_v29 }
  0x11   :  { %v11156_v11 = vld [vmem:[%s15400_s0 + $0x48] sm:$0xff]   ;;  %v11157_v12 = vld [vmem:[%s15400_s0 + $0x50] sm:$0xff]   ;;  %v11158_v13 = vld [vmem:[%s15400_s0 + $0x58] sm:$0xff]   ;;  %11146 = vset.pattern.permute.xlu1 %v15409_v29  ;;  %11145 = vset.pattern.permute.xlu0 %v15409_v29 }
  0x12   :  { %10569 = vmatmul.mubr.msk.bf16.vlgmr.msra.gmra.mxu0 %vm396_vm1, %v11148_v3  ;;  %v11159_v14 = vld [vmem:[%s15400_s0 + $0x60] sm:$0xff]   ;;  %v11160_v15 = vld [vmem:[%s15400_s0 + $0x68] sm:$0xff]   ;;  %v11161_v16 = vld [vmem:[%s15400_s0 + $0x70] sm:$0xff]  }
  0x13   :  { %10572 = vmatprep.mubr.msk.bf16.mxu0 %vm396_vm1, %v11149_v4  ;;  %v11162_v17 = vld [vmem:[%s15400_s0 + $0x78] sm:$0xff]   ;;  %v11163_v18 = vld [vmem:[%s15400_s0 + $0x80] sm:$0xff]   ;;  %v11164_v19 = vld [vmem:[%s15400_s0 + $0x88] sm:$0xff]  }
  0x14   :  { %v11165_v20 = vld [vmem:[%s15400_s0 + $0x90] sm:$0xff]   ;;  %v11166_v21 = vld [vmem:[%s15400_s0 + $0x98] sm:$0xff]   ;;  %v11167_v22 = vld [vmem:[%s15400_s0 + $0xa0] sm:$0xff]  }
  0x15   :  { %v11168_v23 = vld [vmem:[%s15400_s0 + $0xa8] sm:$0xff]   ;;  %v11169_v24 = vld [vmem:[%s15400_s0 + $0xb0] sm:$0xff]   ;;  %v11170_v25 = vld [vmem:[%s15400_s0 + $0xb8] sm:$0xff]  }
  0x16   :  { %v11171_v26 = vld [vmem:[%s15400_s0 + $0xc0] sm:$0xff]   ;;  %v11172_v27 = vld [vmem:[%s15400_s0 + $0xc8] sm:$0xff]   ;;  %v11173_v28 = vld [vmem:[%s15400_s0 + $0xd0] sm:$0xff]  }
  0x17   :  { %v11174_v30 = vld [vmem:[%s15400_s0 + $0xd8] sm:$0xff]   ;;  %v11175_v31 = vld [vmem:[%s15400_s0 + $0xe0] sm:$0xff]   ;;  %v11176_v32 = vld [vmem:[%s15400_s0 + $0xe8] sm:$0xff]  }
  0x18   :  { %v11177_v33 = vld [vmem:[%s15400_s0 + $0xf0] sm:$0xff]   ;;  %v11178_v34 = vld [vmem:[%s15400_s0 + $0xf8] sm:$0xff]  }
  0x19   :  { %v11179_v35 = vld [vmem:[#allocation2 + $0x4] ss:$16 sps:$4 sm:$0xff]   ;;  %v11199_v50 = vld [vmem:[#allocation2 + $0xc] ss:$16 sps:$4 sm:$0xff]  }
  0x1a   :  { %10573 = vmatmul.mubr.msk.bf16.gmra.mxu0 %vm396_vm1, %v11150_v5  ;;  %1490 = vmatprep.mubr.bf16.mxu1 %v11179_v35 }
  0x1b   :  { %10576 = vmatprep.mubr.msk.bf16.mxu0 %vm396_vm1, %v11151_v6 }
  0x22   :  { %10577 = vmatmul.mubr.msk.bf16.gmra.mxu0 %vm396_vm1, %v11152_v7 }
  0x23   :  { %10580 = vmatprep.mubr.msk.bf16.mxu0 %vm396_vm1, %v11153_v8 }
  0x2a   :  { %10581 = vmatmul.mubr.msk.bf16.gmra.mxu0 %vm396_vm1, %v11154_v9 }
  0x2b   :  { %10584 = vmatprep.mubr.msk.bf16.mxu0 %vm396_vm1, %v11155_v10 }
  0x32   :  { %10585 = vmatmul.mubr.msk.bf16.gmra.mxu0 %vm396_vm1, %v11156_v11 }
  0x33   :  { %10588 = vmatprep.mubr.msk.bf16.mxu0 %vm396_vm1, %v11157_v12 }
  0x3a   :  { %10589 = vmatmul.mubr.msk.bf16.gmra.mxu0 %vm396_vm1, %v11158_v13 }
  0x3b   :  { %10592 = vmatprep.mubr.msk.bf16.mxu0 %vm396_vm1, %v11159_v14 }
  0x42   :  { %10593 = vmatmul.mubr.msk.bf16.gmra.mxu0 %vm396_vm1, %v11160_v15 }
  0x43   :  { %10596 = vmatprep.mubr.msk.bf16.mxu0 %vm396_vm1, %v11161_v16 }
  0x4a   :  { %10597 = vmatmul.mubr.msk.bf16.gmra.mxu0 %vm396_vm1, %v11162_v17 }
  0x4b   :  { %10600 = vmatprep.mubr.msk.bf16.mxu0 %vm396_vm1, %v11163_v18 }
  0x52   :  { %10601 = vmatmul.mubr.msk.bf16.gmra.mxu0 %vm396_vm1, %v11164_v19 }
  0x53   :  { %10604 = vmatprep.mubr.msk.bf16.mxu0 %vm396_vm1, %v11165_v20 }
  0x5a   :  { %10605 = vmatmul.mubr.msk.bf16.gmra.mxu0 %vm396_vm1, %v11166_v21 }
  0x5b   :  { %10608 = vmatprep.mubr.msk.bf16.mxu0 %vm396_vm1, %v11167_v22 }
  0x62   :  { %10609 = vmatmul.mubr.msk.bf16.gmra.mxu0 %vm396_vm1, %v11168_v23 }
  0x63   :  { %10612 = vmatprep.mubr.msk.bf16.mxu0 %vm396_vm1, %v11169_v24 }
  0x6a   :  { %10613 = vmatmul.mubr.msk.bf16.gmra.mxu0 %vm396_vm1, %v11170_v25 }
  0x6b   :  { %10616 = vmatprep.mubr.msk.bf16.mxu0 %vm396_vm1, %v11171_v26 }
  0x72   :  { %10617 = vmatmul.mubr.msk.bf16.gmra.mxu0 %vm396_vm1, %v11172_v27 }
  0x73   :  { %10620 = vmatprep.mubr.msk.bf16.mxu0 %vm396_vm1, %v11173_v28 }
  0x7a   :  { %10621 = vmatmul.mubr.msk.bf16.gmra.mxu0 %vm396_vm1, %v11174_v30 }
  0x7b   :  { %10624 = vmatprep.mubr.msk.bf16.mxu0 %vm396_vm1, %v11175_v31 }
  0x82   :  { %10625 = vmatmul.mubr.msk.bf16.gmra.mxu0 %vm396_vm1, %v11176_v32 }
  0x83   :  { %10628 = vmatprep.mubr.msk.bf16.mxu0 %vm396_vm1, %v11177_v33 }
  0x8a   :  { %10629 = vmatmul.mubr.msk.bf16.gmra.mxu0 %vm396_vm1, %v11178_v34 }
  0x8b   :  { %1779 = vmatprep.mubr.bf16.mxu0 %v11199_v50 }
  0xd2   :  { %v10570_v36 = vpop.f32.mrf.mxu0 }
  0xd4   :  { %v531_v37 = vpop.f32.mrf.mxu0 }
  0xd6   :  { %v10571_v38 = vpop.f32.mrf.mxu0 }
  0xd7   :  { %v787_v6 = vpack.c.bf16 %v10571_v38, %v10570_v36  ;;  %v11181_v36 = vld [vmem:[#allocation2] ss:$16 sps:$4 sm:$0xff]  }
  0xd8   :  { %v534_v39 = vpop.f32.mrf.mxu0 }
  0xd9   :  { %v786_v9 = vpack.c.bf16 %v534_v39, %v531_v37  ;;  %v11182_v37 = vld [vmem:[#allocation2 + $0x24] ss:$16 sps:$4 sm:$0xff]  }
  0xda   :  { %v10574_v40 = vpop.f32.mrf.mxu0 }
  0xdc   :  { %v547_v41 = vpop.f32.mrf.mxu0 }
  0xde   :  { %v10575_v42 = vpop.f32.mrf.mxu0 }
  0xdf   :  { %v789_v0 = vpack.c.bf16 %v10575_v42, %v10574_v40 }
  0xe0   :  { %v550_v43 = vpop.f32.mrf.mxu0 }
  0xe1   :  { %v788_v3 = vpack.c.bf16 %v550_v43, %v547_v41 }
  0xe2   :  { %v10578_v44 = vpop.f32.mrf.mxu0 }
  0xe4   :  { %v563_v45 = vpop.f32.mrf.mxu0 }
  0xe6   :  { %v10579_v46 = vpop.f32.mrf.mxu0 }
  0xe7   :  { %v791_v58 = vpack.c.bf16 %v10579_v46, %v10578_v44  ;;  %v11184_v44 = vld [vmem:[#allocation2 + $0x20] ss:$16 sps:$4 sm:$0xff]  }
  0xe8   :  { %v566_v47 = vpop.f32.mrf.mxu0 }
  0xe9   :  { %v790_v61 = vpack.c.bf16 %v566_v47, %v563_v45  ;;  %v11185_v45 = vld [vmem:[#allocation2 + $0x44] ss:$16 sps:$4 sm:$0xff]  }
  0xea   :  { %v10582_v48 = vpop.f32.mrf.mxu0 }
  0xec   :  { %v579_v49 = vpop.f32.mrf.mxu0 }
  0xee   :  { %v10583_v51 = vpop.f32.mrf.mxu0 }
  0xef   :  { %v793_v52 = vpack.c.bf16 %v10583_v51, %v10582_v48 }
  0xf0   :  { %v582_v53 = vpop.f32.mrf.mxu0 }
  0xf1   :  { %1459 = vmatpush1.bf16.msra.mxu1 %v793_v52  ;;  %v792_v55 = vpack.c.bf16 %v582_v53, %v579_v49  ;;  %v11187_v52 = vld [vmem:[#allocation2 + $0x40] ss:$16 sps:$4 sm:$0xff]   ;;  %v11188_v53 = vld [vmem:[#allocation2 + $0x64] ss:$16 sps:$4 sm:$0xff]  }
  0xf2   :  { %v12115_v54 = vpop.f32.mrf.mxu0  ;;  %1460 = vmatprep.subr.bf16.mxu1 %v15409_v29 }
  0xf4   :  { %v12118_v56 = vpop.f32.mrf.mxu0 }
  0xf5   :  { %1461 = vmatpush1.bf16.msra.mxu1 %v792_v55 }
  0xf6   :  { %v12120_v57 = vpop.f32.mrf.mxu0  ;;  %1462 = vmatprep.subr.bf16.mxu1 %v15409_v29 }
  0xf7   :  { %v795_v31 = vpack.c.bf16 %v12120_v57, %v12115_v54 }
  0xf8   :  { %v12123_v59 = vpop.f32.mrf.mxu0 }
  0xf9   :  { %1463 = vmatpush1.bf16.msra.mxu1 %v791_v58  ;;  %v794_v34 = vpack.c.bf16 %v12123_v59, %v12118_v56 }
  0xfa   :  { %v10590_v60 = vpop.f32.mrf.mxu0  ;;  %1464 = vmatprep.subr.bf16.mxu1 %v15409_v29 }
  0xfc   :  { %v611_v62 = vpop.f32.mrf.mxu0 }
  0xfd   :  { %1465 = vmatpush1.bf16.msra.mxu1 %v790_v61  ;;  %v11191_v61 = vld [vmem:[#allocation2 + $0x84] ss:$16 sps:$4 sm:$0xff]  }
  0xfe   :  { %v10591_v63 = vpop.f32.mrf.mxu0  ;;  %1466 = vmatprep.subr.bf16.mxu1 %v15409_v29 }
  0xff   :  { %v797_v24 = vpack.c.bf16 %v10591_v63, %v10590_v60  ;;  %v11190_v60 = vld [vmem:[#allocation2 + $0x60] ss:$16 sps:$4 sm:$0xff]  }
 0x100   :  { %v614_v1 = vpop.f32.mrf.mxu0 }
 0x101   :  { %1467 = vmatpush1.bf16.msra.mxu1 %v789_v0  ;;  %v796_v27 = vpack.c.bf16 %v614_v1, %v611_v62 }
 0x102   :  { %v10594_v2 = vpop.f32.mrf.mxu0  ;;  %1468 = vmatprep.subr.bf16.mxu1 %v15409_v29 }
 0x104   :  { %v627_v4 = vpop.f32.mrf.mxu0 }
 0x105   :  { %1469 = vmatpush1.bf16.msra.mxu1 %v788_v3 }
 0x106   :  { %v10595_v5 = vpop.f32.mrf.mxu0  ;;  %1470 = vmatprep.subr.bf16.mxu1 %v15409_v29 }
 0x107   :  { %v799_v18 = vpack.c.bf16 %v10595_v5, %v10594_v2  ;;  %v11194_v5 = vld [vmem:[#allocation2 + $0xa4] ss:$16 sps:$4 sm:$0xff]  }
 0x108   :  { %v630_v7 = vpop.f32.mrf.mxu0 }
 0x109   :  { %1471 = vmatpush1.bf16.msra.mxu1 %v787_v6  ;;  %v798_v21 = vpack.c.bf16 %v630_v7, %v627_v4  ;;  %v11193_v4 = vld [vmem:[#allocation2 + $0x80] ss:$16 sps:$4 sm:$0xff]  }
 0x10a   :  { %v10598_v8 = vpop.f32.mrf.mxu0  ;;  %1472 = vmatprep.subr.bf16.mxu1 %v15409_v29 }
 0x10c   :  { %v643_v10 = vpop.f32.mrf.mxu0 }
 0x10d   :  { %1473 = vmatpush1.bf16.msra.mxu1 %v786_v9 }
 0x10e   :  { %v10599_v11 = vpop.f32.mrf.mxu0  ;;  %1474 = vmatprep.subr.bf16.mxu1 %v15409_v29 }
 0x10f   :  { %v801_v12 = vpack.c.bf16 %v10599_v11, %v10598_v8  ;;  %v11200_v11 = vld [vmem:[#allocation2 + $0xc4] ss:$16 sps:$4 sm:$0xff]  }
 0x110   :  { %v646_v13 = vpop.f32.mrf.mxu0 }
 0x111   :  { %1475 = vmatpush2.bf16.msra.mxu1 %v801_v12  ;;  %v800_v15 = vpack.c.bf16 %v646_v13, %v643_v10  ;;  %v11196_v10 = vld [vmem:[#allocation2 + $0xa0] ss:$16 sps:$4 sm:$0xff]  }
 0x112   :  { %v12131_v14 = vpop.f32.mrf.mxu0  ;;  %1476 = vmatprep.subr.bf16.mxu1 %v15409_v29 }
 0x114   :  { %v12134_v16 = vpop.f32.mrf.mxu0 }
 0x115   :  { %1477 = vmatpush2.bf16.msra.mxu1 %v800_v15  ;;  %v11206_v15 = vld [vmem:[#allocation2 + $0xe4] ss:$16 sps:$4 sm:$0xff]  }
 0x116   :  { %v12136_v17 = vpop.f32.mrf.mxu0  ;;  %1478 = vmatprep.subr.bf16.mxu1 %v15409_v29 }
 0x117   :  { %v803_v63 = vpack.c.bf16 %v12136_v17, %v12131_v14  ;;  %v11202_v14 = vld [vmem:[#allocation2 + $0xc0] ss:$16 sps:$4 sm:$0xff]  }
 0x118   :  { %v12139_v19 = vpop.f32.mrf.mxu0 }
 0x119   :  { %1479 = vmatpush2.bf16.msra.mxu1 %v799_v18  ;;  %v802_v2 = vpack.c.bf16 %v12139_v19, %v12134_v16  ;;  %v11208_v18 = vld [vmem:[#allocation2 + $0xe0] ss:$16 sps:$4 sm:$0xff]   ;;  %v11212_v19 = vld [vmem:[#allocation2 + $0x104] ss:$16 sps:$4 sm:$0xff]  }
 0x11a   :  { %v10606_v20 = vpop.f32.mrf.mxu0  ;;  %1480 = vmatprep.subr.bf16.mxu1 %v15409_v29 }
 0x11c   :  { %v12142_v22 = vpop.f32.mrf.mxu0 }
 0x11d   :  { %1481 = vmatpush2.bf16.msra.mxu1 %v798_v21 }
 0x11e   :  { %v10607_v23 = vpop.f32.mrf.mxu0  ;;  %1482 = vmatprep.subr.bf16.mxu1 %v15409_v29 }
 0x11f   :  { %v805_v55 = vpack.c.bf16 %v10607_v23, %v10606_v20  ;;  %v11214_v23 = vld [vmem:[#allocation2 + $0x100] ss:$16 sps:$4 sm:$0xff]  }
 0x120   :  { %v678_v25 = vpop.f32.mrf.mxu0 }
 0x121   :  { %1483 = vmatpush2.bf16.msra.mxu1 %v797_v24  ;;  %v804_v58 = vpack.c.bf16 %v678_v25, %v12142_v22  ;;  %v11197_v22 = vld [vmem:[#allocation2 + $0x8] ss:$16 sps:$4 sm:$0xff]   ;;  %v11203_v24 = vld [vmem:[#allocation2 + $0x2c] ss:$16 sps:$4 sm:$0xff]   ;;  %v11218_v25 = vld [vmem:[#allocation2 + $0x124] ss:$16 sps:$4 sm:$0xff]  }
 0x122   :  { %v10610_v26 = vpop.f32.mrf.mxu0  ;;  %1484 = vmatprep.subr.bf16.mxu1 %v15409_v29 }
 0x124   :  { %v691_v28 = vpop.f32.mrf.mxu0 }
 0x125   :  { %1485 = vmatpush2.bf16.msra.mxu1 %v796_v27  ;;  %v11220_v27 = vld [vmem:[#allocation2 + $0x120] ss:$16 sps:$4 sm:$0xff]  }
 0x126   :  { %v10611_v30 = vpop.f32.mrf.mxu0  ;;  %1486 = vmatprep.subr.bf16.mxu1 %v15409_v29 }
 0x127   :  { %v807_v47 = vpack.c.bf16 %v10611_v30, %v10610_v26  ;;  %v11205_v26 = vld [vmem:[#allocation2 + $0x28] ss:$16 sps:$4 sm:$0xff]   ;;  %v11224_v30 = vld [vmem:[#allocation2 + $0x144] ss:$16 sps:$4 sm:$0xff]  }
 0x128   :  { %v694_v32 = vpop.f32.mrf.mxu0 }
 0x129   :  { %1487 = vmatpush2.bf16.msra.mxu1 %v795_v31  ;;  %v806_v50 = vpack.c.bf16 %v694_v32, %v691_v28  ;;  %v11209_v28 = vld [vmem:[#allocation2 + $0x4c] ss:$16 sps:$4 sm:$0xff]   ;;  %v11211_v31 = vld [vmem:[#allocation2 + $0x48] ss:$16 sps:$4 sm:$0xff]   ;;  %v11226_v32 = vld [vmem:[#allocation2 + $0x140] ss:$16 sps:$4 sm:$0xff]  }
 0x12a   :  { %v10614_v33 = vpop.f32.mrf.mxu0  ;;  %1488 = vmatprep.subr.bf16.mxu1 %v15409_v29 }
 0x12c   :  { %v707_v35 = vpop.f32.mrf.mxu0 }
 0x12d   :  { %1489 = vmatpush2.bf16.msra.mxu1 %v794_v34  ;;  %v11230_v34 = vld [vmem:[#allocation2 + $0x164] ss:$16 sps:$4 sm:$0xff]  }
 0x12e   :  { %v10615_v38 = vpop.f32.mrf.mxu0 }
 0x12f   :  { %v809_v39 = vpack.c.bf16 %v10615_v38, %v10614_v33  ;;  %v11215_v33 = vld [vmem:[#allocation2 + $0x6c] ss:$16 sps:$4 sm:$0xff]   ;;  %v11236_v38 = vld [vmem:[#allocation2 + $0x184] ss:$16 sps:$4 sm:$0xff]  }
 0x130   :  { %v710_v40 = vpop.f32.mrf.mxu0  ;;  %1491 = vmatmul.mubr.bf16.vlgmr.msra.gmra.mxu1 %v11181_v36  ;;  %v11232_v36 = vld [vmem:[#allocation2 + $0x160] ss:$16 sps:$4 sm:$0xff]  }
 0x131   :  { %1748 = vmatpush1.bf16.msra.mxu0 %v809_v39  ;;  %1498 = vmatprep.mubr.bf16.mxu1 %v11182_v37  ;;  %v808_v42 = vpack.c.bf16 %v710_v40, %v707_v35  ;;  %v11217_v35 = vld [vmem:[#allocation2 + $0x68] ss:$16 sps:$4 sm:$0xff]   ;;  %v11221_v37 = vld [vmem:[#allocation2 + $0x8c] ss:$16 sps:$4 sm:$0xff]   ;;  %v11238_v40 = vld [vmem:[#allocation2 + $0x180] ss:$16 sps:$4 sm:$0xff]  }
 0x132   :  { %v12152_v41 = vpop.f32.mrf.mxu0  ;;  %1749 = vmatprep.subr.bf16.mxu0 %v15409_v29  ;;  %v11223_v39 = vld [vmem:[#allocation2 + $0x88] ss:$16 sps:$4 sm:$0xff]  }
 0x134   :  { %v12155_v43 = vpop.f32.mrf.mxu0 }
 0x135   :  { %1750 = vmatpush1.bf16.msra.mxu0 %v808_v42  ;;  %v11242_v42 = vld [vmem:[#allocation2 + $0x1a4] ss:$16 sps:$4 sm:$0xff]  }
 0x136   :  { %v12157_v46 = vpop.f32.mrf.mxu0  ;;  %1751 = vmatprep.subr.bf16.mxu0 %v15409_v29 }
 0x137   :  { %v811_v20 = vpack.c.bf16 %v12157_v46, %v12152_v41  ;;  %v11227_v41 = vld [vmem:[#allocation2 + $0xac] ss:$16 sps:$4 sm:$0xff]   ;;  %v11248_v46 = vld [vmem:[#allocation2 + $0x1c4] ss:$16 sps:$4 sm:$0xff]  }
 0x138   :  { %v12160_v48 = vpop.f32.mrf.mxu0  ;;  %1499 = vmatmul.mubr.bf16.gmra.mxu1 %v11184_v44  ;;  %v11244_v44 = vld [vmem:[#allocation2 + $0x1a0] ss:$16 sps:$4 sm:$0xff]  }
 0x139   :  { %1752 = vmatpush1.bf16.msra.mxu0 %v807_v47  ;;  %1506 = vmatprep.mubr.bf16.mxu1 %v11185_v45  ;;  %v810_v21 = vpack.c.bf16 %v12160_v48, %v12155_v43  ;;  %v11229_v43 = vld [vmem:[#allocation2 + $0xa8] ss:$16 sps:$4 sm:$0xff]   ;;  %v11233_v45 = vld [vmem:[#allocation2 + $0xcc] ss:$16 sps:$4 sm:$0xff]  }
 0x13a   :  { %v10622_v49 = vpop.f32.mrf.mxu0  ;;  %1753 = vmatprep.subr.bf16.mxu0 %v15409_v29  ;;  %v11329_v47 = vld [vmem:[%s15403_s3 + $0x8] sm:$0xff]  }
 0x13b   :  { %10632 = vmatprep.subr.bf16.mxu1 %v11329_v47  ;;  %v11235_v48 = vld [vmem:[#allocation2 + $0xc8] ss:$16 sps:$4 sm:$0xff]  }
 0x13c   :  { %v739_v51 = vpop.f32.mrf.mxu0  ;;  %10633 = vmatpush3.bf16.msra.mxu1 %v11329_v47 }
 0x13d   :  { %1754 = vmatpush1.bf16.msra.mxu0 %v806_v50  ;;  %v11239_v50 = vld [vmem:[#allocation2 + $0xec] ss:$16 sps:$4 sm:$0xff]  }
 0x13e   :  { %v10623_v54 = vpop.f32.mrf.mxu0  ;;  %1755 = vmatprep.subr.bf16.mxu0 %v15409_v29 }
 0x13f   :  { %v813_v16 = vpack.c.bf16 %v10623_v54, %v10622_v49  ;;  %v11250_v49 = vld [vmem:[#allocation2 + $0x1c0] ss:$16 sps:$4 sm:$0xff]   ;;  %v11245_v54 = vld [vmem:[#allocation2 + $0x10c] ss:$16 sps:$4 sm:$0xff]  }
 0x140   :  { %v742_v56 = vpop.f32.mrf.mxu0  ;;  %1507 = vmatmul.mubr.bf16.gmra.mxu1 %v11187_v52  ;;  %v11241_v52 = vld [vmem:[#allocation2 + $0xe8] ss:$16 sps:$4 sm:$0xff]  }
 0x141   :  { %1756 = vmatpush1.bf16.msra.mxu0 %v805_v55  ;;  %1514 = vmatprep.mubr.bf16.mxu1 %v11188_v53  ;;  %v812_v17 = vpack.c.bf16 %v742_v56, %v739_v51  ;;  %v11254_v51 = vld [vmem:[#allocation2 + $0x1e4] ss:$16 sps:$4 sm:$0xff]   ;;  %v11256_v53 = vld [vmem:[#allocation2 + $0x1e0] ss:$16 sps:$4 sm:$0xff]   ;;  %v11247_v56 = vld [vmem:[#allocation2 + $0x108] ss:$16 sps:$4 sm:$0xff]  }
 0x142   :  { %v10626_v57 = vpop.f32.mrf.mxu0  ;;  %1757 = vmatprep.subr.bf16.mxu0 %v15409_v29  ;;  %v11260_v55 = vld [vmem:[#allocation2 + $0x204] ss:$16 sps:$4 sm:$0xff]  }
 0x144   :  { %v755_v59 = vpop.f32.mrf.mxu0 }
 0x145   :  { %1758 = vmatpush1.bf16.msra.mxu0 %v804_v58  ;;  %v11251_v58 = vld [vmem:[#allocation2 + $0x12c] ss:$16 sps:$4 sm:$0xff]  }
 0x146   :  { %v10627_v62 = vpop.f32.mrf.mxu0  ;;  %1759 = vmatprep.subr.bf16.mxu0 %v15409_v29 }
 0x147   :  { %v815_v12 = vpack.c.bf16 %v10627_v62, %v10626_v57  ;;  %v11262_v57 = vld [vmem:[#allocation2 + $0x200] ss:$16 sps:$4 sm:$0xff]   ;;  %v11257_v62 = vld [vmem:[#allocation2 + $0x14c] ss:$16 sps:$4 sm:$0xff]  }
 0x148   :  { %v758_v0 = vpop.f32.mrf.mxu0  ;;  %1515 = vmatmul.mubr.bf16.gmra.mxu1 %v11190_v60  ;;  %v11253_v60 = vld [vmem:[#allocation2 + $0x128] ss:$16 sps:$4 sm:$0xff]  }
 0x149   :  { %1760 = vmatpush1.bf16.msra.mxu0 %v803_v63  ;;  %1522 = vmatprep.mubr.bf16.mxu1 %v11191_v61  ;;  %v814_v13 = vpack.c.bf16 %v758_v0, %v755_v59  ;;  %v11266_v59 = vld [vmem:[#allocation2 + $0x224] ss:$16 sps:$4 sm:$0xff]   ;;  %v11268_v61 = vld [vmem:[#allocation2 + $0x220] ss:$16 sps:$4 sm:$0xff]   ;;  %v11259_v0 = vld [vmem:[#allocation2 + $0x148] ss:$16 sps:$4 sm:$0xff]  }
 0x14a   :  { %v10630_v1 = vpop.f32.mrf.mxu0  ;;  %1761 = vmatprep.subr.bf16.mxu0 %v15409_v29  ;;  %v11272_v63 = vld [vmem:[#allocation2 + $0x244] ss:$16 sps:$4 sm:$0xff]  }
 0x14c   :  { %v771_v3 = vpop.f32.mrf.mxu0 }
 0x14d   :  { %1762 = vmatpush1.bf16.msra.mxu0 %v802_v2  ;;  %v11263_v2 = vld [vmem:[#allocation2 + $0x16c] ss:$16 sps:$4 sm:$0xff]  }
 0x14e   :  { %v10631_v6 = vpop.f32.mrf.mxu0  ;;  %1763 = vmatprep.subr.bf16.mxu0 %v15409_v29 }
 0x14f   :  { %v817_v7 = vpack.c.bf16 %v10631_v6, %v10630_v1  ;;  %v11274_v1 = vld [vmem:[#allocation2 + $0x240] ss:$16 sps:$4 sm:$0xff]  }
 0x150   :  { %v774_v8 = vpop.f32.mrf.mxu0  ;;  %1523 = vmatmul.mubr.bf16.gmra.mxu1 %v11193_v4  ;;  %v11357_v4 = vld [vmem:[%s15403_s3] sm:$0xff]  }
 0x151   :  { %1764 = vmatpush2.bf16.msra.mxu0 %v817_v7  ;;  %1530 = vmatprep.mubr.bf16.mxu1 %v11194_v5  ;;  %v816_v9 = vpack.c.bf16 %v774_v8, %v771_v3  ;;  %v11278_v3 = vld [vmem:[#allocation2 + $0x264] ss:$16 sps:$4 sm:$0xff]   ;;  %v11265_v5 = vld [vmem:[#allocation2 + $0x168] ss:$16 sps:$4 sm:$0xff]   ;;  %v11280_v6 = vld [vmem:[#allocation2 + $0x260] ss:$16 sps:$4 sm:$0xff]  }
 0x152   :  { %1765 = vmatprep.subr.bf16.mxu0 %v15409_v29  ;;  %10634 = vmatprep.subr.bf16.mxu1 %v11357_v4  ;;  %v11269_v7 = vld [vmem:[#allocation2 + $0x18c] ss:$16 sps:$4 sm:$0xff]   ;;  %v11284_v8 = vld [vmem:[#allocation2 + $0x284] ss:$16 sps:$4 sm:$0xff]  }
 0x153   :  { %10635 = vmatpush3.bf16.msra.mxu1 %v11357_v4  ;;  %v11345_v4 = vld [vmem:[#allocation2 + $0x3c4] ss:$16 sps:$4 sm:$0xff]  }
 0x154   :  { %11108 = vmatprep.subr.bf16.mxu1 %v15409_v29 }
 0x155   :  { %1766 = vmatpush2.bf16.msra.mxu0 %v816_v9  ;;  %v11271_v9 = vld [vmem:[#allocation2 + $0x188] ss:$16 sps:$4 sm:$0xff]  }
 0x156   :  { %1767 = vmatprep.subr.bf16.mxu0 %v15409_v29 }
 0x158   :  { %1531 = vmatmul.mubr.bf16.gmra.mxu1 %v11196_v10  ;;  %v11286_v10 = vld [vmem:[#allocation2 + $0x280] ss:$16 sps:$4 sm:$0xff]  }
 0x159   :  { %1768 = vmatpush2.bf16.msra.mxu0 %v815_v12  ;;  %1538 = vmatprep.mubr.bf16.mxu1 %v11200_v11  ;;  %v11275_v11 = vld [vmem:[#allocation2 + $0x1ac] ss:$16 sps:$4 sm:$0xff]   ;;  %v11290_v12 = vld [vmem:[#allocation2 + $0x2a4] ss:$16 sps:$4 sm:$0xff]  }
 0x15a   :  { %1769 = vmatprep.subr.bf16.mxu0 %v15409_v29 }
 0x15d   :  { %1770 = vmatpush2.bf16.msra.mxu0 %v814_v13  ;;  %v11277_v13 = vld [vmem:[#allocation2 + $0x1a8] ss:$16 sps:$4 sm:$0xff]  }
 0x15e   :  { %1771 = vmatprep.subr.bf16.mxu0 %v15409_v29 }
 0x160   :  { %1539 = vmatmul.mubr.bf16.gmra.mxu1 %v11202_v14  ;;  %v11292_v14 = vld [vmem:[#allocation2 + $0x2a0] ss:$16 sps:$4 sm:$0xff]  }
 0x161   :  { %1772 = vmatpush2.bf16.msra.mxu0 %v813_v16  ;;  %1546 = vmatprep.mubr.bf16.mxu1 %v11206_v15  ;;  %v11281_v15 = vld [vmem:[#allocation2 + $0x1cc] ss:$16 sps:$4 sm:$0xff]   ;;  %v11296_v16 = vld [vmem:[#allocation2 + $0x2c4] ss:$16 sps:$4 sm:$0xff]  }
 0x162   :  { %1773 = vmatprep.subr.bf16.mxu0 %v15409_v29 }
 0x165   :  { %1774 = vmatpush2.bf16.msra.mxu0 %v812_v17  ;;  %v11283_v17 = vld [vmem:[#allocation2 + $0x1c8] ss:$16 sps:$4 sm:$0xff]  }
 0x166   :  { %1775 = vmatprep.subr.bf16.mxu0 %v15409_v29 }
 0x168   :  { %1547 = vmatmul.mubr.bf16.gmra.mxu1 %v11208_v18  ;;  %v11298_v18 = vld [vmem:[#allocation2 + $0x2c0] ss:$16 sps:$4 sm:$0xff]  }
 0x169   :  { %1776 = vmatpush2.bf16.msra.mxu0 %v811_v20  ;;  %1554 = vmatprep.mubr.bf16.mxu1 %v11212_v19  ;;  %v11287_v19 = vld [vmem:[#allocation2 + $0x1ec] ss:$16 sps:$4 sm:$0xff]   ;;  %v11302_v20 = vld [vmem:[#allocation2 + $0x2e4] ss:$16 sps:$4 sm:$0xff]  }
 0x16a   :  { %1777 = vmatprep.subr.bf16.mxu0 %v15409_v29 }
 0x16d   :  { %1778 = vmatpush2.bf16.msra.mxu0 %v810_v21  ;;  %v11289_v21 = vld [vmem:[#allocation2 + $0x1e8] ss:$16 sps:$4 sm:$0xff]  }
 0x16e   :  { %2694 = vmatprep.subr.bf16.mxu0 %v15409_v29 }
 0x170   :  { %1780 = vmatmul.mubr.bf16.vlgmr.msra.gmra.mxu0 %v11197_v22  ;;  %1555 = vmatmul.mubr.bf16.gmra.mxu1 %v11214_v23  ;;  %v11304_v22 = vld [vmem:[#allocation2 + $0x2e0] ss:$16 sps:$4 sm:$0xff]   ;;  %v11293_v23 = vld [vmem:[#allocation2 + $0x20c] ss:$16 sps:$4 sm:$0xff]  }
 0x171   :  { %1787 = vmatprep.mubr.bf16.mxu0 %v11203_v24  ;;  %1562 = vmatprep.mubr.bf16.mxu1 %v11218_v25  ;;  %v11308_v24 = vld [vmem:[#allocation2 + $0x304] ss:$16 sps:$4 sm:$0xff]   ;;  %v11295_v25 = vld [vmem:[#allocation2 + $0x208] ss:$16 sps:$4 sm:$0xff]  }
 0x178   :  { %1788 = vmatmul.mubr.bf16.gmra.mxu0 %v11205_v26  ;;  %1563 = vmatmul.mubr.bf16.gmra.mxu1 %v11220_v27  ;;  %v11310_v26 = vld [vmem:[#allocation2 + $0x300] ss:$16 sps:$4 sm:$0xff]   ;;  %v11299_v27 = vld [vmem:[#allocation2 + $0x22c] ss:$16 sps:$4 sm:$0xff]  }
 0x179   :  { %1795 = vmatprep.mubr.bf16.mxu0 %v11209_v28  ;;  %1570 = vmatprep.mubr.bf16.mxu1 %v11224_v30  ;;  %v11314_v28 = vld [vmem:[#allocation2 + $0x324] ss:$16 sps:$4 sm:$0xff]  }
 0x180   :  { %1796 = vmatmul.mubr.bf16.gmra.mxu0 %v11211_v31  ;;  %1571 = vmatmul.mubr.bf16.gmra.mxu1 %v11226_v32  ;;  %v11301_v32 = vld [vmem:[#allocation2 + $0x228] ss:$16 sps:$4 sm:$0xff]  }
 0x181   :  { %1803 = vmatprep.mubr.bf16.mxu0 %v11215_v33  ;;  %1578 = vmatprep.mubr.bf16.mxu1 %v11230_v34  ;;  %v11316_v34 = vld [vmem:[#allocation2 + $0x320] ss:$16 sps:$4 sm:$0xff]  }
 0x188   :  { %1804 = vmatmul.mubr.bf16.gmra.mxu0 %v11217_v35  ;;  %1579 = vmatmul.mubr.bf16.gmra.mxu1 %v11232_v36  ;;  %v11305_v35 = vld [vmem:[#allocation2 + $0x24c] ss:$16 sps:$4 sm:$0xff]   ;;  %v11320_v36 = vld [vmem:[#allocation2 + $0x344] ss:$16 sps:$4 sm:$0xff]  }
 0x189   :  { %1811 = vmatprep.mubr.bf16.mxu0 %v11221_v37  ;;  %1586 = vmatprep.mubr.bf16.mxu1 %v11236_v38 }
 0x190   :  { %1812 = vmatmul.mubr.bf16.gmra.mxu0 %v11223_v39  ;;  %1587 = vmatmul.mubr.bf16.gmra.mxu1 %v11238_v40  ;;  %v11307_v40 = vld [vmem:[#allocation2 + $0x248] ss:$16 sps:$4 sm:$0xff]  }
 0x191   :  { %1819 = vmatprep.mubr.bf16.mxu0 %v11227_v41  ;;  %1594 = vmatprep.mubr.bf16.mxu1 %v11242_v42  ;;  %v11322_v42 = vld [vmem:[#allocation2 + $0x340] ss:$16 sps:$4 sm:$0xff]  }
 0x198   :  { %1820 = vmatmul.mubr.bf16.gmra.mxu0 %v11229_v43  ;;  %1595 = vmatmul.mubr.bf16.gmra.mxu1 %v11244_v44  ;;  %v11311_v43 = vld [vmem:[#allocation2 + $0x26c] ss:$16 sps:$4 sm:$0xff]   ;;  %v11326_v44 = vld [vmem:[#allocation2 + $0x364] ss:$16 sps:$4 sm:$0xff]  }
 0x199   :  { %1827 = vmatprep.mubr.bf16.mxu0 %v11233_v45  ;;  %1602 = vmatprep.mubr.bf16.mxu1 %v11248_v46 }
 0x1a0   :  { %1828 = vmatmul.mubr.bf16.gmra.mxu0 %v11235_v48  ;;  %1603 = vmatmul.mubr.bf16.gmra.mxu1 %v11250_v49  ;;  %v11313_v48 = vld [vmem:[#allocation2 + $0x268] ss:$16 sps:$4 sm:$0xff]  }
 0x1a1   :  { %1835 = vmatprep.mubr.bf16.mxu0 %v11239_v50  ;;  %1610 = vmatprep.mubr.bf16.mxu1 %v11254_v51  ;;  %v11328_v50 = vld [vmem:[#allocation2 + $0x360] ss:$16 sps:$4 sm:$0xff]   ;;  %v11317_v51 = vld [vmem:[#allocation2 + $0x28c] ss:$16 sps:$4 sm:$0xff]  }
 0x1a8   :  { %1836 = vmatmul.mubr.bf16.gmra.mxu0 %v11241_v52  ;;  %1611 = vmatmul.mubr.bf16.gmra.mxu1 %v11256_v53  ;;  %v11333_v52 = vld [vmem:[#allocation2 + $0x384] ss:$16 sps:$4 sm:$0xff]  }
 0x1a9   :  { %1843 = vmatprep.mubr.bf16.mxu0 %v11245_v54  ;;  %1618 = vmatprep.mubr.bf16.mxu1 %v11260_v55 }
 0x1b0   :  { %1844 = vmatmul.mubr.bf16.gmra.mxu0 %v11247_v56  ;;  %1619 = vmatmul.mubr.bf16.gmra.mxu1 %v11262_v57  ;;  %v11319_v56 = vld [vmem:[#allocation2 + $0x288] ss:$16 sps:$4 sm:$0xff]  }
 0x1b1   :  { %1851 = vmatprep.mubr.bf16.mxu0 %v11251_v58  ;;  %1626 = vmatprep.mubr.bf16.mxu1 %v11266_v59  ;;  %v11335_v58 = vld [vmem:[#allocation2 + $0x380] ss:$16 sps:$4 sm:$0xff]   ;;  %v11323_v59 = vld [vmem:[#allocation2 + $0x2ac] ss:$16 sps:$4 sm:$0xff]  }
 0x1b8   :  { %1852 = vmatmul.mubr.bf16.gmra.mxu0 %v11253_v60  ;;  %1627 = vmatmul.mubr.bf16.gmra.mxu1 %v11268_v61  ;;  %v11339_v60 = vld [vmem:[#allocation2 + $0x3a4] ss:$16 sps:$4 sm:$0xff]  }
 0x1b9   :  { %1859 = vmatprep.mubr.bf16.mxu0 %v11257_v62  ;;  %1634 = vmatprep.mubr.bf16.mxu1 %v11272_v63 }
 0x1c0   :  { %1860 = vmatmul.mubr.bf16.gmra.mxu0 %v11259_v0  ;;  %1635 = vmatmul.mubr.bf16.gmra.mxu1 %v11274_v1  ;;  %v11325_v0 = vld [vmem:[#allocation2 + $0x2a8] ss:$16 sps:$4 sm:$0xff]  }
 0x1c1   :  { %1867 = vmatprep.mubr.bf16.mxu0 %v11263_v2  ;;  %1642 = vmatprep.mubr.bf16.mxu1 %v11278_v3  ;;  %v11341_v2 = vld [vmem:[#allocation2 + $0x3a0] ss:$16 sps:$4 sm:$0xff]   ;;  %v11330_v3 = vld [vmem:[#allocation2 + $0x2cc] ss:$16 sps:$4 sm:$0xff]  }
 0x1c8   :  { %1868 = vmatmul.mubr.bf16.gmra.mxu0 %v11265_v5  ;;  %1643 = vmatmul.mubr.bf16.gmra.mxu1 %v11280_v6 }
 0x1c9   :  { %1875 = vmatprep.mubr.bf16.mxu0 %v11269_v7  ;;  %1650 = vmatprep.mubr.bf16.mxu1 %v11284_v8  ;;  %v11332_v8 = vld [vmem:[#allocation2 + $0x2c8] ss:$16 sps:$4 sm:$0xff]  }
 0x1d0   :  { %1876 = vmatmul.mubr.bf16.gmra.mxu0 %v11271_v9  ;;  %1651 = vmatmul.mubr.bf16.gmra.mxu1 %v11286_v10  ;;  %v11347_v10 = vld [vmem:[#allocation2 + $0x3c0] ss:$16 sps:$4 sm:$0xff]  }
 0x1d1   :  { %1883 = vmatprep.mubr.bf16.mxu0 %v11275_v11  ;;  %1658 = vmatprep.mubr.bf16.mxu1 %v11290_v12  ;;  %v11336_v11 = vld [vmem:[#allocation2 + $0x2ec] ss:$16 sps:$4 sm:$0xff]   ;;  %v11351_v12 = vld [vmem:[#allocation2 + $0x3e4] ss:$16 sps:$4 sm:$0xff]  }
 0x1d8   :  { %1884 = vmatmul.mubr.bf16.gmra.mxu0 %v11277_v13  ;;  %1659 = vmatmul.mubr.bf16.gmra.mxu1 %v11292_v14 }
 0x1d9   :  { %1891 = vmatprep.mubr.bf16.mxu0 %v11281_v15  ;;  %1666 = vmatprep.mubr.bf16.mxu1 %v11296_v16  ;;  %v11338_v16 = vld [vmem:[#allocation2 + $0x2e8] ss:$16 sps:$4 sm:$0xff]  }
 0x1e0   :  { %1892 = vmatmul.mubr.bf16.gmra.mxu0 %v11283_v17  ;;  %1667 = vmatmul.mubr.bf16.gmra.mxu1 %v11298_v18  ;;  %v11353_v18 = vld [vmem:[#allocation2 + $0x3e0] ss:$16 sps:$4 sm:$0xff]  }
 0x1e1   :  { %1899 = vmatprep.mubr.bf16.mxu0 %v11287_v19  ;;  %1674 = vmatprep.mubr.bf16.mxu1 %v11302_v20  ;;  %v11342_v19 = vld [vmem:[#allocation2 + $0x30c] ss:$16 sps:$4 sm:$0xff]  }
 0x1e8   :  { %1900 = vmatmul.mubr.bf16.gmra.mxu0 %v11289_v21  ;;  %1675 = vmatmul.mubr.bf16.gmra.mxu1 %v11304_v22 }
 0x1e9   :  { %1907 = vmatprep.mubr.bf16.mxu0 %v11293_v23  ;;  %1682 = vmatprep.mubr.bf16.mxu1 %v11308_v24  ;;  %v11344_v23 = vld [vmem:[#allocation2 + $0x308] ss:$16 sps:$4 sm:$0xff]  }
 0x1f0   :  { %1908 = vmatmul.mubr.bf16.gmra.mxu0 %v11295_v25  ;;  %1683 = vmatmul.mubr.bf16.gmra.mxu1 %v11310_v26  ;;  %v12192_v30 = vpop.f32.mrf.mxu1  ;;  %v11348_v25 = vld [vmem:[#allocation2 + $0x32c] ss:$16 sps:$4 sm:$0xff]  }
 0x1f1   :  { %1915 = vmatprep.mubr.bf16.mxu0 %v11299_v27  ;;  %1690 = vmatprep.mubr.bf16.mxu1 %v11314_v28 }
 0x1f2   :  { %v1494_v31 = vpop.f32.mrf.mxu1 }
 0x1f4   :  { %v12194_v33 = vpop.f32.mrf.mxu1 }
 0x1f6   :  { %v1497_v37 = vpop.f32.mrf.mxu1 }
 0x1f8   :  { %1916 = vmatmul.mubr.bf16.gmra.mxu0 %v11301_v32  ;;  %1691 = vmatmul.mubr.bf16.gmra.mxu1 %v11316_v34  ;;  %v12196_v38 = vpop.f32.mrf.mxu1 }
 0x1f9   :  { %1923 = vmatprep.mubr.bf16.mxu0 %v11305_v35  ;;  %1698 = vmatprep.mubr.bf16.mxu1 %v11320_v36  ;;  %v11350_v36 = vld [vmem:[#allocation2 + $0x328] ss:$16 sps:$4 sm:$0xff]  }
 0x1fa   :  { %v1502_v39 = vpop.f32.mrf.mxu1 }
 0x1fc   :  { %v12198_v41 = vpop.f32.mrf.mxu1 }
 0x1fe   :  { %v1505_v45 = vpop.f32.mrf.mxu1 }
 0x200   :  { %1924 = vmatmul.mubr.bf16.gmra.mxu0 %v11307_v40  ;;  %1699 = vmatmul.mubr.bf16.gmra.mxu1 %v11322_v42  ;;  %v12200_v46 = vpop.f32.mrf.mxu1  ;;  %v11354_v42 = vld [vmem:[#allocation2 + $0x34c] ss:$16 sps:$4 sm:$0xff]  }
 0x201   :  { %1931 = vmatprep.mubr.bf16.mxu0 %v11311_v43  ;;  %1706 = vmatprep.mubr.bf16.mxu1 %v11326_v44 }
 0x202   :  { %v1510_v47 = vpop.f32.mrf.mxu1 }
 0x204   :  { %v12202_v49 = vpop.f32.mrf.mxu1 }
 0x206   :  { %v1513_v53 = vpop.f32.mrf.mxu1 }
 0x208   :  { %1932 = vmatmul.mubr.bf16.gmra.mxu0 %v11313_v48  ;;  %1707 = vmatmul.mubr.bf16.gmra.mxu1 %v11328_v50  ;;  %v12204_v54 = vpop.f32.mrf.mxu1 }
 0x209   :  { %1939 = vmatprep.mubr.bf16.mxu0 %v11317_v51  ;;  %1714 = vmatprep.mubr.bf16.mxu1 %v11333_v52 }
 0x20a   :  { %v1518_v55 = vpop.f32.mrf.mxu1 }
 0x20c   :  { %v12206_v57 = vpop.f32.mrf.mxu1 }
 0x20e   :  { %v1521_v61 = vpop.f32.mrf.mxu1 }
 0x20f   :  { %v11358_v61 = vld [vmem:[#allocation2 + $0x36c] ss:$16 sps:$4 sm:$0xff]  }
 0x210   :  { %1940 = vmatmul.mubr.bf16.gmra.mxu0 %v11319_v56  ;;  %1715 = vmatmul.mubr.bf16.gmra.mxu1 %v11335_v58  ;;  %v12208_v62 = vpop.f32.mrf.mxu1  ;;  %v11356_v56 = vld [vmem:[#allocation2 + $0x348] ss:$16 sps:$4 sm:$0xff]  }
 0x211   :  { %1947 = vmatprep.mubr.bf16.mxu0 %v11323_v59  ;;  %1722 = vmatprep.mubr.bf16.mxu1 %v11339_v60 }
 0x212   :  { %v1526_v63 = vpop.f32.mrf.mxu1 }
 0x214   :  { %v12210_v1 = vpop.f32.mrf.mxu1 }
 0x216   :  { %v1529_v5 = vpop.f32.mrf.mxu1 }
 0x218   :  { %1948 = vmatmul.mubr.bf16.gmra.mxu0 %v11325_v0  ;;  %1723 = vmatmul.mubr.bf16.gmra.mxu1 %v11341_v2  ;;  %v12212_v6 = vpop.f32.mrf.mxu1 }
 0x219   :  { %1955 = vmatprep.mubr.bf16.mxu0 %v11330_v3  ;;  %1730 = vmatprep.mubr.bf16.mxu1 %v11345_v4 }
 0x21a   :  { %v1534_v7 = vpop.f32.mrf.mxu1 }
 0x21c   :  { %v12214_v9 = vpop.f32.mrf.mxu1 }
 0x21e   :  { %v1537_v13 = vpop.f32.mrf.mxu1 }
 0x220   :  { %1956 = vmatmul.mubr.bf16.gmra.mxu0 %v11332_v8  ;;  %1731 = vmatmul.mubr.bf16.gmra.mxu1 %v11347_v10  ;;  %v12216_v14 = vpop.f32.mrf.mxu1 }
 0x221   :  { %1963 = vmatprep.mubr.bf16.mxu0 %v11336_v11  ;;  %1738 = vmatprep.mubr.bf16.mxu1 %v11351_v12 }
 0x222   :  { %v1542_v15 = vpop.f32.mrf.mxu1 }
 0x224   :  { %v12218_v17 = vpop.f32.mrf.mxu1 }
 0x226   :  { %v1545_v20 = vpop.f32.mrf.mxu1 }
 0x228   :  { %1964 = vmatmul.mubr.bf16.gmra.mxu0 %v11338_v16  ;;  %1739 = vmatmul.mubr.bf16.gmra.mxu1 %v11353_v18  ;;  %v12220_v21 = vpop.f32.mrf.mxu1  ;;  %v11361_v18 = vld [vmem:[#allocation2 + $0x38c] ss:$16 sps:$4 sm:$0xff]  }
 0x229   :  { %1971 = vmatprep.mubr.bf16.mxu0 %v11342_v19 }
 0x22a   :  { %v1550_v22 = vpop.f32.mrf.mxu1 }
 0x22c   :  { %v12222_v24 = vpop.f32.mrf.mxu1 }
 0x22e   :  { %v1553_v26 = vpop.f32.mrf.mxu1 }
 0x230   :  { %v1781_v27 = vpop.f32.mrf.mxu0  ;;  %1972 = vmatmul.mubr.bf16.gmra.mxu0 %v11344_v23  ;;  %v12224_v28 = vpop.f32.mrf.mxu1 }
 0x231   :  { %v1782_v31 = vadd.f32 %v1781_v27, %v12192_v30  ;;  %1979 = vmatprep.mubr.bf16.mxu0 %v11348_v25 }
 0x232   :  { %v1783_v32 = vpop.f32.mrf.mxu0  ;;  %v1558_v34 = vpop.f32.mrf.mxu1 }
 0x233   :  { %v2100_v39 = vmul.f32 0.01, %v1782_v31  ;;  %vm2036_vm2 = vcmp.gt.f32.partialorder %v1782_v31, 0.0 }
 0x234   :  { %v1784_v35 = vpop.f32.mrf.mxu0  ;;  %v12227_v37 = vpop.f32.mrf.mxu1 }
 0x235   :  { %v1785_v40 = vadd.f32 %v1784_v35, %v12194_v33  ;;  %v2164_v30 = vsel %vm2036_vm2, %v1782_v31, %v2100_v39 }
 0x236   :  { %v1786_v43 = vpop.f32.mrf.mxu0  ;;  %v1561_v44 = vpop.f32.mrf.mxu1 }
 0x237   :  { %vm2037_vm3 = vcmp.gt.f32.partialorder %v1785_v40, 0.0  ;;  %v2101_v45 = vmul.f32 0.01, %v1785_v40 }
 0x238   :  { %v1789_v47 = vpop.f32.mrf.mxu0  ;;  %1980 = vmatmul.mubr.bf16.gmra.mxu0 %v11350_v36  ;;  %v12230_v48 = vpop.f32.mrf.mxu1 }
 0x239   :  { %v2165_v50 = vsel %vm2037_vm3, %v1785_v40, %v2101_v45  ;;  %v1790_v51 = vadd.f32 %v1789_v47, %v12196_v38  ;;  %1987 = vmatprep.mubr.bf16.mxu0 %v11354_v42  ;;  %v11364_v42 = vld [vmem:[#allocation2 + $0x3ac] ss:$16 sps:$4 sm:$0xff]  }
 0x23a   :  { %v2228_v52 = vpack.c.bf16 %v2165_v50, %v2164_v30  ;;  %v1791_v53 = vpop.f32.mrf.mxu0  ;;  %v1566_v55 = vpop.f32.mrf.mxu1 }
 0x23b   :  { %v2102_v59 = vmul.f32 0.01, %v1790_v51  ;;  %vm2038_vm5 = vcmp.gt.f32.partialorder %v1790_v51, 0.0 }
 0x23c   :  { %v1792_v33 = vpop.f32.mrf.mxu0  ;;  %10636 = vmatprep.mubr.msk.bf16.mxu1 %vm2276_vm4, %v2228_v52  ;;  %v12234_v58 = vpop.f32.mrf.mxu1 }
 0x23d   :  { %v1793_v60 = vadd.f32 %v1792_v33, %v12198_v41  ;;  %v2166_v4 = vsel %vm2038_vm5, %v1790_v51, %v2102_v59  ;;  %v11360_v41 = vld [vmem:[#allocation2 + $0x368] ss:$16 sps:$4 sm:$0xff]  }
 0x23e   :  { %v1794_v63 = vpop.f32.mrf.mxu0  ;;  %v1569_v0 = vpop.f32.mrf.mxu1 }
 0x23f   :  { %vm2039_vm6 = vcmp.gt.f32.partialorder %v1793_v60, 0.0  ;;  %v2103_v38 = vmul.f32 0.01, %v1793_v60 }
 0x240   :  { %v1797_v2 = vpop.f32.mrf.mxu0  ;;  %1988 = vmatmul.mubr.bf16.gmra.mxu0 %v11356_v56  ;;  %v12237_v3 = vpop.f32.mrf.mxu1 }
 0x241   :  { %v2167_v5 = vsel %vm2039_vm6, %v1793_v60, %v2103_v38  ;;  %v1798_v7 = vadd.f32 %v1797_v2, %v12200_v46  ;;  %1995 = vmatprep.mubr.bf16.mxu0 %v11358_v61  ;;  %v11367_v61 = vld [vmem:[#allocation2 + $0x3cc] ss:$16 sps:$4 sm:$0xff]  }
 0x242   :  { %v2229_v8 = vpack.c.bf16 %v2167_v5, %v2166_v4  ;;  %v1799_v10 = vpop.f32.mrf.mxu0  ;;  %v1574_v11 = vpop.f32.mrf.mxu1 }
 0x243   :  { %v2104_v15 = vmul.f32 0.01, %v1798_v7  ;;  %vm2040_vm7 = vcmp.gt.f32.partialorder %v1798_v7, 0.0 }
 0x244   :  { %v1800_v12 = vpop.f32.mrf.mxu0  ;;  %10637 = vmatmul.mubr.msk.bf16.vlgmr.msra.gmra.mxu1 %vm2276_vm4, %v2229_v8  ;;  %v12241_v13 = vpop.f32.mrf.mxu1 }
 0x245   :  { %v1801_v16 = vadd.f32 %v1800_v12, %v12202_v49  ;;  %v2168_v25 = vsel %vm2040_vm7, %v1798_v7, %v2104_v15  ;;  %v11363_v49 = vld [vmem:[#allocation2 + $0x388] ss:$16 sps:$4 sm:$0xff]  }
 0x246   :  { %v1802_v19 = vpop.f32.mrf.mxu0  ;;  %v1577_v20 = vpop.f32.mrf.mxu1 }
 0x247   :  { %vm2041_vm8 = vcmp.gt.f32.partialorder %v1801_v16, 0.0  ;;  %v2105_v22 = vmul.f32 0.01, %v1801_v16 }
 0x248   :  { %v1805_v46 = vpop.f32.mrf.mxu0  ;;  %1996 = vmatmul.mubr.bf16.gmra.mxu0 %v11360_v41  ;;  %v12244_v23 = vpop.f32.mrf.mxu1 }
 0x249   :  { %v2169_v26 = vsel %vm2041_vm8, %v1801_v16, %v2105_v22  ;;  %v1806_v27 = vadd.f32 %v1805_v46, %v12204_v54  ;;  %2003 = vmatprep.mubr.bf16.mxu0 %v11361_v18  ;;  %v11370_v18 = vld [vmem:[#allocation2 + $0x3ec] ss:$16 sps:$4 sm:$0xff]  }
 0x24a   :  { %v2230_v31 = vpack.c.bf16 %v2169_v26, %v2168_v25  ;;  %v1807_v32 = vpop.f32.mrf.mxu0  ;;  %v1582_v34 = vpop.f32.mrf.mxu1 }
 0x24b   :  { %v2106_v39 = vmul.f32 0.01, %v1806_v27  ;;  %vm2042_vm9 = vcmp.gt.f32.partialorder %v1806_v27, 0.0 }
 0x24c   :  { %v1808_v35 = vpop.f32.mrf.mxu0  ;;  %10640 = vmatprep.mubr.msk.bf16.mxu1 %vm2276_vm4, %v2230_v31  ;;  %v12248_v36 = vpop.f32.mrf.mxu1 }
 0x24d   :  { %v1809_v40 = vadd.f32 %v1808_v35, %v12206_v57  ;;  %v2170_v30 = vsel %vm2042_vm9, %v1806_v27, %v2106_v39  ;;  %v11366_v57 = vld [vmem:[#allocation2 + $0x3a8] ss:$16 sps:$4 sm:$0xff]  }
 0x24e   :  { %v1810_v43 = vpop.f32.mrf.mxu0  ;;  %v1585_v44 = vpop.f32.mrf.mxu1 }
 0x24f   :  { %vm2043_vm10 = vcmp.gt.f32.partialorder %v1809_v40, 0.0  ;;  %v2107_v45 = vmul.f32 0.01, %v1809_v40 }
 0x250   :  { %v1813_v54 = vpop.f32.mrf.mxu0  ;;  %2004 = vmatmul.mubr.bf16.gmra.mxu0 %v11363_v49  ;;  %v12251_v47 = vpop.f32.mrf.mxu1 }
 0x251   :  { %v2171_v50 = vsel %vm2043_vm10, %v1809_v40, %v2107_v45  ;;  %v1814_v51 = vadd.f32 %v1813_v54, %v12208_v62  ;;  %2011 = vmatprep.mubr.bf16.mxu0 %v11364_v42 }
 0x252   :  { %v2231_v52 = vpack.c.bf16 %v2171_v50, %v2170_v30  ;;  %v1815_v53 = vpop.f32.mrf.mxu0  ;;  %v1590_v55 = vpop.f32.mrf.mxu1 }
 0x253   :  { %v2108_v59 = vmul.f32 0.01, %v1814_v51  ;;  %vm2044_vm11 = vcmp.gt.f32.partialorder %v1814_v51, 0.0 }
 0x254   :  { %v1816_v33 = vpop.f32.mrf.mxu0  ;;  %10641 = vmatmul.mubr.msk.bf16.gmra.mxu1 %vm2276_vm4, %v2231_v52  ;;  %v12255_v56 = vpop.f32.mrf.mxu1 }
 0x255   :  { %v1817_v60 = vadd.f32 %v1816_v33, %v12210_v1  ;;  %v2172_v4 = vsel %vm2044_vm11, %v1814_v51, %v2108_v59  ;;  %v11369_v1 = vld [vmem:[#allocation2 + $0x3c8] ss:$16 sps:$4 sm:$0xff]   ;;  %v11521_v51 = vld [vmem:[#allocation2 + $0x4] ss:$16 sps:$4 sm:$0xff]  }
 0x256   :  { %v1818_v63 = vpop.f32.mrf.mxu0  ;;  %v1593_v0 = vpop.f32.mrf.mxu1 }
 0x257   :  { %vm2045_vm12 = vcmp.gt.f32.partialorder %v1817_v60, 0.0  ;;  %v2109_v38 = vmul.f32 0.01, %v1817_v60 }
 0x258   :  { %v1821_v62 = vpop.f32.mrf.mxu0  ;;  %2012 = vmatmul.mubr.bf16.gmra.mxu0 %v11366_v57  ;;  %v12258_v2 = vpop.f32.mrf.mxu1 }
 0x259   :  { %v2173_v5 = vsel %vm2045_vm12, %v1817_v60, %v2109_v38  ;;  %v1822_v7 = vadd.f32 %v1821_v62, %v12212_v6  ;;  %2019 = vmatprep.mubr.bf16.mxu0 %v11367_v61 }
 0x25a   :  { %v2232_v8 = vpack.c.bf16 %v2173_v5, %v2172_v4  ;;  %v1823_v10 = vpop.f32.mrf.mxu0  ;;  %v1598_v11 = vpop.f32.mrf.mxu1 }
 0x25b   :  { %v2110_v15 = vmul.f32 0.01, %v1822_v7  ;;  %vm2046_vm13 = vcmp.gt.f32.partialorder %v1822_v7, 0.0 }
 0x25c   :  { %v1824_v12 = vpop.f32.mrf.mxu0  ;;  %10644 = vmatprep.mubr.msk.bf16.mxu1 %vm2276_vm4, %v2232_v8  ;;  %v12262_v41 = vpop.f32.mrf.mxu1 }
 0x25d   :  { %v1825_v16 = vadd.f32 %v1824_v12, %v12214_v9  ;;  %v2174_v25 = vsel %vm2046_vm13, %v1822_v7, %v2110_v15  ;;  %v11372_v9 = vld [vmem:[#allocation2 + $0x3e8] ss:$16 sps:$4 sm:$0xff]  }
 0x25e   :  { %v1826_v19 = vpop.f32.mrf.mxu0  ;;  %v1601_v20 = vpop.f32.mrf.mxu1 }
 0x25f   :  { %vm2047_vm14 = vcmp.gt.f32.partialorder %v1825_v16, 0.0  ;;  %v2111_v22 = vmul.f32 0.01, %v1825_v16 }
 0x260   :  { %v1829_v6 = vpop.f32.mrf.mxu0  ;;  %2020 = vmatmul.mubr.bf16.gmra.mxu0 %v11369_v1  ;;  %v12265_v46 = vpop.f32.mrf.mxu1 }
 0x261   :  { %v2175_v26 = vsel %vm2047_vm14, %v1825_v16, %v2111_v22  ;;  %v1830_v27 = vadd.f32 %v1829_v6, %v12216_v14  ;;  %2027 = vmatprep.mubr.bf16.mxu0 %v11370_v18 }
 0x262   :  { %v2233_v31 = vpack.c.bf16 %v2175_v26, %v2174_v25  ;;  %v1831_v32 = vpop.f32.mrf.mxu0  ;;  %v1606_v34 = vpop.f32.mrf.mxu1 }
 0x263   :  { %v2112_v39 = vmul.f32 0.01, %v1830_v27  ;;  %vm2048_vm15 = vcmp.gt.f32.partialorder %v1830_v27, 0.0 }
 0x264   :  { %v1832_v35 = vpop.f32.mrf.mxu0  ;;  %10645 = vmatmul.mubr.msk.bf16.gmra.mxu1 %vm2276_vm4, %v2233_v31  ;;  %v12269_v49 = vpop.f32.mrf.mxu1 }
 0x265   :  { %v1833_v40 = vadd.f32 %v1832_v35, %v12218_v17  ;;  %v2176_v54 = vsel %vm2048_vm15, %v1830_v27, %v2112_v39 }
 0x266   :  { %v1834_v42 = vpop.f32.mrf.mxu0  ;;  %v1609_v43 = vpop.f32.mrf.mxu1 }
 0x267   :  { %vm2049_vm0 = vcmp.gt.f32.partialorder %v1833_v40, 0.0  ;;  %v2113_v44 = vmul.f32 0.01, %v1833_v40 }
 0x268   :  { %v1837_v45 = vpop.f32.mrf.mxu0  ;;  %2028 = vmatmul.mubr.bf16.gmra.mxu0 %v11372_v9  ;;  %v12272_v14 = vpop.f32.mrf.mxu1 }
 0x269   :  { %v2177_v30 = vsel %vm2049_vm0, %v1833_v40, %v2113_v44  ;;  %v1838_v50 = vadd.f32 %v1837_v45, %v12220_v21  ;;  %2726 = vmatprep.mubr.bf16.mxu0 %v11521_v51 }
 0x26a   :  { %v2234_v52 = vpack.c.bf16 %v2177_v30, %v2176_v54  ;;  %v1839_v53 = vpop.f32.mrf.mxu0  ;;  %v1614_v55 = vpop.f32.mrf.mxu1 }
 0x26b   :  { %v2114_v57 = vmul.f32 0.01, %v1838_v50  ;;  %vm2050_vm1 = vcmp.gt.f32.partialorder %v1838_v50, 0.0 }
 0x26c   :  { %v1840_v33 = vpop.f32.mrf.mxu0  ;;  %10648 = vmatprep.mubr.msk.bf16.mxu1 %vm2276_vm4, %v2234_v52  ;;  %v12276_v17 = vpop.f32.mrf.mxu1 }
 0x26d   :  { %v1841_v59 = vadd.f32 %v1840_v33, %v12222_v24  ;;  %v2178_v38 = vsel %vm2050_vm1, %v1838_v50, %v2114_v57 }
 0x26e   :  { %v1842_v60 = vpop.f32.mrf.mxu0  ;;  %v1617_v61 = vpop.f32.mrf.mxu1 }
 0x26f   :  { %vm2051_vm2 = vcmp.gt.f32.partialorder %v1841_v59, 0.0  ;;  %v2115_v63 = vmul.f32 0.01, %v1841_v59 }
 0x270   :  { %v1845_v0 = vpop.f32.mrf.mxu0  ;;  %v12279_v21 = vpop.f32.mrf.mxu1 }
 0x271   :  { %v2179_v62 = vsel %vm2051_vm2, %v1841_v59, %v2115_v63  ;;  %v1846_v4 = vadd.f32 %v1845_v0, %v12224_v28 }
 0x272   :  { %v2235_v5 = vpack.c.bf16 %v2179_v62, %v2178_v38  ;;  %v1847_v7 = vpop.f32.mrf.mxu0  ;;  %v1622_v8 = vpop.f32.mrf.mxu1 }
 0x273   :  { %v2116_v24 = vmul.f32 0.01, %v1846_v4  ;;  %vm2052_vm3 = vcmp.gt.f32.partialorder %v1846_v4, 0.0 }
 0x274   :  { %v1848_v10 = vpop.f32.mrf.mxu0  ;;  %10649 = vmatmul.mubr.msk.bf16.gmra.mxu1 %vm2276_vm4, %v2235_v5  ;;  %v12283_v11 = vpop.f32.mrf.mxu1 }
 0x275   :  { %v1849_v12 = vadd.f32 %v1848_v10, %v12227_v37  ;;  %v2180_v28 = vsel %vm2052_vm3, %v1846_v4, %v2116_v24 }
 0x276   :  { %v1850_v1 = vpop.f32.mrf.mxu0  ;;  %v1625_v15 = vpop.f32.mrf.mxu1 }
 0x277   :  { %vm2053_vm5 = vcmp.gt.f32.partialorder %v1849_v12, 0.0  ;;  %v2117_v16 = vmul.f32 0.01, %v1849_v12 }
 0x278   :  { %v1853_v18 = vpop.f32.mrf.mxu0  ;;  %v12286_v19 = vpop.f32.mrf.mxu1 }
 0x279   :  { %v2181_v20 = vsel %vm2053_vm5, %v1849_v12, %v2117_v16  ;;  %v1854_v22 = vadd.f32 %v1853_v18, %v12230_v48 }
 0x27a   :  { %v2236_v6 = vpack.c.bf16 %v2181_v20, %v2180_v28  ;;  %v1855_v25 = vpop.f32.mrf.mxu0  ;;  %v1630_v26 = vpop.f32.mrf.mxu1 }
 0x27b   :  { %v2118_v37 = vmul.f32 0.01, %v1854_v22  ;;  %vm2054_vm6 = vcmp.gt.f32.partialorder %v1854_v22, 0.0 }
 0x27c   :  { %v1856_v27 = vpop.f32.mrf.mxu0  ;;  %10652 = vmatprep.mubr.msk.bf16.mxu1 %vm2276_vm4, %v2236_v6  ;;  %v12290_v31 = vpop.f32.mrf.mxu1 }
 0x27d   :  { %v1857_v32 = vadd.f32 %v1856_v27, %v12234_v58  ;;  %v2182_v48 = vsel %vm2054_vm6, %v1854_v22, %v2118_v37 }
 0x27e   :  { %v1858_v34 = vpop.f32.mrf.mxu0  ;;  %v1633_v35 = vpop.f32.mrf.mxu1 }
 0x27f   :  { %vm2055_vm7 = vcmp.gt.f32.partialorder %v1857_v32, 0.0  ;;  %v2119_v9 = vmul.f32 0.01, %v1857_v32 }
 0x280   :  { %v1861_v39 = vpop.f32.mrf.mxu0  ;;  %v12293_v40 = vpop.f32.mrf.mxu1 }
 0x281   :  { %v2183_v42 = vsel %vm2055_vm7, %v1857_v32, %v2119_v9  ;;  %v1862_v43 = vadd.f32 %v1861_v39, %v12237_v3 }
 0x282   :  { %v2237_v44 = vpack.c.bf16 %v2183_v42, %v2182_v48  ;;  %v1863_v45 = vpop.f32.mrf.mxu0  ;;  %v1638_v54 = vpop.f32.mrf.mxu1 }
 0x283   :  { %v2120_v58 = vmul.f32 0.01, %v1862_v43  ;;  %vm2056_vm8 = vcmp.gt.f32.partialorder %v1862_v43, 0.0 }
 0x284   :  { %v1864_v30 = vpop.f32.mrf.mxu0  ;;  %10653 = vmatmul.mubr.msk.bf16.gmra.mxu1 %vm2276_vm4, %v2237_v44  ;;  %v12297_v50 = vpop.f32.mrf.mxu1 }
 0x285   :  { %v1865_v51 = vadd.f32 %v1864_v30, %v12241_v13  ;;  %v2184_v3 = vsel %vm2056_vm8, %v1862_v43, %v2120_v58 }
 0x286   :  { %v1866_v52 = vpop.f32.mrf.mxu0  ;;  %v1641_v53 = vpop.f32.mrf.mxu1 }
 0x287   :  { %vm2057_vm9 = vcmp.gt.f32.partialorder %v1865_v51, 0.0  ;;  %v2121_v55 = vmul.f32 0.01, %v1865_v51 }
 0x288   :  { %v1869_v33 = vpop.f32.mrf.mxu0  ;;  %v12300_v57 = vpop.f32.mrf.mxu1 }
 0x289   :  { %v2185_v59 = vsel %vm2057_vm9, %v1865_v51, %v2121_v55  ;;  %v1870_v60 = vadd.f32 %v1869_v33, %v12244_v23 }
 0x28a   :  { %v2238_v61 = vpack.c.bf16 %v2185_v59, %v2184_v3  ;;  %v1871_v63 = vpop.f32.mrf.mxu0  ;;  %v1646_v0 = vpop.f32.mrf.mxu1 }
 0x28b   :  { %v2122_v13 = vmul.f32 0.01, %v1870_v60  ;;  %vm2058_vm10 = vcmp.gt.f32.partialorder %v1870_v60, 0.0 }
 0x28c   :  { %v1872_v38 = vpop.f32.mrf.mxu0  ;;  %10656 = vmatprep.mubr.msk.bf16.mxu1 %vm2276_vm4, %v2238_v61  ;;  %v12304_v62 = vpop.f32.mrf.mxu1 }
 0x28d   :  { %v1873_v4 = vadd.f32 %v1872_v38, %v12248_v36  ;;  %v2186_v23 = vsel %vm2058_vm10, %v1870_v60, %v2122_v13 }
 0x28e   :  { %v1874_v5 = vpop.f32.mrf.mxu0  ;;  %v1649_v7 = vpop.f32.mrf.mxu1 }
 0x28f   :  { %vm2059_vm11 = vcmp.gt.f32.partialorder %v1873_v4, 0.0  ;;  %v2123_v8 = vmul.f32 0.01, %v1873_v4 }
 0x290   :  { %v1877_v10 = vpop.f32.mrf.mxu0  ;;  %v12307_v24 = vpop.f32.mrf.mxu1 }
 0x291   :  { %v2187_v12 = vsel %vm2059_vm11, %v1873_v4, %v2123_v8  ;;  %v1878_v1 = vadd.f32 %v1877_v10, %v12251_v47 }
 0x292   :  { %v2239_v15 = vpack.c.bf16 %v2187_v12, %v2186_v23  ;;  %v1879_v16 = vpop.f32.mrf.mxu0  ;;  %v1654_v18 = vpop.f32.mrf.mxu1 }
 0x293   :  { %v2124_v36 = vmul.f32 0.01, %v1878_v1  ;;  %vm2060_vm12 = vcmp.gt.f32.partialorder %v1878_v1, 0.0 }
 0x294   :  { %v1880_v28 = vpop.f32.mrf.mxu0  ;;  %10657 = vmatmul.mubr.msk.bf16.gmra.mxu1 %vm2276_vm4, %v2239_v15  ;;  %v12311_v20 = vpop.f32.mrf.mxu1 }
 0x295   :  { %v1881_v22 = vadd.f32 %v1880_v28, %v12255_v56  ;;  %v2188_v47 = vsel %vm2060_vm12, %v1878_v1, %v2124_v36 }
 0x296   :  { %v1882_v6 = vpop.f32.mrf.mxu0  ;;  %v1657_v25 = vpop.f32.mrf.mxu1 }
 0x297   :  { %vm2061_vm13 = vcmp.gt.f32.partialorder %v1881_v22, 0.0  ;;  %v2125_v26 = vmul.f32 0.01, %v1881_v22 }
 0x298   :  { %v1885_v27 = vpop.f32.mrf.mxu0  ;;  %v12314_v37 = vpop.f32.mrf.mxu1 }
 0x299   :  { %v2189_v32 = vsel %vm2061_vm13, %v1881_v22, %v2125_v26  ;;  %v1886_v34 = vadd.f32 %v1885_v27, %v12258_v2 }
 0x29a   :  { %v2240_v35 = vpack.c.bf16 %v2189_v32, %v2188_v47  ;;  %v1887_v9 = vpop.f32.mrf.mxu0  ;;  %v1662_v39 = vpop.f32.mrf.mxu1 }
 0x29b   :  { %v2126_v56 = vmul.f32 0.01, %v1886_v34  ;;  %vm2062_vm14 = vcmp.gt.f32.partialorder %v1886_v34, 0.0 }
 0x29c   :  { %v1888_v48 = vpop.f32.mrf.mxu0  ;;  %10660 = vmatprep.mubr.msk.bf16.mxu1 %vm2276_vm4, %v2240_v35  ;;  %v12318_v42 = vpop.f32.mrf.mxu1 }
 0x29d   :  { %v1889_v43 = vadd.f32 %v1888_v48, %v12262_v41  ;;  %v2190_v2 = vsel %vm2062_vm14, %v1886_v34, %v2126_v56 }
 0x29e   :  { %v1890_v44 = vpop.f32.mrf.mxu0  ;;  %v1665_v45 = vpop.f32.mrf.mxu1 }
 0x29f   :  { %vm2063_vm15 = vcmp.gt.f32.partialorder %v1889_v43, 0.0  ;;  %v2127_v54 = vmul.f32 0.01, %v1889_v43 }
 0x2a0   :  { %v1893_v30 = vpop.f32.mrf.mxu0  ;;  %v12321_v58 = vpop.f32.mrf.mxu1 }
 0x2a1   :  { %v2191_v51 = vsel %vm2063_vm15, %v1889_v43, %v2127_v54  ;;  %v1894_v52 = vadd.f32 %v1893_v30, %v12265_v46 }
 0x2a2   :  { %v2241_v53 = vpack.c.bf16 %v2191_v51, %v2190_v2  ;;  %v1895_v55 = vpop.f32.mrf.mxu0  ;;  %v1670_v33 = vpop.f32.mrf.mxu1 }
 0x2a3   :  { %v2128_v41 = vmul.f32 0.01, %v1894_v52  ;;  %vm2064_vm0 = vcmp.gt.f32.partialorder %v1894_v52, 0.0 }
 0x2a4   :  { %v1896_v3 = vpop.f32.mrf.mxu0  ;;  %10661 = vmatmul.mubr.msk.bf16.gmra.mxu1 %vm2276_vm4, %v2241_v53  ;;  %v12325_v59 = vpop.f32.mrf.mxu1 }
 0x2a5   :  { %v1897_v60 = vadd.f32 %v1896_v3, %v12269_v49  ;;  %v2192_v46 = vsel %vm2064_vm0, %v1894_v52, %v2128_v41 }
 0x2a6   :  { %v1898_v61 = vpop.f32.mrf.mxu0  ;;  %v1673_v63 = vpop.f32.mrf.mxu1 }
 0x2a7   :  { %vm2065_vm1 = vcmp.gt.f32.partialorder %v1897_v60, 0.0  ;;  %v2129_v0 = vmul.f32 0.01, %v1897_v60 }
 0x2a8   :  { %v1901_v38 = vpop.f32.mrf.mxu0  ;;  %v12328_v13 = vpop.f32.mrf.mxu1 }
 0x2a9   :  { %v2193_v4 = vsel %vm2065_vm1, %v1897_v60, %v2129_v0  ;;  %v1902_v5 = vadd.f32 %v1901_v38, %v12272_v14 }
 0x2aa   :  { %v2242_v7 = vpack.c.bf16 %v2193_v4, %v2192_v46  ;;  %v1903_v8 = vpop.f32.mrf.mxu0  ;;  %v1678_v10 = vpop.f32.mrf.mxu1 }
 0x2ab   :  { %v2130_v49 = vmul.f32 0.01, %v1902_v5  ;;  %vm2066_vm2 = vcmp.gt.f32.partialorder %v1902_v5, 0.0 }
 0x2ac   :  { %v1904_v23 = vpop.f32.mrf.mxu0  ;;  %10664 = vmatprep.mubr.msk.bf16.mxu1 %vm2276_vm4, %v2242_v7  ;;  %v12332_v12 = vpop.f32.mrf.mxu1 }
 0x2ad   :  { %v1905_v1 = vadd.f32 %v1904_v23, %v12276_v17  ;;  %v2194_v14 = vsel %vm2066_vm2, %v1902_v5, %v2130_v49 }
 0x2ae   :  { %v1906_v15 = vpop.f32.mrf.mxu0  ;;  %v1681_v16 = vpop.f32.mrf.mxu1 }
 0x2af   :  { %vm2067_vm3 = vcmp.gt.f32.partialorder %v1905_v1, 0.0  ;;  %v2131_v18 = vmul.f32 0.01, %v1905_v1 }
 0x2b0   :  { %v1909_v28 = vpop.f32.mrf.mxu0  ;;  %v12335_v36 = vpop.f32.mrf.mxu1 }
 0x2b1   :  { %v2195_v22 = vsel %vm2067_vm3, %v1905_v1, %v2131_v18  ;;  %v1910_v6 = vadd.f32 %v1909_v28, %v12279_v21 }
 0x2b2   :  { %v2243_v25 = vpack.c.bf16 %v2195_v22, %v2194_v14  ;;  %v1911_v26 = vpop.f32.mrf.mxu0  ;;  %v1686_v27 = vpop.f32.mrf.mxu1 }
 0x2b3   :  { %v2132_v47 = vmul.f32 0.01, %v1910_v6  ;;  %vm2068_vm5 = vcmp.gt.f32.partialorder %v1910_v6, 0.0 }
 0x2b4   :  { %v1912_v32 = vpop.f32.mrf.mxu0  ;;  %10665 = vmatmul.mubr.msk.bf16.gmra.mxu1 %vm2276_vm4, %v2243_v25  ;;  %v12339_v17 = vpop.f32.mrf.mxu1 }
 0x2b5   :  { %v1913_v34 = vadd.f32 %v1912_v32, %v12283_v11  ;;  %v2196_v39 = vsel %vm2068_vm5, %v1910_v6, %v2132_v47 }
 0x2b6   :  { %v1914_v35 = vpop.f32.mrf.mxu0  ;;  %v1689_v9 = vpop.f32.mrf.mxu1 }
 0x2b7   :  { %vm2069_vm6 = vcmp.gt.f32.partialorder %v1913_v34, 0.0  ;;  %v2133_v48 = vmul.f32 0.01, %v1913_v34 }
 0x2b8   :  { %v1917_v56 = vpop.f32.mrf.mxu0  ;;  %v12342_v43 = vpop.f32.mrf.mxu1 }
 0x2b9   :  { %v2197_v21 = vsel %vm2069_vm6, %v1913_v34, %v2133_v48  ;;  %v1918_v44 = vadd.f32 %v1917_v56, %v12286_v19 }
 0x2ba   :  { %v2244_v45 = vpack.c.bf16 %v2197_v21, %v2196_v39  ;;  %v1919_v54 = vpop.f32.mrf.mxu0  ;;  %v1694_v30 = vpop.f32.mrf.mxu1 }
 0x2bb   :  { %v2134_v2 = vmul.f32 0.01, %v1918_v44  ;;  %vm2070_vm7 = vcmp.gt.f32.partialorder %v1918_v44, 0.0 }
 0x2bc   :  { %v1920_v51 = vpop.f32.mrf.mxu0  ;;  %10668 = vmatprep.mubr.msk.bf16.mxu1 %vm2276_vm4, %v2244_v45  ;;  %v12346_v11 = vpop.f32.mrf.mxu1 }
 0x2bd   :  { %v1921_v52 = vadd.f32 %v1920_v51, %v12290_v31  ;;  %v2198_v33 = vsel %vm2070_vm7, %v1918_v44, %v2134_v2 }
 0x2be   :  { %v1922_v53 = vpop.f32.mrf.mxu0  ;;  %v1697_v55 = vpop.f32.mrf.mxu1 }
 0x2bf   :  { %vm2071_vm8 = vcmp.gt.f32.partialorder %v1921_v52, 0.0  ;;  %v2135_v3 = vmul.f32 0.01, %v1921_v52 }
 0x2c0   :  { %v1925_v41 = vpop.f32.mrf.mxu0  ;;  %v12349_v60 = vpop.f32.mrf.mxu1 }
 0x2c1   :  { %v2199_v19 = vsel %vm2071_vm8, %v1921_v52, %v2135_v3  ;;  %v1926_v61 = vadd.f32 %v1925_v41, %v12293_v40 }
 0x2c2   :  { %v2245_v63 = vpack.c.bf16 %v2199_v19, %v2198_v33  ;;  %v1927_v0 = vpop.f32.mrf.mxu0  ;;  %v1702_v38 = vpop.f32.mrf.mxu1 }
 0x2c3   :  { %v2136_v46 = vmul.f32 0.01, %v1926_v61  ;;  %vm2072_vm9 = vcmp.gt.f32.partialorder %v1926_v61, 0.0 }
 0x2c4   :  { %v1928_v4 = vpop.f32.mrf.mxu0  ;;  %10669 = vmatmul.mubr.msk.bf16.gmra.mxu1 %vm2276_vm4, %v2245_v63  ;;  %v12353_v31 = vpop.f32.mrf.mxu1 }
 0x2c5   :  { %v1929_v5 = vadd.f32 %v1928_v4, %v12297_v50  ;;  %v2200_v10 = vsel %vm2072_vm9, %v1926_v61, %v2136_v46 }
 0x2c6   :  { %v1930_v7 = vpop.f32.mrf.mxu0  ;;  %v1705_v8 = vpop.f32.mrf.mxu1 }
 0x2c7   :  { %vm2073_vm10 = vcmp.gt.f32.partialorder %v1929_v5, 0.0  ;;  %v2137_v23 = vmul.f32 0.01, %v1929_v5 }
 0x2c8   :  { %v1933_v49 = vpop.f32.mrf.mxu0  ;;  %v12356_v1 = vpop.f32.mrf.mxu1 }
 0x2c9   :  { %v2201_v40 = vsel %vm2073_vm10, %v1929_v5, %v2137_v23  ;;  %v1934_v15 = vadd.f32 %v1933_v49, %v12300_v57 }
 0x2ca   :  { %v2246_v16 = vpack.c.bf16 %v2201_v40, %v2200_v10  ;;  %v1935_v18 = vpop.f32.mrf.mxu0  ;;  %v1710_v28 = vpop.f32.mrf.mxu1 }
 0x2cb   :  { %v2138_v14 = vmul.f32 0.01, %v1934_v15  ;;  %vm2074_vm11 = vcmp.gt.f32.partialorder %v1934_v15, 0.0 }
 0x2cc   :  { %v1936_v22 = vpop.f32.mrf.mxu0  ;;  %10672 = vmatprep.mubr.msk.bf16.mxu1 %vm2276_vm4, %v2246_v16  ;;  %v12360_v50 = vpop.f32.mrf.mxu1 }
 0x2cd   :  { %v1937_v6 = vadd.f32 %v1936_v22, %v12304_v62  ;;  %v2202_v27 = vsel %vm2074_vm11, %v1934_v15, %v2138_v14 }
 0x2ce   :  { %v1938_v25 = vpop.f32.mrf.mxu0  ;;  %v1713_v26 = vpop.f32.mrf.mxu1 }
 0x2cf   :  { %vm2075_vm12 = vcmp.gt.f32.partialorder %v1937_v6, 0.0  ;;  %v2139_v47 = vmul.f32 0.01, %v1937_v6 }
 0x2d0   :  { %v1941_v32 = vpop.f32.mrf.mxu0  ;;  %v12363_v34 = vpop.f32.mrf.mxu1 }
 0x2d1   :  { %v2203_v57 = vsel %vm2075_vm12, %v1937_v6, %v2139_v47  ;;  %v1942_v35 = vadd.f32 %v1941_v32, %v12307_v24 }
 0x2d2   :  { %v2247_v9 = vpack.c.bf16 %v2203_v57, %v2202_v27  ;;  %v1943_v39 = vpop.f32.mrf.mxu0  ;;  %v1718_v48 = vpop.f32.mrf.mxu1 }
 0x2d3   :  { %v2140_v56 = vmul.f32 0.01, %v1942_v35  ;;  %vm2076_vm13 = vcmp.gt.f32.partialorder %v1942_v35, 0.0 }
 0x2d4   :  { %v1944_v21 = vpop.f32.mrf.mxu0  ;;  %10673 = vmatmul.mubr.msk.bf16.gmra.mxu1 %vm2276_vm4, %v2247_v9  ;;  %v12367_v62 = vpop.f32.mrf.mxu1 }
 0x2d5   :  { %v1945_v44 = vadd.f32 %v1944_v21, %v12311_v20  ;;  %v2204_v30 = vsel %vm2076_vm13, %v1942_v35, %v2140_v56 }
 0x2d6   :  { %v1946_v45 = vpop.f32.mrf.mxu0  ;;  %v1721_v54 = vpop.f32.mrf.mxu1 }
 0x2d7   :  { %vm2077_vm14 = vcmp.gt.f32.partialorder %v1945_v44, 0.0  ;;  %v2141_v2 = vmul.f32 0.01, %v1945_v44 }
 0x2d8   :  { %v1949_v51 = vpop.f32.mrf.mxu0  ;;  %v12370_v52 = vpop.f32.mrf.mxu1 }
 0x2d9   :  { %v2205_v24 = vsel %vm2077_vm14, %v1945_v44, %v2141_v2  ;;  %v1950_v53 = vadd.f32 %v1949_v51, %v12314_v37 }
 0x2da   :  { %v2248_v55 = vpack.c.bf16 %v2205_v24, %v2204_v30  ;;  %v1951_v33 = vpop.f32.mrf.mxu0  ;;  %v1726_v3 = vpop.f32.mrf.mxu1 }
 0x2db   :  { %v2142_v41 = vmul.f32 0.01, %v1950_v53  ;;  %vm2078_vm15 = vcmp.gt.f32.partialorder %v1950_v53, 0.0 }
 0x2dc   :  { %v1952_v19 = vpop.f32.mrf.mxu0  ;;  %10676 = vmatprep.mubr.msk.bf16.mxu1 %vm2276_vm4, %v2248_v55  ;;  %v12374_v20 = vpop.f32.mrf.mxu1 }
 0x2dd   :  { %v1953_v61 = vadd.f32 %v1952_v19, %v12318_v42  ;;  %v2206_v38 = vsel %vm2078_vm15, %v1950_v53, %v2142_v41 }
 0x2de   :  { %v1954_v63 = vpop.f32.mrf.mxu0  ;;  %v1729_v0 = vpop.f32.mrf.mxu1 }
 0x2df   :  { %vm2079_vm0 = vcmp.gt.f32.partialorder %v1953_v61, 0.0  ;;  %v2143_v46 = vmul.f32 0.01, %v1953_v61 }
 0x2e0   :  { %v1957_v4 = vpop.f32.mrf.mxu0  ;;  %v12377_v5 = vpop.f32.mrf.mxu1 }
 0x2e1   :  { %v2207_v37 = vsel %vm2079_vm0, %v1953_v61, %v2143_v46  ;;  %v1958_v7 = vadd.f32 %v1957_v4, %v12321_v58 }
 0x2e2   :  { %v2249_v8 = vpack.c.bf16 %v2207_v37, %v2206_v38  ;;  %v1959_v10 = vpop.f32.mrf.mxu0  ;;  %v1734_v23 = vpop.f32.mrf.mxu1 }
 0x2e3   :  { %v2144_v49 = vmul.f32 0.01, %v1958_v7  ;;  %vm2080_vm1 = vcmp.gt.f32.partialorder %v1958_v7, 0.0 }
 0x2e4   :  { %v1960_v40 = vpop.f32.mrf.mxu0  ;;  %10677 = vmatmul.mubr.msk.bf16.gmra.mxu1 %vm2276_vm4, %v2249_v8  ;;  %v12381_v42 = vpop.f32.mrf.mxu1 }
 0x2e5   :  { %v1961_v15 = vadd.f32 %v1960_v40, %v12325_v59  ;;  %v2208_v28 = vsel %vm2080_vm1, %v1958_v7, %v2144_v49 }
 0x2e6   :  { %v1962_v16 = vpop.f32.mrf.mxu0  ;;  %v1737_v18 = vpop.f32.mrf.mxu1 }
 0x2e7   :  { %vm2081_vm2 = vcmp.gt.f32.partialorder %v1961_v15, 0.0  ;;  %v2145_v14 = vmul.f32 0.01, %v1961_v15 }
 0x2e8   :  { %v1965_v22 = vpop.f32.mrf.mxu0  ;;  %v12384_v6 = vpop.f32.mrf.mxu1 }
 0x2e9   :  { %v2209_v58 = vsel %vm2081_vm2, %v1961_v15, %v2145_v14  ;;  %v1966_v25 = vadd.f32 %v1965_v22, %v12328_v13 }
 0x2ea   :  { %v2250_v26 = vpack.c.bf16 %v2209_v58, %v2208_v28  ;;  %v1967_v27 = vpop.f32.mrf.mxu0  ;;  %v1742_v47 = vpop.f32.mrf.mxu1 }
 0x2eb   :  { %v2146_v32 = vmul.f32 0.01, %v1966_v25  ;;  %vm2082_vm3 = vcmp.gt.f32.partialorder %v1966_v25, 0.0 }
 0x2ec   :  { %v1968_v57 = vpop.f32.mrf.mxu0  ;;  %10680 = vmatprep.mubr.msk.bf16.mxu1 %vm2276_vm4, %v2250_v26  ;;  %v12388_v59 = vpop.f32.mrf.mxu1 }
 0x2ed   :  { %v1969_v35 = vadd.f32 %v1968_v57, %v12332_v12  ;;  %v2210_v48 = vsel %vm2082_vm3, %v1966_v25, %v2146_v32 }
 0x2ee   :  { %v1970_v9 = vpop.f32.mrf.mxu0  ;;  %v1745_v39 = vpop.f32.mrf.mxu1 }
 0x2ef   :  { %vm2083_vm5 = vcmp.gt.f32.partialorder %v1969_v35, 0.0  ;;  %v2147_v56 = vmul.f32 0.01, %v1969_v35 }
 0x2f0   :  { %v1973_v21 = vpop.f32.mrf.mxu0 }
 0x2f1   :  { %v2211_v44 = vsel %vm2083_vm5, %v1969_v35, %v2147_v56  ;;  %v1974_v13 = vadd.f32 %v1973_v21, %v12335_v36 }
 0x2f2   :  { %v2251_v45 = vpack.c.bf16 %v2211_v44, %v2210_v48  ;;  %v1975_v54 = vpop.f32.mrf.mxu0 }
 0x2f3   :  { %v2148_v30 = vmul.f32 0.01, %v1974_v13  ;;  %vm2084_vm6 = vcmp.gt.f32.partialorder %v1974_v13, 0.0 }
 0x2f4   :  { %v1976_v2 = vpop.f32.mrf.mxu0  ;;  %10681 = vmatmul.mubr.msk.bf16.gmra.mxu1 %vm2276_vm4, %v2251_v45 }
 0x2f5   :  { %v1977_v51 = vadd.f32 %v1976_v2, %v12339_v17  ;;  %v2212_v12 = vsel %vm2084_vm6, %v1974_v13, %v2148_v30 }
 0x2f6   :  { %v1978_v24 = vpop.f32.mrf.mxu0 }
 0x2f7   :  { %vm2085_vm7 = vcmp.gt.f32.partialorder %v1977_v51, 0.0  ;;  %v2149_v53 = vmul.f32 0.01, %v1977_v51 }
 0x2f8   :  { %v1981_v55 = vpop.f32.mrf.mxu0 }
 0x2f9   :  { %v2213_v33 = vsel %vm2085_vm7, %v1977_v51, %v2149_v53  ;;  %v1982_v3 = vadd.f32 %v1981_v55, %v12342_v43 }
 0x2fa   :  { %v2252_v41 = vpack.c.bf16 %v2213_v33, %v2212_v12  ;;  %v1983_v19 = vpop.f32.mrf.mxu0 }
 0x2fb   :  { %v2150_v36 = vmul.f32 0.01, %v1982_v3  ;;  %vm2086_vm8 = vcmp.gt.f32.partialorder %v1982_v3, 0.0 }
 0x2fc   :  { %v1984_v61 = vpop.f32.mrf.mxu0  ;;  %10684 = vmatprep.mubr.msk.bf16.mxu1 %vm2276_vm4, %v2252_v41 }
 0x2fd   :  { %v1985_v63 = vadd.f32 %v1984_v61, %v12346_v11  ;;  %v2214_v38 = vsel %vm2086_vm8, %v1982_v3, %v2150_v36 }
 0x2fe   :  { %v1986_v0 = vpop.f32.mrf.mxu0 }
 0x2ff   :  { %vm2087_vm9 = vcmp.gt.f32.partialorder %v1985_v63, 0.0  ;;  %v2151_v17 = vmul.f32 0.01, %v1985_v63 }
 0x300   :  { %v1989_v46 = vpop.f32.mrf.mxu0 }
 0x301   :  { %v2215_v4 = vsel %vm2087_vm9, %v1985_v63, %v2151_v17  ;;  %v1990_v37 = vadd.f32 %v1989_v46, %v12349_v60 }
 0x302   :  { %v2253_v7 = vpack.c.bf16 %v2215_v4, %v2214_v38  ;;  %v1991_v8 = vpop.f32.mrf.mxu0 }
 0x303   :  { %v2152_v43 = vmul.f32 0.01, %v1990_v37  ;;  %vm2088_vm10 = vcmp.gt.f32.partialorder %v1990_v37, 0.0 }
 0x304   :  { %v1992_v10 = vpop.f32.mrf.mxu0  ;;  %10685 = vmatmul.mubr.msk.bf16.gmra.mxu1 %vm2276_vm4, %v2253_v7  ;;  %v12401_v14 = vpop.f32.mrf.mxu1 }
 0x305   :  { %v1993_v23 = vadd.f32 %v1992_v10, %v12353_v31  ;;  %v2216_v40 = vsel %vm2088_vm10, %v1990_v37, %v2152_v43 }
 0x306   :  { %v1994_v49 = vpop.f32.mrf.mxu0  ;;  %v12405_v31 = vpop.f32.mrf.mxu1 }
 0x307   :  { %vm2089_vm11 = vcmp.gt.f32.partialorder %v1993_v23, 0.0  ;;  %v2153_v11 = vmul.f32 0.01, %v1993_v23 }
 0x308   :  { %v1997_v15 = vpop.f32.mrf.mxu0  ;;  %v12408_v35 = vpop.f32.mrf.mxu1 }
 0x309   :  { %v2217_v16 = vsel %vm2089_vm11, %v1993_v23, %v2153_v11  ;;  %v1998_v18 = vadd.f32 %v1997_v15, %v12356_v1 }
 0x30a   :  { %v2254_v28 = vpack.c.bf16 %v2217_v16, %v2216_v40  ;;  %v1999_v60 = vpop.f32.mrf.mxu0  ;;  %v12412_v21 = vpop.f32.mrf.mxu1 }
 0x30b   :  { %v2154_v22 = vmul.f32 0.01, %v1998_v18  ;;  %vm2090_vm12 = vcmp.gt.f32.partialorder %v1998_v18, 0.0 }
 0x30c   :  { %v2000_v58 = vpop.f32.mrf.mxu0  ;;  %10688 = vmatprep.mubr.msk.bf16.mxu1 %vm2276_vm4, %v2254_v28 }
 0x30d   :  { %v2001_v25 = vadd.f32 %v2000_v58, %v12360_v50  ;;  %v2218_v27 = vsel %vm2090_vm12, %v1998_v18, %v2154_v22 }
 0x30e   :  { %v2002_v26 = vpop.f32.mrf.mxu0 }
 0x30f   :  { %vm2091_vm13 = vcmp.gt.f32.partialorder %v2001_v25, 0.0  ;;  %v2155_v47 = vmul.f32 0.01, %v2001_v25 }
 0x310   :  { %v2005_v32 = vpop.f32.mrf.mxu0 }
 0x311   :  { %v2219_v57 = vsel %vm2091_vm13, %v2001_v25, %v2155_v47  ;;  %v2006_v1 = vadd.f32 %v2005_v32, %v12363_v34 }
 0x312   :  { %v2255_v9 = vpack.c.bf16 %v2219_v57, %v2218_v27  ;;  %v2007_v39 = vpop.f32.mrf.mxu0 }
 0x313   :  { %v2156_v48 = vmul.f32 0.01, %v2006_v1  ;;  %vm2092_vm14 = vcmp.gt.f32.partialorder %v2006_v1, 0.0 }
 0x314   :  { %v2008_v56 = vpop.f32.mrf.mxu0  ;;  %10689 = vmatmul.mubr.msk.bf16.gmra.mxu1 %vm2276_vm4, %v2255_v9  ;;  %v12414_v54 = vpop.f32.mrf.mxu1 }
 0x315   :  { %v2009_v50 = vadd.f32 %v2008_v56, %v12367_v62  ;;  %v2220_v13 = vsel %vm2092_vm14, %v2006_v1, %v2156_v48 }
 0x316   :  { %v2010_v44 = vpop.f32.mrf.mxu0  ;;  %v12417_v53 = vpop.f32.mrf.mxu1 }
 0x317   :  { %vm2093_vm15 = vcmp.gt.f32.partialorder %v2009_v50, 0.0  ;;  %v2157_v45 = vmul.f32 0.01, %v2009_v50  ;;  %v2663_v44 = vpack.c.bf16 %v12408_v35, %v12401_v14 }
 0x318   :  { %v2013_v34 = vpop.f32.mrf.mxu0  ;;  %v10643_v19 = vpop.f32.mrf.mxu1 }
 0x319   :  { %v2221_v30 = vsel %vm2093_vm15, %v2009_v50, %v2157_v45  ;;  %v2014_v2 = vadd.f32 %v2013_v34, %v12370_v52  ;;  %v2665_v39 = vpack.c.bf16 %v10643_v19, %v12414_v54  ;;  %v2662_v45 = vpack.c.bf16 %v12412_v21, %v12405_v31 }
 0x31a   :  { %v2256_v51 = vpack.c.bf16 %v2221_v30, %v2220_v13  ;;  %v2015_v24 = vpop.f32.mrf.mxu0  ;;  %v2426_v17 = vpop.f32.mrf.mxu1 }
 0x31b   :  { %v2158_v12 = vmul.f32 0.01, %v2014_v2  ;;  %vm2094_vm0 = vcmp.gt.f32.partialorder %v2014_v2, 0.0  ;;  %v2664_v56 = vpack.c.bf16 %v2426_v17, %v12417_v53 }
 0x31c   :  { %v2016_v55 = vpop.f32.mrf.mxu0  ;;  %10692 = vmatprep.mubr.msk.bf16.mxu1 %vm2276_vm4, %v2256_v51 }
 0x31d   :  { %v2017_v62 = vadd.f32 %v2016_v55, %v12374_v20  ;;  %v2222_v3 = vsel %vm2094_vm0, %v2014_v2, %v2158_v12 }
 0x31e   :  { %v2018_v33 = vpop.f32.mrf.mxu0 }
 0x31f   :  { %vm2095_vm1 = vcmp.gt.f32.partialorder %v2017_v62, 0.0  ;;  %v2159_v41 = vmul.f32 0.01, %v2017_v62 }
 0x320   :  { %v2021_v36 = vpop.f32.mrf.mxu0 }
 0x321   :  { %v2223_v61 = vsel %vm2095_vm1, %v2017_v62, %v2159_v41  ;;  %v2022_v52 = vadd.f32 %v2021_v36, %v12377_v5 }
 0x322   :  { %v2257_v63 = vpack.c.bf16 %v2223_v61, %v2222_v3  ;;  %v2023_v0 = vpop.f32.mrf.mxu0 }
 0x323   :  { %v2160_v38 = vmul.f32 0.01, %v2022_v52  ;;  %vm2096_vm2 = vcmp.gt.f32.partialorder %v2022_v52, 0.0 }
 0x324   :  { %v2024_v46 = vpop.f32.mrf.mxu0  ;;  %10693 = vmatmul.mubr.msk.bf16.gmra.mxu1 %vm2276_vm4, %v2257_v63  ;;  %v10646_v20 = vpop.f32.mrf.mxu1 }
 0x325   :  { %v2025_v4 = vadd.f32 %v2024_v46, %v12381_v42  ;;  %v2224_v7 = vsel %vm2096_vm2, %v2022_v52, %v2160_v38 }
 0x326   :  { %v2026_v37 = vpop.f32.mrf.mxu0  ;;  %v2439_v49 = vpop.f32.mrf.mxu1 }
 0x327   :  { %vm2097_vm3 = vcmp.gt.f32.partialorder %v2025_v4, 0.0  ;;  %v2161_v8 = vmul.f32 0.01, %v2025_v4 }
 0x328   :  { %v2029_v43 = vpop.f32.mrf.mxu0  ;;  %v10647_v42 = vpop.f32.mrf.mxu1 }
 0x329   :  { %v2225_v10 = vsel %vm2097_vm3, %v2025_v4, %v2161_v8  ;;  %v2030_v23 = vadd.f32 %v2029_v43, %v12384_v6  ;;  %v11522_v6 = vld [vmem:[#allocation2 + $0x6c] ss:$16 sps:$4 sm:$0xff]   ;;  %v2667_v1 = vpack.c.bf16 %v10647_v42, %v10646_v20  ;;  %v11523_v4 = vld [vmem:[#allocation2] ss:$16 sps:$4 sm:$0xff]   ;;  %v11524_v20 = vld [vmem:[#allocation2 + $0x24] ss:$16 sps:$4 sm:$0xff]  }
 0x32a   :  { %v2258_v5 = vpack.c.bf16 %v2225_v10, %v2224_v7  ;;  %v2031_v40 = vpop.f32.mrf.mxu0  ;;  %v2442_v58 = vpop.f32.mrf.mxu1  ;;  %v11525_v8 = vld [vmem:[#allocation2 + $0x20] ss:$16 sps:$4 sm:$0xff]   ;;  %v11526_v43 = vld [vmem:[#allocation2 + $0x44] ss:$16 sps:$4 sm:$0xff]  }
 0x32b   :  { %v2162_v11 = vmul.f32 0.01, %v2030_v23  ;;  %vm2098_vm5 = vcmp.gt.f32.partialorder %v2030_v23, 0.0  ;;  %v2666_v9 = vpack.c.bf16 %v2442_v58, %v2439_v49  ;;  %v11527_v49 = vld [vmem:[#allocation2 + $0x40] ss:$16 sps:$4 sm:$0xff]  }
 0x32c   :  { %v2032_v15 = vpop.f32.mrf.mxu0  ;;  %10696 = vmatprep.mubr.msk.bf16.mxu1 %vm2276_vm4, %v2258_v5  ;;  %v11528_v40 = vld [vmem:[#allocation2 + $0x64] ss:$16 sps:$4 sm:$0xff]  }
 0x32d   :  { %v2033_v16 = vadd.f32 %v2032_v15, %v12388_v59  ;;  %v2226_v28 = vsel %vm2098_vm5, %v2030_v23, %v2162_v11  ;;  %v11530_v42 = vld [vmem:[#allocation2 + $0x84] ss:$16 sps:$4 sm:$0xff]  }
 0x32e   :  { %v2034_v18 = vpop.f32.mrf.mxu0 }
 0x32f   :  { %vm2099_vm6 = vcmp.gt.f32.partialorder %v2033_v16, 0.0  ;;  %v2163_v60 = vmul.f32 0.01, %v2033_v16 }
 0x331   :  { %v2227_v22 = vsel %vm2099_vm6, %v2033_v16, %v2163_v60  ;;  %v11529_v16 = vld [vmem:[#allocation2 + $0x60] ss:$16 sps:$4 sm:$0xff]  }
 0x332   :  { %v2259_v25 = vpack.c.bf16 %v2227_v22, %v2226_v28 }
 0x334   :  { %v10650_v26 = vpop.f32.mrf.mxu1  ;;  %10697 = vmatmul.mubr.msk.bf16.gmra.mxu1 %vm2276_vm4, %v2259_v25  ;;  %v11531_v25 = vld [vmem:[#allocation2 + $0x80] ss:$16 sps:$4 sm:$0xff]  }
 0x335   :  { %3039 = vmatprep.mubr.bf16.mxu1 %v11522_v6  ;;  %v11532_v6 = vld [vmem:[#allocation2 + $0xa4] ss:$16 sps:$4 sm:$0xff]  }
 0x336   :  { %v2455_v27 = vpop.f32.mrf.mxu1 }
 0x338   :  { %v10651_v47 = vpop.f32.mrf.mxu1 }
 0x339   :  { %v2669_v32 = vpack.c.bf16 %v10651_v47, %v10650_v26  ;;  %v11533_v47 = vld [vmem:[#allocation2 + $0xa0] ss:$16 sps:$4 sm:$0xff]  }
 0x33a   :  { %v2458_v57 = vpop.f32.mrf.mxu1 }
 0x33b   :  { %2695 = vmatpush1.bf16.msra.mxu0 %v2669_v32  ;;  %v2668_v59 = vpack.c.bf16 %v2458_v57, %v2455_v27  ;;  %v11534_v57 = vld [vmem:[#allocation2 + $0xc4] ss:$16 sps:$4 sm:$0xff]  }
 0x33c   :  { %2696 = vmatprep.subr.bf16.mxu0 %v15409_v29 }
 0x33f   :  { %2697 = vmatpush1.bf16.msra.mxu0 %v2668_v59 }
 0x340   :  { %2698 = vmatprep.subr.bf16.mxu0 %v15409_v29 }
 0x343   :  { %2699 = vmatpush1.bf16.msra.mxu0 %v2667_v1 }
 0x344   :  { %2700 = vmatprep.subr.bf16.mxu0 %v15409_v29  ;;  %v10654_v48 = vpop.f32.mrf.mxu1 }
 0x346   :  { %v2471_v50 = vpop.f32.mrf.mxu1 }
 0x347   :  { %2701 = vmatpush1.bf16.msra.mxu0 %v2666_v9  ;;  %v11535_v9 = vld [vmem:[#allocation2 + $0xc0] ss:$16 sps:$4 sm:$0xff]  }
 0x348   :  { %2702 = vmatprep.subr.bf16.mxu0 %v15409_v29  ;;  %v10655_v13 = vpop.f32.mrf.mxu1 }
 0x349   :  { %v2671_v63 = vpack.c.bf16 %v10655_v13, %v10654_v48  ;;  %v11536_v48 = vld [vmem:[#allocation2 + $0xe4] ss:$16 sps:$4 sm:$0xff]   ;;  %v11537_v13 = vld [vmem:[#allocation2 + $0xe0] ss:$16 sps:$4 sm:$0xff]  }
 0x34a   :  { %v2474_v54 = vpop.f32.mrf.mxu1 }
 0x34b   :  { %2703 = vmatpush1.bf16.msra.mxu0 %v2665_v39  ;;  %v2670_v38 = vpack.c.bf16 %v2474_v54, %v2471_v50  ;;  %v11538_v54 = vld [vmem:[#allocation2 + $0x104] ss:$16 sps:$4 sm:$0xff]  }
 0x34c   :  { %2704 = vmatprep.subr.bf16.mxu0 %v15409_v29 }
 0x34f   :  { %2705 = vmatpush1.bf16.msra.mxu0 %v2664_v56 }
 0x350   :  { %2706 = vmatprep.subr.bf16.mxu0 %v15409_v29 }
 0x353   :  { %2707 = vmatpush1.bf16.msra.mxu0 %v2663_v44 }
 0x354   :  { %2708 = vmatprep.subr.bf16.mxu0 %v15409_v29  ;;  %v10658_v34 = vpop.f32.mrf.mxu1 }
 0x356   :  { %v2487_v30 = vpop.f32.mrf.mxu1 }
 0x357   :  { %2709 = vmatpush1.bf16.msra.mxu0 %v2662_v45 }
 0x358   :  { %2710 = vmatprep.subr.bf16.mxu0 %v15409_v29  ;;  %v10659_v2 = vpop.f32.mrf.mxu1 }
 0x359   :  { %v2673_v19 = vpack.c.bf16 %v10659_v2, %v10658_v34  ;;  %v11539_v2 = vld [vmem:[#allocation2 + $0x100] ss:$16 sps:$4 sm:$0xff]  }
 0x35a   :  { %v2490_v51 = vpop.f32.mrf.mxu1 }
 0x35b   :  { %v2672_v61 = vpack.c.bf16 %v2490_v51, %v2487_v30  ;;  %v11540_v51 = vld [vmem:[#allocation2 + $0x124] ss:$16 sps:$4 sm:$0xff]  }
 0x364   :  { %v10662_v24 = vpop.f32.mrf.mxu1 }
 0x366   :  { %v2503_v12 = vpop.f32.mrf.mxu1 }
 0x368   :  { %v10663_v53 = vpop.f32.mrf.mxu1 }
 0x369   :  { %v2675_v21 = vpack.c.bf16 %v10663_v53, %v10662_v24  ;;  %v11541_v53 = vld [vmem:[#allocation2 + $0x120] ss:$16 sps:$4 sm:$0xff]  }
 0x36a   :  { %v2506_v55 = vpop.f32.mrf.mxu1 }
 0x36b   :  { %v2674_v41 = vpack.c.bf16 %v2506_v55, %v2503_v12  ;;  %v11542_v55 = vld [vmem:[#allocation2 + $0x144] ss:$16 sps:$4 sm:$0xff]  }
 0x374   :  { %v10666_v14 = vpop.f32.mrf.mxu1 }
 0x376   :  { %v2519_v35 = vpop.f32.mrf.mxu1 }
 0x378   :  { %v10667_v62 = vpop.f32.mrf.mxu1 }
 0x379   :  { %v2677_v33 = vpack.c.bf16 %v10667_v62, %v10666_v14 }
 0x37a   :  { %v2522_v3 = vpop.f32.mrf.mxu1 }
 0x37b   :  { %2711 = vmatpush2.bf16.msra.mxu0 %v2677_v33  ;;  %v2676_v31 = vpack.c.bf16 %v2522_v3, %v2519_v35  ;;  %v11543_v33 = vld [vmem:[#allocation2 + $0x140] ss:$16 sps:$4 sm:$0xff]   ;;  %v11544_v3 = vld [vmem:[#allocation2 + $0x164] ss:$16 sps:$4 sm:$0xff]  }
 0x37c   :  { %2712 = vmatprep.subr.bf16.mxu0 %v15409_v29 }
 0x37f   :  { %2713 = vmatpush2.bf16.msra.mxu0 %v2676_v31 }
 0x380   :  { %2714 = vmatprep.subr.bf16.mxu0 %v15409_v29 }
 0x383   :  { %2715 = vmatpush2.bf16.msra.mxu0 %v2675_v21 }
 0x384   :  { %2716 = vmatprep.subr.bf16.mxu0 %v15409_v29  ;;  %v12446_v36 = vpop.f32.mrf.mxu1 }
 0x386   :  { %v12449_v52 = vpop.f32.mrf.mxu1 }
 0x387   :  { %2717 = vmatpush2.bf16.msra.mxu0 %v2674_v41  ;;  %v11545_v41 = vld [vmem:[#allocation2 + $0x160] ss:$16 sps:$4 sm:$0xff]  }
 0x388   :  { %2718 = vmatprep.subr.bf16.mxu0 %v15409_v29  ;;  %v12452_v0 = vpop.f32.mrf.mxu1 }
 0x389   :  { %v2679_v50 = vpack.c.bf16 %v12452_v0, %v12446_v36 }
 0x38a   :  { %v12455_v17 = vpop.f32.mrf.mxu1 }
 0x38b   :  { %2719 = vmatpush2.bf16.msra.mxu0 %v2673_v19  ;;  %v2678_v45 = vpack.c.bf16 %v12455_v17, %v12449_v52  ;;  %v11546_v19 = vld [vmem:[#allocation2 + $0x184] ss:$16 sps:$4 sm:$0xff]  }
 0x38c   :  { %2720 = vmatprep.subr.bf16.mxu0 %v15409_v29 }
 0x38f   :  { %2721 = vmatpush2.bf16.msra.mxu0 %v2672_v61 }
 0x390   :  { %2722 = vmatprep.subr.bf16.mxu0 %v15409_v29 }
 0x393   :  { %2723 = vmatpush2.bf16.msra.mxu0 %v2671_v63 }
 0x394   :  { %2724 = vmatprep.subr.bf16.mxu0 %v15409_v29  ;;  %v10674_v46 = vpop.f32.mrf.mxu1 }
 0x396   :  { %v2551_v37 = vpop.f32.mrf.mxu1 }
 0x397   :  { %2725 = vmatpush2.bf16.msra.mxu0 %v2670_v38  ;;  %v11547_v38 = vld [vmem:[#allocation2 + $0x180] ss:$16 sps:$4 sm:$0xff]  }
 0x398   :  { %2983 = vmatprep.subr.bf16.mxu0 %v15409_v29  ;;  %v10675_v7 = vpop.f32.mrf.mxu1 }
 0x399   :  { %v2681_v59 = vpack.c.bf16 %v10675_v7, %v10674_v46  ;;  %v11548_v46 = vld [vmem:[#allocation2 + $0x1a4] ss:$16 sps:$4 sm:$0xff]  }
 0x39a   :  { %2727 = vmatmul.mubr.bf16.vlgmr.msra.gmra.mxu0 %v11523_v4  ;;  %v2554_v10 = vpop.f32.mrf.mxu1  ;;  %v11550_v7 = vld [vmem:[#allocation2 + $0x1c4] ss:$16 sps:$4 sm:$0xff]  }
 0x39b   :  { %2734 = vmatprep.mubr.bf16.mxu0 %v11524_v20  ;;  %v2680_v39 = vpack.c.bf16 %v2554_v10, %v2551_v37  ;;  %v11549_v20 = vld [vmem:[#allocation2 + $0x1a0] ss:$16 sps:$4 sm:$0xff]  }
 0x3a2   :  { %2735 = vmatmul.mubr.bf16.gmra.mxu0 %v11525_v8 }
 0x3a3   :  { %2742 = vmatprep.mubr.bf16.mxu0 %v11526_v43  ;;  %v11551_v43 = vld [vmem:[#allocation2 + $0x1c0] ss:$16 sps:$4 sm:$0xff]  }
 0x3a4   :  { %v10678_v23 = vpop.f32.mrf.mxu1 }
 0x3a6   :  { %v2567_v5 = vpop.f32.mrf.mxu1 }
 0x3a8   :  { %v10679_v11 = vpop.f32.mrf.mxu1 }
 0x3a9   :  { %v2683_v27 = vpack.c.bf16 %v10679_v11, %v10678_v23  ;;  %v11552_v23 = vld [vmem:[#allocation2 + $0x1e4] ss:$16 sps:$4 sm:$0xff]  }
 0x3aa   :  { %2743 = vmatmul.mubr.bf16.gmra.mxu0 %v11527_v49  ;;  %v2570_v15 = vpop.f32.mrf.mxu1  ;;  %v11553_v49 = vld [vmem:[#allocation2 + $0x1e0] ss:$16 sps:$4 sm:$0xff]   ;;  %v11554_v11 = vld [vmem:[#allocation2 + $0x204] ss:$16 sps:$4 sm:$0xff]  }
 0x3ab   :  { %2750 = vmatprep.mubr.bf16.mxu0 %v11528_v40  ;;  %v2682_v32 = vpack.c.bf16 %v2570_v15, %v2567_v5  ;;  %v11555_v15 = vld [vmem:[#allocation2 + $0x200] ss:$16 sps:$4 sm:$0xff]  }
 0x3b2   :  { %2751 = vmatmul.mubr.bf16.gmra.mxu0 %v11529_v16  ;;  %v11556_v16 = vld [vmem:[#allocation2 + $0x68] ss:$16 sps:$4 sm:$0xff]  }
 0x3b3   :  { %2758 = vmatprep.mubr.bf16.mxu0 %v11530_v42  ;;  %v11557_v42 = vld [vmem:[#allocation2 + $0x224] ss:$16 sps:$4 sm:$0xff]  }
 0x3b4   :  { %v10682_v18 = vpop.f32.mrf.mxu1 }
 0x3b6   :  { %v2583_v28 = vpop.f32.mrf.mxu1 }
 0x3b8   :  { %v10683_v60 = vpop.f32.mrf.mxu1 }
 0x3b9   :  { %v2685_v22 = vpack.c.bf16 %v10683_v60, %v10682_v18  ;;  %v11558_v18 = vld [vmem:[#allocation2 + $0x8c] ss:$16 sps:$4 sm:$0xff]   ;;  %v11560_v60 = vld [vmem:[#allocation2 + $0x88] ss:$16 sps:$4 sm:$0xff]  }
 0x3ba   :  { %v2586_v58 = vpop.f32.mrf.mxu1  ;;  %2759 = vmatmul.mubr.bf16.gmra.mxu0 %v11531_v25  ;;  %v11563_v25 = vld [vmem:[#allocation2 + $0x240] ss:$16 sps:$4 sm:$0xff]  }
 0x3bb   :  { %2984 = vmatpush1.bf16.msra.mxu0 %v2685_v22  ;;  %11124 = vmatpush1.bf16.msra.mxu1 %v2685_v22  ;;  %v2684_v26 = vpack.c.bf16 %v2586_v58, %v2583_v28  ;;  %v11559_v28 = vld [vmem:[#allocation2 + $0x220] ss:$16 sps:$4 sm:$0xff]   ;;  %v11561_v22 = vld [vmem:[#allocation2 + $0x244] ss:$16 sps:$4 sm:$0xff]   ;;  %v11562_v58 = vld [vmem:[#allocation2 + $0xac] ss:$16 sps:$4 sm:$0xff]  }
 0x3bc   :  { %2985 = vmatprep.subr.bf16.mxu0 %v15409_v29  ;;  %11109 = vmatprep.subr.bf16.mxu1 %v15409_v29 }
 0x3bd   :  { %2766 = vmatprep.mubr.bf16.mxu0 %v11532_v6  ;;  %v11565_v6 = vld [vmem:[#allocation2 + $0x264] ss:$16 sps:$4 sm:$0xff]  }
 0x3bf   :  { %2986 = vmatpush1.bf16.msra.mxu0 %v2684_v26  ;;  %11125 = vmatpush1.bf16.msra.mxu1 %v2684_v26  ;;  %v11564_v26 = vld [vmem:[#allocation2 + $0xa8] ss:$16 sps:$4 sm:$0xff]  }
 0x3c0   :  { %2987 = vmatprep.subr.bf16.mxu0 %v15409_v29  ;;  %11110 = vmatprep.subr.bf16.mxu1 %v15409_v29 }
 0x3c2   :  { %2767 = vmatmul.mubr.bf16.gmra.mxu0 %v11533_v47  ;;  %v11567_v47 = vld [vmem:[#allocation2 + $0x260] ss:$16 sps:$4 sm:$0xff]  }
 0x3c3   :  { %2988 = vmatpush1.bf16.msra.mxu0 %v2683_v27  ;;  %11126 = vmatpush1.bf16.msra.mxu1 %v2683_v27  ;;  %v11566_v27 = vld [vmem:[#allocation2 + $0xcc] ss:$16 sps:$4 sm:$0xff]  }
 0x3c4   :  { %2989 = vmatprep.subr.bf16.mxu0 %v15409_v29  ;;  %11111 = vmatprep.subr.bf16.mxu1 %v15409_v29  ;;  %v12466_v1 = vpop.f32.mrf.mxu1 }
 0x3c5   :  { %2774 = vmatprep.mubr.bf16.mxu0 %v11534_v57  ;;  %v11569_v57 = vld [vmem:[#allocation2 + $0x284] ss:$16 sps:$4 sm:$0xff]  }
 0x3c6   :  { %v12470_v56 = vpop.f32.mrf.mxu1 }
 0x3c7   :  { %2990 = vmatpush1.bf16.msra.mxu0 %v2682_v32  ;;  %11127 = vmatpush1.bf16.msra.mxu1 %v2682_v32  ;;  %v11568_v32 = vld [vmem:[#allocation2 + $0xc8] ss:$16 sps:$4 sm:$0xff]  }
 0x3c8   :  { %2991 = vmatprep.subr.bf16.mxu0 %v15409_v29  ;;  %11112 = vmatprep.subr.bf16.mxu1 %v15409_v29  ;;  %v12476_v44 = vpop.f32.mrf.mxu1 }
 0x3c9   :  { %v2687_v5 = vpack.c.bf16 %v12476_v44, %v12466_v1  ;;  %v11571_v1 = vld [vmem:[#allocation2 + $0x280] ss:$16 sps:$4 sm:$0xff]   ;;  %v11577_v44 = vld [vmem:[#allocation2 + $0x2c4] ss:$16 sps:$4 sm:$0xff]  }
 0x3ca   :  { %2775 = vmatmul.mubr.bf16.gmra.mxu0 %v11535_v9  ;;  %v12482_v34 = vpop.f32.mrf.mxu1  ;;  %v11572_v9 = vld [vmem:[#allocation2 + $0xe8] ss:$16 sps:$4 sm:$0xff]  }
 0x3cb   :  { %2992 = vmatpush1.bf16.msra.mxu0 %v2681_v59  ;;  %11128 = vmatpush1.bf16.msra.mxu1 %v2681_v59  ;;  %v2686_v40 = vpack.c.bf16 %v12482_v34, %v12470_v56  ;;  %v11570_v59 = vld [vmem:[#allocation2 + $0xec] ss:$16 sps:$4 sm:$0xff]   ;;  %v11575_v56 = vld [vmem:[#allocation2 + $0x2a0] ss:$16 sps:$4 sm:$0xff]   ;;  %v11581_v34 = vld [vmem:[#allocation2 + $0x2e4] ss:$16 sps:$4 sm:$0xff]  }
 0x3cc   :  { %2993 = vmatprep.subr.bf16.mxu0 %v15409_v29  ;;  %11113 = vmatprep.subr.bf16.mxu1 %v15409_v29 }
 0x3cd   :  { %2782 = vmatprep.mubr.bf16.mxu0 %v11536_v48  ;;  %v11574_v48 = vld [vmem:[#allocation2 + $0x10c] ss:$16 sps:$4 sm:$0xff]  }
 0x3cf   :  { %2994 = vmatpush1.bf16.msra.mxu0 %v2680_v39  ;;  %11129 = vmatpush1.bf16.msra.mxu1 %v2680_v39  ;;  %v11573_v39 = vld [vmem:[#allocation2 + $0x2a4] ss:$16 sps:$4 sm:$0xff]  }
 0x3d0   :  { %2995 = vmatprep.subr.bf16.mxu0 %v15409_v29  ;;  %11114 = vmatprep.subr.bf16.mxu1 %v15409_v29 }
 0x3d2   :  { %2783 = vmatmul.mubr.bf16.gmra.mxu0 %v11537_v13  ;;  %v11578_v13 = vld [vmem:[#allocation2 + $0x12c] ss:$16 sps:$4 sm:$0xff]  }
 0x3d3   :  { %2996 = vmatpush1.bf16.msra.mxu0 %v2679_v50  ;;  %11130 = vmatpush1.bf16.msra.mxu1 %v2679_v50  ;;  %v11576_v50 = vld [vmem:[#allocation2 + $0x108] ss:$16 sps:$4 sm:$0xff]  }
 0x3d4   :  { %2997 = vmatprep.subr.bf16.mxu0 %v15409_v29  ;;  %11115 = vmatprep.subr.bf16.mxu1 %v15409_v29  ;;  %v10690_v30 = vpop.f32.mrf.mxu1 }
 0x3d5   :  { %2790 = vmatprep.mubr.bf16.mxu0 %v11538_v54  ;;  %v11580_v54 = vld [vmem:[#allocation2 + $0x128] ss:$16 sps:$4 sm:$0xff]  }
 0x3d6   :  { %v2615_v24 = vpop.f32.mrf.mxu1 }
 0x3d7   :  { %2998 = vmatpush1.bf16.msra.mxu0 %v2678_v45  ;;  %11131 = vmatpush1.bf16.msra.mxu1 %v2678_v45  ;;  %v11579_v45 = vld [vmem:[#allocation2 + $0x2c0] ss:$16 sps:$4 sm:$0xff]  }
 0x3d8   :  { %2999 = vmatprep.subr.bf16.mxu0 %v15409_v29  ;;  %11116 = vmatprep.subr.bf16.mxu1 %v15409_v29  ;;  %v10691_v12 = vpop.f32.mrf.mxu1 }
 0x3d9   :  { %v2689_v8 = vpack.c.bf16 %v10691_v12, %v10690_v30  ;;  %v11582_v30 = vld [vmem:[#allocation2 + $0x14c] ss:$16 sps:$4 sm:$0xff]  }
 0x3da   :  { %2791 = vmatmul.mubr.bf16.gmra.mxu0 %v11539_v2  ;;  %v2618_v14 = vpop.f32.mrf.mxu1  ;;  %v11583_v2 = vld [vmem:[#allocation2 + $0x2e0] ss:$16 sps:$4 sm:$0xff]   ;;  %v11586_v12 = vld [vmem:[#allocation2 + $0x16c] ss:$16 sps:$4 sm:$0xff]  }
 0x3db   :  { %2798 = vmatprep.mubr.bf16.mxu0 %v11540_v51  ;;  %v2688_v10 = vpack.c.bf16 %v2618_v14, %v2615_v24  ;;  %v11584_v51 = vld [vmem:[#allocation2 + $0x148] ss:$16 sps:$4 sm:$0xff]   ;;  %v11585_v24 = vld [vmem:[#allocation2 + $0x304] ss:$16 sps:$4 sm:$0xff]  }
 0x3dc   :  { %v11588_v14 = vld [vmem:[#allocation2 + $0x168] ss:$16 sps:$4 sm:$0xff]  }
 0x3e2   :  { %2799 = vmatmul.mubr.bf16.gmra.mxu0 %v11541_v53 }
 0x3e3   :  { %2806 = vmatprep.mubr.bf16.mxu0 %v11542_v55  ;;  %v11587_v55 = vld [vmem:[#allocation2 + $0x300] ss:$16 sps:$4 sm:$0xff]  }
 0x3e4   :  { %v10694_v35 = vpop.f32.mrf.mxu1 }
 0x3e6   :  { %v2631_v62 = vpop.f32.mrf.mxu1 }
 0x3e8   :  { %v10695_v31 = vpop.f32.mrf.mxu1 }
 0x3e9   :  { %v2691_v4 = vpack.c.bf16 %v10695_v31, %v10694_v35  ;;  %v11589_v35 = vld [vmem:[#allocation2 + $0x324] ss:$16 sps:$4 sm:$0xff]  }
 0x3ea   :  { %2807 = vmatmul.mubr.bf16.gmra.mxu0 %v11543_v33  ;;  %v2634_v21 = vpop.f32.mrf.mxu1 }
 0x3eb   :  { %2814 = vmatprep.mubr.bf16.mxu0 %v11544_v3  ;;  %v2690_v37 = vpack.c.bf16 %v2634_v21, %v2631_v62  ;;  %v11590_v62 = vld [vmem:[#allocation2 + $0x18c] ss:$16 sps:$4 sm:$0xff]  }
 0x3f2   :  { %2815 = vmatmul.mubr.bf16.gmra.mxu0 %v11545_v41  ;;  %v11591_v41 = vld [vmem:[#allocation2 + $0x320] ss:$16 sps:$4 sm:$0xff]  }
 0x3f3   :  { %2822 = vmatprep.mubr.bf16.mxu0 %v11546_v19  ;;  %v11592_v19 = vld [vmem:[#allocation2 + $0x188] ss:$16 sps:$4 sm:$0xff]  }
 0x3f4   :  { %v10698_v36 = vpop.f32.mrf.mxu1 }
 0x3f6   :  { %v2647_v61 = vpop.f32.mrf.mxu1 }
 0x3f8   :  { %v10699_v52 = vpop.f32.mrf.mxu1 }
 0x3f9   :  { %v2693_v63 = vpack.c.bf16 %v10699_v52, %v10698_v36  ;;  %v11593_v36 = vld [vmem:[#allocation2 + $0x344] ss:$16 sps:$4 sm:$0xff]  }
 0x3fa   :  { %v2650_v0 = vpop.f32.mrf.mxu1  ;;  %2823 = vmatmul.mubr.bf16.gmra.mxu0 %v11547_v38 }
 0x3fb   :  { %3000 = vmatpush2.bf16.msra.mxu0 %v2693_v63  ;;  %11132 = vmatpush2.bf16.msra.mxu1 %v2693_v63  ;;  %v2692_v17 = vpack.c.bf16 %v2650_v0, %v2647_v61  ;;  %v11594_v61 = vld [vmem:[#allocation2 + $0x1ac] ss:$16 sps:$4 sm:$0xff]  }
 0x3fc   :  { %3001 = vmatprep.subr.bf16.mxu0 %v15409_v29  ;;  %11117 = vmatprep.subr.bf16.mxu1 %v15409_v29 }
 0x3fd   :  { %2830 = vmatprep.mubr.bf16.mxu0 %v11548_v46  ;;  %v11596_v46 = vld [vmem:[#allocation2 + $0x1a8] ss:$16 sps:$4 sm:$0xff]  }
 0x3ff   :  { %3002 = vmatpush2.bf16.msra.mxu0 %v2692_v17  ;;  %11133 = vmatpush2.bf16.msra.mxu1 %v2692_v17  ;;  %v11595_v17 = vld [vmem:[#allocation2 + $0x340] ss:$16 sps:$4 sm:$0xff]  }
 0x400   :  { %3003 = vmatprep.subr.bf16.mxu0 %v15409_v29  ;;  %11118 = vmatprep.subr.bf16.mxu1 %v15409_v29 }
 0x402   :  { %2831 = vmatmul.mubr.bf16.gmra.mxu0 %v11549_v20  ;;  %v11598_v20 = vld [vmem:[#allocation2 + $0x1cc] ss:$16 sps:$4 sm:$0xff]  }
 0x403   :  { %3004 = vmatpush2.bf16.msra.mxu0 %v2691_v4  ;;  %11134 = vmatpush2.bf16.msra.mxu1 %v2691_v4  ;;  %v11597_v4 = vld [vmem:[#allocation2 + $0x364] ss:$16 sps:$4 sm:$0xff]  }
 0x404   :  { %3005 = vmatprep.subr.bf16.mxu0 %v15409_v29  ;;  %11119 = vmatprep.subr.bf16.mxu1 %v15409_v29 }
 0x405   :  { %2838 = vmatprep.mubr.bf16.mxu0 %v11550_v7 }
 0x407   :  { %3006 = vmatpush2.bf16.msra.mxu0 %v2690_v37  ;;  %11135 = vmatpush2.bf16.msra.mxu1 %v2690_v37 }
 0x408   :  { %3007 = vmatprep.subr.bf16.mxu0 %v15409_v29  ;;  %11120 = vmatprep.subr.bf16.mxu1 %v15409_v29 }
 0x40a   :  { %2839 = vmatmul.mubr.bf16.gmra.mxu0 %v11551_v43 }
 0x40b   :  { %3008 = vmatpush2.bf16.msra.mxu0 %v2689_v8  ;;  %11136 = vmatpush2.bf16.msra.mxu1 %v2689_v8 }
 0x40c   :  { %3009 = vmatprep.subr.bf16.mxu0 %v15409_v29  ;;  %11121 = vmatprep.subr.bf16.mxu1 %v15409_v29 }
 0x40d   :  { %2846 = vmatprep.mubr.bf16.mxu0 %v11552_v23  ;;  %v11600_v23 = vld [vmem:[#allocation2 + $0x1c8] ss:$16 sps:$4 sm:$0xff]  }
 0x40f   :  { %3010 = vmatpush2.bf16.msra.mxu0 %v2688_v10  ;;  %11137 = vmatpush2.bf16.msra.mxu1 %v2688_v10  ;;  %v11599_v10 = vld [vmem:[#allocation2 + $0x360] ss:$16 sps:$4 sm:$0xff]  }
 0x410   :  { %3011 = vmatprep.subr.bf16.mxu0 %v15409_v29  ;;  %11122 = vmatprep.subr.bf16.mxu1 %v15409_v29 }
 0x412   :  { %2847 = vmatmul.mubr.bf16.gmra.mxu0 %v11553_v49  ;;  %v11602_v49 = vld [vmem:[#allocation2 + $0x1ec] ss:$16 sps:$4 sm:$0xff]  }
 0x413   :  { %3012 = vmatpush2.bf16.msra.mxu0 %v2687_v5  ;;  %11138 = vmatpush2.bf16.msra.mxu1 %v2687_v5  ;;  %v11601_v5 = vld [vmem:[#allocation2 + $0x384] ss:$16 sps:$4 sm:$0xff]  }
 0x414   :  { %3013 = vmatprep.subr.bf16.mxu0 %v15409_v29  ;;  %11123 = vmatprep.subr.bf16.mxu1 %v15409_v29 }
 0x415   :  { %2854 = vmatprep.mubr.bf16.mxu0 %v11554_v11 }
 0x417   :  { %3014 = vmatpush2.bf16.msra.mxu0 %v2686_v40  ;;  %11139 = vmatpush2.bf16.msra.mxu1 %v2686_v40 }
 0x418   :  { %3930 = vmatprep.subr.bf16.mxu1 %v15409_v29 }
 0x41a   :  { %2855 = vmatmul.mubr.bf16.gmra.mxu0 %v11555_v15  ;;  %3040 = vmatmul.mubr.bf16.vlgmr.msra.gmra.mxu1 %v11556_v16 }
 0x41b   :  { %2862 = vmatprep.mubr.bf16.mxu0 %v11557_v42  ;;  %3047 = vmatprep.mubr.bf16.mxu1 %v11558_v18  ;;  %v11603_v42 = vld [vmem:[#allocation2 + $0x380] ss:$16 sps:$4 sm:$0xff]   ;;  %v11604_v18 = vld [vmem:[#allocation2 + $0x1e8] ss:$16 sps:$4 sm:$0xff]  }
 0x422   :  { %2863 = vmatmul.mubr.bf16.gmra.mxu0 %v11559_v28  ;;  %3048 = vmatmul.mubr.bf16.gmra.mxu1 %v11560_v60  ;;  %v11605_v28 = vld [vmem:[#allocation2 + $0x3a4] ss:$16 sps:$4 sm:$0xff]   ;;  %v11606_v60 = vld [vmem:[#allocation2 + $0x20c] ss:$16 sps:$4 sm:$0xff]  }
 0x423   :  { %2870 = vmatprep.mubr.bf16.mxu0 %v11561_v22  ;;  %3055 = vmatprep.mubr.bf16.mxu1 %v11562_v58 }
 0x42a   :  { %2871 = vmatmul.mubr.bf16.gmra.mxu0 %v11563_v25  ;;  %3056 = vmatmul.mubr.bf16.gmra.mxu1 %v11564_v26 }
 0x42b   :  { %2878 = vmatprep.mubr.bf16.mxu0 %v11565_v6  ;;  %3063 = vmatprep.mubr.bf16.mxu1 %v11566_v27  ;;  %v11607_v6 = vld [vmem:[#allocation2 + $0x3a0] ss:$16 sps:$4 sm:$0xff]   ;;  %v11608_v27 = vld [vmem:[#allocation2 + $0x208] ss:$16 sps:$4 sm:$0xff]  }
 0x432   :  { %2879 = vmatmul.mubr.bf16.gmra.mxu0 %v11567_v47  ;;  %3064 = vmatmul.mubr.bf16.gmra.mxu1 %v11568_v32  ;;  %v11609_v47 = vld [vmem:[#allocation2 + $0x3c4] ss:$16 sps:$4 sm:$0xff]   ;;  %v11610_v32 = vld [vmem:[#allocation2 + $0x22c] ss:$16 sps:$4 sm:$0xff]  }
 0x433   :  { %2886 = vmatprep.mubr.bf16.mxu0 %v11569_v57  ;;  %3071 = vmatprep.mubr.bf16.mxu1 %v11570_v59 }
 0x43a   :  { %2887 = vmatmul.mubr.bf16.gmra.mxu0 %v11571_v1  ;;  %3072 = vmatmul.mubr.bf16.gmra.mxu1 %v11572_v9 }
 0x43b   :  { %2894 = vmatprep.mubr.bf16.mxu0 %v11573_v39  ;;  %3079 = vmatprep.mubr.bf16.mxu1 %v11574_v48  ;;  %v11611_v39 = vld [vmem:[#allocation2 + $0x3c0] ss:$16 sps:$4 sm:$0xff]   ;;  %v11612_v48 = vld [vmem:[#allocation2 + $0x228] ss:$16 sps:$4 sm:$0xff]  }
 0x442   :  { %2895 = vmatmul.mubr.bf16.gmra.mxu0 %v11575_v56  ;;  %3080 = vmatmul.mubr.bf16.gmra.mxu1 %v11576_v50  ;;  %v11613_v56 = vld [vmem:[#allocation2 + $0x3e4] ss:$16 sps:$4 sm:$0xff]   ;;  %v11614_v50 = vld [vmem:[#allocation2 + $0x24c] ss:$16 sps:$4 sm:$0xff]  }
 0x443   :  { %2902 = vmatprep.mubr.bf16.mxu0 %v11577_v44  ;;  %3087 = vmatprep.mubr.bf16.mxu1 %v11578_v13 }
 0x44a   :  { %2903 = vmatmul.mubr.bf16.gmra.mxu0 %v11579_v45  ;;  %3088 = vmatmul.mubr.bf16.gmra.mxu1 %v11580_v54 }
 0x44b   :  { %2910 = vmatprep.mubr.bf16.mxu0 %v11581_v34  ;;  %3095 = vmatprep.mubr.bf16.mxu1 %v11582_v30  ;;  %v11615_v34 = vld [vmem:[#allocation2 + $0x3e0] ss:$16 sps:$4 sm:$0xff]   ;;  %v11616_v30 = vld [vmem:[#allocation2 + $0x248] ss:$16 sps:$4 sm:$0xff]  }
 0x452   :  { %2911 = vmatmul.mubr.bf16.gmra.mxu0 %v11583_v2  ;;  %3096 = vmatmul.mubr.bf16.gmra.mxu1 %v11584_v51  ;;  %v11617_v2 = vld [vmem:[#allocation2 + $0xc] ss:$16 sps:$4 sm:$0xff]  }
 0x453   :  { %2918 = vmatprep.mubr.bf16.mxu0 %v11585_v24  ;;  %3103 = vmatprep.mubr.bf16.mxu1 %v11586_v12  ;;  %v11618_v51 = vld [vmem:[#allocation2 + $0x26c] ss:$16 sps:$4 sm:$0xff]  }
 0x45a   :  { %v12505_v53 = vpop.f32.mrf.mxu0  ;;  %2919 = vmatmul.mubr.bf16.gmra.mxu0 %v11587_v55  ;;  %3104 = vmatmul.mubr.bf16.gmra.mxu1 %v11588_v14 }
 0x45b   :  { %2926 = vmatprep.mubr.bf16.mxu0 %v11589_v35  ;;  %3111 = vmatprep.mubr.bf16.mxu1 %v11590_v62  ;;  %v11619_v35 = vld [vmem:[#allocation2 + $0x8] ss:$16 sps:$4 sm:$0xff]  }
 0x45c   :  { %v2730_v33 = vpop.f32.mrf.mxu0  ;;  %v11620_v62 = vld [vmem:[#allocation2 + $0x268] ss:$16 sps:$4 sm:$0xff]  }
 0x45d   :  { %v11621_v33 = vld [vmem:[#allocation2 + $0x2c] ss:$16 sps:$4 sm:$0xff]  }
 0x45e   :  { %v12507_v3 = vpop.f32.mrf.mxu0 }
 0x460   :  { %v2733_v31 = vpop.f32.mrf.mxu0 }
 0x461   :  { %v11622_v31 = vld [vmem:[#allocation2 + $0x28c] ss:$16 sps:$4 sm:$0xff]  }
 0x462   :  { %v12509_v21 = vpop.f32.mrf.mxu0  ;;  %2927 = vmatmul.mubr.bf16.gmra.mxu0 %v11591_v41  ;;  %3112 = vmatmul.mubr.bf16.gmra.mxu1 %v11592_v19 }
 0x463   :  { %2934 = vmatprep.mubr.bf16.mxu0 %v11593_v36  ;;  %3119 = vmatprep.mubr.bf16.mxu1 %v11594_v61 }
 0x464   :  { %v2738_v52 = vpop.f32.mrf.mxu0 }
 0x465   :  { %v11623_v52 = vld [vmem:[#allocation2 + $0x28] ss:$16 sps:$4 sm:$0xff]  }
 0x466   :  { %v12511_v63 = vpop.f32.mrf.mxu0 }
 0x468   :  { %v2741_v0 = vpop.f32.mrf.mxu0 }
 0x469   :  { %v11624_v0 = vld [vmem:[#allocation2 + $0x288] ss:$16 sps:$4 sm:$0xff]  }
 0x46a   :  { %v12513_v38 = vpop.f32.mrf.mxu0  ;;  %2935 = vmatmul.mubr.bf16.gmra.mxu0 %v11595_v17  ;;  %3120 = vmatmul.mubr.bf16.gmra.mxu1 %v11596_v46  ;;  %v11625_v17 = vld [vmem:[#allocation2 + $0x4c] ss:$16 sps:$4 sm:$0xff]  }
 0x46b   :  { %2942 = vmatprep.mubr.bf16.mxu0 %v11597_v4  ;;  %3127 = vmatprep.mubr.bf16.mxu1 %v11598_v20  ;;  %v11626_v46 = vld [vmem:[#allocation2 + $0x2ac] ss:$16 sps:$4 sm:$0xff]  }
 0x46c   :  { %v2746_v37 = vpop.f32.mrf.mxu0 }
 0x46e   :  { %v12515_v7 = vpop.f32.mrf.mxu0 }
 0x470   :  { %v2749_v8 = vpop.f32.mrf.mxu0 }
 0x472   :  { %v12517_v43 = vpop.f32.mrf.mxu0  ;;  %2943 = vmatmul.mubr.bf16.gmra.mxu0 %v11599_v10  ;;  %3128 = vmatmul.mubr.bf16.gmra.mxu1 %v11600_v23  ;;  %v11627_v10 = vld [vmem:[#allocation2 + $0x48] ss:$16 sps:$4 sm:$0xff]  }
 0x473   :  { %2950 = vmatprep.mubr.bf16.mxu0 %v11601_v5  ;;  %3135 = vmatprep.mubr.bf16.mxu1 %v11602_v49  ;;  %v11628_v23 = vld [vmem:[#allocation2 + $0x2a8] ss:$16 sps:$4 sm:$0xff]   ;;  %v11629_v5 = vld [vmem:[#allocation2 + $0x2cc] ss:$16 sps:$4 sm:$0xff]  }
 0x474   :  { %v2754_v40 = vpop.f32.mrf.mxu0 }
 0x476   :  { %v12519_v11 = vpop.f32.mrf.mxu0 }
 0x478   :  { %v2757_v15 = vpop.f32.mrf.mxu0 }
 0x47a   :  { %v12521_v16 = vpop.f32.mrf.mxu0  ;;  %2951 = vmatmul.mubr.bf16.gmra.mxu0 %v11603_v42  ;;  %3136 = vmatmul.mubr.bf16.gmra.mxu1 %v11604_v18  ;;  %v11630_v18 = vld [vmem:[#allocation2 + $0x2c8] ss:$16 sps:$4 sm:$0xff]  }
 0x47b   :  { %2958 = vmatprep.mubr.bf16.mxu0 %v11605_v28  ;;  %3143 = vmatprep.mubr.bf16.mxu1 %v11606_v60  ;;  %v11631_v28 = vld [vmem:[#allocation2 + $0x2ec] ss:$16 sps:$4 sm:$0xff]  }
 0x47c   :  { %v2762_v22 = vpop.f32.mrf.mxu0 }
 0x47e   :  { %v12523_v58 = vpop.f32.mrf.mxu0 }
 0x480   :  { %v2765_v25 = vpop.f32.mrf.mxu0 }
 0x482   :  { %v12525_v26 = vpop.f32.mrf.mxu0  ;;  %2959 = vmatmul.mubr.bf16.gmra.mxu0 %v11607_v6  ;;  %3144 = vmatmul.mubr.bf16.gmra.mxu1 %v11608_v27  ;;  %v11632_v27 = vld [vmem:[#allocation2 + $0x2e8] ss:$16 sps:$4 sm:$0xff]  }
 0x483   :  { %2966 = vmatprep.mubr.bf16.mxu0 %v11609_v47  ;;  %3151 = vmatprep.mubr.bf16.mxu1 %v11610_v32  ;;  %v11633_v47 = vld [vmem:[#allocation2 + $0x30c] ss:$16 sps:$4 sm:$0xff]  }
 0x484   :  { %v2770_v57 = vpop.f32.mrf.mxu0 }
 0x486   :  { %v12527_v59 = vpop.f32.mrf.mxu0 }
 0x488   :  { %v2773_v1 = vpop.f32.mrf.mxu0 }
 0x48a   :  { %v12529_v9 = vpop.f32.mrf.mxu0  ;;  %2967 = vmatmul.mubr.bf16.gmra.mxu0 %v11611_v39  ;;  %3152 = vmatmul.mubr.bf16.gmra.mxu1 %v11612_v48  ;;  %v11634_v48 = vld [vmem:[#allocation2 + $0x308] ss:$16 sps:$4 sm:$0xff]  }
 0x48b   :  { %2974 = vmatprep.mubr.bf16.mxu0 %v11613_v56  ;;  %3159 = vmatprep.mubr.bf16.mxu1 %v11614_v50  ;;  %v11635_v56 = vld [vmem:[#allocation2 + $0x32c] ss:$16 sps:$4 sm:$0xff]  }
 0x48c   :  { %v2778_v44 = vpop.f32.mrf.mxu0 }
 0x48e   :  { %v12531_v13 = vpop.f32.mrf.mxu0 }
 0x490   :  { %v2781_v45 = vpop.f32.mrf.mxu0 }
 0x492   :  { %v12533_v54 = vpop.f32.mrf.mxu0  ;;  %2975 = vmatmul.mubr.bf16.gmra.mxu0 %v11615_v34  ;;  %3160 = vmatmul.mubr.bf16.gmra.mxu1 %v11616_v30  ;;  %v11636_v30 = vld [vmem:[#allocation2 + $0x328] ss:$16 sps:$4 sm:$0xff]  }
 0x493   :  { %3015 = vmatprep.mubr.bf16.mxu0 %v11617_v2  ;;  %3167 = vmatprep.mubr.bf16.mxu1 %v11618_v51  ;;  %v11637_v2 = vld [vmem:[#allocation2 + $0x34c] ss:$16 sps:$4 sm:$0xff]  }
 0x494   :  { %v2786_v24 = vpop.f32.mrf.mxu0 }
 0x496   :  { %v12535_v12 = vpop.f32.mrf.mxu0 }
 0x498   :  { %v2789_v55 = vpop.f32.mrf.mxu0 }
 0x49a   :  { %v12537_v14 = vpop.f32.mrf.mxu0  ;;  %3016 = vmatmul.mubr.bf16.vlgmr.msra.gmra.mxu0 %v11619_v35  ;;  %3168 = vmatmul.mubr.bf16.gmra.mxu1 %v11620_v62  ;;  %v11638_v62 = vld [vmem:[#allocation2 + $0x348] ss:$16 sps:$4 sm:$0xff]  }
 0x49b   :  { %3023 = vmatprep.mubr.bf16.mxu0 %v11621_v33  ;;  %3175 = vmatprep.mubr.bf16.mxu1 %v11622_v31  ;;  %v11639_v33 = vld [vmem:[#allocation2 + $0x36c] ss:$16 sps:$4 sm:$0xff]  }
 0x49c   :  { %v2794_v41 = vpop.f32.mrf.mxu0 }
 0x49e   :  { %v12539_v19 = vpop.f32.mrf.mxu0 }
 0x4a0   :  { %v2797_v36 = vpop.f32.mrf.mxu0 }
 0x4a2   :  { %v12541_v61 = vpop.f32.mrf.mxu0  ;;  %3024 = vmatmul.mubr.bf16.gmra.mxu0 %v11623_v52  ;;  %3176 = vmatmul.mubr.bf16.gmra.mxu1 %v11624_v0 }
 0x4a3   :  { %3031 = vmatprep.mubr.bf16.mxu0 %v11625_v17  ;;  %3183 = vmatprep.mubr.bf16.mxu1 %v11626_v46  ;;  %v11640_v17 = vld [vmem:[#allocation2 + $0x368] ss:$16 sps:$4 sm:$0xff]  }
 0x4a4   :  { %v2802_v4 = vpop.f32.mrf.mxu0 }
 0x4a5   :  { %v11641_v4 = vld [vmem:[#allocation2 + $0x38c] ss:$16 sps:$4 sm:$0xff]  }
 0x4a6   :  { %v12543_v20 = vpop.f32.mrf.mxu0 }
 0x4a8   :  { %v2805_v37 = vpop.f32.mrf.mxu0 }
 0x4aa   :  { %v12545_v8 = vpop.f32.mrf.mxu0  ;;  %3032 = vmatmul.mubr.bf16.gmra.mxu0 %v11627_v10  ;;  %3184 = vmatmul.mubr.bf16.gmra.mxu1 %v11628_v23 }
 0x4ab   :  { %3191 = vmatprep.mubr.bf16.mxu1 %v11629_v5 }
 0x4ac   :  { %v2810_v49 = vpop.f32.mrf.mxu0 }
 0x4ae   :  { %v12547_v40 = vpop.f32.mrf.mxu0 }
 0x4b0   :  { %v2813_v15 = vpop.f32.mrf.mxu0 }
 0x4b2   :  { %v12549_v42 = vpop.f32.mrf.mxu0  ;;  %3192 = vmatmul.mubr.bf16.gmra.mxu1 %v11630_v18 }
 0x4b3   :  { %3199 = vmatprep.mubr.bf16.mxu1 %v11631_v28 }
 0x4b4   :  { %v2818_v60 = vpop.f32.mrf.mxu0 }
 0x4b6   :  { %v12551_v22 = vpop.f32.mrf.mxu0 }
 0x4b8   :  { %v2821_v25 = vpop.f32.mrf.mxu0 }
 0x4ba   :  { %v12553_v6 = vpop.f32.mrf.mxu0  ;;  %3200 = vmatmul.mubr.bf16.gmra.mxu1 %v11632_v27 }
 0x4bb   :  { %3207 = vmatprep.mubr.bf16.mxu1 %v11633_v47  ;;  %v11642_v47 = vld [vmem:[#allocation2 + $0x388] ss:$16 sps:$4 sm:$0xff]  }
 0x4bc   :  { %v2826_v32 = vpop.f32.mrf.mxu0 }
 0x4be   :  { %v12555_v57 = vpop.f32.mrf.mxu0 }
 0x4c0   :  { %v2829_v1 = vpop.f32.mrf.mxu0 }
 0x4c2   :  { %v12557_v39 = vpop.f32.mrf.mxu0  ;;  %3208 = vmatmul.mubr.bf16.gmra.mxu1 %v11634_v48  ;;  %v11643_v48 = vld [vmem:[#allocation2 + $0x3ac] ss:$16 sps:$4 sm:$0xff]  }
 0x4c3   :  { %3215 = vmatprep.mubr.bf16.mxu1 %v11635_v56 }
 0x4c4   :  { %v2834_v50 = vpop.f32.mrf.mxu0 }
 0x4c6   :  { %v12559_v44 = vpop.f32.mrf.mxu0 }
 0x4c8   :  { %v2837_v45 = vpop.f32.mrf.mxu0 }
 0x4c9   :  { %v11373_v45 = vld [vmem:[%s15403_s3 + $0x18] sm:$0xff]  }
 0x4ca   :  { %v12561_v34 = vpop.f32.mrf.mxu0  ;;  %3216 = vmatmul.mubr.bf16.gmra.mxu1 %v11636_v30  ;;  %10700 = vmatprep.subr.bf16.mxu0 %v11373_v45 }
 0x4cb   :  { %3223 = vmatprep.mubr.bf16.mxu1 %v11637_v2  ;;  %10701 = vmatpush3.bf16.msra.mxu0 %v11373_v45 }
 0x4cc   :  { %v2842_v51 = vpop.f32.mrf.mxu0 }
 0x4ce   :  { %v12563_v24 = vpop.f32.mrf.mxu0 }
 0x4d0   :  { %v2845_v55 = vpop.f32.mrf.mxu0 }
 0x4d2   :  { %v12565_v35 = vpop.f32.mrf.mxu0  ;;  %3224 = vmatmul.mubr.bf16.gmra.mxu1 %v11638_v62 }
 0x4d3   :  { %3231 = vmatprep.mubr.bf16.mxu1 %v11639_v33  ;;  %v11374_v33 = vld [vmem:[%s15403_s3 + $0x10] sm:$0xff]  }
 0x4d4   :  { %v2850_v31 = vpop.f32.mrf.mxu0  ;;  %10702 = vmatprep.subr.bf16.mxu0 %v11374_v33 }
 0x4d5   :  { %10703 = vmatpush3.bf16.msra.mxu0 %v11374_v33 }
 0x4d6   :  { %v12567_v41 = vpop.f32.mrf.mxu0  ;;  %4219 = vmatprep.subr.bf16.mxu0 %v15409_v29 }
 0x4d8   :  { %v2853_v36 = vpop.f32.mrf.mxu0 }
 0x4da   :  { %v12569_v52 = vpop.f32.mrf.mxu0  ;;  %v3041_v0 = vpop.f32.mrf.mxu1  ;;  %3232 = vmatmul.mubr.bf16.gmra.mxu1 %v11640_v17  ;;  %v11644_v17 = vld [vmem:[#allocation2 + $0x3a8] ss:$16 sps:$4 sm:$0xff]  }
 0x4db   :  { %v3042_v46 = vadd.f32 %v3041_v0, %v12517_v43  ;;  %3239 = vmatprep.mubr.bf16.mxu1 %v11641_v4 }
 0x4dc   :  { %v2858_v37 = vpop.f32.mrf.mxu0  ;;  %v3043_v10 = vpop.f32.mrf.mxu1 }
 0x4dd   :  { %v3342_v49 = vmul.f32 0.01, %v3042_v46  ;;  %vm3278_vm7 = vcmp.gt.f32.partialorder %v3042_v46, 0.0  ;;  %v11645_v37 = vld [vmem:[#allocation2 + $0x3cc] ss:$16 sps:$4 sm:$0xff]  }
 0x4de   :  { %v12572_v23 = vpop.f32.mrf.mxu0  ;;  %v3044_v5 = vpop.f32.mrf.mxu1 }
 0x4df   :  { %v3045_v15 = vadd.f32 %v3044_v5, %v12519_v11  ;;  %v12577_v43 = vsel %vm3278_vm7, %v3042_v46, %v3342_v49 }
 0x4e0   :  { %v2861_v18 = vpop.f32.mrf.mxu0  ;;  %v3046_v28 = vpop.f32.mrf.mxu1 }
 0x4e1   :  { %vm3279_vm8 = vcmp.gt.f32.partialorder %v3045_v15, 0.0  ;;  %v3343_v60 = vmul.f32 0.01, %v3045_v15 }
 0x4e2   :  { %v12575_v25 = vpop.f32.mrf.mxu0  ;;  %v3049_v27 = vpop.f32.mrf.mxu1  ;;  %3240 = vmatmul.mubr.bf16.gmra.mxu1 %v11642_v47 }
 0x4e3   :  { %v12579_v32 = vsel %vm3279_vm8, %v3045_v15, %v3343_v60  ;;  %v3050_v1 = vadd.f32 %v3049_v27, %v12521_v16  ;;  %3247 = vmatprep.mubr.bf16.mxu1 %v11643_v48 }
 0x4e4   :  { %v2866_v56 = vpop.f32.mrf.mxu0  ;;  %v3051_v50 = vpop.f32.mrf.mxu1 }
 0x4e5   :  { %v3344_v51 = vmul.f32 0.01, %v3050_v1  ;;  %vm3280_vm9 = vcmp.gt.f32.partialorder %v3050_v1, 0.0  ;;  %v11646_v56 = vld [vmem:[#allocation2 + $0x3c8] ss:$16 sps:$4 sm:$0xff]  }
 0x4e6   :  { %v12587_v30 = vpop.f32.mrf.mxu0  ;;  %v3052_v2 = vpop.f32.mrf.mxu1 }
 0x4e7   :  { %v3053_v55 = vadd.f32 %v3052_v2, %v12523_v58  ;;  %v12595_v46 = vsel %vm3280_vm9, %v3050_v1, %v3344_v51  ;;  %v11647_v51 = vld [vmem:[#allocation2 + $0x3ec] ss:$16 sps:$4 sm:$0xff]  }
 0x4e8   :  { %v2869_v16 = vpop.f32.mrf.mxu0  ;;  %v3054_v62 = vpop.f32.mrf.mxu1 }
 0x4e9   :  { %vm3281_vm10 = vcmp.gt.f32.partialorder %v3053_v55, 0.0  ;;  %v3345_v31 = vmul.f32 0.01, %v3053_v55 }
 0x4ea   :  { %v12593_v36 = vpop.f32.mrf.mxu0  ;;  %v3057_v0 = vpop.f32.mrf.mxu1  ;;  %3248 = vmatmul.mubr.bf16.gmra.mxu1 %v11644_v17 }
 0x4eb   :  { %v12597_v4 = vsel %vm3281_vm10, %v3053_v55, %v3345_v31  ;;  %v3058_v58 = vadd.f32 %v3057_v0, %v12525_v26  ;;  %3255 = vmatprep.mubr.bf16.mxu1 %v11645_v37 }
 0x4ec   :  { %v2874_v5 = vpop.f32.mrf.mxu0  ;;  %v3059_v49 = vpop.f32.mrf.mxu1 }
 0x4ed   :  { %v3346_v28 = vmul.f32 0.01, %v3058_v58  ;;  %vm3282_vm11 = vcmp.gt.f32.partialorder %v3058_v58, 0.0  ;;  %v11648_v49 = vld [vmem:[#allocation2 + $0x3e8] ss:$16 sps:$4 sm:$0xff]  }
 0x4ee   :  { %v12603_v15 = vpop.f32.mrf.mxu0  ;;  %v3060_v18 = vpop.f32.mrf.mxu1 }
 0x4ef   :  { %v3061_v60 = vadd.f32 %v3060_v18, %v12527_v59  ;;  %v12608_v50 = vsel %vm3282_vm11, %v3058_v58, %v3346_v28 }
 0x4f0   :  { %v2877_v27 = vpop.f32.mrf.mxu0  ;;  %v3062_v47 = vpop.f32.mrf.mxu1 }
 0x4f1   :  { %vm3283_vm12 = vcmp.gt.f32.partialorder %v3061_v60, 0.0  ;;  %v3347_v26 = vmul.f32 0.01, %v3061_v60  ;;  %v11649_v27 = vld [vmem:[#allocation2 + $0x4] ss:$16 sps:$4 sm:$0xff]  }
 0x4f2   :  { %v12606_v1 = vpop.f32.mrf.mxu0  ;;  %v3065_v48 = vpop.f32.mrf.mxu1  ;;  %3256 = vmatmul.mubr.bf16.gmra.mxu1 %v11646_v56 }
 0x4f3   :  { %v12610_v45 = vsel %vm3283_vm12, %v3061_v60, %v3347_v26  ;;  %v3066_v2 = vadd.f32 %v3065_v48, %v12529_v9  ;;  %3263 = vmatprep.mubr.bf16.mxu1 %v11647_v51 }
 0x4f4   :  { %v2882_v55 = vpop.f32.mrf.mxu0  ;;  %v3067_v16 = vpop.f32.mrf.mxu1 }
 0x4f5   :  { %v3348_v31 = vmul.f32 0.01, %v3066_v2  ;;  %vm3284_vm13 = vcmp.gt.f32.partialorder %v3066_v2, 0.0 }
 0x4f6   :  { %v12615_v62 = vpop.f32.mrf.mxu0  ;;  %v3068_v33 = vpop.f32.mrf.mxu1 }
 0x4f7   :  { %v3069_v0 = vadd.f32 %v3068_v33, %v12531_v13  ;;  %v12620_v18 = vsel %vm3284_vm13, %v3066_v2, %v3348_v31 }
 0x4f8   :  { %v2885_v17 = vpop.f32.mrf.mxu0  ;;  %v3070_v58 = vpop.f32.mrf.mxu1 }
 0x4f9   :  { %vm3285_vm14 = vcmp.gt.f32.partialorder %v3069_v0, 0.0  ;;  %v3349_v37 = vmul.f32 0.01, %v3069_v0 }
 0x4fa   :  { %v12618_v5 = vpop.f32.mrf.mxu0  ;;  %v3073_v9 = vpop.f32.mrf.mxu1  ;;  %3264 = vmatmul.mubr.bf16.gmra.mxu1 %v11648_v49 }
 0x4fb   :  { %v12622_v28 = vsel %vm3285_vm14, %v3069_v0, %v3349_v37  ;;  %v3074_v60 = vadd.f32 %v3073_v9, %v12533_v54  ;;  %3962 = vmatprep.mubr.bf16.mxu1 %v11649_v27 }
 0x4fc   :  { %v2890_v47 = vpop.f32.mrf.mxu0  ;;  %v3075_v26 = vpop.f32.mrf.mxu1 }
 0x4fd   :  { %v3350_v51 = vmul.f32 0.01, %v3074_v60  ;;  %vm3286_vm15 = vcmp.gt.f32.partialorder %v3074_v60, 0.0 }
 0x4fe   :  { %v12627_v48 = vpop.f32.mrf.mxu0  ;;  %v3076_v56 = vpop.f32.mrf.mxu1 }
 0x4ff   :  { %v3077_v55 = vadd.f32 %v3076_v56, %v12535_v12  ;;  %v12632_v0 = vsel %vm3286_vm15, %v3074_v60, %v3350_v51 }
 0x500   :  { %v2893_v2 = vpop.f32.mrf.mxu0  ;;  %v3078_v16 = vpop.f32.mrf.mxu1 }
 0x501   :  { %vm3287_vm0 = vcmp.gt.f32.partialorder %v3077_v55, 0.0  ;;  %v3351_v33 = vmul.f32 0.01, %v3077_v55 }
 0x502   :  { %v12630_v31 = vpop.f32.mrf.mxu0  ;;  %v3081_v54 = vpop.f32.mrf.mxu1 }
 0x503   :  { %v12634_v17 = vsel %vm3287_vm0, %v3077_v55, %v3351_v33  ;;  %v3082_v58 = vadd.f32 %v3081_v54, %v12537_v14 }
 0x504   :  { %v2898_v9 = vpop.f32.mrf.mxu0  ;;  %v3083_v49 = vpop.f32.mrf.mxu1 }
 0x505   :  { %v3352_v47 = vmul.f32 0.01, %v3082_v58  ;;  %vm3288_vm1 = vcmp.gt.f32.partialorder %v3082_v58, 0.0 }
 0x506   :  { %v12639_v12 = vpop.f32.mrf.mxu0  ;;  %v3084_v27 = vpop.f32.mrf.mxu1 }
 0x507   :  { %v3085_v26 = vadd.f32 %v3084_v27, %v12539_v19  ;;  %v12644_v14 = vsel %vm3288_vm1, %v3082_v58, %v3352_v47 }
 0x508   :  { %v2901_v56 = vpop.f32.mrf.mxu0  ;;  %v3086_v2 = vpop.f32.mrf.mxu1 }
 0x509   :  { %vm3289_vm2 = vcmp.gt.f32.partialorder %v3085_v26, 0.0  ;;  %v3353_v60 = vmul.f32 0.01, %v3085_v26 }
 0x50a   :  { %v12642_v51 = vpop.f32.mrf.mxu0  ;;  %v3089_v55 = vpop.f32.mrf.mxu1 }
 0x50b   :  { %v12646_v16 = vsel %vm3289_vm2, %v3085_v26, %v3353_v60  ;;  %v3090_v33 = vadd.f32 %v3089_v55, %v12541_v61 }
 0x50c   :  { %v2906_v9 = vpop.f32.mrf.mxu0  ;;  %v3091_v49 = vpop.f32.mrf.mxu1 }
 0x50d   :  { %v3354_v56 = vmul.f32 0.01, %v3090_v33  ;;  %vm3290_vm3 = vcmp.gt.f32.partialorder %v3090_v33, 0.0 }
 0x50e   :  { %v12651_v19 = vpop.f32.mrf.mxu0  ;;  %v3092_v27 = vpop.f32.mrf.mxu1 }
 0x50f   :  { %v3093_v2 = vadd.f32 %v3092_v27, %v12543_v20  ;;  %v12656_v61 = vsel %vm3290_vm3, %v3090_v33, %v3354_v56 }
 0x510   :  { %v2909_v29 = vpop.f32.mrf.mxu0  ;;  %v3094_v37 = vpop.f32.mrf.mxu1 }
 0x511   :  { %vm3291_vm5 = vcmp.gt.f32.partialorder %v3093_v2, 0.0  ;;  %v3355_v58 = vmul.f32 0.01, %v3093_v2 }
 0x512   :  { %v12654_v47 = vpop.f32.mrf.mxu0  ;;  %v3097_v26 = vpop.f32.mrf.mxu1 }
 0x513   :  { %v12658_v60 = vsel %vm3291_vm5, %v3093_v2, %v3355_v58  ;;  %v3098_v55 = vadd.f32 %v3097_v26, %v12545_v8 }
 0x514   :  { %v2914_v49 = vpop.f32.mrf.mxu0  ;;  %v3099_v54 = vpop.f32.mrf.mxu1 }
 0x515   :  { %v3356_v37 = vmul.f32 0.01, %v3098_v55  ;;  %vm3292_vm6 = vcmp.gt.f32.partialorder %v3098_v55, 0.0 }
 0x516   :  { %v12663_v20 = vpop.f32.mrf.mxu0  ;;  %v3100_v29 = vpop.f32.mrf.mxu1 }
 0x517   :  { %v3101_v27 = vadd.f32 %v3100_v29, %v12547_v40  ;;  %v12668_v8 = vsel %vm3292_vm6, %v3098_v55, %v3356_v37 }
 0x518   :  { %v2917_v13 = vpop.f32.mrf.mxu0  ;;  %v3102_v59 = vpop.f32.mrf.mxu1 }
 0x519   :  { %vm3293_vm7 = vcmp.gt.f32.partialorder %v3101_v27, 0.0  ;;  %v3357_v33 = vmul.f32 0.01, %v3101_v27 }
 0x51a   :  { %v12666_v56 = vpop.f32.mrf.mxu0  ;;  %v3105_v2 = vpop.f32.mrf.mxu1 }
 0x51b   :  { %15493 = vst [vmem:[#allocation5_spill] sm:$0xff] %v12666_v56  ;;  %v12670_v58 = vsel %vm3293_vm7, %v3101_v27, %v3357_v33  ;;  %v3106_v54 = vadd.f32 %v3105_v2, %v12549_v42 }
 0x51c   :  { %v2922_v49 = vpop.f32.mrf.mxu0  ;;  %v3107_v9 = vpop.f32.mrf.mxu1 }
 0x51d   :  { %v3358_v59 = vmul.f32 0.01, %v3106_v54  ;;  %vm3294_vm8 = vcmp.gt.f32.partialorder %v3106_v54, 0.0 }
 0x51e   :  { %v12675_v40 = vpop.f32.mrf.mxu0  ;;  %v3108_v13 = vpop.f32.mrf.mxu1 }
 0x51f   :  { %15494 = vst [vmem:[#allocation6_spill] sm:$0xff] %v12675_v40  ;;  %v3109_v29 = vadd.f32 %v3108_v13, %v12551_v22  ;;  %v12680_v42 = vsel %vm3294_vm8, %v3106_v54, %v3358_v59 }
 0x520   :  { %v2925_v10 = vpop.f32.mrf.mxu0  ;;  %v3110_v11 = vpop.f32.mrf.mxu1 }
 0x521   :  { %vm3295_vm9 = vcmp.gt.f32.partialorder %v3109_v29, 0.0  ;;  %v3359_v55 = vmul.f32 0.01, %v3109_v29 }
 0x522   :  { %v12678_v37 = vpop.f32.mrf.mxu0  ;;  %v3113_v27 = vpop.f32.mrf.mxu1 }
 0x523   :  { %15495 = vst [vmem:[#allocation7_spill] sm:$0xff] %v12678_v37  ;;  %v12682_v33 = vsel %vm3295_vm9, %v3109_v29, %v3359_v55  ;;  %v3114_v9 = vadd.f32 %v3113_v27, %v12553_v6 }
 0x524   :  { %v2930_v49 = vpop.f32.mrf.mxu0  ;;  %v3115_v26 = vpop.f32.mrf.mxu1 }
 0x525   :  { %v3360_v11 = vmul.f32 0.01, %v3114_v9  ;;  %vm3296_vm10 = vcmp.gt.f32.partialorder %v3114_v9, 0.0 }
 0x526   :  { %v12687_v22 = vpop.f32.mrf.mxu0  ;;  %v3116_v10 = vpop.f32.mrf.mxu1 }
 0x527   :  { %15496 = vst [vmem:[#allocation8_spill] sm:$0xff] %v12687_v22  ;;  %v3117_v13 = vadd.f32 %v3116_v10, %v12555_v57  ;;  %v12692_v6 = vsel %vm3296_vm10, %v3114_v9, %v3360_v11 }
 0x528   :  { %v2933_v37 = vpop.f32.mrf.mxu0  ;;  %v3118_v56 = vpop.f32.mrf.mxu1 }
 0x529   :  { %vm3297_vm11 = vcmp.gt.f32.partialorder %v3117_v13, 0.0  ;;  %v3361_v54 = vmul.f32 0.01, %v3117_v13 }
 0x52a   :  { %v12690_v59 = vpop.f32.mrf.mxu0  ;;  %v3121_v29 = vpop.f32.mrf.mxu1 }
 0x52b   :  { %15497 = vst [vmem:[#allocation9_spill] sm:$0xff] %v12690_v59  ;;  %v12694_v55 = vsel %vm3297_vm11, %v3117_v13, %v3361_v54  ;;  %v3122_v26 = vadd.f32 %v3121_v29, %v12557_v39 }
 0x52c   :  { %v2938_v49 = vpop.f32.mrf.mxu0  ;;  %v3123_v2 = vpop.f32.mrf.mxu1 }
 0x52d   :  { %v3362_v56 = vmul.f32 0.01, %v3122_v26  ;;  %vm3298_vm12 = vcmp.gt.f32.partialorder %v3122_v26, 0.0 }
 0x52e   :  { %v12699_v57 = vpop.f32.mrf.mxu0  ;;  %v3124_v37 = vpop.f32.mrf.mxu1 }
 0x52f   :  { %15498 = vst [vmem:[#allocation10_spill] sm:$0xff] %v12699_v57  ;;  %v3125_v10 = vadd.f32 %v3124_v37, %v12559_v44  ;;  %v12704_v39 = vsel %vm3298_vm12, %v3122_v26, %v3362_v56 }
 0x530   :  { %v2941_v59 = vpop.f32.mrf.mxu0  ;;  %v3126_v22 = vpop.f32.mrf.mxu1 }
 0x531   :  { %vm3299_vm13 = vcmp.gt.f32.partialorder %v3125_v10, 0.0  ;;  %v3363_v9 = vmul.f32 0.01, %v3125_v10 }
 0x532   :  { %v12702_v11 = vpop.f32.mrf.mxu0  ;;  %v3129_v13 = vpop.f32.mrf.mxu1 }
 0x533   :  { %15499 = vst [vmem:[#allocation11_spill] sm:$0xff] %v12702_v11  ;;  %v12706_v54 = vsel %vm3299_vm13, %v3125_v10, %v3363_v9  ;;  %v3130_v2 = vadd.f32 %v3129_v13, %v12561_v34 }
 0x534   :  { %v2946_v49 = vpop.f32.mrf.mxu0  ;;  %v3131_v27 = vpop.f32.mrf.mxu1 }
 0x535   :  { %v3364_v22 = vmul.f32 0.01, %v3130_v2  ;;  %vm3300_vm14 = vcmp.gt.f32.partialorder %v3130_v2, 0.0 }
 0x536   :  { %v12711_v44 = vpop.f32.mrf.mxu0  ;;  %v3132_v59 = vpop.f32.mrf.mxu1 }
 0x537   :  { %15500 = vst [vmem:[#allocation12_spill] sm:$0xff] %v12711_v44  ;;  %v3133_v37 = vadd.f32 %v3132_v59, %v12563_v24  ;;  %v12716_v34 = vsel %vm3300_vm14, %v3130_v2, %v3364_v22 }
 0x538   :  { %v2949_v11 = vpop.f32.mrf.mxu0  ;;  %v3134_v57 = vpop.f32.mrf.mxu1 }
 0x539   :  { %vm3301_vm15 = vcmp.gt.f32.partialorder %v3133_v37, 0.0  ;;  %v3365_v26 = vmul.f32 0.01, %v3133_v37 }
 0x53a   :  { %v12714_v56 = vpop.f32.mrf.mxu0  ;;  %v3137_v10 = vpop.f32.mrf.mxu1 }
 0x53b   :  { %15501 = vst [vmem:[#allocation13_spill] sm:$0xff] %v12714_v56  ;;  %v12718_v9 = vsel %vm3301_vm15, %v3133_v37, %v3365_v26  ;;  %v3138_v27 = vadd.f32 %v3137_v10, %v12565_v35 }
 0x53c   :  { %v2954_v49 = vpop.f32.mrf.mxu0  ;;  %v3139_v29 = vpop.f32.mrf.mxu1 }
 0x53d   :  { %v3366_v57 = vmul.f32 0.01, %v3138_v27  ;;  %vm3302_vm0 = vcmp.gt.f32.partialorder %v3138_v27, 0.0 }
 0x53e   :  { %v12723_v24 = vpop.f32.mrf.mxu0  ;;  %v3140_v11 = vpop.f32.mrf.mxu1 }
 0x53f   :  { %15502 = vst [vmem:[#allocation14_spill] sm:$0xff] %v12723_v24  ;;  %v3141_v59 = vadd.f32 %v3140_v11, %v12567_v41  ;;  %v12728_v35 = vsel %vm3302_vm0, %v3138_v27, %v3366_v57 }
 0x540   :  { %v2957_v56 = vpop.f32.mrf.mxu0  ;;  %v3142_v44 = vpop.f32.mrf.mxu1 }
 0x541   :  { %vm3303_vm1 = vcmp.gt.f32.partialorder %v3141_v59, 0.0  ;;  %v3367_v2 = vmul.f32 0.01, %v3141_v59 }
 0x542   :  { %v12726_v22 = vpop.f32.mrf.mxu0  ;;  %v3145_v37 = vpop.f32.mrf.mxu1 }
 0x543   :  { %15503 = vst [vmem:[#allocation15_spill] sm:$0xff] %v12726_v22  ;;  %v12730_v26 = vsel %vm3303_vm1, %v3141_v59, %v3367_v2  ;;  %v3146_v29 = vadd.f32 %v3145_v37, %v12569_v52 }
 0x544   :  { %v2962_v49 = vpop.f32.mrf.mxu0  ;;  %v3147_v13 = vpop.f32.mrf.mxu1 }
 0x545   :  { %v3368_v44 = vmul.f32 0.01, %v3146_v29  ;;  %vm3304_vm2 = vcmp.gt.f32.partialorder %v3146_v29, 0.0 }
 0x546   :  { %v12735_v41 = vpop.f32.mrf.mxu0  ;;  %v3148_v56 = vpop.f32.mrf.mxu1 }
 0x547   :  { %15504 = vst [vmem:[#allocation16_spill] sm:$0xff] %v12735_v41  ;;  %v3149_v11 = vadd.f32 %v3148_v56, %v12572_v23  ;;  %v12740_v52 = vsel %vm3304_vm2, %v3146_v29, %v3368_v44 }
 0x548   :  { %v2965_v22 = vpop.f32.mrf.mxu0  ;;  %v3150_v24 = vpop.f32.mrf.mxu1 }
 0x549   :  { %vm3305_vm3 = vcmp.gt.f32.partialorder %v3149_v11, 0.0  ;;  %v3369_v27 = vmul.f32 0.01, %v3149_v11 }
 0x54a   :  { %v12738_v57 = vpop.f32.mrf.mxu0  ;;  %v3153_v59 = vpop.f32.mrf.mxu1 }
 0x54b   :  { %15505 = vst [vmem:[#allocation17_spill] sm:$0xff] %v12738_v57  ;;  %v12742_v2 = vsel %vm3305_vm3, %v3149_v11, %v3369_v27  ;;  %v3154_v13 = vadd.f32 %v3153_v59, %v12575_v25 }
 0x54c   :  { %v2970_v49 = vpop.f32.mrf.mxu0  ;;  %v3155_v10 = vpop.f32.mrf.mxu1 }
 0x54d   :  { %v3370_v24 = vmul.f32 0.01, %v3154_v13  ;;  %vm3306_vm5 = vcmp.gt.f32.partialorder %v3154_v13, 0.0 }
 0x54e   :  { %v12747_v23 = vpop.f32.mrf.mxu0  ;;  %v3156_v22 = vpop.f32.mrf.mxu1 }
 0x54f   :  { %15506 = vst [vmem:[#allocation18_spill] sm:$0xff] %v12747_v23  ;;  %v3157_v56 = vadd.f32 %v3156_v22, %v12587_v30  ;;  %v12752_v25 = vsel %vm3306_vm5, %v3154_v13, %v3370_v24 }
 0x550   :  { %v2973_v57 = vpop.f32.mrf.mxu0  ;;  %v3158_v41 = vpop.f32.mrf.mxu1 }
 0x551   :  { %vm3307_vm6 = vcmp.gt.f32.partialorder %v3157_v56, 0.0  ;;  %v3371_v29 = vmul.f32 0.01, %v3157_v56 }
 0x552   :  { %v12750_v44 = vpop.f32.mrf.mxu0  ;;  %v3161_v11 = vpop.f32.mrf.mxu1 }
 0x553   :  { %15507 = vst [vmem:[#allocation19_spill] sm:$0xff] %v12750_v44  ;;  %v12754_v27 = vsel %vm3307_vm6, %v3157_v56, %v3371_v29  ;;  %v3162_v10 = vadd.f32 %v3161_v11, %v12593_v36 }
 0x554   :  { %v2978_v49 = vpop.f32.mrf.mxu0  ;;  %v3163_v37 = vpop.f32.mrf.mxu1 }
 0x555   :  { %v3372_v41 = vmul.f32 0.01, %v3162_v10  ;;  %vm3308_vm7 = vcmp.gt.f32.partialorder %v3162_v10, 0.0 }
 0x556   :  { %v12759_v30 = vpop.f32.mrf.mxu0  ;;  %v3164_v57 = vpop.f32.mrf.mxu1 }
 0x557   :  { %15508 = vst [vmem:[#allocation20_spill] sm:$0xff] %v12759_v30  ;;  %v3165_v22 = vadd.f32 %v3164_v57, %v12603_v15  ;;  %v12762_v29 = vsel %vm3308_vm7, %v3162_v10, %v3372_v41 }
 0x558   :  { %v2981_v44 = vpop.f32.mrf.mxu0  ;;  %v3166_v23 = vpop.f32.mrf.mxu1  ;;  %15509 = vst [vmem:[#allocation21_spill] sm:$0xff] %v12762_v29 }
 0x559   :  { %vm3309_vm8 = vcmp.gt.f32.partialorder %v3165_v22, 0.0  ;;  %v3373_v13 = vmul.f32 0.01, %v3165_v22 }
 0x55a   :  { %v3017_v24 = vpop.f32.mrf.mxu0  ;;  %v3169_v56 = vpop.f32.mrf.mxu1 }
 0x55b   :  { %v12764_v36 = vsel %vm3309_vm8, %v3165_v22, %v3373_v13  ;;  %v3018_v11 = vadd.f32 %v3017_v24, %v12505_v53  ;;  %v3170_v37 = vadd.f32 %v3169_v56, %v12606_v1 }
 0x55c   :  { %15510 = vst [vmem:[#allocation22_spill] sm:$0xff] %v12764_v36  ;;  %v3019_v59 = vpop.f32.mrf.mxu0  ;;  %v3171_v15 = vpop.f32.mrf.mxu1 }
 0x55d   :  { %v3336_v57 = vmul.f32 0.01, %v3018_v11  ;;  %v3374_v44 = vmul.f32 0.01, %v3170_v37  ;;  %vm3272_vm9 = vcmp.gt.f32.partialorder %v3018_v11, 0.0  ;;  %vm3310_vm10 = vcmp.gt.f32.partialorder %v3170_v37, 0.0 }
 0x55e   :  { %v3020_v23 = vpop.f32.mrf.mxu0  ;;  %v3172_v30 = vpop.f32.mrf.mxu1 }
 0x55f   :  { %v3021_v10 = vadd.f32 %v3020_v23, %v12507_v3  ;;  %v3173_v41 = vadd.f32 %v3172_v30, %v12615_v62  ;;  %v3400_v24 = vsel %vm3272_vm9, %v3018_v11, %v3336_v57  ;;  %v12772_v56 = vsel %vm3310_vm10, %v3170_v37, %v3374_v44 }
 0x560   :  { %v3022_v22 = vpop.f32.mrf.mxu0  ;;  %v3174_v13 = vpop.f32.mrf.mxu1 }
 0x561   :  { %vm3273_vm11 = vcmp.gt.f32.partialorder %v3021_v10, 0.0  ;;  %v3337_v53 = vmul.f32 0.01, %v3021_v10  ;;  %vm3311_vm12 = vcmp.gt.f32.partialorder %v3173_v41, 0.0  ;;  %v3375_v1 = vmul.f32 0.01, %v3173_v41 }
 0x562   :  { %v3025_v59 = vpop.f32.mrf.mxu0  ;;  %v3177_v15 = vpop.f32.mrf.mxu1 }
 0x563   :  { %v3401_v49 = vsel %vm3273_vm11, %v3021_v10, %v3337_v53  ;;  %v12774_v40 = vsel %vm3311_vm12, %v3173_v41, %v3375_v1  ;;  %v3026_v29 = vadd.f32 %v3025_v59, %v12509_v21  ;;  %v3178_v3 = vadd.f32 %v3177_v15, %v12618_v5 }
 0x564   :  { %v3464_v23 = vpack.c.bf16 %v3401_v49, %v3400_v24  ;;  %v3483_v62 = vpack.c.bf16 %v12774_v40, %v12772_v56  ;;  %v3027_v30 = vpop.f32.mrf.mxu0  ;;  %v3179_v22 = vpop.f32.mrf.mxu1 }
 0x565   :  { %v3338_v13 = vmul.f32 0.01, %v3026_v29  ;;  %v3376_v36 = vmul.f32 0.01, %v3178_v3  ;;  %vm3274_vm13 = vcmp.gt.f32.partialorder %v3026_v29, 0.0  ;;  %vm3312_vm14 = vcmp.gt.f32.partialorder %v3178_v3, 0.0 }
 0x566   :  { %v3028_v11 = vpop.f32.mrf.mxu0  ;;  %v3180_v37 = vpop.f32.mrf.mxu1  ;;  %10704 = vmatprep.mubr.msk.bf16.mxu0 %vm2276_vm4, %v3464_v23 }
 0x567   :  { %v3029_v57 = vadd.f32 %v3028_v11, %v12511_v63  ;;  %v3181_v21 = vadd.f32 %v3180_v37, %v12627_v48  ;;  %v3402_v41 = vsel %vm3274_vm13, %v3026_v29, %v3338_v13  ;;  %v12783_v53 = vsel %vm3312_vm14, %v3178_v3, %v3376_v36 }
 0x568   :  { %v3030_v44 = vpop.f32.mrf.mxu0  ;;  %v3182_v5 = vpop.f32.mrf.mxu1 }
 0x569   :  { %vm3275_vm15 = vcmp.gt.f32.partialorder %v3029_v57, 0.0  ;;  %v3339_v49 = vmul.f32 0.01, %v3029_v57  ;;  %vm3313_vm0 = vcmp.gt.f32.partialorder %v3181_v21, 0.0  ;;  %v3377_v10 = vmul.f32 0.01, %v3181_v21 }
 0x56a   :  { %v3033_v1 = vpop.f32.mrf.mxu0  ;;  %v3185_v24 = vpop.f32.mrf.mxu1 }
 0x56b   :  { %v3403_v59 = vsel %vm3275_vm15, %v3029_v57, %v3339_v49  ;;  %v12785_v15 = vsel %vm3313_vm0, %v3181_v21, %v3377_v10  ;;  %v3034_v23 = vadd.f32 %v3033_v1, %v12513_v38  ;;  %v3186_v63 = vadd.f32 %v3185_v24, %v12630_v31 }
 0x56c   :  { %v3465_v30 = vpack.c.bf16 %v3403_v59, %v3402_v41  ;;  %v3484_v48 = vpack.c.bf16 %v12785_v15, %v12783_v53  ;;  %v3035_v22 = vpop.f32.mrf.mxu0  ;;  %v3187_v11 = vpop.f32.mrf.mxu1 }
 0x56d   :  { %v3340_v37 = vmul.f32 0.01, %v3034_v23  ;;  %vm3276_vm1 = vcmp.gt.f32.partialorder %v3034_v23, 0.0  ;;  %v3378_v36 = vmul.f32 0.01, %v3186_v63  ;;  %vm3314_vm2 = vcmp.gt.f32.partialorder %v3186_v63, 0.0 }
 0x56e   :  { %v3036_v44 = vpop.f32.mrf.mxu0  ;;  %v3188_v29 = vpop.f32.mrf.mxu1  ;;  %10705 = vmatmul.mubr.msk.bf16.vlgmr.msra.gmra.mxu0 %vm2276_vm4, %v3465_v30 }
 0x56f   :  { %v3037_v3 = vadd.f32 %v3036_v44, %v12515_v7  ;;  %v3189_v13 = vadd.f32 %v3188_v29, %v12639_v12  ;;  %v3404_v5 = vsel %vm3276_vm1, %v3034_v23, %v3340_v37  ;;  %v12794_v10 = vsel %vm3314_vm2, %v3186_v63, %v3378_v36 }
 0x570   :  { %v3190_v38 = vpop.f32.mrf.mxu1  ;;  %v3038_v31 = vpop.f32.mrf.mxu0  ;;  %v15511_v23 = vpack.c.bf16 %v12579_v32, %v12577_v43 }
 0x571   :  { %vm3277_vm3 = vcmp.gt.f32.partialorder %v3037_v3, 0.0  ;;  %v3341_v57 = vmul.f32 0.01, %v3037_v3  ;;  %vm3315_vm5 = vcmp.gt.f32.partialorder %v3189_v13, 0.0  ;;  %v3379_v21 = vmul.f32 0.01, %v3189_v13 }
 0x572   :  { %v3193_v49 = vpop.f32.mrf.mxu1  ;;  %v15514_v31 = vpack.c.bf16 %v12622_v28, %v12620_v18  ;;  %v15516_v28 = vpack.c.bf16 %v12646_v16, %v12644_v14  ;;  %v15519_v14 = vpack.c.bf16 %v12682_v33, %v12680_v42  ;;  %v15522_v42 = vpack.c.bf16 %v12718_v9, %v12716_v34 }
 0x573   :  { %v3405_v41 = vsel %vm3277_vm3, %v3037_v3, %v3341_v57  ;;  %v12796_v1 = vsel %vm3315_vm5, %v3189_v13, %v3379_v21  ;;  %v3194_v24 = vadd.f32 %v3193_v49, %v12642_v51  ;;  %v15512_v51 = vpack.c.bf16 %v12597_v4, %v12595_v46 }
 0x574   :  { %v3466_v59 = vpack.c.bf16 %v3405_v41, %v3404_v5  ;;  %v3485_v7 = vpack.c.bf16 %v12796_v1, %v12794_v10  ;;  %v3195_v12 = vpop.f32.mrf.mxu1  ;;  %v15513_v46 = vpack.c.bf16 %v12610_v45, %v12608_v50  ;;  %v15515_v49 = vpack.c.bf16 %v12634_v17, %v12632_v0  ;;  %v15534_v10 = vld [vmem:[#allocation9_spill] sm:$0xff] }
 0x575   :  { %v3380_v22 = vmul.f32 0.01, %v3194_v24  ;;  %vm3316_vm6 = vcmp.gt.f32.partialorder %v3194_v24, 0.0  ;;  %v15517_v12 = vpack.c.bf16 %v12658_v60, %v12656_v61  ;;  %v15518_v0 = vpack.c.bf16 %v12670_v58, %v12668_v8 }
 0x576   :  { %v3196_v30 = vpop.f32.mrf.mxu1  ;;  %10708 = vmatprep.mubr.msk.bf16.mxu0 %vm2276_vm4, %v3466_v59  ;;  %v15520_v61 = vpack.c.bf16 %v12694_v55, %v12692_v6  ;;  %v15521_v8 = vpack.c.bf16 %v12706_v54, %v12704_v39  ;;  %v15523_v6 = vpack.c.bf16 %v12730_v26, %v12728_v35  ;;  %v15524_v39 = vpack.c.bf16 %v12742_v2, %v12740_v52  ;;  %v15527_v35 = vld [vmem:[#allocation21_spill] sm:$0xff] }
 0x577   :  { %v3197_v11 = vadd.f32 %v3196_v30, %v12651_v19  ;;  %10709 = vmatmul.mubr.msk.bf16.gmra.mxu0 %vm2276_vm4, %v15511_v23  ;;  %v12811_v29 = vsel %vm3316_vm6, %v3194_v24, %v3380_v22  ;;  %v15525_v9 = vpack.c.bf16 %v12754_v27, %v12752_v25  ;;  %v15529_v27 = vld [vmem:[#allocation6_spill] sm:$0xff] }
 0x578   :  { %v3198_v63 = vpop.f32.mrf.mxu1  ;;  %10712 = vmatprep.mubr.msk.bf16.mxu0 %vm2276_vm4, %v15512_v51 }
 0x579   :  { %vm3317_vm7 = vcmp.gt.f32.partialorder %v3197_v11, 0.0  ;;  %v3381_v37 = vmul.f32 0.01, %v3197_v11 }
 0x57a   :  { %v3201_v44 = vpop.f32.mrf.mxu1 }
 0x57b   :  { %v12813_v36 = vsel %vm3317_vm7, %v3197_v11, %v3381_v37  ;;  %v3202_v19 = vadd.f32 %v3201_v44, %v12654_v47 }
 0x57c   :  { %v3486_v43 = vpack.c.bf16 %v12813_v36, %v12811_v29  ;;  %v3203_v32 = vpop.f32.mrf.mxu1 }
 0x57d   :  { %v3382_v13 = vmul.f32 0.01, %v3202_v19  ;;  %vm3318_vm8 = vcmp.gt.f32.partialorder %v3202_v19, 0.0  ;;  %v15526_v32 = vld [vmem:[#allocation22_spill] sm:$0xff] }
 0x57e   :  { %v3204_v3 = vpop.f32.mrf.mxu1  ;;  %v15528_v26 = vpack.c.bf16 %v15526_v32, %v15527_v35 }
 0x57f   :  { %v3205_v38 = vadd.f32 %v3204_v3, %v12663_v20  ;;  %10713 = vmatmul.mubr.msk.bf16.gmra.mxu0 %vm2276_vm4, %v15513_v46  ;;  %v12827_v21 = vsel %vm3318_vm8, %v3202_v19, %v3382_v13 }
 0x580   :  { %v3206_v4 = vpop.f32.mrf.mxu1  ;;  %10716 = vmatprep.mubr.msk.bf16.mxu0 %vm2276_vm4, %v15514_v31 }
 0x581   :  { %vm3319_vm9 = vcmp.gt.f32.partialorder %v3205_v38, 0.0  ;;  %v3383_v47 = vmul.f32 0.01, %v3205_v38  ;;  %v15530_v4 = vld [vmem:[#allocation5_spill] sm:$0xff] }
 0x582   :  { %v3209_v57 = vpop.f32.mrf.mxu1 }
 0x583   :  { %v12829_v5 = vsel %vm3319_vm9, %v3205_v38, %v3383_v47  ;;  %v3210_v31 = vadd.f32 %v3209_v57, %v15530_v4 }
 0x584   :  { %v3487_v20 = vpack.c.bf16 %v12829_v5, %v12827_v21  ;;  %v3211_v50 = vpop.f32.mrf.mxu1  ;;  %v15538_v5 = vld [vmem:[#allocation13_spill] sm:$0xff] }
 0x585   :  { %v3384_v56 = vmul.f32 0.01, %v3210_v31  ;;  %vm3320_vm11 = vcmp.gt.f32.partialorder %v3210_v31, 0.0 }
 0x586   :  { %v3212_v45 = vpop.f32.mrf.mxu1 }
 0x587   :  { %10717 = vmatmul.mubr.msk.bf16.gmra.mxu0 %vm2276_vm4, %v15515_v49  ;;  %v3213_v38 = vadd.f32 %v3212_v45, %v15529_v27  ;;  %v15533_v45 = vld [vmem:[#allocation7_spill] sm:$0xff] }
 0x588   :  { %v3214_v18 = vpop.f32.mrf.mxu1  ;;  %10720 = vmatprep.mubr.msk.bf16.mxu0 %vm2276_vm4, %v15516_v28 }
 0x589   :  { %v3385_v50 = vmul.f32 0.01, %v3213_v38  ;;  %vm3321_vm10 = vcmp.gt.f32.partialorder %v3213_v38, 0.0  ;;  %v3448_v18 = vsel %vm3320_vm11, %v3210_v31, %v3384_v56 }
 0x58a   :  { %v3217_v41 = vpop.f32.mrf.mxu1 }
 0x58b   :  { %v3449_v15 = vsel %vm3321_vm10, %v3213_v38, %v3385_v50  ;;  %v3218_v49 = vadd.f32 %v3217_v41, %v15533_v45  ;;  %v15535_v41 = vld [vmem:[#allocation12_spill] sm:$0xff] }
 0x58c   :  { %v3219_v24 = vpop.f32.mrf.mxu1 }
 0x58d   :  { %v3386_v29 = vmul.f32 0.01, %v3218_v49  ;;  %vm3322_vm14 = vcmp.gt.f32.partialorder %v3218_v49, 0.0 }
 0x58e   :  { %v3220_v59 = vpop.f32.mrf.mxu1 }
 0x58f   :  { %10721 = vmatmul.mubr.msk.bf16.gmra.mxu0 %vm2276_vm4, %v15517_v12 }
 0x590   :  { %v3222_v30 = vpop.f32.mrf.mxu1  ;;  %10724 = vmatprep.mubr.msk.bf16.mxu0 %vm2276_vm4, %v15518_v0 }
 0x591   :  { %v15536_v30 = vld [vmem:[#allocation14_spill] sm:$0xff] }
 0x592   :  { %v3225_v17 = vpop.f32.mrf.mxu1 }
 0x593   :  { %v3226_v1 = vadd.f32 %v3225_v17, %v15534_v10  ;;  %v3450_v17 = vsel %vm3322_vm14, %v3218_v49, %v3386_v29 }
 0x594   :  { %v3227_v22 = vpop.f32.mrf.mxu1 }
 0x595   :  { %v3388_v36 = vmul.f32 0.01, %v3226_v1  ;;  %vm3324_vm15 = vcmp.gt.f32.partialorder %v3226_v1, 0.0  ;;  %v15537_v22 = vld [vmem:[#allocation11_spill] sm:$0xff] }
 0x596   :  { %v3228_v11 = vpop.f32.mrf.mxu1 }
 0x597   :  { %10725 = vmatmul.mubr.msk.bf16.gmra.mxu0 %vm2276_vm4, %v15519_v14  ;;  %v3452_v21 = vsel %vm3324_vm15, %v3226_v1, %v3388_v36 }
 0x598   :  { %v3230_v16 = vpop.f32.mrf.mxu1  ;;  %10728 = vmatprep.mubr.msk.bf16.mxu0 %vm2276_vm4, %v15520_v61 }
 0x59a   :  { %v3233_v60 = vpop.f32.mrf.mxu1 }
 0x59c   :  { %v3235_v23 = vpop.f32.mrf.mxu1 }
 0x59e   :  { %v3236_v63 = vpop.f32.mrf.mxu1 }
 0x59f   :  { %10729 = vmatmul.mubr.msk.bf16.gmra.mxu0 %vm2276_vm4, %v15521_v8 }
 0x5a0   :  { %v3238_v58 = vpop.f32.mrf.mxu1  ;;  %10732 = vmatprep.mubr.msk.bf16.mxu0 %vm2276_vm4, %v15522_v42  ;;  %v15539_v42 = vld [vmem:[#allocation16_spill] sm:$0xff] }
 0x5a2   :  { %v3241_v33 = vpop.f32.mrf.mxu1 }
 0x5a4   :  { %v3243_v51 = vpop.f32.mrf.mxu1 }
 0x5a6   :  { %v3244_v37 = vpop.f32.mrf.mxu1 }
 0x5a7   :  { %10733 = vmatmul.mubr.msk.bf16.gmra.mxu0 %vm2276_vm4, %v15523_v6  ;;  %v3245_v0 = vadd.f32 %v3244_v37, %v15536_v30  ;;  %v15540_v37 = vld [vmem:[#allocation18_spill] sm:$0xff] }
 0x5a8   :  { %v3246_v55 = vpop.f32.mrf.mxu1  ;;  %10736 = vmatprep.mubr.msk.bf16.mxu0 %vm2276_vm4, %v15524_v39 }
 0x5a9   :  { %v3393_v23 = vmul.f32 0.01, %v3245_v0  ;;  %vm3329_vm1 = vcmp.gt.f32.partialorder %v3245_v0, 0.0  ;;  %v15541_v55 = vld [vmem:[#allocation15_spill] sm:$0xff] }
 0x5aa   :  { %v12873_v54 = vpop.f32.mrf.mxu1 }
 0x5ab   :  { %v3457_v51 = vsel %vm3329_vm1, %v3245_v0, %v3393_v23  ;;  %v3250_v39 = vadd.f32 %v12873_v54, %v15541_v55  ;;  %v15543_v54 = vld [vmem:[#allocation20_spill] sm:$0xff] }
 0x5ac   :  { %v3251_v44 = vpop.f32.mrf.mxu1 }
 0x5ad   :  { %vm3330_vm7 = vcmp.gt.f32.partialorder %v3250_v39, 0.0 }
 0x5ae   :  { %v3252_v34 = vpop.f32.mrf.mxu1 }
 0x5af   :  { %10737 = vmatmul.mubr.msk.bf16.gmra.mxu0 %vm2276_vm4, %v15525_v9 }
 0x5b0   :  { %v3254_v19 = vpop.f32.mrf.mxu1  ;;  %10740 = vmatprep.mubr.msk.bf16.mxu0 %vm2276_vm4, %v15528_v26 }
 0x5b1   :  { %v15542_v19 = vld [vmem:[#allocation17_spill] sm:$0xff] }
 0x5b2   :  { %v12883_v3 = vpop.f32.mrf.mxu1 }
 0x5b3   :  { %v3258_v32 = vadd.f32 %v12883_v3, %v15542_v19  ;;  %v15544_v3 = vld [vmem:[#allocation19_spill] sm:$0xff] }
 0x5b4   :  { %v3259_v52 = vpop.f32.mrf.mxu1 }
 0x5b5   :  { %vm3332_vm8 = vcmp.gt.f32.partialorder %v3258_v32, 0.0 }
 0x5b6   :  { %v3260_v2 = vpop.f32.mrf.mxu1 }
 0x5b7   :  { %10741 = vmatmul.mubr.msk.bf16.gmra.mxu0 %vm2276_vm4, %v3483_v62  ;;  %v15531_v62 = vld [vmem:[#allocation8_spill] sm:$0xff]  ;;  %v3261_v6 = vadd.f32 %v3260_v2, %v15540_v37 }
 0x5b8   :  { %v3262_v13 = vpop.f32.mrf.mxu1  ;;  %10744 = vmatprep.mubr.msk.bf16.mxu0 %vm2276_vm4, %v3484_v48  ;;  %v3221_v53 = vadd.f32 %v3220_v59, %v15531_v62  ;;  %v15532_v48 = vld [vmem:[#allocation10_spill] sm:$0xff]  ;;  %v3237_v59 = vadd.f32 %v3236_v63, %v15535_v41 }
 0x5b9   :  { %v3229_v57 = vadd.f32 %v3228_v11, %v15532_v48  ;;  %v3234_v11 = vadd.f32 %v3233_v60, %v15537_v22  ;;  %v3253_v60 = vadd.f32 %v3252_v34, %v15539_v42  ;;  %v3397_v52 = vmul.f32 0.01, %v3261_v6 }
 0x5ba   :  { %v12893_v25 = vpop.f32.mrf.mxu1  ;;  %v3387_v28 = vmul.f32 0.01, %v3221_v53  ;;  %vm3323_vm12 = vcmp.gt.f32.partialorder %v3221_v53, 0.0  ;;  %v3391_v61 = vmul.f32 0.01, %v3237_v59  ;;  %vm3327_vm0 = vcmp.gt.f32.partialorder %v3237_v59, 0.0 }
 0x5bb   :  { %v3389_v24 = vmul.f32 0.01, %v3229_v57  ;;  %vm3325_vm13 = vcmp.gt.f32.partialorder %v3229_v57, 0.0  ;;  %v3390_v8 = vmul.f32 0.01, %v3234_v11  ;;  %vm3326_vm2 = vcmp.gt.f32.partialorder %v3234_v11, 0.0 }
 0x5bc   :  { %v3267_v46 = vpop.f32.mrf.mxu1  ;;  %v3455_v58 = vsel %vm3327_vm0, %v3237_v59, %v3391_v61  ;;  %v3395_v26 = vmul.f32 0.01, %v3253_v60  ;;  %vm3331_vm5 = vcmp.gt.f32.partialorder %v3253_v60, 0.0  ;;  %v3394_v13 = vmul.f32 0.01, %v3250_v39 }
 0x5bd   :  { %v3453_v12 = vsel %vm3325_vm13, %v3229_v57, %v3389_v24  ;;  %vm3333_vm6 = vcmp.gt.f32.partialorder %v3261_v6, 0.0  ;;  %v3396_v34 = vmul.f32 0.01, %v3258_v32  ;;  %v3266_v4 = vadd.f32 %v12893_v25, %v15544_v3 }
 0x5be   :  { %v12897_v47 = vpop.f32.mrf.mxu1  ;;  %v3490_v16 = vpack.c.bf16 %v3453_v12, %v3452_v21  ;;  %v3459_v2 = vsel %vm3331_vm5, %v3253_v60, %v3395_v26  ;;  %v3461_v38 = vsel %vm3333_vm6, %v3261_v6, %v3397_v52  ;;  %v3458_v46 = vsel %vm3330_vm7, %v3250_v39, %v3394_v13 }
 0x5bf   :  { %10745 = vmatmul.mubr.msk.bf16.gmra.mxu0 %vm2276_vm4, %v3485_v7  ;;  %v3488_v7 = vpack.c.bf16 %v3449_v15, %v3448_v18  ;;  %v3269_v27 = vadd.f32 %v12897_v47, %v15543_v54  ;;  %v3493_v31 = vpack.c.bf16 %v3459_v2, %v3458_v46  ;;  %v3460_v50 = vsel %vm3332_vm8, %v3258_v32, %v3396_v34  ;;  %v11650_v47 = vld [vmem:[#allocation2 + $0xc] ss:$16 sps:$4 sm:$0xff]  }
 0x5c0   :  { %10748 = vmatprep.mubr.msk.bf16.mxu0 %vm2276_vm4, %v3486_v43  ;;  %v3270_v40 = vpop.f32.mrf.mxu1  ;;  %v3451_v43 = vsel %vm3323_vm12, %v3221_v53, %v3387_v28  ;;  %v3398_v62 = vmul.f32 0.01, %v3266_v4  ;;  %vm3334_vm10 = vcmp.gt.f32.partialorder %v3266_v4, 0.0 }
 0x5c1   :  { %v3489_v14 = vpack.c.bf16 %v3451_v43, %v3450_v17  ;;  %v3494_v40 = vpack.c.bf16 %v3461_v38, %v3460_v50  ;;  %v3399_v56 = vmul.f32 0.01, %v3269_v27  ;;  %vm3335_vm9 = vcmp.gt.f32.partialorder %v3269_v27, 0.0 }
 0x5c2   :  { %v3462_v15 = vsel %vm3334_vm10, %v3266_v4, %v3398_v62  ;;  %v15545_v17 = vmov 0  }
 0x5c3   :  { %v3463_v53 = vsel %vm3335_vm9, %v3269_v27, %v3399_v56 }
 0x5c4   :  { %v3495_v48 = vpack.c.bf16 %v3463_v53, %v3462_v15 }
 0x5c7   :  { %10749 = vmatmul.mubr.msk.bf16.gmra.mxu0 %vm2276_vm4, %v3487_v20  ;;  %v3242_v20 = vadd.f32 %v3241_v33, %v15538_v5  ;;  %v3454_v33 = vsel %vm3326_vm2, %v3234_v11, %v3390_v8 }
 0x5c8   :  { %10752 = vmatprep.mubr.msk.bf16.mxu0 %vm2276_vm4, %v3488_v7  ;;  %v3491_v44 = vpack.c.bf16 %v3455_v58, %v3454_v33 }
 0x5c9   :  { %v3392_v63 = vmul.f32 0.01, %v3242_v20  ;;  %vm3328_vm3 = vcmp.gt.f32.partialorder %v3242_v20, 0.0 }
 0x5cb   :  { %v3456_v9 = vsel %vm3328_vm3, %v3242_v20, %v3392_v63 }
 0x5cc   :  { %v3492_v35 = vpack.c.bf16 %v3457_v51, %v3456_v9 }
 0x5cf   :  { %10753 = vmatmul.mubr.msk.bf16.gmra.mxu0 %vm2276_vm4, %v3489_v14 }
 0x5d0   :  { %10756 = vmatprep.mubr.msk.bf16.mxu0 %vm2276_vm4, %v3490_v16 }
 0x5d7   :  { %10757 = vmatmul.mubr.msk.bf16.gmra.mxu0 %vm2276_vm4, %v3491_v44 }
 0x5d8   :  { %10760 = vmatprep.mubr.msk.bf16.mxu0 %vm2276_vm4, %v3492_v35 }
 0x5df   :  { %10761 = vmatmul.mubr.msk.bf16.gmra.mxu0 %vm2276_vm4, %v3493_v31 }
 0x5e0   :  { %10764 = vmatprep.mubr.msk.bf16.mxu0 %vm2276_vm4, %v3494_v40 }
 0x5e7   :  { %10765 = vmatmul.mubr.msk.bf16.gmra.mxu0 %vm2276_vm4, %v3495_v48 }
 0x5e8   :  { %4251 = vmatprep.mubr.bf16.mxu0 %v11650_v47 }
 0x62e   :  { %v10706_v57 = vpop.f32.mrf.mxu0 }
 0x630   :  { %v3643_v25 = vpop.f32.mrf.mxu0 }
 0x632   :  { %v10707_v45 = vpop.f32.mrf.mxu0 }
 0x633   :  { %v3899_v37 = vpack.c.bf16 %v10707_v45, %v10706_v57  ;;  %v11651_v45 = vld [vmem:[#allocation2] ss:$16 sps:$4 sm:$0xff]  }
 0x634   :  { %v3646_v49 = vpop.f32.mrf.mxu0 }
 0x635   :  { %v3898_v55 = vpack.c.bf16 %v3646_v49, %v3643_v25  ;;  %v11652_v49 = vld [vmem:[#allocation2 + $0x24] ss:$16 sps:$4 sm:$0xff]  }
 0x637   :  { %v10710_v18 = vpop.f32.mrf.mxu0 }
 0x639   :  { %v3659_v10 = vpop.f32.mrf.mxu0 }
 0x63b   :  { %v10711_v1 = vpop.f32.mrf.mxu0 }
 0x63c   :  { %v3901_v8 = vpack.c.bf16 %v10711_v1, %v10710_v18 }
 0x63d   :  { %v3662_v7 = vpop.f32.mrf.mxu0 }
 0x63e   :  { %v3900_v42 = vpack.c.bf16 %v3662_v7, %v3659_v10 }
 0x63f   :  { %v10714_v28 = vpop.f32.mrf.mxu0 }
 0x641   :  { %v3675_v24 = vpop.f32.mrf.mxu0 }
 0x643   :  { %v10715_v29 = vpop.f32.mrf.mxu0 }
 0x644   :  { %v3903_v21 = vpack.c.bf16 %v10715_v29, %v10714_v28  ;;  %v11653_v29 = vld [vmem:[#allocation2 + $0x20] ss:$16 sps:$4 sm:$0xff]  }
 0x645   :  { %v3678_v36 = vpop.f32.mrf.mxu0 }
 0x646   :  { %v3902_v16 = vpack.c.bf16 %v3678_v36, %v3675_v24  ;;  %v11654_v36 = vld [vmem:[#allocation2 + $0x44] ss:$16 sps:$4 sm:$0xff]  }
 0x647   :  { %v10718_v43 = vpop.f32.mrf.mxu0 }
 0x649   :  { %v3691_v41 = vpop.f32.mrf.mxu0 }
 0x64b   :  { %v10719_v59 = vpop.f32.mrf.mxu0 }
 0x64c   :  { %v3905_v12 = vpack.c.bf16 %v10719_v59, %v10718_v43 }
 0x64d   :  { %v3694_v30 = vpop.f32.mrf.mxu0 }
 0x64e   :  { %3931 = vmatpush1.bf16.msra.mxu1 %v3905_v12  ;;  %v3904_v22 = vpack.c.bf16 %v3694_v30, %v3691_v41 }
 0x64f   :  { %v12937_v0 = vpop.f32.mrf.mxu0  ;;  %3932 = vmatprep.subr.bf16.mxu1 %v15545_v17 }
 0x651   :  { %v12940_v11 = vpop.f32.mrf.mxu0 }
 0x652   :  { %3933 = vmatpush1.bf16.msra.mxu1 %v3904_v22  ;;  %v11655_v22 = vld [vmem:[#allocation2 + $0x40] ss:$16 sps:$4 sm:$0xff]  }
 0x653   :  { %v12942_v14 = vpop.f32.mrf.mxu0  ;;  %3934 = vmatprep.subr.bf16.mxu1 %v15545_v17 }
 0x654   :  { %v3907_v56 = vpack.c.bf16 %v12942_v14, %v12937_v0 }
 0x655   :  { %v12945_v5 = vpop.f32.mrf.mxu0 }
 0x656   :  { %3935 = vmatpush1.bf16.msra.mxu1 %v3903_v21  ;;  %v3906_v15 = vpack.c.bf16 %v12945_v5, %v12940_v11  ;;  %v11656_v11 = vld [vmem:[#allocation2 + $0x64] ss:$16 sps:$4 sm:$0xff]  }
 0x657   :  { %v10726_v20 = vpop.f32.mrf.mxu0  ;;  %3936 = vmatprep.subr.bf16.mxu1 %v15545_v17 }
 0x659   :  { %v3723_v61 = vpop.f32.mrf.mxu0 }
 0x65a   :  { %3937 = vmatpush1.bf16.msra.mxu1 %v3902_v16 }
 0x65b   :  { %v10727_v23 = vpop.f32.mrf.mxu0  ;;  %3938 = vmatprep.subr.bf16.mxu1 %v15545_v17 }
 0x65c   :  { %v3909_v46 = vpack.c.bf16 %v10727_v23, %v10726_v20  ;;  %v11657_v23 = vld [vmem:[#allocation2 + $0x60] ss:$16 sps:$4 sm:$0xff]  }
 0x65d   :  { %v3726_v63 = vpop.f32.mrf.mxu0 }
 0x65e   :  { %3939 = vmatpush1.bf16.msra.mxu1 %v3901_v8  ;;  %v3908_v31 = vpack.c.bf16 %v3726_v63, %v3723_v61  ;;  %v11658_v8 = vld [vmem:[#allocation2 + $0x84] ss:$16 sps:$4 sm:$0xff]  }
 0x65f   :  { %v10730_v58 = vpop.f32.mrf.mxu0  ;;  %3940 = vmatprep.subr.bf16.mxu1 %v15545_v17 }
 0x661   :  { %v3739_v60 = vpop.f32.mrf.mxu0 }
 0x662   :  { %3941 = vmatpush1.bf16.msra.mxu1 %v3900_v42 }
 0x663   :  { %v10731_v51 = vpop.f32.mrf.mxu0  ;;  %3942 = vmatprep.subr.bf16.mxu1 %v15545_v17 }
 0x664   :  { %v3911_v13 = vpack.c.bf16 %v10731_v51, %v10730_v58 }
 0x665   :  { %v3742_v6 = vpop.f32.mrf.mxu0 }
 0x666   :  { %3943 = vmatpush1.bf16.msra.mxu1 %v3899_v37  ;;  %v3910_v54 = vpack.c.bf16 %v3742_v6, %v3739_v60  ;;  %v11659_v6 = vld [vmem:[#allocation2 + $0x80] ss:$16 sps:$4 sm:$0xff]  }
 0x667   :  { %v10734_v33 = vpop.f32.mrf.mxu0  ;;  %3944 = vmatprep.subr.bf16.mxu1 %v15545_v17 }
 0x669   :  { %v3755_v39 = vpop.f32.mrf.mxu0 }
 0x66a   :  { %3945 = vmatpush1.bf16.msra.mxu1 %v3898_v55 }
 0x66b   :  { %v10735_v44 = vpop.f32.mrf.mxu0  ;;  %3946 = vmatprep.subr.bf16.mxu1 %v15545_v17 }
 0x66c   :  { %v3913_v9 = vpack.c.bf16 %v10735_v44, %v10734_v33  ;;  %v11660_v33 = vld [vmem:[#allocation2 + $0xa4] ss:$16 sps:$4 sm:$0xff]   ;;  %v11661_v44 = vld [vmem:[#allocation2 + $0xa0] ss:$16 sps:$4 sm:$0xff]  }
 0x66d   :  { %v3758_v19 = vpop.f32.mrf.mxu0 }
 0x66e   :  { %3947 = vmatpush2.bf16.msra.mxu1 %v3913_v9  ;;  %v3912_v35 = vpack.c.bf16 %v3758_v19, %v3755_v39  ;;  %v11662_v9 = vld [vmem:[#allocation2 + $0xc4] ss:$16 sps:$4 sm:$0xff]  }
 0x66f   :  { %v12953_v32 = vpop.f32.mrf.mxu0  ;;  %3948 = vmatprep.subr.bf16.mxu1 %v15545_v17 }
 0x671   :  { %v12956_v26 = vpop.f32.mrf.mxu0 }
 0x672   :  { %3949 = vmatpush2.bf16.msra.mxu1 %v3912_v35  ;;  %v11663_v35 = vld [vmem:[#allocation2 + $0xc0] ss:$16 sps:$4 sm:$0xff]  }
 0x673   :  { %v12958_v52 = vpop.f32.mrf.mxu0  ;;  %3950 = vmatprep.subr.bf16.mxu1 %v15545_v17 }
 0x674   :  { %v3915_v16 = vpack.c.bf16 %v12958_v52, %v12953_v32 }
 0x675   :  { %v12961_v34 = vpop.f32.mrf.mxu0 }
 0x676   :  { %3951 = vmatpush2.bf16.msra.mxu1 %v3911_v13  ;;  %v3914_v58 = vpack.c.bf16 %v12961_v34, %v12956_v26  ;;  %v11664_v26 = vld [vmem:[#allocation2 + $0xe4] ss:$16 sps:$4 sm:$0xff]   ;;  %v11665_v34 = vld [vmem:[#allocation2 + $0xe0] ss:$16 sps:$4 sm:$0xff]  }
 0x677   :  { %v10742_v2 = vpop.f32.mrf.mxu0  ;;  %3952 = vmatprep.subr.bf16.mxu1 %v15545_v17 }
 0x679   :  { %v3787_v27 = vpop.f32.mrf.mxu0 }
 0x67a   :  { %3953 = vmatpush2.bf16.msra.mxu1 %v3910_v54 }
 0x67b   :  { %v10743_v38 = vpop.f32.mrf.mxu0  ;;  %3954 = vmatprep.subr.bf16.mxu1 %v15545_v17 }
 0x67c   :  { %v3917_v30 = vpack.c.bf16 %v10743_v38, %v10742_v2  ;;  %v11666_v2 = vld [vmem:[#allocation2 + $0x104] ss:$16 sps:$4 sm:$0xff]   ;;  %v11668_v38 = vld [vmem:[#allocation2 + $0x100] ss:$16 sps:$4 sm:$0xff]  }
 0x67d   :  { %v3790_v3 = vpop.f32.mrf.mxu0 }
 0x67e   :  { %3955 = vmatpush2.bf16.msra.mxu1 %v3909_v46  ;;  %v3916_v21 = vpack.c.bf16 %v3790_v3, %v3787_v27  ;;  %v11667_v27 = vld [vmem:[#allocation2 + $0x8] ss:$16 sps:$4 sm:$0xff]   ;;  %v11669_v46 = vld [vmem:[#allocation2 + $0x2c] ss:$16 sps:$4 sm:$0xff]   ;;  %v11670_v3 = vld [vmem:[#allocation2 + $0x124] ss:$16 sps:$4 sm:$0xff]  }
 0x67f   :  { %v10746_v4 = vpop.f32.mrf.mxu0  ;;  %3956 = vmatprep.subr.bf16.mxu1 %v15545_v17 }
 0x681   :  { %v3803_v50 = vpop.f32.mrf.mxu0 }
 0x682   :  { %3957 = vmatpush2.bf16.msra.mxu1 %v3908_v31  ;;  %v11672_v31 = vld [vmem:[#allocation2 + $0x120] ss:$16 sps:$4 sm:$0xff]  }
 0x683   :  { %v10747_v40 = vpop.f32.mrf.mxu0  ;;  %3958 = vmatprep.subr.bf16.mxu1 %v15545_v17 }
 0x684   :  { %v3919_v28 = vpack.c.bf16 %v10747_v40, %v10746_v4  ;;  %v11671_v4 = vld [vmem:[#allocation2 + $0x28] ss:$16 sps:$4 sm:$0xff]   ;;  %v11674_v40 = vld [vmem:[#allocation2 + $0x144] ss:$16 sps:$4 sm:$0xff]  }
 0x685   :  { %v3806_v62 = vpop.f32.mrf.mxu0 }
 0x686   :  { %3959 = vmatpush2.bf16.msra.mxu1 %v3907_v56  ;;  %v3918_v41 = vpack.c.bf16 %v3806_v62, %v3803_v50  ;;  %v11673_v50 = vld [vmem:[#allocation2 + $0x4c] ss:$16 sps:$4 sm:$0xff]   ;;  %v11675_v56 = vld [vmem:[#allocation2 + $0x48] ss:$16 sps:$4 sm:$0xff]   ;;  %v11676_v62 = vld [vmem:[#allocation2 + $0x140] ss:$16 sps:$4 sm:$0xff]  }
 0x687   :  { %v10750_v53 = vpop.f32.mrf.mxu0  ;;  %3960 = vmatprep.subr.bf16.mxu1 %v15545_v17 }
 0x689   :  { %v3819_v48 = vpop.f32.mrf.mxu0 }
 0x68a   :  { %3961 = vmatpush2.bf16.msra.mxu1 %v3906_v15  ;;  %v11678_v15 = vld [vmem:[#allocation2 + $0x164] ss:$16 sps:$4 sm:$0xff]  }
 0x68b   :  { %v10751_v47 = vpop.f32.mrf.mxu0 }
 0x68c   :  { %v3921_v57 = vpack.c.bf16 %v10751_v47, %v10750_v53  ;;  %v11677_v53 = vld [vmem:[#allocation2 + $0x6c] ss:$16 sps:$4 sm:$0xff]   ;;  %v11680_v47 = vld [vmem:[#allocation2 + $0x160] ss:$16 sps:$4 sm:$0xff]  }
 0x68d   :  { %v3822_v25 = vpop.f32.mrf.mxu0  ;;  %3963 = vmatmul.mubr.bf16.vlgmr.msra.gmra.mxu1 %v11651_v45  ;;  %v11683_v45 = vld [vmem:[#allocation2 + $0x88] ss:$16 sps:$4 sm:$0xff]  }
 0x68e   :  { %4220 = vmatpush1.bf16.msra.mxu0 %v3921_v57  ;;  %3970 = vmatprep.mubr.bf16.mxu1 %v11652_v49  ;;  %v3920_v10 = vpack.c.bf16 %v3822_v25, %v3819_v48  ;;  %v11679_v48 = vld [vmem:[#allocation2 + $0x68] ss:$16 sps:$4 sm:$0xff]   ;;  %v11681_v57 = vld [vmem:[#allocation2 + $0x8c] ss:$16 sps:$4 sm:$0xff]   ;;  %v11682_v25 = vld [vmem:[#allocation2 + $0x184] ss:$16 sps:$4 sm:$0xff]  }
 0x68f   :  { %v12972_v18 = vpop.f32.mrf.mxu0  ;;  %4221 = vmatprep.subr.bf16.mxu0 %v15545_v17  ;;  %v11684_v49 = vld [vmem:[#allocation2 + $0x180] ss:$16 sps:$4 sm:$0xff]  }
 0x691   :  { %v12975_v1 = vpop.f32.mrf.mxu0 }
 0x692   :  { %4222 = vmatpush1.bf16.msra.mxu0 %v3920_v10  ;;  %v11686_v10 = vld [vmem:[#allocation2 + $0x1a4] ss:$16 sps:$4 sm:$0xff]  }
 0x693   :  { %v12977_v7 = vpop.f32.mrf.mxu0  ;;  %4223 = vmatprep.subr.bf16.mxu0 %v15545_v17 }
 0x694   :  { %v3923_v13 = vpack.c.bf16 %v12977_v7, %v12972_v18  ;;  %v11685_v18 = vld [vmem:[#allocation2 + $0xac] ss:$16 sps:$4 sm:$0xff]   ;;  %v11688_v7 = vld [vmem:[#allocation2 + $0x1a0] ss:$16 sps:$4 sm:$0xff]  }
 0x695   :  { %v12980_v24 = vpop.f32.mrf.mxu0  ;;  %3971 = vmatmul.mubr.bf16.gmra.mxu1 %v11653_v29  ;;  %v11691_v29 = vld [vmem:[#allocation2 + $0xc8] ss:$16 sps:$4 sm:$0xff]  }
 0x696   :  { %4224 = vmatpush1.bf16.msra.mxu0 %v3919_v28  ;;  %3978 = vmatprep.mubr.bf16.mxu1 %v11654_v36  ;;  %v3922_v54 = vpack.c.bf16 %v12980_v24, %v12975_v1  ;;  %v11687_v1 = vld [vmem:[#allocation2 + $0xa8] ss:$16 sps:$4 sm:$0xff]   ;;  %v11689_v28 = vld [vmem:[#allocation2 + $0xcc] ss:$16 sps:$4 sm:$0xff]   ;;  %v11690_v24 = vld [vmem:[#allocation2 + $0x1c4] ss:$16 sps:$4 sm:$0xff]  }
 0x697   :  { %v10758_v43 = vpop.f32.mrf.mxu0  ;;  %4225 = vmatprep.subr.bf16.mxu0 %v15545_v17  ;;  %v11692_v36 = vld [vmem:[#allocation2 + $0x1c0] ss:$16 sps:$4 sm:$0xff]  }
 0x699   :  { %v3851_v59 = vpop.f32.mrf.mxu0 }
 0x69a   :  { %4226 = vmatpush1.bf16.msra.mxu0 %v3918_v41  ;;  %v11694_v41 = vld [vmem:[#allocation2 + $0x1e4] ss:$16 sps:$4 sm:$0xff]  }
 0x69b   :  { %v10759_v12 = vpop.f32.mrf.mxu0  ;;  %4227 = vmatprep.subr.bf16.mxu0 %v15545_v17 }
 0x69c   :  { %v3925_v32 = vpack.c.bf16 %v10759_v12, %v10758_v43  ;;  %v11693_v43 = vld [vmem:[#allocation2 + $0xec] ss:$16 sps:$4 sm:$0xff]   ;;  %v11696_v12 = vld [vmem:[#allocation2 + $0x1e0] ss:$16 sps:$4 sm:$0xff]  }
 0x69d   :  { %v3854_v0 = vpop.f32.mrf.mxu0  ;;  %3979 = vmatmul.mubr.bf16.gmra.mxu1 %v11655_v22  ;;  %v11699_v22 = vld [vmem:[#allocation2 + $0x108] ss:$16 sps:$4 sm:$0xff]  }
 0x69e   :  { %4228 = vmatpush1.bf16.msra.mxu0 %v3917_v30  ;;  %3986 = vmatprep.mubr.bf16.mxu1 %v11656_v11  ;;  %v3924_v52 = vpack.c.bf16 %v3854_v0, %v3851_v59  ;;  %v11695_v59 = vld [vmem:[#allocation2 + $0xe8] ss:$16 sps:$4 sm:$0xff]   ;;  %v11697_v30 = vld [vmem:[#allocation2 + $0x10c] ss:$16 sps:$4 sm:$0xff]   ;;  %v11698_v0 = vld [vmem:[#allocation2 + $0x204] ss:$16 sps:$4 sm:$0xff]  }
 0x69f   :  { %v10762_v14 = vpop.f32.mrf.mxu0  ;;  %4229 = vmatprep.subr.bf16.mxu0 %v15545_v17  ;;  %v11700_v11 = vld [vmem:[#allocation2 + $0x200] ss:$16 sps:$4 sm:$0xff]  }
 0x6a1   :  { %v3867_v5 = vpop.f32.mrf.mxu0 }
 0x6a2   :  { %4230 = vmatpush1.bf16.msra.mxu0 %v3916_v21  ;;  %v11702_v21 = vld [vmem:[#allocation2 + $0x224] ss:$16 sps:$4 sm:$0xff]  }
 0x6a3   :  { %v10763_v20 = vpop.f32.mrf.mxu0  ;;  %4231 = vmatprep.subr.bf16.mxu0 %v15545_v17 }
 0x6a4   :  { %v3927_v39 = vpack.c.bf16 %v10763_v20, %v10762_v14  ;;  %v11701_v14 = vld [vmem:[#allocation2 + $0x12c] ss:$16 sps:$4 sm:$0xff]   ;;  %v11704_v20 = vld [vmem:[#allocation2 + $0x220] ss:$16 sps:$4 sm:$0xff]  }
 0x6a5   :  { %v3870_v61 = vpop.f32.mrf.mxu0  ;;  %3987 = vmatmul.mubr.bf16.gmra.mxu1 %v11657_v23  ;;  %v11375_v23 = vld [vmem:[%s15403_s3 + $0x28] sm:$0xff]  }
 0x6a6   :  { %4232 = vmatpush1.bf16.msra.mxu0 %v3915_v16  ;;  %3994 = vmatprep.mubr.bf16.mxu1 %v11658_v8  ;;  %v3926_v19 = vpack.c.bf16 %v3870_v61, %v3867_v5  ;;  %v11703_v5 = vld [vmem:[#allocation2 + $0x128] ss:$16 sps:$4 sm:$0xff]   ;;  %v11705_v16 = vld [vmem:[#allocation2 + $0x14c] ss:$16 sps:$4 sm:$0xff]   ;;  %v11706_v61 = vld [vmem:[#allocation2 + $0x244] ss:$16 sps:$4 sm:$0xff]  }
 0x6a7   :  { %v10766_v63 = vpop.f32.mrf.mxu0  ;;  %4233 = vmatprep.subr.bf16.mxu0 %v15545_v17  ;;  %10768 = vmatprep.subr.bf16.mxu1 %v11375_v23  ;;  %v11376_v8 = vld [vmem:[%s15403_s3 + $0x20] sm:$0xff]  }
 0x6a8   :  { %10769 = vmatpush3.bf16.msra.mxu1 %v11375_v23 }
 0x6a9   :  { %v3883_v42 = vpop.f32.mrf.mxu0  ;;  %10770 = vmatprep.subr.bf16.mxu1 %v11376_v8 }
 0x6aa   :  { %4234 = vmatpush1.bf16.msra.mxu0 %v3914_v58  ;;  %v11708_v58 = vld [vmem:[#allocation2 + $0x240] ss:$16 sps:$4 sm:$0xff]  }
 0x6ab   :  { %v10767_v60 = vpop.f32.mrf.mxu0  ;;  %4235 = vmatprep.subr.bf16.mxu0 %v15545_v17 }
 0x6ac   :  { %v3929_v51 = vpack.c.bf16 %v10767_v60, %v10766_v63  ;;  %v11707_v63 = vld [vmem:[#allocation2 + $0x148] ss:$16 sps:$4 sm:$0xff]   ;;  %v11710_v60 = vld [vmem:[#allocation2 + $0x264] ss:$16 sps:$4 sm:$0xff]   ;;  %10771 = vmatpush3.bf16.msra.mxu1 %v11376_v8 }
 0x6ad   :  { %v3886_v37 = vpop.f32.mrf.mxu0  ;;  %3995 = vmatmul.mubr.bf16.gmra.mxu1 %v11659_v6  ;;  %5455 = vmatprep.subr.bf16.mxu1 %v15545_v17  ;;  %v11713_v6 = vld [vmem:[#allocation2 + $0x18c] ss:$16 sps:$4 sm:$0xff]  }
 0x6ae   :  { %4236 = vmatpush2.bf16.msra.mxu0 %v3929_v51  ;;  %4002 = vmatprep.mubr.bf16.mxu1 %v11660_v33  ;;  %v3928_v55 = vpack.c.bf16 %v3886_v37, %v3883_v42  ;;  %v11709_v42 = vld [vmem:[#allocation2 + $0x16c] ss:$16 sps:$4 sm:$0xff]   ;;  %v11711_v51 = vld [vmem:[#allocation2 + $0x168] ss:$16 sps:$4 sm:$0xff]   ;;  %v11712_v37 = vld [vmem:[#allocation2 + $0x260] ss:$16 sps:$4 sm:$0xff]  }
 0x6af   :  { %4237 = vmatprep.subr.bf16.mxu0 %v15545_v17  ;;  %v11714_v33 = vld [vmem:[#allocation2 + $0x284] ss:$16 sps:$4 sm:$0xff]  }
 0x6b2   :  { %4238 = vmatpush2.bf16.msra.mxu0 %v3928_v55  ;;  %v11715_v55 = vld [vmem:[#allocation2 + $0x188] ss:$16 sps:$4 sm:$0xff]  }
 0x6b3   :  { %4239 = vmatprep.subr.bf16.mxu0 %v15545_v17 }
 0x6b5   :  { %4003 = vmatmul.mubr.bf16.gmra.mxu1 %v11661_v44  ;;  %v11717_v44 = vld [vmem:[#allocation2 + $0x1ac] ss:$16 sps:$4 sm:$0xff]  }
 0x6b6   :  { %4240 = vmatpush2.bf16.msra.mxu0 %v3927_v39  ;;  %4010 = vmatprep.mubr.bf16.mxu1 %v11662_v9  ;;  %v11716_v39 = vld [vmem:[#allocation2 + $0x280] ss:$16 sps:$4 sm:$0xff]   ;;  %v11718_v9 = vld [vmem:[#allocation2 + $0x2a4] ss:$16 sps:$4 sm:$0xff]  }
 0x6b7   :  { %4241 = vmatprep.subr.bf16.mxu0 %v15545_v17 }
 0x6ba   :  { %4242 = vmatpush2.bf16.msra.mxu0 %v3926_v19  ;;  %v11719_v19 = vld [vmem:[#allocation2 + $0x1a8] ss:$16 sps:$4 sm:$0xff]  }
 0x6bb   :  { %4243 = vmatprep.subr.bf16.mxu0 %v15545_v17 }
 0x6bd   :  { %4011 = vmatmul.mubr.bf16.gmra.mxu1 %v11663_v35  ;;  %v11721_v35 = vld [vmem:[#allocation2 + $0x1cc] ss:$16 sps:$4 sm:$0xff]  }
 0x6be   :  { %4244 = vmatpush2.bf16.msra.mxu0 %v3925_v32  ;;  %4018 = vmatprep.mubr.bf16.mxu1 %v11664_v26  ;;  %v11720_v32 = vld [vmem:[#allocation2 + $0x2a0] ss:$16 sps:$4 sm:$0xff]   ;;  %v11722_v26 = vld [vmem:[#allocation2 + $0x2c4] ss:$16 sps:$4 sm:$0xff]  }
 0x6bf   :  { %4245 = vmatprep.subr.bf16.mxu0 %v15545_v17 }
 0x6c2   :  { %4246 = vmatpush2.bf16.msra.mxu0 %v3924_v52  ;;  %v11723_v52 = vld [vmem:[#allocation2 + $0x1c8] ss:$16 sps:$4 sm:$0xff]  }
 0x6c3   :  { %4247 = vmatprep.subr.bf16.mxu0 %v15545_v17 }
 0x6c5   :  { %4019 = vmatmul.mubr.bf16.gmra.mxu1 %v11665_v34  ;;  %v11725_v34 = vld [vmem:[#allocation2 + $0x1ec] ss:$16 sps:$4 sm:$0xff]  }
 0x6c6   :  { %4248 = vmatpush2.bf16.msra.mxu0 %v3923_v13  ;;  %4026 = vmatprep.mubr.bf16.mxu1 %v11666_v2  ;;  %v11724_v13 = vld [vmem:[#allocation2 + $0x2c0] ss:$16 sps:$4 sm:$0xff]   ;;  %v11726_v2 = vld [vmem:[#allocation2 + $0x2e4] ss:$16 sps:$4 sm:$0xff]  }
 0x6c7   :  { %4249 = vmatprep.subr.bf16.mxu0 %v15545_v17 }
 0x6ca   :  { %4250 = vmatpush2.bf16.msra.mxu0 %v3922_v54  ;;  %v11727_v54 = vld [vmem:[#allocation2 + $0x1e8] ss:$16 sps:$4 sm:$0xff]  }
 0x6cb   :  { %5166 = vmatprep.subr.bf16.mxu0 %v15545_v17 }
 0x6cd   :  { %4252 = vmatmul.mubr.bf16.vlgmr.msra.gmra.mxu0 %v11667_v27  ;;  %4027 = vmatmul.mubr.bf16.gmra.mxu1 %v11668_v38  ;;  %v11728_v27 = vld [vmem:[#allocation2 + $0x2e0] ss:$16 sps:$4 sm:$0xff]   ;;  %v11729_v38 = vld [vmem:[#allocation2 + $0x20c] ss:$16 sps:$4 sm:$0xff]  }
 0x6ce   :  { %4259 = vmatprep.mubr.bf16.mxu0 %v11669_v46  ;;  %4034 = vmatprep.mubr.bf16.mxu1 %v11670_v3  ;;  %v11730_v46 = vld [vmem:[#allocation2 + $0x304] ss:$16 sps:$4 sm:$0xff]   ;;  %v11731_v3 = vld [vmem:[#allocation2 + $0x208] ss:$16 sps:$4 sm:$0xff]  }
 0x6d5   :  { %4260 = vmatmul.mubr.bf16.gmra.mxu0 %v11671_v4  ;;  %4035 = vmatmul.mubr.bf16.gmra.mxu1 %v11672_v31  ;;  %v11732_v31 = vld [vmem:[#allocation2 + $0x300] ss:$16 sps:$4 sm:$0xff]  }
 0x6d6   :  { %4267 = vmatprep.mubr.bf16.mxu0 %v11673_v50  ;;  %4042 = vmatprep.mubr.bf16.mxu1 %v11674_v40  ;;  %v11733_v50 = vld [vmem:[#allocation2 + $0x22c] ss:$16 sps:$4 sm:$0xff]   ;;  %v11734_v40 = vld [vmem:[#allocation2 + $0x324] ss:$16 sps:$4 sm:$0xff]  }
 0x6dd   :  { %4268 = vmatmul.mubr.bf16.gmra.mxu0 %v11675_v56  ;;  %4043 = vmatmul.mubr.bf16.gmra.mxu1 %v11676_v62 }
 0x6de   :  { %4275 = vmatprep.mubr.bf16.mxu0 %v11677_v53  ;;  %4050 = vmatprep.mubr.bf16.mxu1 %v11678_v15  ;;  %v11735_v15 = vld [vmem:[#allocation2 + $0x228] ss:$16 sps:$4 sm:$0xff]  }
 0x6e5   :  { %4276 = vmatmul.mubr.bf16.gmra.mxu0 %v11679_v48  ;;  %4051 = vmatmul.mubr.bf16.gmra.mxu1 %v11680_v47  ;;  %v11736_v47 = vld [vmem:[#allocation2 + $0x320] ss:$16 sps:$4 sm:$0xff]  }
 0x6e6   :  { %4283 = vmatprep.mubr.bf16.mxu0 %v11681_v57  ;;  %4058 = vmatprep.mubr.bf16.mxu1 %v11682_v25  ;;  %v11737_v57 = vld [vmem:[#allocation2 + $0x24c] ss:$16 sps:$4 sm:$0xff]   ;;  %v11738_v25 = vld [vmem:[#allocation2 + $0x344] ss:$16 sps:$4 sm:$0xff]  }
 0x6ed   :  { %4284 = vmatmul.mubr.bf16.gmra.mxu0 %v11683_v45  ;;  %4059 = vmatmul.mubr.bf16.gmra.mxu1 %v11684_v49 }
 0x6ee   :  { %4291 = vmatprep.mubr.bf16.mxu0 %v11685_v18  ;;  %4066 = vmatprep.mubr.bf16.mxu1 %v11686_v10  ;;  %v11739_v10 = vld [vmem:[#allocation2 + $0x248] ss:$16 sps:$4 sm:$0xff]  }
 0x6f5   :  { %4292 = vmatmul.mubr.bf16.gmra.mxu0 %v11687_v1  ;;  %4067 = vmatmul.mubr.bf16.gmra.mxu1 %v11688_v7  ;;  %v11740_v7 = vld [vmem:[#allocation2 + $0x340] ss:$16 sps:$4 sm:$0xff]  }
 0x6f6   :  { %4299 = vmatprep.mubr.bf16.mxu0 %v11689_v28  ;;  %4074 = vmatprep.mubr.bf16.mxu1 %v11690_v24  ;;  %v11741_v28 = vld [vmem:[#allocation2 + $0x26c] ss:$16 sps:$4 sm:$0xff]   ;;  %v11742_v24 = vld [vmem:[#allocation2 + $0x364] ss:$16 sps:$4 sm:$0xff]  }
 0x6fd   :  { %4300 = vmatmul.mubr.bf16.gmra.mxu0 %v11691_v29  ;;  %4075 = vmatmul.mubr.bf16.gmra.mxu1 %v11692_v36 }
 0x6fe   :  { %4307 = vmatprep.mubr.bf16.mxu0 %v11693_v43  ;;  %4082 = vmatprep.mubr.bf16.mxu1 %v11694_v41  ;;  %v11743_v41 = vld [vmem:[#allocation2 + $0x268] ss:$16 sps:$4 sm:$0xff]  }
 0x705   :  { %4308 = vmatmul.mubr.bf16.gmra.mxu0 %v11695_v59  ;;  %4083 = vmatmul.mubr.bf16.gmra.mxu1 %v11696_v12  ;;  %v11744_v12 = vld [vmem:[#allocation2 + $0x360] ss:$16 sps:$4 sm:$0xff]  }
 0x706   :  { %4315 = vmatprep.mubr.bf16.mxu0 %v11697_v30  ;;  %4090 = vmatprep.mubr.bf16.mxu1 %v11698_v0  ;;  %v11745_v30 = vld [vmem:[#allocation2 + $0x28c] ss:$16 sps:$4 sm:$0xff]   ;;  %v11746_v0 = vld [vmem:[#allocation2 + $0x384] ss:$16 sps:$4 sm:$0xff]  }
 0x70d   :  { %4316 = vmatmul.mubr.bf16.gmra.mxu0 %v11699_v22  ;;  %4091 = vmatmul.mubr.bf16.gmra.mxu1 %v11700_v11 }
 0x70e   :  { %4323 = vmatprep.mubr.bf16.mxu0 %v11701_v14  ;;  %4098 = vmatprep.mubr.bf16.mxu1 %v11702_v21  ;;  %v11747_v21 = vld [vmem:[#allocation2 + $0x288] ss:$16 sps:$4 sm:$0xff]  }
 0x715   :  { %4324 = vmatmul.mubr.bf16.gmra.mxu0 %v11703_v5  ;;  %4099 = vmatmul.mubr.bf16.gmra.mxu1 %v11704_v20  ;;  %v11748_v20 = vld [vmem:[#allocation2 + $0x380] ss:$16 sps:$4 sm:$0xff]  }
 0x716   :  { %4331 = vmatprep.mubr.bf16.mxu0 %v11705_v16  ;;  %4106 = vmatprep.mubr.bf16.mxu1 %v11706_v61  ;;  %v11749_v16 = vld [vmem:[#allocation2 + $0x2ac] ss:$16 sps:$4 sm:$0xff]   ;;  %v11750_v61 = vld [vmem:[#allocation2 + $0x3a4] ss:$16 sps:$4 sm:$0xff]  }
 0x71d   :  { %4332 = vmatmul.mubr.bf16.gmra.mxu0 %v11707_v63  ;;  %4107 = vmatmul.mubr.bf16.gmra.mxu1 %v11708_v58  ;;  %v11751_v58 = vld [vmem:[#allocation2 + $0x2a8] ss:$16 sps:$4 sm:$0xff]  }
 0x71e   :  { %4339 = vmatprep.mubr.bf16.mxu0 %v11709_v42  ;;  %4114 = vmatprep.mubr.bf16.mxu1 %v11710_v60  ;;  %v11752_v60 = vld [vmem:[#allocation2 + $0x3a0] ss:$16 sps:$4 sm:$0xff]  }
 0x725   :  { %4340 = vmatmul.mubr.bf16.gmra.mxu0 %v11711_v51  ;;  %4115 = vmatmul.mubr.bf16.gmra.mxu1 %v11712_v37  ;;  %v11753_v51 = vld [vmem:[#allocation2 + $0x2cc] ss:$16 sps:$4 sm:$0xff]   ;;  %v11754_v37 = vld [vmem:[#allocation2 + $0x3c4] ss:$16 sps:$4 sm:$0xff]  }
 0x726   :  { %4347 = vmatprep.mubr.bf16.mxu0 %v11713_v6  ;;  %4122 = vmatprep.mubr.bf16.mxu1 %v11714_v33 }
 0x72d   :  { %4348 = vmatmul.mubr.bf16.gmra.mxu0 %v11715_v55  ;;  %4123 = vmatmul.mubr.bf16.gmra.mxu1 %v11716_v39  ;;  %v11755_v39 = vld [vmem:[#allocation2 + $0x2c8] ss:$16 sps:$4 sm:$0xff]  }
 0x72e   :  { %4355 = vmatprep.mubr.bf16.mxu0 %v11717_v44  ;;  %4130 = vmatprep.mubr.bf16.mxu1 %v11718_v9  ;;  %v11756_v9 = vld [vmem:[#allocation2 + $0x3c0] ss:$16 sps:$4 sm:$0xff]  }
 0x735   :  { %4356 = vmatmul.mubr.bf16.gmra.mxu0 %v11719_v19  ;;  %4131 = vmatmul.mubr.bf16.gmra.mxu1 %v11720_v32  ;;  %v11757_v19 = vld [vmem:[#allocation2 + $0x2ec] ss:$16 sps:$4 sm:$0xff]   ;;  %v11758_v32 = vld [vmem:[#allocation2 + $0x3e4] ss:$16 sps:$4 sm:$0xff]  }
 0x736   :  { %4363 = vmatprep.mubr.bf16.mxu0 %v11721_v35  ;;  %4138 = vmatprep.mubr.bf16.mxu1 %v11722_v26 }
 0x73d   :  { %4364 = vmatmul.mubr.bf16.gmra.mxu0 %v11723_v52  ;;  %4139 = vmatmul.mubr.bf16.gmra.mxu1 %v11724_v13  ;;  %v11759_v13 = vld [vmem:[#allocation2 + $0x2e8] ss:$16 sps:$4 sm:$0xff]  }
 0x73e   :  { %4371 = vmatprep.mubr.bf16.mxu0 %v11725_v34  ;;  %4146 = vmatprep.mubr.bf16.mxu1 %v11726_v2  ;;  %v11760_v2 = vld [vmem:[#allocation2 + $0x3e0] ss:$16 sps:$4 sm:$0xff]  }
 0x745   :  { %4372 = vmatmul.mubr.bf16.gmra.mxu0 %v11727_v54  ;;  %4147 = vmatmul.mubr.bf16.gmra.mxu1 %v11728_v27  ;;  %v11761_v54 = vld [vmem:[#allocation2 + $0x30c] ss:$16 sps:$4 sm:$0xff]  }
 0x746   :  { %4379 = vmatprep.mubr.bf16.mxu0 %v11729_v38  ;;  %4154 = vmatprep.mubr.bf16.mxu1 %v11730_v46 }
 0x74d   :  { %4380 = vmatmul.mubr.bf16.gmra.mxu0 %v11731_v3  ;;  %v13011_v4 = vpop.f32.mrf.mxu1  ;;  %4155 = vmatmul.mubr.bf16.gmra.mxu1 %v11732_v31  ;;  %v11762_v31 = vld [vmem:[#allocation2 + $0x308] ss:$16 sps:$4 sm:$0xff]  }
 0x74e   :  { %4387 = vmatprep.mubr.bf16.mxu0 %v11733_v50  ;;  %4162 = vmatprep.mubr.bf16.mxu1 %v11734_v40 }
 0x74f   :  { %v3966_v56 = vpop.f32.mrf.mxu1 }
 0x750   :  { %v11763_v56 = vld [vmem:[#allocation2 + $0x32c] ss:$16 sps:$4 sm:$0xff]  }
 0x751   :  { %v13013_v62 = vpop.f32.mrf.mxu1 }
 0x753   :  { %v3969_v53 = vpop.f32.mrf.mxu1 }
 0x755   :  { %4388 = vmatmul.mubr.bf16.gmra.mxu0 %v11735_v15  ;;  %v13015_v48 = vpop.f32.mrf.mxu1  ;;  %4163 = vmatmul.mubr.bf16.gmra.mxu1 %v11736_v47 }
 0x756   :  { %4395 = vmatprep.mubr.bf16.mxu0 %v11737_v57  ;;  %4170 = vmatprep.mubr.bf16.mxu1 %v11738_v25 }
 0x757   :  { %v3974_v45 = vpop.f32.mrf.mxu1 }
 0x759   :  { %v13017_v49 = vpop.f32.mrf.mxu1 }
 0x75b   :  { %v3977_v18 = vpop.f32.mrf.mxu1 }
 0x75d   :  { %4396 = vmatmul.mubr.bf16.gmra.mxu0 %v11739_v10  ;;  %v13019_v1 = vpop.f32.mrf.mxu1  ;;  %4171 = vmatmul.mubr.bf16.gmra.mxu1 %v11740_v7 }
 0x75e   :  { %4403 = vmatprep.mubr.bf16.mxu0 %v11741_v28  ;;  %4178 = vmatprep.mubr.bf16.mxu1 %v11742_v24  ;;  %v11764_v24 = vld [vmem:[#allocation2 + $0x328] ss:$16 sps:$4 sm:$0xff]  }
 0x75f   :  { %v3982_v29 = vpop.f32.mrf.mxu1 }
 0x761   :  { %v13021_v36 = vpop.f32.mrf.mxu1 }
 0x763   :  { %v3985_v43 = vpop.f32.mrf.mxu1 }
 0x765   :  { %4404 = vmatmul.mubr.bf16.gmra.mxu0 %v11743_v41  ;;  %v13023_v59 = vpop.f32.mrf.mxu1  ;;  %4179 = vmatmul.mubr.bf16.gmra.mxu1 %v11744_v12  ;;  %v11765_v12 = vld [vmem:[#allocation2 + $0x34c] ss:$16 sps:$4 sm:$0xff]  }
 0x766   :  { %4411 = vmatprep.mubr.bf16.mxu0 %v11745_v30  ;;  %4186 = vmatprep.mubr.bf16.mxu1 %v11746_v0 }
 0x767   :  { %v3990_v22 = vpop.f32.mrf.mxu1 }
 0x769   :  { %v13025_v11 = vpop.f32.mrf.mxu1 }
 0x76b   :  { %v3993_v14 = vpop.f32.mrf.mxu1 }
 0x76d   :  { %4412 = vmatmul.mubr.bf16.gmra.mxu0 %v11747_v21  ;;  %v13027_v5 = vpop.f32.mrf.mxu1  ;;  %4187 = vmatmul.mubr.bf16.gmra.mxu1 %v11748_v20 }
 0x76e   :  { %4419 = vmatprep.mubr.bf16.mxu0 %v11749_v16  ;;  %4194 = vmatprep.mubr.bf16.mxu1 %v11750_v61 }
 0x76f   :  { %v3998_v23 = vpop.f32.mrf.mxu1 }
 0x771   :  { %v13029_v8 = vpop.f32.mrf.mxu1 }
 0x773   :  { %v4001_v63 = vpop.f32.mrf.mxu1 }
 0x775   :  { %4420 = vmatmul.mubr.bf16.gmra.mxu0 %v11751_v58  ;;  %v13031_v42 = vpop.f32.mrf.mxu1  ;;  %4195 = vmatmul.mubr.bf16.gmra.mxu1 %v11752_v60 }
 0x776   :  { %4427 = vmatprep.mubr.bf16.mxu0 %v11753_v51  ;;  %4202 = vmatprep.mubr.bf16.mxu1 %v11754_v37 }
 0x777   :  { %v4006_v6 = vpop.f32.mrf.mxu1 }
 0x778   :  { %v11767_v6 = vld [vmem:[#allocation2 + $0x36c] ss:$16 sps:$4 sm:$0xff]  }
 0x779   :  { %v13033_v33 = vpop.f32.mrf.mxu1 }
 0x77b   :  { %v4009_v55 = vpop.f32.mrf.mxu1 }
 0x77d   :  { %4428 = vmatmul.mubr.bf16.gmra.mxu0 %v11755_v39  ;;  %v13035_v44 = vpop.f32.mrf.mxu1  ;;  %4203 = vmatmul.mubr.bf16.gmra.mxu1 %v11756_v9 }
 0x77e   :  { %4435 = vmatprep.mubr.bf16.mxu0 %v11757_v19  ;;  %4210 = vmatprep.mubr.bf16.mxu1 %v11758_v32 }
 0x77f   :  { %v4014_v35 = vpop.f32.mrf.mxu1 }
 0x781   :  { %v13037_v26 = vpop.f32.mrf.mxu1 }
 0x783   :  { %v4017_v52 = vpop.f32.mrf.mxu1 }
 0x785   :  { %4436 = vmatmul.mubr.bf16.gmra.mxu0 %v11759_v13  ;;  %v13039_v34 = vpop.f32.mrf.mxu1  ;;  %4211 = vmatmul.mubr.bf16.gmra.mxu1 %v11760_v2 }
 0x786   :  { %4443 = vmatprep.mubr.bf16.mxu0 %v11761_v54 }
 0x787   :  { %v4022_v27 = vpop.f32.mrf.mxu1 }
 0x789   :  { %v13041_v38 = vpop.f32.mrf.mxu1 }
 0x78b   :  { %v4025_v46 = vpop.f32.mrf.mxu1 }
 0x78d   :  { %v4253_v3 = vpop.f32.mrf.mxu0  ;;  %4444 = vmatmul.mubr.bf16.gmra.mxu0 %v11762_v31  ;;  %v13043_v50 = vpop.f32.mrf.mxu1 }
 0x78e   :  { %v4254_v40 = vadd.f32 %v4253_v3, %v13011_v4  ;;  %4451 = vmatprep.mubr.bf16.mxu0 %v11763_v56 }
 0x78f   :  { %v4255_v53 = vpop.f32.mrf.mxu0  ;;  %v4030_v15 = vpop.f32.mrf.mxu1 }
 0x790   :  { %v4572_v25 = vmul.f32 0.01, %v4254_v40  ;;  %vm4508_vm11 = vcmp.gt.f32.partialorder %v4254_v40, 0.0 }
 0x791   :  { %v4256_v47 = vpop.f32.mrf.mxu0  ;;  %v13046_v57 = vpop.f32.mrf.mxu1 }
 0x792   :  { %v4257_v45 = vadd.f32 %v4256_v47, %v13013_v62  ;;  %v4636_v4 = vsel %vm4508_vm11, %v4254_v40, %v4572_v25  ;;  %v11769_v40 = vld [vmem:[#allocation2 + $0x38c] ss:$16 sps:$4 sm:$0xff]  }
 0x793   :  { %v4258_v18 = vpop.f32.mrf.mxu0  ;;  %v4033_v10 = vpop.f32.mrf.mxu1 }
 0x794   :  { %vm4509_vm12 = vcmp.gt.f32.partialorder %v4257_v45, 0.0  ;;  %v4573_v7 = vmul.f32 0.01, %v4257_v45 }
 0x795   :  { %v4261_v28 = vpop.f32.mrf.mxu0  ;;  %4452 = vmatmul.mubr.bf16.gmra.mxu0 %v11764_v24  ;;  %v13049_v29 = vpop.f32.mrf.mxu1 }
 0x796   :  { %v4637_v43 = vsel %vm4509_vm12, %v4257_v45, %v4573_v7  ;;  %v4262_v41 = vadd.f32 %v4261_v28, %v13015_v48  ;;  %4459 = vmatprep.mubr.bf16.mxu0 %v11765_v12  ;;  %v11766_v48 = vld [vmem:[#allocation2 + $0x348] ss:$16 sps:$4 sm:$0xff]   ;;  %v11771_v12 = vld [vmem:[#allocation2 + $0x3ac] ss:$16 sps:$4 sm:$0xff]  }
 0x797   :  { %v4700_v30 = vpack.c.bf16 %v4637_v43, %v4636_v4  ;;  %v4263_v0 = vpop.f32.mrf.mxu0  ;;  %v4038_v22 = vpop.f32.mrf.mxu1 }
 0x798   :  { %v4574_v21 = vmul.f32 0.01, %v4262_v41  ;;  %vm4510_vm13 = vcmp.gt.f32.partialorder %v4262_v41, 0.0 }
 0x799   :  { %v4264_v62 = vpop.f32.mrf.mxu0  ;;  %10772 = vmatprep.mubr.msk.bf16.mxu1 %vm2276_vm4, %v4700_v30  ;;  %v13053_v14 = vpop.f32.mrf.mxu1 }
 0x79a   :  { %v4265_v20 = vadd.f32 %v4264_v62, %v13017_v49  ;;  %v4638_v60 = vsel %vm4510_vm13, %v4262_v41, %v4574_v21 }
 0x79b   :  { %v4266_v16 = vpop.f32.mrf.mxu0  ;;  %v4041_v61 = vpop.f32.mrf.mxu1 }
 0x79c   :  { %vm4511_vm14 = vcmp.gt.f32.partialorder %v4265_v20, 0.0  ;;  %v4575_v23 = vmul.f32 0.01, %v4265_v20 }
 0x79d   :  { %v4269_v63 = vpop.f32.mrf.mxu0  ;;  %4460 = vmatmul.mubr.bf16.gmra.mxu0 %v11766_v48  ;;  %v13056_v58 = vpop.f32.mrf.mxu1 }
 0x79e   :  { %v4639_v51 = vsel %vm4511_vm14, %v4265_v20, %v4575_v23  ;;  %v4270_v37 = vadd.f32 %v4269_v63, %v13019_v1  ;;  %4467 = vmatprep.mubr.bf16.mxu0 %v11767_v6  ;;  %v11768_v1 = vld [vmem:[#allocation2 + $0x368] ss:$16 sps:$4 sm:$0xff]   ;;  %v11773_v6 = vld [vmem:[#allocation2 + $0x3cc] ss:$16 sps:$4 sm:$0xff]  }
 0x79f   :  { %v4701_v55 = vpack.c.bf16 %v4639_v51, %v4638_v60  ;;  %v4271_v39 = vpop.f32.mrf.mxu0  ;;  %v4046_v9 = vpop.f32.mrf.mxu1 }
 0x7a0   :  { %v4576_v32 = vmul.f32 0.01, %v4270_v37  ;;  %vm4512_vm15 = vcmp.gt.f32.partialorder %v4270_v37, 0.0 }
 0x7a1   :  { %v4272_v49 = vpop.f32.mrf.mxu0  ;;  %10773 = vmatmul.mubr.msk.bf16.vlgmr.msra.gmra.mxu1 %vm2276_vm4, %v4701_v55  ;;  %v13060_v19 = vpop.f32.mrf.mxu1 }
 0x7a2   :  { %v4273_v35 = vadd.f32 %v4272_v49, %v13021_v36  ;;  %v4640_v46 = vsel %vm4512_vm15, %v4270_v37, %v4576_v32 }
 0x7a3   :  { %v4274_v52 = vpop.f32.mrf.mxu0  ;;  %v4049_v13 = vpop.f32.mrf.mxu1 }
 0x7a4   :  { %vm4513_vm0 = vcmp.gt.f32.partialorder %v4273_v35, 0.0  ;;  %v4577_v2 = vmul.f32 0.01, %v4273_v35 }
 0x7a5   :  { %v4277_v54 = vpop.f32.mrf.mxu0  ;;  %4468 = vmatmul.mubr.bf16.gmra.mxu0 %v11768_v1  ;;  %v13063_v27 = vpop.f32.mrf.mxu1 }
 0x7a6   :  { %v4641_v3 = vsel %vm4513_vm0, %v4273_v35, %v4577_v2  ;;  %v4278_v31 = vadd.f32 %v4277_v54, %v13023_v59  ;;  %4475 = vmatprep.mubr.bf16.mxu0 %v11769_v40  ;;  %v11770_v59 = vld [vmem:[#allocation2 + $0x388] ss:$16 sps:$4 sm:$0xff]   ;;  %v11775_v40 = vld [vmem:[#allocation2 + $0x3ec] ss:$16 sps:$4 sm:$0xff]  }
 0x7a7   :  { %v4702_v56 = vpack.c.bf16 %v4641_v3, %v4640_v46  ;;  %v4279_v53 = vpop.f32.mrf.mxu0  ;;  %v4054_v15 = vpop.f32.mrf.mxu1 }
 0x7a8   :  { %v4578_v25 = vmul.f32 0.01, %v4278_v31  ;;  %vm4514_vm1 = vcmp.gt.f32.partialorder %v4278_v31, 0.0 }
 0x7a9   :  { %v4280_v36 = vpop.f32.mrf.mxu0  ;;  %10776 = vmatprep.mubr.msk.bf16.mxu1 %vm2276_vm4, %v4702_v56  ;;  %v13067_v47 = vpop.f32.mrf.mxu1 }
 0x7aa   :  { %v4281_v45 = vadd.f32 %v4280_v36, %v13025_v11  ;;  %v4642_v4 = vsel %vm4514_vm1, %v4278_v31, %v4578_v25 }
 0x7ab   :  { %v4282_v18 = vpop.f32.mrf.mxu0  ;;  %v4057_v10 = vpop.f32.mrf.mxu1 }
 0x7ac   :  { %vm4515_vm2 = vcmp.gt.f32.partialorder %v4281_v45, 0.0  ;;  %v4579_v7 = vmul.f32 0.01, %v4281_v45 }
 0x7ad   :  { %v4285_v28 = vpop.f32.mrf.mxu0  ;;  %4476 = vmatmul.mubr.bf16.gmra.mxu0 %v11770_v59  ;;  %v13070_v24 = vpop.f32.mrf.mxu1 }
 0x7ae   :  { %v4643_v43 = vsel %vm4515_vm2, %v4281_v45, %v4579_v7  ;;  %v4286_v41 = vadd.f32 %v4285_v28, %v13027_v5  ;;  %4483 = vmatprep.mubr.bf16.mxu0 %v11771_v12  ;;  %v11772_v5 = vld [vmem:[#allocation2 + $0x3a8] ss:$16 sps:$4 sm:$0xff]   ;;  %v11777_v12 = vld [vmem:[#allocation2 + $0x4] ss:$16 sps:$4 sm:$0xff]  }
 0x7af   :  { %v4703_v30 = vpack.c.bf16 %v4643_v43, %v4642_v4  ;;  %v4287_v0 = vpop.f32.mrf.mxu0  ;;  %v4062_v22 = vpop.f32.mrf.mxu1 }
 0x7b0   :  { %v4580_v21 = vmul.f32 0.01, %v4286_v41  ;;  %vm4516_vm3 = vcmp.gt.f32.partialorder %v4286_v41, 0.0 }
 0x7b1   :  { %v4288_v11 = vpop.f32.mrf.mxu0  ;;  %10777 = vmatmul.mubr.msk.bf16.gmra.mxu1 %vm2276_vm4, %v4703_v30  ;;  %v13074_v62 = vpop.f32.mrf.mxu1 }
 0x7b2   :  { %v4289_v20 = vadd.f32 %v4288_v11, %v13029_v8  ;;  %v4644_v60 = vsel %vm4516_vm3, %v4286_v41, %v4580_v21 }
 0x7b3   :  { %v4290_v16 = vpop.f32.mrf.mxu0  ;;  %v4065_v61 = vpop.f32.mrf.mxu1 }
 0x7b4   :  { %vm4517_vm5 = vcmp.gt.f32.partialorder %v4289_v20, 0.0  ;;  %v4581_v23 = vmul.f32 0.01, %v4289_v20 }
 0x7b5   :  { %v4293_v63 = vpop.f32.mrf.mxu0  ;;  %4484 = vmatmul.mubr.bf16.gmra.mxu0 %v11772_v5  ;;  %v13077_v48 = vpop.f32.mrf.mxu1 }
 0x7b6   :  { %v4645_v51 = vsel %vm4517_vm5, %v4289_v20, %v4581_v23  ;;  %v4294_v37 = vadd.f32 %v4293_v63, %v13031_v42  ;;  %4491 = vmatprep.mubr.bf16.mxu0 %v11773_v6  ;;  %v11774_v42 = vld [vmem:[#allocation2 + $0x3c8] ss:$16 sps:$4 sm:$0xff]  }
 0x7b7   :  { %v4704_v55 = vpack.c.bf16 %v4645_v51, %v4644_v60  ;;  %v4295_v39 = vpop.f32.mrf.mxu0  ;;  %v4070_v9 = vpop.f32.mrf.mxu1 }
 0x7b8   :  { %v4582_v32 = vmul.f32 0.01, %v4294_v37  ;;  %vm4518_vm6 = vcmp.gt.f32.partialorder %v4294_v37, 0.0 }
 0x7b9   :  { %v4296_v8 = vpop.f32.mrf.mxu0  ;;  %10780 = vmatprep.mubr.msk.bf16.mxu1 %vm2276_vm4, %v4704_v55  ;;  %v13081_v49 = vpop.f32.mrf.mxu1 }
 0x7ba   :  { %v4297_v35 = vadd.f32 %v4296_v8, %v13033_v33  ;;  %v4646_v46 = vsel %vm4518_vm6, %v4294_v37, %v4582_v32 }
 0x7bb   :  { %v4298_v52 = vpop.f32.mrf.mxu0  ;;  %v4073_v13 = vpop.f32.mrf.mxu1 }
 0x7bc   :  { %vm4519_vm7 = vcmp.gt.f32.partialorder %v4297_v35, 0.0  ;;  %v4583_v2 = vmul.f32 0.01, %v4297_v35 }
 0x7bd   :  { %v4301_v54 = vpop.f32.mrf.mxu0  ;;  %4492 = vmatmul.mubr.bf16.gmra.mxu0 %v11774_v42  ;;  %v13084_v1 = vpop.f32.mrf.mxu1 }
 0x7be   :  { %v4647_v3 = vsel %vm4519_vm7, %v4297_v35, %v4583_v2  ;;  %v4302_v31 = vadd.f32 %v4301_v54, %v13035_v44  ;;  %4499 = vmatprep.mubr.bf16.mxu0 %v11775_v40  ;;  %v11776_v44 = vld [vmem:[#allocation2 + $0x3e8] ss:$16 sps:$4 sm:$0xff]  }
 0x7bf   :  { %v4705_v56 = vpack.c.bf16 %v4647_v3, %v4646_v46  ;;  %v4303_v53 = vpop.f32.mrf.mxu0  ;;  %v4078_v15 = vpop.f32.mrf.mxu1 }
 0x7c0   :  { %v4584_v25 = vmul.f32 0.01, %v4302_v31  ;;  %vm4520_vm8 = vcmp.gt.f32.partialorder %v4302_v31, 0.0 }
 0x7c1   :  { %v4304_v33 = vpop.f32.mrf.mxu0  ;;  %10781 = vmatmul.mubr.msk.bf16.gmra.mxu1 %vm2276_vm4, %v4705_v56  ;;  %v13088_v36 = vpop.f32.mrf.mxu1 }
 0x7c2   :  { %v4305_v45 = vadd.f32 %v4304_v33, %v13037_v26  ;;  %v4648_v4 = vsel %vm4520_vm8, %v4302_v31, %v4584_v25 }
 0x7c3   :  { %v4306_v18 = vpop.f32.mrf.mxu0  ;;  %v4081_v10 = vpop.f32.mrf.mxu1 }
 0x7c4   :  { %vm4521_vm9 = vcmp.gt.f32.partialorder %v4305_v45, 0.0  ;;  %v4585_v7 = vmul.f32 0.01, %v4305_v45 }
 0x7c5   :  { %v4309_v28 = vpop.f32.mrf.mxu0  ;;  %4500 = vmatmul.mubr.bf16.gmra.mxu0 %v11776_v44  ;;  %v13091_v59 = vpop.f32.mrf.mxu1 }
 0x7c6   :  { %v4649_v43 = vsel %vm4521_vm9, %v4305_v45, %v4585_v7  ;;  %v4310_v41 = vadd.f32 %v4309_v28, %v13039_v34  ;;  %5198 = vmatprep.mubr.bf16.mxu0 %v11777_v12 }
 0x7c7   :  { %v4706_v30 = vpack.c.bf16 %v4649_v43, %v4648_v4  ;;  %v4311_v0 = vpop.f32.mrf.mxu0  ;;  %v4086_v22 = vpop.f32.mrf.mxu1 }
 0x7c8   :  { %v4586_v21 = vmul.f32 0.01, %v4310_v41  ;;  %vm4522_vm10 = vcmp.gt.f32.partialorder %v4310_v41, 0.0 }
 0x7c9   :  { %v4312_v26 = vpop.f32.mrf.mxu0  ;;  %10784 = vmatprep.mubr.msk.bf16.mxu1 %vm2276_vm4, %v4706_v30  ;;  %v13095_v11 = vpop.f32.mrf.mxu1 }
 0x7ca   :  { %v4313_v20 = vadd.f32 %v4312_v26, %v13041_v38  ;;  %v4650_v5 = vsel %vm4522_vm10, %v4310_v41, %v4586_v21 }
 0x7cb   :  { %v4314_v16 = vpop.f32.mrf.mxu0  ;;  %v4089_v61 = vpop.f32.mrf.mxu1 }
 0x7cc   :  { %vm4523_vm11 = vcmp.gt.f32.partialorder %v4313_v20, 0.0  ;;  %v4587_v23 = vmul.f32 0.01, %v4313_v20 }
 0x7cd   :  { %v4317_v63 = vpop.f32.mrf.mxu0  ;;  %v13098_v34 = vpop.f32.mrf.mxu1 }
 0x7ce   :  { %v4651_v60 = vsel %vm4523_vm11, %v4313_v20, %v4587_v23  ;;  %v4318_v51 = vadd.f32 %v4317_v63, %v13043_v50 }
 0x7cf   :  { %v4707_v37 = vpack.c.bf16 %v4651_v60, %v4650_v5  ;;  %v4319_v6 = vpop.f32.mrf.mxu0  ;;  %v4094_v55 = vpop.f32.mrf.mxu1 }
 0x7d0   :  { %v4588_v38 = vmul.f32 0.01, %v4318_v51  ;;  %vm4524_vm12 = vcmp.gt.f32.partialorder %v4318_v51, 0.0 }
 0x7d1   :  { %v4320_v39 = vpop.f32.mrf.mxu0  ;;  %10785 = vmatmul.mubr.msk.bf16.gmra.mxu1 %vm2276_vm4, %v4707_v37  ;;  %v13102_v9 = vpop.f32.mrf.mxu1 }
 0x7d2   :  { %v4321_v8 = vadd.f32 %v4320_v39, %v13046_v57  ;;  %v4652_v50 = vsel %vm4524_vm12, %v4318_v51, %v4588_v38 }
 0x7d3   :  { %v4322_v32 = vpop.f32.mrf.mxu0  ;;  %v4097_v35 = vpop.f32.mrf.mxu1 }
 0x7d4   :  { %vm4525_vm13 = vcmp.gt.f32.partialorder %v4321_v8, 0.0  ;;  %v4589_v52 = vmul.f32 0.01, %v4321_v8 }
 0x7d5   :  { %v4325_v13 = vpop.f32.mrf.mxu0  ;;  %v13105_v2 = vpop.f32.mrf.mxu1 }
 0x7d6   :  { %v4653_v54 = vsel %vm4525_vm13, %v4321_v8, %v4589_v52  ;;  %v4326_v42 = vadd.f32 %v4325_v13, %v13049_v29 }
 0x7d7   :  { %v4708_v46 = vpack.c.bf16 %v4653_v54, %v4652_v50  ;;  %v4327_v3 = vpop.f32.mrf.mxu0  ;;  %v4102_v31 = vpop.f32.mrf.mxu1 }
 0x7d8   :  { %v4590_v57 = vmul.f32 0.01, %v4326_v42  ;;  %vm4526_vm14 = vcmp.gt.f32.partialorder %v4326_v42, 0.0 }
 0x7d9   :  { %v4328_v40 = vpop.f32.mrf.mxu0  ;;  %10788 = vmatprep.mubr.msk.bf16.mxu1 %vm2276_vm4, %v4708_v46  ;;  %v13109_v56 = vpop.f32.mrf.mxu1 }
 0x7da   :  { %v4329_v53 = vadd.f32 %v4328_v40, %v13053_v14  ;;  %v4654_v29 = vsel %vm4526_vm14, %v4326_v42, %v4590_v57 }
 0x7db   :  { %v4330_v15 = vpop.f32.mrf.mxu0  ;;  %v4105_v33 = vpop.f32.mrf.mxu1 }
 0x7dc   :  { %vm4527_vm15 = vcmp.gt.f32.partialorder %v4329_v53, 0.0  ;;  %v4591_v25 = vmul.f32 0.01, %v4329_v53 }
 0x7dd   :  { %v4333_v45 = vpop.f32.mrf.mxu0  ;;  %v13112_v18 = vpop.f32.mrf.mxu1 }
 0x7de   :  { %v4655_v10 = vsel %vm4527_vm15, %v4329_v53, %v4591_v25  ;;  %v4334_v7 = vadd.f32 %v4333_v45, %v13056_v58 }
 0x7df   :  { %v4709_v28 = vpack.c.bf16 %v4655_v10, %v4654_v29  ;;  %v4335_v44 = vpop.f32.mrf.mxu0  ;;  %v4110_v4 = vpop.f32.mrf.mxu1 }
 0x7e0   :  { %v4592_v14 = vmul.f32 0.01, %v4334_v7  ;;  %vm4528_vm0 = vcmp.gt.f32.partialorder %v4334_v7, 0.0 }
 0x7e1   :  { %v4336_v43 = vpop.f32.mrf.mxu0  ;;  %10789 = vmatmul.mubr.msk.bf16.gmra.mxu1 %vm2276_vm4, %v4709_v28  ;;  %v13116_v41 = vpop.f32.mrf.mxu1 }
 0x7e2   :  { %v4337_v12 = vadd.f32 %v4336_v43, %v13060_v19  ;;  %v4656_v58 = vsel %vm4528_vm0, %v4334_v7, %v4592_v14 }
 0x7e3   :  { %v4338_v30 = vpop.f32.mrf.mxu0  ;;  %v4113_v0 = vpop.f32.mrf.mxu1 }
 0x7e4   :  { %vm4529_vm1 = vcmp.gt.f32.partialorder %v4337_v12, 0.0  ;;  %v4593_v22 = vmul.f32 0.01, %v4337_v12 }
 0x7e5   :  { %v4341_v26 = vpop.f32.mrf.mxu0  ;;  %v13119_v21 = vpop.f32.mrf.mxu1 }
 0x7e6   :  { %v4657_v20 = vsel %vm4529_vm1, %v4337_v12, %v4593_v22  ;;  %v4342_v16 = vadd.f32 %v4341_v26, %v13063_v27 }
 0x7e7   :  { %v4710_v61 = vpack.c.bf16 %v4657_v20, %v4656_v58  ;;  %v4343_v23 = vpop.f32.mrf.mxu0  ;;  %v4118_v63 = vpop.f32.mrf.mxu1 }
 0x7e8   :  { %v4594_v19 = vmul.f32 0.01, %v4342_v16  ;;  %vm4530_vm2 = vcmp.gt.f32.partialorder %v4342_v16, 0.0 }
 0x7e9   :  { %v4344_v5 = vpop.f32.mrf.mxu0  ;;  %10792 = vmatprep.mubr.msk.bf16.mxu1 %vm2276_vm4, %v4710_v61  ;;  %v13123_v60 = vpop.f32.mrf.mxu1 }
 0x7ea   :  { %v4345_v51 = vadd.f32 %v4344_v5, %v13067_v47  ;;  %v4658_v27 = vsel %vm4530_vm2, %v4342_v16, %v4594_v19 }
 0x7eb   :  { %v4346_v37 = vpop.f32.mrf.mxu0  ;;  %v4121_v6 = vpop.f32.mrf.mxu1 }
 0x7ec   :  { %vm4531_vm3 = vcmp.gt.f32.partialorder %v4345_v51, 0.0  ;;  %v4595_v55 = vmul.f32 0.01, %v4345_v51 }
 0x7ed   :  { %v4349_v39 = vpop.f32.mrf.mxu0  ;;  %v13126_v38 = vpop.f32.mrf.mxu1 }
 0x7ee   :  { %v4659_v8 = vsel %vm4531_vm3, %v4345_v51, %v4595_v55  ;;  %v4350_v32 = vadd.f32 %v4349_v39, %v13070_v24 }
 0x7ef   :  { %v4711_v35 = vpack.c.bf16 %v4659_v8, %v4658_v27  ;;  %v4351_v52 = vpop.f32.mrf.mxu0  ;;  %v4126_v13 = vpop.f32.mrf.mxu1 }
 0x7f0   :  { %v4596_v47 = vmul.f32 0.01, %v4350_v32  ;;  %vm4532_vm5 = vcmp.gt.f32.partialorder %v4350_v32, 0.0 }
 0x7f1   :  { %v4352_v50 = vpop.f32.mrf.mxu0  ;;  %10793 = vmatmul.mubr.msk.bf16.gmra.mxu1 %vm2276_vm4, %v4711_v35  ;;  %v13130_v54 = vpop.f32.mrf.mxu1 }
 0x7f2   :  { %v4353_v42 = vadd.f32 %v4352_v50, %v13074_v62  ;;  %v4660_v24 = vsel %vm4532_vm5, %v4350_v32, %v4596_v47 }
 0x7f3   :  { %v4354_v46 = vpop.f32.mrf.mxu0  ;;  %v4129_v3 = vpop.f32.mrf.mxu1 }
 0x7f4   :  { %vm4533_vm6 = vcmp.gt.f32.partialorder %v4353_v42, 0.0  ;;  %v4597_v31 = vmul.f32 0.01, %v4353_v42 }
 0x7f5   :  { %v4357_v40 = vpop.f32.mrf.mxu0  ;;  %v13133_v57 = vpop.f32.mrf.mxu1 }
 0x7f6   :  { %v4661_v53 = vsel %vm4533_vm6, %v4353_v42, %v4597_v31  ;;  %v4358_v15 = vadd.f32 %v4357_v40, %v13077_v48 }
 0x7f7   :  { %v4712_v33 = vpack.c.bf16 %v4661_v53, %v4660_v24  ;;  %v4359_v25 = vpop.f32.mrf.mxu0  ;;  %v4134_v45 = vpop.f32.mrf.mxu1 }
 0x7f8   :  { %v4598_v62 = vmul.f32 0.01, %v4358_v15  ;;  %vm4534_vm7 = vcmp.gt.f32.partialorder %v4358_v15, 0.0 }
 0x7f9   :  { %v4360_v29 = vpop.f32.mrf.mxu0  ;;  %10796 = vmatprep.mubr.msk.bf16.mxu1 %vm2276_vm4, %v4712_v33  ;;  %v13137_v10 = vpop.f32.mrf.mxu1 }
 0x7fa   :  { %v4361_v7 = vadd.f32 %v4360_v29, %v13081_v49  ;;  %v4662_v48 = vsel %vm4534_vm7, %v4358_v15, %v4598_v62 }
 0x7fb   :  { %v4362_v28 = vpop.f32.mrf.mxu0  ;;  %v4137_v44 = vpop.f32.mrf.mxu1 }
 0x7fc   :  { %vm4535_vm8 = vcmp.gt.f32.partialorder %v4361_v7, 0.0  ;;  %v4599_v4 = vmul.f32 0.01, %v4361_v7 }
 0x7fd   :  { %v4365_v43 = vpop.f32.mrf.mxu0  ;;  %v13140_v14 = vpop.f32.mrf.mxu1 }
 0x7fe   :  { %v4663_v12 = vsel %vm4535_vm8, %v4361_v7, %v4599_v4  ;;  %v4366_v30 = vadd.f32 %v4365_v43, %v13084_v1 }
 0x7ff   :  { %v4713_v0 = vpack.c.bf16 %v4663_v12, %v4662_v48  ;;  %v4367_v22 = vpop.f32.mrf.mxu0  ;;  %v4142_v26 = vpop.f32.mrf.mxu1 }
 0x800   :  { %v4600_v49 = vmul.f32 0.01, %v4366_v30  ;;  %vm4536_vm9 = vcmp.gt.f32.partialorder %v4366_v30, 0.0 }
 0x801   :  { %v4368_v58 = vpop.f32.mrf.mxu0  ;;  %10797 = vmatmul.mubr.msk.bf16.gmra.mxu1 %vm2276_vm4, %v4713_v0  ;;  %v13144_v20 = vpop.f32.mrf.mxu1 }
 0x802   :  { %v4369_v16 = vadd.f32 %v4368_v58, %v13088_v36  ;;  %v4664_v1 = vsel %vm4536_vm9, %v4366_v30, %v4600_v49 }
 0x803   :  { %v4370_v61 = vpop.f32.mrf.mxu0  ;;  %v4145_v23 = vpop.f32.mrf.mxu1 }
 0x804   :  { %vm4537_vm10 = vcmp.gt.f32.partialorder %v4369_v16, 0.0  ;;  %v4601_v63 = vmul.f32 0.01, %v4369_v16 }
 0x805   :  { %v4373_v5 = vpop.f32.mrf.mxu0  ;;  %v13147_v19 = vpop.f32.mrf.mxu1 }
 0x806   :  { %v4665_v51 = vsel %vm4537_vm10, %v4369_v16, %v4601_v63  ;;  %v4374_v37 = vadd.f32 %v4373_v5, %v13091_v59 }
 0x807   :  { %v4714_v6 = vpack.c.bf16 %v4665_v51, %v4664_v1  ;;  %v4375_v55 = vpop.f32.mrf.mxu0  ;;  %v4150_v39 = vpop.f32.mrf.mxu1 }
 0x808   :  { %v4602_v36 = vmul.f32 0.01, %v4374_v37  ;;  %vm4538_vm11 = vcmp.gt.f32.partialorder %v4374_v37, 0.0 }
 0x809   :  { %v4376_v27 = vpop.f32.mrf.mxu0  ;;  %10800 = vmatprep.mubr.msk.bf16.mxu1 %vm2276_vm4, %v4714_v6  ;;  %v13151_v8 = vpop.f32.mrf.mxu1 }
 0x80a   :  { %v4377_v32 = vadd.f32 %v4376_v27, %v13095_v11  ;;  %v4666_v59 = vsel %vm4538_vm11, %v4374_v37, %v4602_v36 }
 0x80b   :  { %v4378_v35 = vpop.f32.mrf.mxu0  ;;  %v4153_v52 = vpop.f32.mrf.mxu1 }
 0x80c   :  { %vm4539_vm12 = vcmp.gt.f32.partialorder %v4377_v32, 0.0  ;;  %v4603_v13 = vmul.f32 0.01, %v4377_v32 }
 0x80d   :  { %v4381_v50 = vpop.f32.mrf.mxu0  ;;  %v13154_v47 = vpop.f32.mrf.mxu1 }
 0x80e   :  { %v4667_v42 = vsel %vm4539_vm12, %v4377_v32, %v4603_v13  ;;  %v4382_v46 = vadd.f32 %v4381_v50, %v13098_v34 }
 0x80f   :  { %v4715_v3 = vpack.c.bf16 %v4667_v42, %v4666_v59  ;;  %v4383_v31 = vpop.f32.mrf.mxu0  ;;  %v4158_v40 = vpop.f32.mrf.mxu1 }
 0x810   :  { %v4604_v11 = vmul.f32 0.01, %v4382_v46  ;;  %vm4540_vm13 = vcmp.gt.f32.partialorder %v4382_v46, 0.0 }
 0x811   :  { %v4384_v24 = vpop.f32.mrf.mxu0  ;;  %10801 = vmatmul.mubr.msk.bf16.gmra.mxu1 %vm2276_vm4, %v4715_v3  ;;  %v13158_v53 = vpop.f32.mrf.mxu1 }
 0x812   :  { %v4385_v15 = vadd.f32 %v4384_v24, %v13102_v9  ;;  %v4668_v34 = vsel %vm4540_vm13, %v4382_v46, %v4604_v11 }
 0x813   :  { %v4386_v33 = vpop.f32.mrf.mxu0  ;;  %v4161_v25 = vpop.f32.mrf.mxu1 }
 0x814   :  { %vm4541_vm14 = vcmp.gt.f32.partialorder %v4385_v15, 0.0  ;;  %v4605_v45 = vmul.f32 0.01, %v4385_v15 }
 0x815   :  { %v4389_v29 = vpop.f32.mrf.mxu0  ;;  %v13161_v62 = vpop.f32.mrf.mxu1 }
 0x816   :  { %v4669_v7 = vsel %vm4541_vm14, %v4385_v15, %v4605_v45  ;;  %v4390_v28 = vadd.f32 %v4389_v29, %v13105_v2 }
 0x817   :  { %v4716_v44 = vpack.c.bf16 %v4669_v7, %v4668_v34  ;;  %v4391_v4 = vpop.f32.mrf.mxu0  ;;  %v4166_v43 = vpop.f32.mrf.mxu1 }
 0x818   :  { %v4606_v9 = vmul.f32 0.01, %v4390_v28  ;;  %vm4542_vm15 = vcmp.gt.f32.partialorder %v4390_v28, 0.0 }
 0x819   :  { %v4392_v48 = vpop.f32.mrf.mxu0  ;;  %10804 = vmatprep.mubr.msk.bf16.mxu1 %vm2276_vm4, %v4716_v44  ;;  %v13165_v12 = vpop.f32.mrf.mxu1 }
 0x81a   :  { %v4393_v30 = vadd.f32 %v4392_v48, %v13109_v56  ;;  %v4670_v2 = vsel %vm4542_vm15, %v4390_v28, %v4606_v9 }
 0x81b   :  { %v4394_v0 = vpop.f32.mrf.mxu0  ;;  %v4169_v22 = vpop.f32.mrf.mxu1 }
 0x81c   :  { %vm4543_vm0 = vcmp.gt.f32.partialorder %v4393_v30, 0.0  ;;  %v4607_v26 = vmul.f32 0.01, %v4393_v30 }
 0x81d   :  { %v4397_v58 = vpop.f32.mrf.mxu0  ;;  %v13168_v49 = vpop.f32.mrf.mxu1 }
 0x81e   :  { %v4671_v16 = vsel %vm4543_vm0, %v4393_v30, %v4607_v26  ;;  %v4398_v61 = vadd.f32 %v4397_v58, %v13112_v18 }
 0x81f   :  { %v4717_v23 = vpack.c.bf16 %v4671_v16, %v4670_v2  ;;  %v4399_v63 = vpop.f32.mrf.mxu0  ;;  %v4174_v5 = vpop.f32.mrf.mxu1 }
 0x820   :  { %v4608_v56 = vmul.f32 0.01, %v4398_v61  ;;  %vm4544_vm1 = vcmp.gt.f32.partialorder %v4398_v61, 0.0 }
 0x821   :  { %v4400_v1 = vpop.f32.mrf.mxu0  ;;  %10805 = vmatmul.mubr.msk.bf16.gmra.mxu1 %vm2276_vm4, %v4717_v23  ;;  %v13172_v51 = vpop.f32.mrf.mxu1 }
 0x822   :  { %v4401_v37 = vadd.f32 %v4400_v1, %v13116_v41  ;;  %v4672_v18 = vsel %vm4544_vm1, %v4398_v61, %v4608_v56 }
 0x823   :  { %v4402_v6 = vpop.f32.mrf.mxu0  ;;  %v4177_v55 = vpop.f32.mrf.mxu1 }
 0x824   :  { %vm4545_vm2 = vcmp.gt.f32.partialorder %v4401_v37, 0.0  ;;  %v4609_v39 = vmul.f32 0.01, %v4401_v37 }
 0x825   :  { %v4405_v27 = vpop.f32.mrf.mxu0  ;;  %v13175_v36 = vpop.f32.mrf.mxu1 }
 0x826   :  { %v4673_v32 = vsel %vm4545_vm2, %v4401_v37, %v4609_v39  ;;  %v4406_v35 = vadd.f32 %v4405_v27, %v13119_v21 }
 0x827   :  { %v4718_v52 = vpack.c.bf16 %v4673_v32, %v4672_v18  ;;  %v4407_v13 = vpop.f32.mrf.mxu0  ;;  %v4182_v50 = vpop.f32.mrf.mxu1 }
 0x828   :  { %v4610_v41 = vmul.f32 0.01, %v4406_v35  ;;  %vm4546_vm3 = vcmp.gt.f32.partialorder %v4406_v35, 0.0 }
 0x829   :  { %v4408_v59 = vpop.f32.mrf.mxu0  ;;  %10808 = vmatprep.mubr.msk.bf16.mxu1 %vm2276_vm4, %v4718_v52  ;;  %v13179_v42 = vpop.f32.mrf.mxu1 }
 0x82a   :  { %v4409_v46 = vadd.f32 %v4408_v59, %v13123_v60  ;;  %v4674_v21 = vsel %vm4546_vm3, %v4406_v35, %v4610_v41 }
 0x82b   :  { %v4410_v3 = vpop.f32.mrf.mxu0  ;;  %v4185_v31 = vpop.f32.mrf.mxu1 }
 0x82c   :  { %vm4547_vm5 = vcmp.gt.f32.partialorder %v4409_v46, 0.0  ;;  %v4611_v40 = vmul.f32 0.01, %v4409_v46 }
 0x82d   :  { %v4413_v24 = vpop.f32.mrf.mxu0  ;;  %v13182_v11 = vpop.f32.mrf.mxu1 }
 0x82e   :  { %v4675_v15 = vsel %vm4547_vm5, %v4409_v46, %v4611_v40  ;;  %v4414_v33 = vadd.f32 %v4413_v24, %v13126_v38 }
 0x82f   :  { %v4719_v25 = vpack.c.bf16 %v4675_v15, %v4674_v21  ;;  %v4415_v45 = vpop.f32.mrf.mxu0  ;;  %v4190_v29 = vpop.f32.mrf.mxu1 }
 0x830   :  { %v4612_v60 = vmul.f32 0.01, %v4414_v33  ;;  %vm4548_vm6 = vcmp.gt.f32.partialorder %v4414_v33, 0.0 }
 0x831   :  { %v4416_v34 = vpop.f32.mrf.mxu0  ;;  %10809 = vmatmul.mubr.msk.bf16.gmra.mxu1 %vm2276_vm4, %v4719_v25  ;;  %v13186_v7 = vpop.f32.mrf.mxu1 }
 0x832   :  { %v4417_v28 = vadd.f32 %v4416_v34, %v13130_v54  ;;  %v4676_v38 = vsel %vm4548_vm6, %v4414_v33, %v4612_v60 }
 0x833   :  { %v4418_v44 = vpop.f32.mrf.mxu0  ;;  %v4193_v4 = vpop.f32.mrf.mxu1 }
 0x834   :  { %vm4549_vm7 = vcmp.gt.f32.partialorder %v4417_v28, 0.0  ;;  %v4613_v43 = vmul.f32 0.01, %v4417_v28 }
 0x835   :  { %v4421_v48 = vpop.f32.mrf.mxu0  ;;  %v13189_v9 = vpop.f32.mrf.mxu1 }
 0x836   :  { %v4677_v30 = vsel %vm4549_vm7, %v4417_v28, %v4613_v43  ;;  %v4422_v0 = vadd.f32 %v4421_v48, %v13133_v57 }
 0x837   :  { %v4720_v22 = vpack.c.bf16 %v4677_v30, %v4676_v38  ;;  %v4423_v26 = vpop.f32.mrf.mxu0  ;;  %v4198_v58 = vpop.f32.mrf.mxu1 }
 0x838   :  { %v4614_v54 = vmul.f32 0.01, %v4422_v0  ;;  %vm4550_vm8 = vcmp.gt.f32.partialorder %v4422_v0, 0.0 }
 0x839   :  { %v4424_v2 = vpop.f32.mrf.mxu0  ;;  %10812 = vmatprep.mubr.msk.bf16.mxu1 %vm2276_vm4, %v4720_v22  ;;  %v13193_v16 = vpop.f32.mrf.mxu1 }
 0x83a   :  { %v4425_v61 = vadd.f32 %v4424_v2, %v13137_v10  ;;  %v4678_v57 = vsel %vm4550_vm8, %v4422_v0, %v4614_v54 }
 0x83b   :  { %v4426_v23 = vpop.f32.mrf.mxu0  ;;  %v4201_v63 = vpop.f32.mrf.mxu1 }
 0x83c   :  { %vm4551_vm9 = vcmp.gt.f32.partialorder %v4425_v61, 0.0  ;;  %v4615_v5 = vmul.f32 0.01, %v4425_v61 }
 0x83d   :  { %v4429_v1 = vpop.f32.mrf.mxu0  ;;  %v13196_v56 = vpop.f32.mrf.mxu1 }
 0x83e   :  { %v4679_v37 = vsel %vm4551_vm9, %v4425_v61, %v4615_v5  ;;  %v4430_v6 = vadd.f32 %v4429_v1, %v13140_v14 }
 0x83f   :  { %v4721_v55 = vpack.c.bf16 %v4679_v37, %v4678_v57  ;;  %v4431_v39 = vpop.f32.mrf.mxu0  ;;  %v4206_v27 = vpop.f32.mrf.mxu1 }
 0x840   :  { %v4616_v10 = vmul.f32 0.01, %v4430_v6  ;;  %vm4552_vm10 = vcmp.gt.f32.partialorder %v4430_v6, 0.0 }
 0x841   :  { %v4432_v18 = vpop.f32.mrf.mxu0  ;;  %10813 = vmatmul.mubr.msk.bf16.gmra.mxu1 %vm2276_vm4, %v4721_v55  ;;  %v13200_v32 = vpop.f32.mrf.mxu1 }
 0x842   :  { %v4433_v35 = vadd.f32 %v4432_v18, %v13144_v20  ;;  %v4680_v14 = vsel %vm4552_vm10, %v4430_v6, %v4616_v10 }
 0x843   :  { %v4434_v52 = vpop.f32.mrf.mxu0  ;;  %v4209_v13 = vpop.f32.mrf.mxu1 }
 0x844   :  { %vm4553_vm11 = vcmp.gt.f32.partialorder %v4433_v35, 0.0  ;;  %v4617_v50 = vmul.f32 0.01, %v4433_v35 }
 0x845   :  { %v4437_v59 = vpop.f32.mrf.mxu0  ;;  %v13203_v41 = vpop.f32.mrf.mxu1 }
 0x846   :  { %v4681_v46 = vsel %vm4553_vm11, %v4433_v35, %v4617_v50  ;;  %v4438_v3 = vadd.f32 %v4437_v59, %v13147_v19 }
 0x847   :  { %v4722_v31 = vpack.c.bf16 %v4681_v46, %v4680_v14  ;;  %v4439_v40 = vpop.f32.mrf.mxu0  ;;  %v4214_v24 = vpop.f32.mrf.mxu1 }
 0x848   :  { %v4618_v20 = vmul.f32 0.01, %v4438_v3  ;;  %vm4554_vm12 = vcmp.gt.f32.partialorder %v4438_v3, 0.0 }
 0x849   :  { %v4440_v21 = vpop.f32.mrf.mxu0  ;;  %10816 = vmatprep.mubr.msk.bf16.mxu1 %vm2276_vm4, %v4722_v31  ;;  %v13207_v15 = vpop.f32.mrf.mxu1 }
 0x84a   :  { %v4441_v33 = vadd.f32 %v4440_v21, %v13151_v8  ;;  %v4682_v60 = vsel %vm4554_vm12, %v4438_v3, %v4618_v20 }
 0x84b   :  { %v4442_v25 = vpop.f32.mrf.mxu0  ;;  %v4217_v45 = vpop.f32.mrf.mxu1 }
 0x84c   :  { %vm4555_vm13 = vcmp.gt.f32.partialorder %v4441_v33, 0.0  ;;  %v4619_v29 = vmul.f32 0.01, %v4441_v33 }
 0x84d   :  { %v4445_v34 = vpop.f32.mrf.mxu0 }
 0x84e   :  { %v4683_v28 = vsel %vm4555_vm13, %v4441_v33, %v4619_v29  ;;  %v4446_v19 = vadd.f32 %v4445_v34, %v13154_v47 }
 0x84f   :  { %v4723_v44 = vpack.c.bf16 %v4683_v28, %v4682_v60  ;;  %v4447_v4 = vpop.f32.mrf.mxu0 }
 0x850   :  { %v4620_v48 = vmul.f32 0.01, %v4446_v19  ;;  %vm4556_vm14 = vcmp.gt.f32.partialorder %v4446_v19, 0.0 }
 0x851   :  { %v4448_v43 = vpop.f32.mrf.mxu0  ;;  %10817 = vmatmul.mubr.msk.bf16.gmra.mxu1 %vm2276_vm4, %v4723_v44 }
 0x852   :  { %v4449_v38 = vadd.f32 %v4448_v43, %v13158_v53  ;;  %v4684_v22 = vsel %vm4556_vm14, %v4446_v19, %v4620_v48 }
 0x853   :  { %v4450_v8 = vpop.f32.mrf.mxu0 }
 0x854   :  { %vm4557_vm15 = vcmp.gt.f32.partialorder %v4449_v38, 0.0  ;;  %v4621_v30 = vmul.f32 0.01, %v4449_v38 }
 0x855   :  { %v4453_v0 = vpop.f32.mrf.mxu0 }
 0x856   :  { %v4685_v26 = vsel %vm4557_vm15, %v4449_v38, %v4621_v30  ;;  %v4454_v58 = vadd.f32 %v4453_v0, %v13161_v62 }
 0x857   :  { %v4724_v2 = vpack.c.bf16 %v4685_v26, %v4684_v22  ;;  %v4455_v54 = vpop.f32.mrf.mxu0 }
 0x858   :  { %v4622_v61 = vmul.f32 0.01, %v4454_v58  ;;  %vm4558_vm0 = vcmp.gt.f32.partialorder %v4454_v58, 0.0 }
 0x859   :  { %v4456_v47 = vpop.f32.mrf.mxu0  ;;  %10820 = vmatprep.mubr.msk.bf16.mxu1 %vm2276_vm4, %v4724_v2 }
 0x85a   :  { %v4457_v23 = vadd.f32 %v4456_v47, %v13165_v12  ;;  %v4686_v1 = vsel %vm4558_vm0, %v4454_v58, %v4622_v61 }
 0x85b   :  { %v4458_v63 = vpop.f32.mrf.mxu0 }
 0x85c   :  { %vm4559_vm1 = vcmp.gt.f32.partialorder %v4457_v23, 0.0  ;;  %v4623_v53 = vmul.f32 0.01, %v4457_v23 }
 0x85d   :  { %v4461_v5 = vpop.f32.mrf.mxu0 }
 0x85e   :  { %v4687_v57 = vsel %vm4559_vm1, %v4457_v23, %v4623_v53  ;;  %v4462_v37 = vadd.f32 %v4461_v5, %v13168_v49 }
 0x85f   :  { %v4725_v6 = vpack.c.bf16 %v4687_v57, %v4686_v1  ;;  %v4463_v55 = vpop.f32.mrf.mxu0 }
 0x860   :  { %v4624_v39 = vmul.f32 0.01, %v4462_v37  ;;  %vm4560_vm2 = vcmp.gt.f32.partialorder %v4462_v37, 0.0 }
 0x861   :  { %v4464_v62 = vpop.f32.mrf.mxu0  ;;  %10821 = vmatmul.mubr.msk.bf16.gmra.mxu1 %vm2276_vm4, %v4725_v6  ;;  %v13220_v49 = vpop.f32.mrf.mxu1 }
 0x862   :  { %v4465_v27 = vadd.f32 %v4464_v62, %v13172_v51  ;;  %v4688_v35 = vsel %vm4560_vm2, %v4462_v37, %v4624_v39 }
 0x863   :  { %v4466_v18 = vpop.f32.mrf.mxu0  ;;  %v13224_v31 = vpop.f32.mrf.mxu1 }
 0x864   :  { %vm4561_vm3 = vcmp.gt.f32.partialorder %v4465_v27, 0.0  ;;  %v4625_v12 = vmul.f32 0.01, %v4465_v27 }
 0x865   :  { %v4469_v10 = vpop.f32.mrf.mxu0  ;;  %v13227_v45 = vpop.f32.mrf.mxu1 }
 0x866   :  { %v4689_v52 = vsel %vm4561_vm3, %v4465_v27, %v4625_v12  ;;  %v4470_v13 = vadd.f32 %v4469_v10, %v13175_v36 }
 0x867   :  { %v4726_v50 = vpack.c.bf16 %v4689_v52, %v4688_v35  ;;  %v4471_v59 = vpop.f32.mrf.mxu0  ;;  %v13231_v28 = vpop.f32.mrf.mxu1 }
 0x868   :  { %v4626_v46 = vmul.f32 0.01, %v4470_v13  ;;  %vm4562_vm5 = vcmp.gt.f32.partialorder %v4470_v13, 0.0 }
 0x869   :  { %v4472_v14 = vpop.f32.mrf.mxu0  ;;  %10824 = vmatprep.mubr.msk.bf16.mxu1 %vm2276_vm4, %v4726_v50 }
 0x86a   :  { %v4473_v3 = vadd.f32 %v4472_v14, %v13179_v42  ;;  %v4690_v21 = vsel %vm4562_vm5, %v4470_v13, %v4626_v46 }
 0x86b   :  { %v4474_v51 = vpop.f32.mrf.mxu0 }
 0x86c   :  { %vm4563_vm6 = vcmp.gt.f32.partialorder %v4473_v3, 0.0  ;;  %v4627_v40 = vmul.f32 0.01, %v4473_v3  ;;  %v11778_v51 = vld [vmem:[#allocation2 + $0xc] ss:$16 sps:$4 sm:$0xff]  }
 0x86d   :  { %v4477_v24 = vpop.f32.mrf.mxu0 }
 0x86e   :  { %v4691_v20 = vsel %vm4563_vm6, %v4473_v3, %v4627_v40  ;;  %v4478_v36 = vadd.f32 %v4477_v24, %v13182_v11 }
 0x86f   :  { %v4727_v33 = vpack.c.bf16 %v4691_v20, %v4690_v21  ;;  %v4479_v25 = vpop.f32.mrf.mxu0 }
 0x870   :  { %v4628_v34 = vmul.f32 0.01, %v4478_v36  ;;  %vm4564_vm7 = vcmp.gt.f32.partialorder %v4478_v36, 0.0 }
 0x871   :  { %v4480_v29 = vpop.f32.mrf.mxu0  ;;  %10825 = vmatmul.mubr.msk.bf16.gmra.mxu1 %vm2276_vm4, %v4727_v33  ;;  %v13233_v4 = vpop.f32.mrf.mxu1 }
 0x872   :  { %v4481_v42 = vadd.f32 %v4480_v29, %v13186_v7  ;;  %v4692_v11 = vsel %vm4564_vm7, %v4478_v36, %v4628_v34 }
 0x873   :  { %v4482_v60 = vpop.f32.mrf.mxu0  ;;  %v13237_v0 = vpop.f32.mrf.mxu1 }
 0x874   :  { %vm4565_vm8 = vcmp.gt.f32.partialorder %v4481_v42, 0.0  ;;  %v4629_v19 = vmul.f32 0.01, %v4481_v42  ;;  %v5135_v60 = vpack.c.bf16 %v13227_v45, %v13220_v49 }
 0x875   :  { %v4485_v44 = vpop.f32.mrf.mxu0  ;;  %v10779_v54 = vpop.f32.mrf.mxu1 }
 0x876   :  { %v4693_v43 = vsel %vm4565_vm8, %v4481_v42, %v4629_v19  ;;  %v4486_v48 = vadd.f32 %v4485_v44, %v13189_v9  ;;  %v5137_v25 = vpack.c.bf16 %v10779_v54, %v13233_v4  ;;  %v5134_v44 = vpack.c.bf16 %v13231_v28, %v13224_v31 }
 0x877   :  { %v4728_v38 = vpack.c.bf16 %v4693_v43, %v4692_v11  ;;  %v4487_v8 = vpop.f32.mrf.mxu0  ;;  %v4898_v5 = vpop.f32.mrf.mxu1 }
 0x878   :  { %v4630_v7 = vmul.f32 0.01, %v4486_v48  ;;  %vm4566_vm9 = vcmp.gt.f32.partialorder %v4486_v48, 0.0  ;;  %v5136_v34 = vpack.c.bf16 %v4898_v5, %v13237_v0 }
 0x879   :  { %v4488_v30 = vpop.f32.mrf.mxu0  ;;  %10828 = vmatprep.mubr.msk.bf16.mxu1 %vm2276_vm4, %v4728_v38 }
 0x87a   :  { %v4489_v22 = vadd.f32 %v4488_v30, %v13193_v16  ;;  %v4694_v47 = vsel %vm4566_vm9, %v4486_v48, %v4630_v7 }
 0x87b   :  { %v4490_v26 = vpop.f32.mrf.mxu0 }
 0x87c   :  { %vm4567_vm10 = vcmp.gt.f32.partialorder %v4489_v22, 0.0  ;;  %v4631_v58 = vmul.f32 0.01, %v4489_v22 }
 0x87d   :  { %v4493_v2 = vpop.f32.mrf.mxu0 }
 0x87e   :  { %v4695_v61 = vsel %vm4567_vm10, %v4489_v22, %v4631_v58  ;;  %v4494_v9 = vadd.f32 %v4493_v2, %v13196_v56 }
 0x87f   :  { %v4729_v23 = vpack.c.bf16 %v4695_v61, %v4694_v47  ;;  %v4495_v63 = vpop.f32.mrf.mxu0 }
 0x880   :  { %v4632_v1 = vmul.f32 0.01, %v4494_v9  ;;  %vm4568_vm11 = vcmp.gt.f32.partialorder %v4494_v9, 0.0 }
 0x881   :  { %v4496_v53 = vpop.f32.mrf.mxu0  ;;  %10829 = vmatmul.mubr.msk.bf16.gmra.mxu1 %vm2276_vm4, %v4729_v23  ;;  %v10782_v37 = vpop.f32.mrf.mxu1 }
 0x882   :  { %v4497_v57 = vadd.f32 %v4496_v53, %v13200_v32  ;;  %v4696_v62 = vsel %vm4568_vm11, %v4494_v9, %v4632_v1 }
 0x883   :  { %v4498_v16 = vpop.f32.mrf.mxu0  ;;  %v4911_v12 = vpop.f32.mrf.mxu1 }
 0x884   :  { %vm4569_vm12 = vcmp.gt.f32.partialorder %v4497_v57, 0.0  ;;  %v4633_v6 = vmul.f32 0.01, %v4497_v57  ;;  %v11780_v16 = vld [vmem:[#allocation2 + $0x24] ss:$16 sps:$4 sm:$0xff]  }
 0x885   :  { %v4501_v55 = vpop.f32.mrf.mxu0  ;;  %v10783_v32 = vpop.f32.mrf.mxu1 }
 0x886   :  { %v4697_v39 = vsel %vm4569_vm12, %v4497_v57, %v4633_v6  ;;  %v4502_v27 = vadd.f32 %v4501_v55, %v13203_v41  ;;  %v5139_v36 = vpack.c.bf16 %v10783_v32, %v10782_v37  ;;  %v11779_v57 = vld [vmem:[#allocation2] ss:$16 sps:$4 sm:$0xff]   ;;  %v11786_v32 = vld [vmem:[#allocation2 + $0x84] ss:$16 sps:$4 sm:$0xff]  }
 0x887   :  { %v4730_v56 = vpack.c.bf16 %v4697_v39, %v4696_v62  ;;  %v4503_v18 = vpop.f32.mrf.mxu0  ;;  %v4914_v3 = vpop.f32.mrf.mxu1  ;;  %v11781_v55 = vld [vmem:[#allocation2 + $0x20] ss:$16 sps:$4 sm:$0xff]   ;;  %v11782_v62 = vld [vmem:[#allocation2 + $0x44] ss:$16 sps:$4 sm:$0xff]  }
 0x888   :  { %v4634_v35 = vmul.f32 0.01, %v4502_v27  ;;  %vm4570_vm13 = vcmp.gt.f32.partialorder %v4502_v27, 0.0  ;;  %v5138_v33 = vpack.c.bf16 %v4914_v3, %v4911_v12  ;;  %v11783_v18 = vld [vmem:[#allocation2 + $0x40] ss:$16 sps:$4 sm:$0xff]  }
 0x889   :  { %v4504_v10 = vpop.f32.mrf.mxu0  ;;  %10832 = vmatprep.mubr.msk.bf16.mxu1 %vm2276_vm4, %v4730_v56  ;;  %v11784_v12 = vld [vmem:[#allocation2 + $0x64] ss:$16 sps:$4 sm:$0xff]   ;;  %v11787_v3 = vld [vmem:[#allocation2 + $0x80] ss:$16 sps:$4 sm:$0xff]  }
 0x88a   :  { %v4505_v52 = vadd.f32 %v4504_v10, %v13207_v15  ;;  %v4698_v59 = vsel %vm4570_vm13, %v4502_v27, %v4634_v35 }
 0x88b   :  { %v4506_v13 = vpop.f32.mrf.mxu0 }
 0x88c   :  { %vm4571_vm14 = vcmp.gt.f32.partialorder %v4505_v52, 0.0  ;;  %v4635_v50 = vmul.f32 0.01, %v4505_v52 }
 0x88e   :  { %v4699_v14 = vsel %vm4571_vm14, %v4505_v52, %v4635_v50  ;;  %v11785_v52 = vld [vmem:[#allocation2 + $0x60] ss:$16 sps:$4 sm:$0xff]  }
 0x88f   :  { %v4731_v46 = vpack.c.bf16 %v4699_v14, %v4698_v59 }
 0x891   :  { %10833 = vmatmul.mubr.msk.bf16.gmra.mxu1 %vm2276_vm4, %v4731_v46  ;;  %v10786_v41 = vpop.f32.mrf.mxu1 }
 0x892   :  { %5487 = vmatprep.mubr.bf16.mxu1 %v11778_v51 }
 0x893   :  { %v4927_v40 = vpop.f32.mrf.mxu1 }
 0x895   :  { %v10787_v24 = vpop.f32.mrf.mxu1 }
 0x896   :  { %v5141_v21 = vpack.c.bf16 %v10787_v24, %v10786_v41  ;;  %v11788_v41 = vld [vmem:[#allocation2 + $0xa4] ss:$16 sps:$4 sm:$0xff]   ;;  %v11789_v24 = vld [vmem:[#allocation2 + $0xa0] ss:$16 sps:$4 sm:$0xff]  }
 0x897   :  { %v4930_v20 = vpop.f32.mrf.mxu1 }
 0x898   :  { %5167 = vmatpush1.bf16.msra.mxu0 %v5141_v21  ;;  %v5140_v15 = vpack.c.bf16 %v4930_v20, %v4927_v40  ;;  %v11790_v21 = vld [vmem:[#allocation2 + $0xc4] ss:$16 sps:$4 sm:$0xff]  }
 0x899   :  { %5168 = vmatprep.subr.bf16.mxu0 %v15545_v17 }
 0x89c   :  { %5169 = vmatpush1.bf16.msra.mxu0 %v5140_v15 }
 0x89d   :  { %5170 = vmatprep.subr.bf16.mxu0 %v15545_v17 }
 0x8a0   :  { %5171 = vmatpush1.bf16.msra.mxu0 %v5139_v36 }
 0x8a1   :  { %5172 = vmatprep.subr.bf16.mxu0 %v15545_v17  ;;  %v10790_v29 = vpop.f32.mrf.mxu1 }
 0x8a3   :  { %v4943_v42 = vpop.f32.mrf.mxu1 }
 0x8a4   :  { %5173 = vmatpush1.bf16.msra.mxu0 %v5138_v33  ;;  %v11791_v33 = vld [vmem:[#allocation2 + $0xc0] ss:$16 sps:$4 sm:$0xff]  }
 0x8a5   :  { %5174 = vmatprep.subr.bf16.mxu0 %v15545_v17  ;;  %v10791_v19 = vpop.f32.mrf.mxu1 }
 0x8a6   :  { %v5143_v23 = vpack.c.bf16 %v10791_v19, %v10790_v29  ;;  %v11793_v19 = vld [vmem:[#allocation2 + $0xe0] ss:$16 sps:$4 sm:$0xff]  }
 0x8a7   :  { %v4946_v4 = vpop.f32.mrf.mxu1 }
 0x8a8   :  { %5175 = vmatpush1.bf16.msra.mxu0 %v5137_v25  ;;  %v5142_v53 = vpack.c.bf16 %v4946_v4, %v4943_v42  ;;  %v11792_v25 = vld [vmem:[#allocation2 + $0xe4] ss:$16 sps:$4 sm:$0xff]  }
 0x8a9   :  { %5176 = vmatprep.subr.bf16.mxu0 %v15545_v17 }
 0x8ac   :  { %5177 = vmatpush1.bf16.msra.mxu0 %v5136_v34 }
 0x8ad   :  { %5178 = vmatprep.subr.bf16.mxu0 %v15545_v17 }
 0x8b0   :  { %5179 = vmatpush1.bf16.msra.mxu0 %v5135_v60 }
 0x8b1   :  { %5180 = vmatprep.subr.bf16.mxu0 %v15545_v17  ;;  %v10794_v11 = vpop.f32.mrf.mxu1 }
 0x8b3   :  { %v4959_v43 = vpop.f32.mrf.mxu1 }
 0x8b4   :  { %5181 = vmatpush1.bf16.msra.mxu0 %v5134_v44  ;;  %v11794_v44 = vld [vmem:[#allocation2 + $0x104] ss:$16 sps:$4 sm:$0xff]  }
 0x8b5   :  { %5182 = vmatprep.subr.bf16.mxu0 %v15545_v17  ;;  %v10795_v48 = vpop.f32.mrf.mxu1 }
 0x8b6   :  { %v5145_v54 = vpack.c.bf16 %v10795_v48, %v10794_v11  ;;  %v11795_v48 = vld [vmem:[#allocation2 + $0x100] ss:$16 sps:$4 sm:$0xff]  }
 0x8b7   :  { %v4962_v38 = vpop.f32.mrf.mxu1 }
 0x8b8   :  { %v5144_v61 = vpack.c.bf16 %v4962_v38, %v4959_v43  ;;  %v11796_v38 = vld [vmem:[#allocation2 + $0x124] ss:$16 sps:$4 sm:$0xff]  }
 0x8c1   :  { %v10798_v8 = vpop.f32.mrf.mxu1 }
 0x8c3   :  { %v4975_v30 = vpop.f32.mrf.mxu1 }
 0x8c5   :  { %v10799_v0 = vpop.f32.mrf.mxu1 }
 0x8c6   :  { %v5147_v28 = vpack.c.bf16 %v10799_v0, %v10798_v8  ;;  %v11797_v0 = vld [vmem:[#allocation2 + $0x120] ss:$16 sps:$4 sm:$0xff]  }
 0x8c7   :  { %v4978_v7 = vpop.f32.mrf.mxu1 }
 0x8c8   :  { %v5146_v2 = vpack.c.bf16 %v4978_v7, %v4975_v30  ;;  %v11798_v7 = vld [vmem:[#allocation2 + $0x144] ss:$16 sps:$4 sm:$0xff]  }
 0x8d1   :  { %v10802_v49 = vpop.f32.mrf.mxu1 }
 0x8d3   :  { %v4991_v45 = vpop.f32.mrf.mxu1 }
 0x8d5   :  { %v10803_v22 = vpop.f32.mrf.mxu1 }
 0x8d6   :  { %v5149_v26 = vpack.c.bf16 %v10803_v22, %v10802_v49 }
 0x8d7   :  { %v4994_v58 = vpop.f32.mrf.mxu1 }
 0x8d8   :  { %5183 = vmatpush2.bf16.msra.mxu0 %v5149_v26  ;;  %v5148_v31 = vpack.c.bf16 %v4994_v58, %v4991_v45  ;;  %v11799_v26 = vld [vmem:[#allocation2 + $0x140] ss:$16 sps:$4 sm:$0xff]   ;;  %v11800_v58 = vld [vmem:[#allocation2 + $0x164] ss:$16 sps:$4 sm:$0xff]  }
 0x8d9   :  { %5184 = vmatprep.subr.bf16.mxu0 %v15545_v17 }
 0x8dc   :  { %5185 = vmatpush2.bf16.msra.mxu0 %v5148_v31 }
 0x8dd   :  { %5186 = vmatprep.subr.bf16.mxu0 %v15545_v17 }
 0x8e0   :  { %5187 = vmatpush2.bf16.msra.mxu0 %v5147_v28 }
 0x8e1   :  { %5188 = vmatprep.subr.bf16.mxu0 %v15545_v17  ;;  %v13265_v47 = vpop.f32.mrf.mxu1 }
 0x8e3   :  { %v13268_v9 = vpop.f32.mrf.mxu1 }
 0x8e4   :  { %5189 = vmatpush2.bf16.msra.mxu0 %v5146_v2  ;;  %v11801_v2 = vld [vmem:[#allocation2 + $0x160] ss:$16 sps:$4 sm:$0xff]  }
 0x8e5   :  { %5190 = vmatprep.subr.bf16.mxu0 %v15545_v17  ;;  %v13271_v63 = vpop.f32.mrf.mxu1 }
 0x8e6   :  { %v5151_v42 = vpack.c.bf16 %v13271_v63, %v13265_v47 }
 0x8e7   :  { %v13274_v5 = vpop.f32.mrf.mxu1 }
 0x8e8   :  { %5191 = vmatpush2.bf16.msra.mxu0 %v5145_v54  ;;  %v5150_v4 = vpack.c.bf16 %v13274_v5, %v13268_v9  ;;  %v11802_v54 = vld [vmem:[#allocation2 + $0x184] ss:$16 sps:$4 sm:$0xff]  }
 0x8e9   :  { %5192 = vmatprep.subr.bf16.mxu0 %v15545_v17  ;;  %v11804_v5 = vld [vmem:[#allocation2 + $0x1a4] ss:$16 sps:$4 sm:$0xff]  }
 0x8ec   :  { %5193 = vmatpush2.bf16.msra.mxu0 %v5144_v61 }
 0x8ed   :  { %5194 = vmatprep.subr.bf16.mxu0 %v15545_v17 }
 0x8f0   :  { %5195 = vmatpush2.bf16.msra.mxu0 %v5143_v23 }
 0x8f1   :  { %5196 = vmatprep.subr.bf16.mxu0 %v15545_v17  ;;  %v10810_v1 = vpop.f32.mrf.mxu1 }
 0x8f3   :  { %v5023_v37 = vpop.f32.mrf.mxu1 }
 0x8f4   :  { %5197 = vmatpush2.bf16.msra.mxu0 %v5142_v53  ;;  %v11803_v53 = vld [vmem:[#allocation2 + $0x180] ss:$16 sps:$4 sm:$0xff]  }
 0x8f5   :  { %v10811_v6 = vpop.f32.mrf.mxu1 }
 0x8f6   :  { %v5153_v15 = vpack.c.bf16 %v10811_v6, %v10810_v1 }
 0x8f7   :  { %5199 = vmatmul.mubr.bf16.vlgmr.msra.gmra.mxu0 %v11779_v57  ;;  %v5026_v39 = vpop.f32.mrf.mxu1 }
 0x8f8   :  { %5206 = vmatprep.mubr.bf16.mxu0 %v11780_v16  ;;  %v5152_v29 = vpack.c.bf16 %v5026_v39, %v5023_v37  ;;  %v11805_v16 = vld [vmem:[#allocation2 + $0x1a0] ss:$16 sps:$4 sm:$0xff]   ;;  %v11806_v37 = vld [vmem:[#allocation2 + $0x1c4] ss:$16 sps:$4 sm:$0xff]  }
 0x8f9   :  { %v11808_v39 = vld [vmem:[#allocation2 + $0x1e4] ss:$16 sps:$4 sm:$0xff]  }
 0x8ff   :  { %5207 = vmatmul.mubr.bf16.gmra.mxu0 %v11781_v55 }
 0x900   :  { %5214 = vmatprep.mubr.bf16.mxu0 %v11782_v62  ;;  %v11807_v62 = vld [vmem:[#allocation2 + $0x1c0] ss:$16 sps:$4 sm:$0xff]  }
 0x901   :  { %v10814_v27 = vpop.f32.mrf.mxu1 }
 0x903   :  { %v5039_v56 = vpop.f32.mrf.mxu1 }
 0x905   :  { %v10815_v10 = vpop.f32.mrf.mxu1 }
 0x906   :  { %v5155_v40 = vpack.c.bf16 %v10815_v10, %v10814_v27 }
 0x907   :  { %5215 = vmatmul.mubr.bf16.gmra.mxu0 %v11783_v18  ;;  %v5042_v35 = vpop.f32.mrf.mxu1  ;;  %v11809_v18 = vld [vmem:[#allocation2 + $0x1e0] ss:$16 sps:$4 sm:$0xff]  }
 0x908   :  { %5222 = vmatprep.mubr.bf16.mxu0 %v11784_v12  ;;  %v5154_v20 = vpack.c.bf16 %v5042_v35, %v5039_v56  ;;  %v11810_v12 = vld [vmem:[#allocation2 + $0x204] ss:$16 sps:$4 sm:$0xff]   ;;  %v11811_v35 = vld [vmem:[#allocation2 + $0x8] ss:$16 sps:$4 sm:$0xff]  }
 0x90f   :  { %5223 = vmatmul.mubr.bf16.gmra.mxu0 %v11785_v52  ;;  %v11812_v52 = vld [vmem:[#allocation2 + $0x200] ss:$16 sps:$4 sm:$0xff]  }
 0x910   :  { %5230 = vmatprep.mubr.bf16.mxu0 %v11786_v32  ;;  %v11813_v32 = vld [vmem:[#allocation2 + $0x2c] ss:$16 sps:$4 sm:$0xff]  }
 0x911   :  { %v10818_v13 = vpop.f32.mrf.mxu1 }
 0x913   :  { %v5055_v50 = vpop.f32.mrf.mxu1 }
 0x915   :  { %v10819_v59 = vpop.f32.mrf.mxu1 }
 0x916   :  { %v5157_v14 = vpack.c.bf16 %v10819_v59, %v10818_v13  ;;  %v11814_v13 = vld [vmem:[#allocation2 + $0x224] ss:$16 sps:$4 sm:$0xff]   ;;  %v11816_v59 = vld [vmem:[#allocation2 + $0x220] ss:$16 sps:$4 sm:$0xff]  }
 0x917   :  { %v5058_v46 = vpop.f32.mrf.mxu1  ;;  %5231 = vmatmul.mubr.bf16.gmra.mxu0 %v11787_v3  ;;  %v11820_v3 = vld [vmem:[#allocation2 + $0x240] ss:$16 sps:$4 sm:$0xff]  }
 0x918   :  { %5456 = vmatpush1.bf16.msra.mxu1 %v5157_v14  ;;  %5238 = vmatprep.mubr.bf16.mxu0 %v11788_v41  ;;  %v5156_v51 = vpack.c.bf16 %v5058_v46, %v5055_v50  ;;  %v11815_v50 = vld [vmem:[#allocation2 + $0x28] ss:$16 sps:$4 sm:$0xff]   ;;  %v11817_v14 = vld [vmem:[#allocation2 + $0x4c] ss:$16 sps:$4 sm:$0xff]   ;;  %v11818_v46 = vld [vmem:[#allocation2 + $0x244] ss:$16 sps:$4 sm:$0xff]  }
 0x919   :  { %5457 = vmatprep.subr.bf16.mxu1 %v15545_v17  ;;  %v11821_v41 = vld [vmem:[#allocation2 + $0x6c] ss:$16 sps:$4 sm:$0xff]  }
 0x91c   :  { %5458 = vmatpush1.bf16.msra.mxu1 %v5156_v51  ;;  %v11822_v51 = vld [vmem:[#allocation2 + $0x264] ss:$16 sps:$4 sm:$0xff]  }
 0x91d   :  { %5459 = vmatprep.subr.bf16.mxu1 %v15545_v17 }
 0x91f   :  { %5239 = vmatmul.mubr.bf16.gmra.mxu0 %v11789_v24  ;;  %v11824_v24 = vld [vmem:[#allocation2 + $0x260] ss:$16 sps:$4 sm:$0xff]  }
 0x920   :  { %5460 = vmatpush1.bf16.msra.mxu1 %v5155_v40  ;;  %5246 = vmatprep.mubr.bf16.mxu0 %v11790_v21  ;;  %v11823_v40 = vld [vmem:[#allocation2 + $0x68] ss:$16 sps:$4 sm:$0xff]   ;;  %v11825_v21 = vld [vmem:[#allocation2 + $0x8c] ss:$16 sps:$4 sm:$0xff]  }
 0x921   :  { %5461 = vmatprep.subr.bf16.mxu1 %v15545_v17  ;;  %v13280_v36 = vpop.f32.mrf.mxu1 }
 0x923   :  { %v13283_v34 = vpop.f32.mrf.mxu1 }
 0x924   :  { %5462 = vmatpush1.bf16.msra.mxu1 %v5154_v20  ;;  %v11826_v20 = vld [vmem:[#allocation2 + $0x284] ss:$16 sps:$4 sm:$0xff]  }
 0x925   :  { %5463 = vmatprep.subr.bf16.mxu1 %v15545_v17  ;;  %v13288_v60 = vpop.f32.mrf.mxu1 }
 0x926   :  { %v5159_v56 = vpack.c.bf16 %v13288_v60, %v13280_v36  ;;  %v11828_v36 = vld [vmem:[#allocation2 + $0x280] ss:$16 sps:$4 sm:$0xff]   ;;  %v11834_v60 = vld [vmem:[#allocation2 + $0x2c4] ss:$16 sps:$4 sm:$0xff]  }
 0x927   :  { %5247 = vmatmul.mubr.bf16.gmra.mxu0 %v11791_v33  ;;  %v13293_v11 = vpop.f32.mrf.mxu1  ;;  %v11829_v33 = vld [vmem:[#allocation2 + $0xac] ss:$16 sps:$4 sm:$0xff]  }
 0x928   :  { %5464 = vmatpush1.bf16.msra.mxu1 %v5153_v15  ;;  %5254 = vmatprep.mubr.bf16.mxu0 %v11792_v25  ;;  %v5158_v10 = vpack.c.bf16 %v13293_v11, %v13283_v34  ;;  %v11827_v15 = vld [vmem:[#allocation2 + $0x88] ss:$16 sps:$4 sm:$0xff]   ;;  %v11830_v25 = vld [vmem:[#allocation2 + $0x2a4] ss:$16 sps:$4 sm:$0xff]   ;;  %v11832_v34 = vld [vmem:[#allocation2 + $0x2a0] ss:$16 sps:$4 sm:$0xff]  }
 0x929   :  { %5465 = vmatprep.subr.bf16.mxu1 %v15545_v17  ;;  %v11838_v11 = vld [vmem:[#allocation2 + $0x2e4] ss:$16 sps:$4 sm:$0xff]  }
 0x92c   :  { %5466 = vmatpush1.bf16.msra.mxu1 %v5152_v29  ;;  %v11831_v29 = vld [vmem:[#allocation2 + $0xa8] ss:$16 sps:$4 sm:$0xff]  }
 0x92d   :  { %5467 = vmatprep.subr.bf16.mxu1 %v15545_v17 }
 0x92f   :  { %5255 = vmatmul.mubr.bf16.gmra.mxu0 %v11793_v19  ;;  %v11835_v19 = vld [vmem:[#allocation2 + $0xc8] ss:$16 sps:$4 sm:$0xff]  }
 0x930   :  { %5468 = vmatpush1.bf16.msra.mxu1 %v5151_v42  ;;  %5262 = vmatprep.mubr.bf16.mxu0 %v11794_v44  ;;  %v11833_v42 = vld [vmem:[#allocation2 + $0xcc] ss:$16 sps:$4 sm:$0xff]   ;;  %v11836_v44 = vld [vmem:[#allocation2 + $0x2c0] ss:$16 sps:$4 sm:$0xff]  }
 0x931   :  { %5469 = vmatprep.subr.bf16.mxu1 %v15545_v17  ;;  %v10826_v43 = vpop.f32.mrf.mxu1 }
 0x933   :  { %v5087_v8 = vpop.f32.mrf.mxu1 }
 0x934   :  { %5470 = vmatpush1.bf16.msra.mxu1 %v5150_v4  ;;  %v11837_v4 = vld [vmem:[#allocation2 + $0xec] ss:$16 sps:$4 sm:$0xff]  }
 0x935   :  { %5471 = vmatprep.subr.bf16.mxu1 %v15545_v17  ;;  %v10827_v30 = vpop.f32.mrf.mxu1 }
 0x936   :  { %v5161_v55 = vpack.c.bf16 %v10827_v30, %v10826_v43  ;;  %v11839_v43 = vld [vmem:[#allocation2 + $0xe8] ss:$16 sps:$4 sm:$0xff]  }
 0x937   :  { %5263 = vmatmul.mubr.bf16.gmra.mxu0 %v11795_v48  ;;  %v5090_v49 = vpop.f32.mrf.mxu1  ;;  %v11840_v48 = vld [vmem:[#allocation2 + $0x2e0] ss:$16 sps:$4 sm:$0xff]   ;;  %v11843_v30 = vld [vmem:[#allocation2 + $0x108] ss:$16 sps:$4 sm:$0xff]  }
 0x938   :  { %5270 = vmatprep.mubr.bf16.mxu0 %v11796_v38  ;;  %v5160_v27 = vpack.c.bf16 %v5090_v49, %v5087_v8  ;;  %v11841_v38 = vld [vmem:[#allocation2 + $0x10c] ss:$16 sps:$4 sm:$0xff]   ;;  %v11842_v8 = vld [vmem:[#allocation2 + $0x304] ss:$16 sps:$4 sm:$0xff]  }
 0x939   :  { %v11845_v49 = vld [vmem:[#allocation2 + $0x12c] ss:$16 sps:$4 sm:$0xff]  }
 0x93f   :  { %5271 = vmatmul.mubr.bf16.gmra.mxu0 %v11797_v0 }
 0x940   :  { %5278 = vmatprep.mubr.bf16.mxu0 %v11798_v7  ;;  %v11844_v7 = vld [vmem:[#allocation2 + $0x300] ss:$16 sps:$4 sm:$0xff]  }
 0x941   :  { %v10830_v45 = vpop.f32.mrf.mxu1 }
 0x943   :  { %v5103_v22 = vpop.f32.mrf.mxu1 }
 0x945   :  { %v10831_v31 = vpop.f32.mrf.mxu1 }
 0x946   :  { %v5163_v57 = vpack.c.bf16 %v10831_v31, %v10830_v45  ;;  %v11846_v45 = vld [vmem:[#allocation2 + $0x324] ss:$16 sps:$4 sm:$0xff]   ;;  %v11847_v31 = vld [vmem:[#allocation2 + $0x128] ss:$16 sps:$4 sm:$0xff]  }
 0x947   :  { %5279 = vmatmul.mubr.bf16.gmra.mxu0 %v11799_v26  ;;  %v5106_v28 = vpop.f32.mrf.mxu1 }
 0x948   :  { %5286 = vmatprep.mubr.bf16.mxu0 %v11800_v58  ;;  %v5162_v6 = vpack.c.bf16 %v5106_v28, %v5103_v22 }
 0x94f   :  { %5287 = vmatmul.mubr.bf16.gmra.mxu0 %v11801_v2  ;;  %v11848_v2 = vld [vmem:[#allocation2 + $0x320] ss:$16 sps:$4 sm:$0xff]  }
 0x950   :  { %5294 = vmatprep.mubr.bf16.mxu0 %v11802_v54  ;;  %v11849_v54 = vld [vmem:[#allocation2 + $0x14c] ss:$16 sps:$4 sm:$0xff]  }
 0x951   :  { %v10834_v47 = vpop.f32.mrf.mxu1 }
 0x953   :  { %v5119_v61 = vpop.f32.mrf.mxu1 }
 0x955   :  { %v10835_v9 = vpop.f32.mrf.mxu1 }
 0x956   :  { %v5165_v23 = vpack.c.bf16 %v10835_v9, %v10834_v47  ;;  %v11850_v47 = vld [vmem:[#allocation2 + $0x344] ss:$16 sps:$4 sm:$0xff]   ;;  %v11377_v9 = vld [vmem:[%s15405_s5 + $0x8] sm:$0xff]  }
 0x957   :  { %v5122_v63 = vpop.f32.mrf.mxu1  ;;  %5295 = vmatmul.mubr.bf16.gmra.mxu0 %v11803_v53  ;;  %10836 = vmatprep.subr.bf16.mxu0 %v11377_v9  ;;  %v11378_v53 = vld [vmem:[%s15405_s5] sm:$0xff]  }
 0x958   :  { %5472 = vmatpush2.bf16.msra.mxu1 %v5165_v23  ;;  %5302 = vmatprep.mubr.bf16.mxu0 %v11804_v5  ;;  %v5164_v1 = vpack.c.bf16 %v5122_v63, %v5119_v61  ;;  %v11851_v5 = vld [vmem:[#allocation2 + $0x148] ss:$16 sps:$4 sm:$0xff]  }
 0x959   :  { %5473 = vmatprep.subr.bf16.mxu1 %v15545_v17  ;;  %10837 = vmatpush3.bf16.msra.mxu0 %v11377_v9 }
 0x95a   :  { %10838 = vmatprep.subr.bf16.mxu0 %v11378_v53 }
 0x95c   :  { %5474 = vmatpush2.bf16.msra.mxu1 %v5164_v1 }
 0x95d   :  { %5475 = vmatprep.subr.bf16.mxu1 %v15545_v17  ;;  %10839 = vmatpush3.bf16.msra.mxu0 %v11378_v53  ;;  %v11878_v53 = vld [vmem:[#allocation2 + $0x248] ss:$16 sps:$4 sm:$0xff]  }
 0x95f   :  { %5303 = vmatmul.mubr.bf16.gmra.mxu0 %v11805_v16  ;;  %v11853_v16 = vld [vmem:[#allocation2 + $0x16c] ss:$16 sps:$4 sm:$0xff]  }
 0x960   :  { %5476 = vmatpush2.bf16.msra.mxu1 %v5163_v57  ;;  %5310 = vmatprep.mubr.bf16.mxu0 %v11806_v37  ;;  %v11852_v57 = vld [vmem:[#allocation2 + $0x340] ss:$16 sps:$4 sm:$0xff]   ;;  %v11854_v37 = vld [vmem:[#allocation2 + $0x364] ss:$16 sps:$4 sm:$0xff]  }
 0x961   :  { %5477 = vmatprep.subr.bf16.mxu1 %v15545_v17 }
 0x964   :  { %5478 = vmatpush2.bf16.msra.mxu1 %v5162_v6 }
 0x965   :  { %5479 = vmatprep.subr.bf16.mxu1 %v15545_v17 }
 0x967   :  { %5311 = vmatmul.mubr.bf16.gmra.mxu0 %v11807_v62 }
 0x968   :  { %5480 = vmatpush2.bf16.msra.mxu1 %v5161_v55  ;;  %5318 = vmatprep.mubr.bf16.mxu0 %v11808_v39  ;;  %v11855_v39 = vld [vmem:[#allocation2 + $0x168] ss:$16 sps:$4 sm:$0xff]  }
 0x969   :  { %5481 = vmatprep.subr.bf16.mxu1 %v15545_v17 }
 0x96c   :  { %5482 = vmatpush2.bf16.msra.mxu1 %v5160_v27 }
 0x96d   :  { %5483 = vmatprep.subr.bf16.mxu1 %v15545_v17 }
 0x96f   :  { %5319 = vmatmul.mubr.bf16.gmra.mxu0 %v11809_v18  ;;  %v11857_v18 = vld [vmem:[#allocation2 + $0x18c] ss:$16 sps:$4 sm:$0xff]  }
 0x970   :  { %5484 = vmatpush2.bf16.msra.mxu1 %v5159_v56  ;;  %5326 = vmatprep.mubr.bf16.mxu0 %v11810_v12  ;;  %v11856_v56 = vld [vmem:[#allocation2 + $0x360] ss:$16 sps:$4 sm:$0xff]   ;;  %v11858_v12 = vld [vmem:[#allocation2 + $0x384] ss:$16 sps:$4 sm:$0xff]  }
 0x971   :  { %5485 = vmatprep.subr.bf16.mxu1 %v15545_v17  ;;  %v11819_v17 = vld [vmem:[#allocation2 + $0x48] ss:$16 sps:$4 sm:$0xff]  }
 0x974   :  { %5486 = vmatpush2.bf16.msra.mxu1 %v5158_v10 }
 0x977   :  { %5488 = vmatmul.mubr.bf16.vlgmr.msra.gmra.mxu1 %v11811_v35  ;;  %5327 = vmatmul.mubr.bf16.gmra.mxu0 %v11812_v52 }
 0x978   :  { %5495 = vmatprep.mubr.bf16.mxu1 %v11813_v32  ;;  %5334 = vmatprep.mubr.bf16.mxu0 %v11814_v13  ;;  %v11859_v32 = vld [vmem:[#allocation2 + $0x188] ss:$16 sps:$4 sm:$0xff]  }
 0x97f   :  { %5496 = vmatmul.mubr.bf16.gmra.mxu1 %v11815_v50  ;;  %5335 = vmatmul.mubr.bf16.gmra.mxu0 %v11816_v59  ;;  %v11860_v50 = vld [vmem:[#allocation2 + $0x380] ss:$16 sps:$4 sm:$0xff]   ;;  %v11861_v59 = vld [vmem:[#allocation2 + $0x1ac] ss:$16 sps:$4 sm:$0xff]  }
 0x980   :  { %5503 = vmatprep.mubr.bf16.mxu1 %v11817_v14  ;;  %5342 = vmatprep.mubr.bf16.mxu0 %v11818_v46  ;;  %v11862_v14 = vld [vmem:[#allocation2 + $0x3a4] ss:$16 sps:$4 sm:$0xff]  }
 0x987   :  { %5504 = vmatmul.mubr.bf16.gmra.mxu1 %v11819_v17  ;;  %5343 = vmatmul.mubr.bf16.gmra.mxu0 %v11820_v3 }
 0x988   :  { %5511 = vmatprep.mubr.bf16.mxu1 %v11821_v41  ;;  %5350 = vmatprep.mubr.bf16.mxu0 %v11822_v51  ;;  %v11863_v41 = vld [vmem:[#allocation2 + $0x1a8] ss:$16 sps:$4 sm:$0xff]  }
 0x98f   :  { %5512 = vmatmul.mubr.bf16.gmra.mxu1 %v11823_v40  ;;  %5351 = vmatmul.mubr.bf16.gmra.mxu0 %v11824_v24  ;;  %v11864_v40 = vld [vmem:[#allocation2 + $0x3a0] ss:$16 sps:$4 sm:$0xff]   ;;  %v11865_v24 = vld [vmem:[#allocation2 + $0x1cc] ss:$16 sps:$4 sm:$0xff]  }
 0x990   :  { %5519 = vmatprep.mubr.bf16.mxu1 %v11825_v21  ;;  %5358 = vmatprep.mubr.bf16.mxu0 %v11826_v20  ;;  %v11866_v21 = vld [vmem:[#allocation2 + $0x3c4] ss:$16 sps:$4 sm:$0xff]  }
 0x997   :  { %5520 = vmatmul.mubr.bf16.gmra.mxu1 %v11827_v15  ;;  %5359 = vmatmul.mubr.bf16.gmra.mxu0 %v11828_v36 }
 0x998   :  { %5527 = vmatprep.mubr.bf16.mxu1 %v11829_v33  ;;  %5366 = vmatprep.mubr.bf16.mxu0 %v11830_v25  ;;  %v11867_v33 = vld [vmem:[#allocation2 + $0x1c8] ss:$16 sps:$4 sm:$0xff]  }
 0x99f   :  { %5528 = vmatmul.mubr.bf16.gmra.mxu1 %v11831_v29  ;;  %5367 = vmatmul.mubr.bf16.gmra.mxu0 %v11832_v34  ;;  %v11868_v29 = vld [vmem:[#allocation2 + $0x3c0] ss:$16 sps:$4 sm:$0xff]   ;;  %v11869_v34 = vld [vmem:[#allocation2 + $0x1ec] ss:$16 sps:$4 sm:$0xff]  }
 0x9a0   :  { %5535 = vmatprep.mubr.bf16.mxu1 %v11833_v42  ;;  %5374 = vmatprep.mubr.bf16.mxu0 %v11834_v60  ;;  %v11870_v42 = vld [vmem:[#allocation2 + $0x3e4] ss:$16 sps:$4 sm:$0xff]  }
 0x9a7   :  { %5536 = vmatmul.mubr.bf16.gmra.mxu1 %v11835_v19  ;;  %5375 = vmatmul.mubr.bf16.gmra.mxu0 %v11836_v44 }
 0x9a8   :  { %5543 = vmatprep.mubr.bf16.mxu1 %v11837_v4  ;;  %5382 = vmatprep.mubr.bf16.mxu0 %v11838_v11  ;;  %v11871_v4 = vld [vmem:[#allocation2 + $0x1e8] ss:$16 sps:$4 sm:$0xff]  }
 0x9af   :  { %5544 = vmatmul.mubr.bf16.gmra.mxu1 %v11839_v43  ;;  %5383 = vmatmul.mubr.bf16.gmra.mxu0 %v11840_v48  ;;  %v11872_v43 = vld [vmem:[#allocation2 + $0x3e0] ss:$16 sps:$4 sm:$0xff]   ;;  %v11873_v48 = vld [vmem:[#allocation2 + $0x20c] ss:$16 sps:$4 sm:$0xff]  }
 0x9b0   :  { %5551 = vmatprep.mubr.bf16.mxu1 %v11841_v38  ;;  %5390 = vmatprep.mubr.bf16.mxu0 %v11842_v8 }
 0x9b7   :  { %5552 = vmatmul.mubr.bf16.gmra.mxu1 %v11843_v30  ;;  %v13307_v0 = vpop.f32.mrf.mxu0  ;;  %5391 = vmatmul.mubr.bf16.gmra.mxu0 %v11844_v7  ;;  %v11874_v7 = vld [vmem:[#allocation2 + $0x208] ss:$16 sps:$4 sm:$0xff]  }
 0x9b8   :  { %5559 = vmatprep.mubr.bf16.mxu1 %v11845_v49  ;;  %5398 = vmatprep.mubr.bf16.mxu0 %v11846_v45  ;;  %v11875_v45 = vld [vmem:[#allocation2 + $0x22c] ss:$16 sps:$4 sm:$0xff]  }
 0x9b9   :  { %v5202_v22 = vpop.f32.mrf.mxu0 }
 0x9bb   :  { %v13309_v26 = vpop.f32.mrf.mxu0 }
 0x9bd   :  { %v5205_v58 = vpop.f32.mrf.mxu0 }
 0x9bf   :  { %5560 = vmatmul.mubr.bf16.gmra.mxu1 %v11847_v31  ;;  %v13311_v28 = vpop.f32.mrf.mxu0  ;;  %5399 = vmatmul.mubr.bf16.gmra.mxu0 %v11848_v2  ;;  %v11876_v2 = vld [vmem:[#allocation2 + $0x228] ss:$16 sps:$4 sm:$0xff]  }
 0x9c0   :  { %5567 = vmatprep.mubr.bf16.mxu1 %v11849_v54  ;;  %5406 = vmatprep.mubr.bf16.mxu0 %v11850_v47  ;;  %v11877_v47 = vld [vmem:[#allocation2 + $0x24c] ss:$16 sps:$4 sm:$0xff]  }
 0x9c1   :  { %v5210_v61 = vpop.f32.mrf.mxu0 }
 0x9c3   :  { %v13316_v23 = vpop.f32.mrf.mxu0 }
 0x9c5   :  { %v5213_v63 = vpop.f32.mrf.mxu0 }
 0x9c7   :  { %5568 = vmatmul.mubr.bf16.gmra.mxu1 %v11851_v5  ;;  %v13321_v1 = vpop.f32.mrf.mxu0  ;;  %5407 = vmatmul.mubr.bf16.gmra.mxu0 %v11852_v57  ;;  %v11879_v57 = vld [vmem:[#allocation2 + $0x26c] ss:$16 sps:$4 sm:$0xff]  }
 0x9c8   :  { %5575 = vmatprep.mubr.bf16.mxu1 %v11853_v16  ;;  %5414 = vmatprep.mubr.bf16.mxu0 %v11854_v37 }
 0x9c9   :  { %v5218_v6 = vpop.f32.mrf.mxu0 }
 0x9cb   :  { %v13323_v55 = vpop.f32.mrf.mxu0 }
 0x9cd   :  { %v5221_v62 = vpop.f32.mrf.mxu0 }
 0x9ce   :  { %v11880_v62 = vld [vmem:[#allocation2 + $0x268] ss:$16 sps:$4 sm:$0xff]  }
 0x9cf   :  { %5576 = vmatmul.mubr.bf16.gmra.mxu1 %v11855_v39  ;;  %v13325_v27 = vpop.f32.mrf.mxu0  ;;  %5415 = vmatmul.mubr.bf16.gmra.mxu0 %v11856_v56  ;;  %v11881_v56 = vld [vmem:[#allocation2 + $0x28c] ss:$16 sps:$4 sm:$0xff]  }
 0x9d0   :  { %5583 = vmatprep.mubr.bf16.mxu1 %v11857_v18  ;;  %5422 = vmatprep.mubr.bf16.mxu0 %v11858_v12 }
 0x9d1   :  { %v5226_v10 = vpop.f32.mrf.mxu0 }
 0x9d3   :  { %v13327_v35 = vpop.f32.mrf.mxu0 }
 0x9d5   :  { %v5229_v52 = vpop.f32.mrf.mxu0 }
 0x9d6   :  { %v11882_v52 = vld [vmem:[#allocation2 + $0x288] ss:$16 sps:$4 sm:$0xff]  }
 0x9d7   :  { %5584 = vmatmul.mubr.bf16.gmra.mxu1 %v11859_v32  ;;  %v13329_v13 = vpop.f32.mrf.mxu0  ;;  %5423 = vmatmul.mubr.bf16.gmra.mxu0 %v11860_v50  ;;  %v11883_v50 = vld [vmem:[#allocation2 + $0x2ac] ss:$16 sps:$4 sm:$0xff]  }
 0x9d8   :  { %5591 = vmatprep.mubr.bf16.mxu1 %v11861_v59  ;;  %5430 = vmatprep.mubr.bf16.mxu0 %v11862_v14 }
 0x9d9   :  { %v5234_v46 = vpop.f32.mrf.mxu0 }
 0x9db   :  { %v13331_v17 = vpop.f32.mrf.mxu0 }
 0x9dd   :  { %v5237_v3 = vpop.f32.mrf.mxu0 }
 0x9de   :  { %v11884_v3 = vld [vmem:[#allocation2 + $0x2a8] ss:$16 sps:$4 sm:$0xff]  }
 0x9df   :  { %5592 = vmatmul.mubr.bf16.gmra.mxu1 %v11863_v41  ;;  %v13333_v51 = vpop.f32.mrf.mxu0  ;;  %5431 = vmatmul.mubr.bf16.gmra.mxu0 %v11864_v40  ;;  %v11885_v40 = vld [vmem:[#allocation2 + $0x2cc] ss:$16 sps:$4 sm:$0xff]  }
 0x9e0   :  { %5599 = vmatprep.mubr.bf16.mxu1 %v11865_v24  ;;  %5438 = vmatprep.mubr.bf16.mxu0 %v11866_v21 }
 0x9e1   :  { %v5242_v20 = vpop.f32.mrf.mxu0 }
 0x9e3   :  { %v13335_v15 = vpop.f32.mrf.mxu0 }
 0x9e5   :  { %v5245_v36 = vpop.f32.mrf.mxu0 }
 0x9e6   :  { %v11886_v36 = vld [vmem:[#allocation2 + $0x2c8] ss:$16 sps:$4 sm:$0xff]  }
 0x9e7   :  { %5600 = vmatmul.mubr.bf16.gmra.mxu1 %v11867_v33  ;;  %v13337_v25 = vpop.f32.mrf.mxu0  ;;  %5439 = vmatmul.mubr.bf16.gmra.mxu0 %v11868_v29  ;;  %v11887_v29 = vld [vmem:[#allocation2 + $0x2ec] ss:$16 sps:$4 sm:$0xff]  }
 0x9e8   :  { %5607 = vmatprep.mubr.bf16.mxu1 %v11869_v34  ;;  %5446 = vmatprep.mubr.bf16.mxu0 %v11870_v42 }
 0x9e9   :  { %v5250_v60 = vpop.f32.mrf.mxu0 }
 0x9eb   :  { %v13339_v19 = vpop.f32.mrf.mxu0 }
 0x9ed   :  { %v5253_v44 = vpop.f32.mrf.mxu0 }
 0x9ee   :  { %v11888_v44 = vld [vmem:[#allocation2 + $0x2e8] ss:$16 sps:$4 sm:$0xff]  }
 0x9ef   :  { %5608 = vmatmul.mubr.bf16.gmra.mxu1 %v11871_v4  ;;  %v13341_v11 = vpop.f32.mrf.mxu0  ;;  %5447 = vmatmul.mubr.bf16.gmra.mxu0 %v11872_v43  ;;  %v11889_v43 = vld [vmem:[#allocation2 + $0x30c] ss:$16 sps:$4 sm:$0xff]  }
 0x9f0   :  { %5615 = vmatprep.mubr.bf16.mxu1 %v11873_v48 }
 0x9f1   :  { %v5258_v38 = vpop.f32.mrf.mxu0 }
 0x9f3   :  { %v13343_v8 = vpop.f32.mrf.mxu0 }
 0x9f5   :  { %v5261_v30 = vpop.f32.mrf.mxu0 }
 0x9f7   :  { %5616 = vmatmul.mubr.bf16.gmra.mxu1 %v11874_v7  ;;  %v13345_v49 = vpop.f32.mrf.mxu0 }
 0x9f8   :  { %5623 = vmatprep.mubr.bf16.mxu1 %v11875_v45  ;;  %v11890_v45 = vld [vmem:[#allocation2 + $0x308] ss:$16 sps:$4 sm:$0xff]  }
 0x9f9   :  { %v5266_v22 = vpop.f32.mrf.mxu0 }
 0x9fb   :  { %v13347_v58 = vpop.f32.mrf.mxu0 }
 0x9fd   :  { %v5269_v31 = vpop.f32.mrf.mxu0 }
 0x9ff   :  { %5624 = vmatmul.mubr.bf16.gmra.mxu1 %v11876_v2  ;;  %v13349_v54 = vpop.f32.mrf.mxu0  ;;  %v11891_v2 = vld [vmem:[#allocation2 + $0x32c] ss:$16 sps:$4 sm:$0xff]  }
 0xa00   :  { %5631 = vmatprep.mubr.bf16.mxu1 %v11877_v47 }
 0xa01   :  { %v5274_v61 = vpop.f32.mrf.mxu0 }
 0xa03   :  { %v13351_v9 = vpop.f32.mrf.mxu0 }
 0xa05   :  { %v5277_v63 = vpop.f32.mrf.mxu0 }
 0xa07   :  { %5632 = vmatmul.mubr.bf16.gmra.mxu1 %v11878_v53  ;;  %v13353_v5 = vpop.f32.mrf.mxu0  ;;  %v13383_v53 = vld [vmem:[%s15404_s4] ss:$0 sm:$0xff] }
 0xa08   :  { %5639 = vmatprep.mubr.bf16.mxu1 %v11879_v57 }
 0xa09   :  { %v5282_v16 = vpop.f32.mrf.mxu0 }
 0xa0b   :  { %v13355_v37 = vpop.f32.mrf.mxu0 }
 0xa0d   :  { %v5285_v6 = vpop.f32.mrf.mxu0 }
 0xa0f   :  { %5640 = vmatmul.mubr.bf16.gmra.mxu1 %v11880_v62  ;;  %v13357_v39 = vpop.f32.mrf.mxu0 }
 0xa10   :  { %5647 = vmatprep.mubr.bf16.mxu1 %v11881_v56 }
 0xa11   :  { %v5290_v18 = vpop.f32.mrf.mxu0 }
 0xa13   :  { %v13359_v12 = vpop.f32.mrf.mxu0 }
 0xa15   :  { %v5293_v10 = vpop.f32.mrf.mxu0 }
 0xa17   :  { %5648 = vmatmul.mubr.bf16.gmra.mxu1 %v11882_v52  ;;  %v13361_v32 = vpop.f32.mrf.mxu0 }
 0xa18   :  { %5655 = vmatprep.mubr.bf16.mxu1 %v11883_v50  ;;  %v11892_v50 = vld [vmem:[#allocation2 + $0x328] ss:$16 sps:$4 sm:$0xff]  }
 0xa19   :  { %v5298_v59 = vpop.f32.mrf.mxu0 }
 0xa1b   :  { %v13363_v14 = vpop.f32.mrf.mxu0 }
 0xa1d   :  { %v5301_v46 = vpop.f32.mrf.mxu0 }
 0xa1f   :  { %5656 = vmatmul.mubr.bf16.gmra.mxu1 %v11884_v3  ;;  %v13365_v41 = vpop.f32.mrf.mxu0 }
 0xa20   :  { %5663 = vmatprep.mubr.bf16.mxu1 %v11885_v40  ;;  %v11893_v40 = vld [vmem:[#allocation2 + $0x34c] ss:$16 sps:$4 sm:$0xff]  }
 0xa21   :  { %v5306_v24 = vpop.f32.mrf.mxu0 }
 0xa23   :  { %v13367_v21 = vpop.f32.mrf.mxu0 }
 0xa25   :  { %v5309_v20 = vpop.f32.mrf.mxu0 }
 0xa27   :  { %5664 = vmatmul.mubr.bf16.gmra.mxu1 %v11886_v36  ;;  %v13369_v33 = vpop.f32.mrf.mxu0 }
 0xa28   :  { %5671 = vmatprep.mubr.bf16.mxu1 %v11887_v29 }
 0xa29   :  { %v5314_v34 = vpop.f32.mrf.mxu0 }
 0xa2b   :  { %v13371_v42 = vpop.f32.mrf.mxu0 }
 0xa2d   :  { %v5317_v60 = vpop.f32.mrf.mxu0 }
 0xa2f   :  { %5672 = vmatmul.mubr.bf16.gmra.mxu1 %v11888_v44  ;;  %v13373_v4 = vpop.f32.mrf.mxu0 }
 0xa30   :  { %5679 = vmatprep.mubr.bf16.mxu1 %v11889_v43 }
 0xa31   :  { %v5322_v48 = vpop.f32.mrf.mxu0 }
 0xa33   :  { %v13375_v38 = vpop.f32.mrf.mxu0 }
 0xa35   :  { %v5325_v30 = vpop.f32.mrf.mxu0 }
 0xa37   :  { %v5489_v7 = vpop.f32.mrf.mxu1  ;;  %5680 = vmatmul.mubr.bf16.gmra.mxu1 %v11890_v45  ;;  %v13377_v22 = vpop.f32.mrf.mxu0 }
 0xa38   :  { %v5490_v31 = vadd.f32 %v5489_v7, %v13307_v0  ;;  %5687 = vmatprep.mubr.bf16.mxu1 %v11891_v2 }
 0xa39   :  { %v5491_v47 = vpop.f32.mrf.mxu1  ;;  %v5330_v61 = vpop.f32.mrf.mxu0 }
 0xa3a   :  { %v5808_v63 = vmul.f32 0.01, %v5490_v31  ;;  %vm5744_vm15 = vcmp.gt.f32.partialorder %v5490_v31, 0.0  ;;  %v11894_v47 = vld [vmem:[#allocation2 + $0x348] ss:$16 sps:$4 sm:$0xff]  }
 0xa3b   :  { %v5492_v57 = vpop.f32.mrf.mxu1  ;;  %v13385_v16 = vpop.f32.mrf.mxu0 }
 0xa3c   :  { %v5493_v6 = vadd.f32 %v5492_v57, %v13309_v26  ;;  %v5872_v62 = vsel %vm5744_vm15, %v5490_v31, %v5808_v63 }
 0xa3d   :  { %v5494_v56 = vpop.f32.mrf.mxu1  ;;  %v5943_v0 = vmul.f32 %v13383_v53, %v5872_v62  ;;  %v5333_v18 = vpop.f32.mrf.mxu0 }
 0xa3e   :  { %vm5745_vm0 = vcmp.gt.f32.partialorder %v5493_v6, 0.0  ;;  %v5809_v10 = vmul.f32 0.01, %v5493_v6 }
 0xa3f   :  { %v5497_v52 = vpop.f32.mrf.mxu1  ;;  %5688 = vmatmul.mubr.bf16.gmra.mxu1 %v11892_v50  ;;  %v6007_v59 = vsel %vm2276_vm4, %v5943_v0, 0.0  ;;  %v13390_v46 = vpop.f32.mrf.mxu0 }
 0xa40   :  { %v5498_v3 = vadd.f32 %v5497_v52, %v13311_v28  ;;  %5695 = vmatprep.mubr.bf16.mxu1 %v11893_v40  ;;  %6008 = vadd.xlane.f32.xlu0 %v6007_v59  ;;  %v5873_v26 = vsel %vm5745_vm0, %v5493_v6, %v5809_v10  ;;  %v11895_v6 = vld [vmem:[#allocation2 + $0x36c] ss:$16 sps:$4 sm:$0xff]  }
 0xa41   :  { %v5499_v24 = vpop.f32.mrf.mxu1  ;;  %v5944_v20 = vmul.f32 %v13383_v53, %v5873_v26  ;;  %v7848_v36 = vpack.c.bf16 %v5873_v26, %v5872_v62  ;;  %v5338_v29 = vpop.f32.mrf.mxu0 }
 0xa42   :  { %v5810_v34 = vmul.f32 0.01, %v5498_v3  ;;  %vm5746_vm1 = vcmp.gt.f32.partialorder %v5498_v3, 0.0  ;;  %v11896_v29 = vld [vmem:[#allocation2 + $0x368] ss:$16 sps:$4 sm:$0xff]  }
 0xa43   :  { %v5500_v60 = vpop.f32.mrf.mxu1  ;;  %v6010_v44 = vsel %vm2276_vm4, %v5944_v20, 0.0  ;;  %v13395_v43 = vpop.f32.mrf.mxu0  ;;  %10840 = vmatprep.mubr.msk.bf16.mxu0 %vm2276_vm4, %v7848_v36 }
 0xa44   :  { %v5501_v28 = vadd.f32 %v5500_v60, %v13316_v23  ;;  %v5874_v48 = vsel %vm5746_vm1, %v5498_v3, %v5810_v34  ;;  %6011 = vadd.xlane.f32.xlu0 %v6010_v44 }
 0xa45   :  { %v5502_v30 = vpop.f32.mrf.mxu1  ;;  %v5945_v7 = vmul.f32 %v13383_v53, %v5874_v48  ;;  %v5341_v45 = vpop.f32.mrf.mxu0 }
 0xa46   :  { %vm5747_vm2 = vcmp.gt.f32.partialorder %v5501_v28, 0.0  ;;  %v5811_v31 = vmul.f32 0.01, %v5501_v28 }
 0xa47   :  { %v5505_v2 = vpop.f32.mrf.mxu1  ;;  %5696 = vmatmul.mubr.bf16.gmra.mxu1 %v11894_v47  ;;  %v6013_v61 = vsel %vm2276_vm4, %v5945_v7, 0.0  ;;  %v13401_v63 = vpop.f32.mrf.mxu0 }
 0xa48   :  { %v5506_v57 = vadd.f32 %v5505_v2, %v13321_v1  ;;  %5703 = vmatprep.mubr.bf16.mxu1 %v11895_v6  ;;  %6014 = vadd.xlane.f32.xlu1 %v6013_v61  ;;  %v5875_v23 = vsel %vm5747_vm2, %v5501_v28, %v5811_v31  ;;  %v11897_v28 = vld [vmem:[#allocation2 + $0x38c] ss:$16 sps:$4 sm:$0xff]  }
 0xa49   :  { %v5507_v62 = vpop.f32.mrf.mxu1  ;;  %v5946_v56 = vmul.f32 %v13383_v53, %v5875_v23  ;;  %v7849_v0 = vpack.c.bf16 %v5875_v23, %v5874_v48  ;;  %v5346_v18 = vpop.f32.mrf.mxu0 }
 0xa4a   :  { %vm5748_vm3 = vcmp.gt.f32.partialorder %v5506_v57, 0.0  ;;  %v5812_v10 = vmul.f32 0.01, %v5506_v57  ;;  %v11898_v18 = vld [vmem:[#allocation2 + $0x388] ss:$16 sps:$4 sm:$0xff]  }
 0xa4b   :  { %v5508_v52 = vpop.f32.mrf.mxu1  ;;  %v6016_v50 = vsel %vm2276_vm4, %v5946_v56, 0.0  ;;  %v13406_v59 = vpop.f32.mrf.mxu0  ;;  %10841 = vmatmul.mubr.msk.bf16.vlgmr.msra.gmra.mxu0 %vm2276_vm4, %v7849_v0 }
 0xa4c   :  { %v5509_v1 = vadd.f32 %v5508_v52, %v13323_v55  ;;  %6017 = vadd.xlane.f32.xlu1 %v6016_v50  ;;  %v5876_v3 = vsel %vm5748_vm3, %v5506_v57, %v5812_v10 }
 0xa4d   :  { %v5510_v40 = vpop.f32.mrf.mxu1  ;;  %v5947_v26 = vmul.f32 %v13383_v53, %v5876_v3  ;;  %v5349_v24 = vpop.f32.mrf.mxu0 }
 0xa4e   :  { %vm5749_vm5 = vcmp.gt.f32.partialorder %v5509_v1, 0.0  ;;  %v5813_v20 = vmul.f32 0.01, %v5509_v1 }
 0xa4f   :  { %v5513_v36 = vpop.f32.mrf.mxu1  ;;  %5704 = vmatmul.mubr.bf16.gmra.mxu1 %v11896_v29  ;;  %v6019_v34 = vsel %vm2276_vm4, %v5947_v26, 0.0  ;;  %v13412_v60 = vpop.f32.mrf.mxu0 }
 0xa50   :  { %v5514_v44 = vadd.f32 %v5513_v36, %v13325_v27  ;;  %5711 = vmatprep.mubr.bf16.mxu1 %v11897_v28  ;;  %v5877_v55 = vsel %vm5749_vm5, %v5509_v1, %v5813_v20  ;;  %6020 = vadd.xlane.f32.xlu0 %v6019_v34  ;;  %v11899_v1 = vld [vmem:[#allocation2 + $0x3ac] ss:$16 sps:$4 sm:$0xff]  }
 0xa51   :  { %v5515_v48 = vpop.f32.mrf.mxu1  ;;  %v5948_v30 = vmul.f32 %v13383_v53, %v5877_v55  ;;  %v7850_v7 = vpack.c.bf16 %v5877_v55, %v5876_v3  ;;  %v5354_v45 = vpop.f32.mrf.mxu0 }
 0xa52   :  { %vm5750_vm6 = vcmp.gt.f32.partialorder %v5514_v44, 0.0  ;;  %v5814_v31 = vmul.f32 0.01, %v5514_v44  ;;  %v11900_v45 = vld [vmem:[#allocation2 + $0x3a8] ss:$16 sps:$4 sm:$0xff]  }
 0xa53   :  { %v5516_v2 = vpop.f32.mrf.mxu1  ;;  %v6022_v47 = vsel %vm2276_vm4, %v5948_v30, 0.0  ;;  %v13417_v61 = vpop.f32.mrf.mxu0  ;;  %10844 = vmatprep.mubr.msk.bf16.mxu0 %vm2276_vm4, %v7850_v7 }
 0xa54   :  { %v5517_v27 = vadd.f32 %v5516_v2, %v13327_v35  ;;  %6023 = vadd.xlane.f32.xlu1 %v6022_v47  ;;  %v5878_v57 = vsel %vm5750_vm6, %v5514_v44, %v5814_v31 }
 0xa55   :  { %v5518_v6 = vpop.f32.mrf.mxu1  ;;  %v5949_v23 = vmul.f32 %v13383_v53, %v5878_v57  ;;  %v5357_v62 = vpop.f32.mrf.mxu0 }
 0xa56   :  { %vm5751_vm7 = vcmp.gt.f32.partialorder %v5517_v27, 0.0  ;;  %v5815_v56 = vmul.f32 0.01, %v5517_v27 }
 0xa57   :  { %v5521_v0 = vpop.f32.mrf.mxu1  ;;  %5712 = vmatmul.mubr.bf16.gmra.mxu1 %v11898_v18  ;;  %v6025_v10 = vsel %vm2276_vm4, %v5949_v23, 0.0  ;;  %v13423_v52 = vpop.f32.mrf.mxu0 }
 0xa58   :  { %v5522_v50 = vadd.f32 %v5521_v0, %v13329_v13  ;;  %5719 = vmatprep.mubr.bf16.mxu1 %v11899_v1  ;;  %v5879_v35 = vsel %vm5751_vm7, %v5517_v27, %v5815_v56  ;;  %6026 = vadd.xlane.f32.xlu0 %v6025_v10  ;;  %v11901_v27 = vld [vmem:[#allocation2 + $0x3cc] ss:$16 sps:$4 sm:$0xff]  }
 0xa59   :  { %v5523_v3 = vpop.f32.mrf.mxu1  ;;  %v5950_v40 = vmul.f32 %v13383_v53, %v5879_v35  ;;  %v7851_v26 = vpack.c.bf16 %v5879_v35, %v5878_v57  ;;  %v5362_v24 = vpop.f32.mrf.mxu0 }
 0xa5a   :  { %vm5752_vm8 = vcmp.gt.f32.partialorder %v5522_v50, 0.0  ;;  %v5816_v20 = vmul.f32 0.01, %v5522_v50  ;;  %v11902_v24 = vld [vmem:[#allocation2 + $0x3c8] ss:$16 sps:$4 sm:$0xff]  }
 0xa5b   :  { %v5524_v36 = vpop.f32.mrf.mxu1  ;;  %v6028_v29 = vsel %vm2276_vm4, %v5950_v40, 0.0  ;;  %v13428_v34 = vpop.f32.mrf.mxu0  ;;  %10845 = vmatmul.mubr.msk.bf16.gmra.mxu0 %vm2276_vm4, %v7851_v26 }
 0xa5c   :  { %v5525_v13 = vadd.f32 %v5524_v36, %v13331_v17  ;;  %6029 = vadd.xlane.f32.xlu1 %v6028_v29  ;;  %v5880_v44 = vsel %vm5752_vm8, %v5522_v50, %v5816_v20 }
 0xa5d   :  { %v5526_v28 = vpop.f32.mrf.mxu1  ;;  %v5951_v55 = vmul.f32 %v13383_v53, %v5880_v44  ;;  %v5365_v48 = vpop.f32.mrf.mxu0 }
 0xa5e   :  { %vm5753_vm9 = vcmp.gt.f32.partialorder %v5525_v13, 0.0  ;;  %v5817_v30 = vmul.f32 0.01, %v5525_v13 }
 0xa5f   :  { %v5529_v7 = vpop.f32.mrf.mxu1  ;;  %5720 = vmatmul.mubr.bf16.gmra.mxu1 %v11900_v45  ;;  %v6031_v31 = vsel %vm2276_vm4, %v5951_v55, 0.0  ;;  %v13434_v2 = vpop.f32.mrf.mxu0 }
 0xa60   :  { %v5530_v47 = vadd.f32 %v5529_v7, %v13333_v51  ;;  %5727 = vmatprep.mubr.bf16.mxu1 %v11901_v27  ;;  %v5881_v17 = vsel %vm5753_vm9, %v5525_v13, %v5817_v30  ;;  %6032 = vadd.xlane.f32.xlu0 %v6031_v31  ;;  %v11903_v13 = vld [vmem:[#allocation2 + $0x3ec] ss:$16 sps:$4 sm:$0xff]  }
 0xa61   :  { %v5531_v57 = vpop.f32.mrf.mxu1  ;;  %v5952_v6 = vmul.f32 %v13383_v53, %v5881_v17  ;;  %v7852_v23 = vpack.c.bf16 %v5881_v17, %v5880_v44  ;;  %v5370_v62 = vpop.f32.mrf.mxu0 }
 0xa62   :  { %vm5754_vm10 = vcmp.gt.f32.partialorder %v5530_v47, 0.0  ;;  %v5818_v56 = vmul.f32 0.01, %v5530_v47  ;;  %v11904_v62 = vld [vmem:[#allocation2 + $0x3e8] ss:$16 sps:$4 sm:$0xff]  }
 0xa63   :  { %v5532_v0 = vpop.f32.mrf.mxu1  ;;  %v6034_v18 = vsel %vm2276_vm4, %v5952_v6, 0.0  ;;  %v13439_v10 = vpop.f32.mrf.mxu0  ;;  %10848 = vmatprep.mubr.msk.bf16.mxu0 %vm2276_vm4, %v7852_v23 }
 0xa64   :  { %v5533_v51 = vadd.f32 %v5532_v0, %v13335_v15  ;;  %6035 = vadd.xlane.f32.xlu1 %v6034_v18  ;;  %v5882_v50 = vsel %vm5754_vm10, %v5530_v47, %v5818_v56 }
 0xa65   :  { %v5534_v1 = vpop.f32.mrf.mxu1  ;;  %v5953_v35 = vmul.f32 %v13383_v53, %v5882_v50  ;;  %v5373_v3 = vpop.f32.mrf.mxu0 }
 0xa66   :  { %vm5755_vm11 = vcmp.gt.f32.partialorder %v5533_v51, 0.0  ;;  %v5819_v40 = vmul.f32 0.01, %v5533_v51 }
 0xa67   :  { %v5537_v26 = vpop.f32.mrf.mxu1  ;;  %5728 = vmatmul.mubr.bf16.gmra.mxu1 %v11902_v24  ;;  %v6037_v20 = vsel %vm2276_vm4, %v5953_v35, 0.0  ;;  %v13445_v36 = vpop.f32.mrf.mxu0 }
 0xa68   :  { %v5538_v29 = vadd.f32 %v5537_v26, %v13337_v25  ;;  %5735 = vmatprep.mubr.bf16.mxu1 %v11903_v13  ;;  %v5883_v15 = vsel %vm5755_vm11, %v5533_v51, %v5819_v40  ;;  %6038 = vadd.xlane.f32.xlu0 %v6037_v20 }
 0xa69   :  { %v5539_v44 = vpop.f32.mrf.mxu1  ;;  %v5954_v28 = vmul.f32 %v13383_v53, %v5883_v15  ;;  %v7853_v55 = vpack.c.bf16 %v5883_v15, %v5882_v50  ;;  %v5378_v48 = vpop.f32.mrf.mxu0 }
 0xa6a   :  { %vm5756_vm12 = vcmp.gt.f32.partialorder %v5538_v29, 0.0  ;;  %v5820_v30 = vmul.f32 0.01, %v5538_v29 }
 0xa6b   :  { %v5540_v7 = vpop.f32.mrf.mxu1  ;;  %v6040_v45 = vsel %vm2276_vm4, %v5954_v28, 0.0  ;;  %v13450_v31 = vpop.f32.mrf.mxu0  ;;  %10849 = vmatmul.mubr.msk.bf16.gmra.mxu0 %vm2276_vm4, %v7853_v55 }
 0xa6c   :  { %v5541_v25 = vadd.f32 %v5540_v7, %v13339_v19  ;;  %6041 = vadd.xlane.f32.xlu1 %v6040_v45  ;;  %v5884_v47 = vsel %vm5756_vm12, %v5538_v29, %v5820_v30 }
 0xa6d   :  { %v5542_v27 = vpop.f32.mrf.mxu1  ;;  %v5955_v17 = vmul.f32 %v13383_v53, %v5884_v47  ;;  %v5381_v57 = vpop.f32.mrf.mxu0 }
 0xa6e   :  { %vm5757_vm13 = vcmp.gt.f32.partialorder %v5541_v25, 0.0  ;;  %v5821_v6 = vmul.f32 0.01, %v5541_v25 }
 0xa6f   :  { %v5545_v23 = vpop.f32.mrf.mxu1  ;;  %5736 = vmatmul.mubr.bf16.gmra.mxu1 %v11904_v62  ;;  %v6043_v56 = vsel %vm2276_vm4, %v5955_v17, 0.0  ;;  %v13456_v0 = vpop.f32.mrf.mxu0 }
 0xa70   :  { %v5546_v18 = vadd.f32 %v5545_v23, %v13341_v11  ;;  %v5885_v51 = vsel %vm5757_vm13, %v5541_v25, %v5821_v6  ;;  %6044 = vadd.xlane.f32.xlu0 %v6043_v56 }
 0xa71   :  { %v5547_v19 = vpop.f32.mrf.mxu1  ;;  %v5956_v50 = vmul.f32 %v13383_v53, %v5885_v51  ;;  %v7854_v1 = vpack.c.bf16 %v5885_v51, %v5884_v47  ;;  %v5386_v35 = vpop.f32.mrf.mxu0 }
 0xa72   :  { %vm5758_vm14 = vcmp.gt.f32.partialorder %v5546_v18, 0.0  ;;  %v5822_v3 = vmul.f32 0.01, %v5546_v18 }
 0xa73   :  { %v5548_v40 = vpop.f32.mrf.mxu1  ;;  %v6046_v26 = vsel %vm2276_vm4, %v5956_v50, 0.0  ;;  %v13461_v24 = vpop.f32.mrf.mxu0  ;;  %10852 = vmatprep.mubr.msk.bf16.mxu0 %vm2276_vm4, %v7854_v1 }
 0xa74   :  { %v5549_v20 = vadd.f32 %v5548_v40, %v13343_v8  ;;  %6047 = vadd.xlane.f32.xlu1 %v6046_v26  ;;  %v5886_v11 = vsel %vm5758_vm14, %v5546_v18, %v5822_v3 }
 0xa75   :  { %v5550_v29 = vpop.f32.mrf.mxu1  ;;  %v5957_v13 = vmul.f32 %v13383_v53, %v5886_v11  ;;  %v5389_v15 = vpop.f32.mrf.mxu0 }
 0xa76   :  { %vm5759_vm15 = vcmp.gt.f32.partialorder %v5549_v20, 0.0  ;;  %v5823_v44 = vmul.f32 0.01, %v5549_v20 }
 0xa77   :  { %v5553_v28 = vpop.f32.mrf.mxu1  ;;  %v6049_v55 = vsel %vm2276_vm4, %v5957_v13, 0.0  ;;  %v13467_v48 = vpop.f32.mrf.mxu0 }
 0xa78   :  { %v5554_v30 = vadd.f32 %v5553_v28, %v13345_v49  ;;  %v5887_v7 = vsel %vm5759_vm15, %v5549_v20, %v5823_v44  ;;  %6050 = vadd.xlane.f32.xlu0 %v6049_v55 }
 0xa79   :  { %v5555_v45 = vpop.f32.mrf.mxu1  ;;  %v5958_v8 = vmul.f32 %v13383_v53, %v5887_v7  ;;  %v7855_v25 = vpack.c.bf16 %v5887_v7, %v5886_v11  ;;  %v5394_v47 = vpop.f32.mrf.mxu0 }
 0xa7a   :  { %vm5760_vm0 = vcmp.gt.f32.partialorder %v5554_v30, 0.0  ;;  %v5824_v27 = vmul.f32 0.01, %v5554_v30 }
 0xa7b   :  { %v5556_v17 = vpop.f32.mrf.mxu1  ;;  %v6052_v57 = vsel %vm2276_vm4, %v5958_v8, 0.0  ;;  %v13472_v6 = vpop.f32.mrf.mxu0  ;;  %10853 = vmatmul.mubr.msk.bf16.gmra.mxu0 %vm2276_vm4, %v7855_v25 }
 0xa7c   :  { %v5557_v23 = vadd.f32 %v5556_v17, %v13347_v58  ;;  %6053 = vadd.xlane.f32.xlu1 %v6052_v57  ;;  %v5888_v49 = vsel %vm5760_vm0, %v5554_v30, %v5824_v27 }
 0xa7d   :  { %v5558_v62 = vpop.f32.mrf.mxu1  ;;  %v5959_v56 = vmul.f32 %v13383_v53, %v5888_v49  ;;  %v5397_v18 = vpop.f32.mrf.mxu0 }
 0xa7e   :  { %vm5761_vm1 = vcmp.gt.f32.partialorder %v5557_v23, 0.0  ;;  %v5825_v51 = vmul.f32 0.01, %v5557_v23 }
 0xa7f   :  { %v5561_v19 = vpop.f32.mrf.mxu1  ;;  %v6055_v50 = vsel %vm2276_vm4, %v5959_v56, 0.0  ;;  %v13478_v1 = vpop.f32.mrf.mxu0 }
 0xa80   :  { %v5562_v35 = vadd.f32 %v5561_v19, %v13349_v54  ;;  %v5889_v3 = vsel %vm5761_vm1, %v5557_v23, %v5825_v51  ;;  %6056 = vadd.xlane.f32.xlu0 %v6055_v50 }
 0xa81   :  { %v5563_v40 = vpop.f32.mrf.mxu1  ;;  %v5960_v58 = vmul.f32 %v13383_v53, %v5889_v3  ;;  %v7856_v26 = vpack.c.bf16 %v5889_v3, %v5888_v49  ;;  %v5402_v20 = vpop.f32.mrf.mxu0  ;;  %v11379_v3 = vld [vmem:[%s15405_s5 + $0x18] sm:$0xff]  }
 0xa82   :  { %vm5762_vm2 = vcmp.gt.f32.partialorder %v5562_v35, 0.0  ;;  %v5826_v11 = vmul.f32 0.01, %v5562_v35  ;;  %10904 = vmatprep.subr.bf16.mxu1 %v11379_v3 }
 0xa83   :  { %v5564_v29 = vpop.f32.mrf.mxu1  ;;  %v6058_v13 = vsel %vm2276_vm4, %v5960_v58, 0.0  ;;  %v13483_v15 = vpop.f32.mrf.mxu0  ;;  %10856 = vmatprep.mubr.msk.bf16.mxu0 %vm2276_vm4, %v7856_v26  ;;  %10905 = vmatpush3.bf16.msra.mxu1 %v11379_v3 }
 0xa84   :  { %v5565_v44 = vadd.f32 %v5564_v29, %v13351_v9  ;;  %6059 = vadd.xlane.f32.xlu1 %v6058_v13  ;;  %v5890_v54 = vsel %vm5762_vm2, %v5562_v35, %v5826_v11 }
 0xa85   :  { %v5566_v28 = vpop.f32.mrf.mxu1  ;;  %v5961_v55 = vmul.f32 %v13383_v53, %v5890_v54  ;;  %v5405_v30 = vpop.f32.mrf.mxu0 }
 0xa86   :  { %vm5763_vm3 = vcmp.gt.f32.partialorder %v5565_v44, 0.0  ;;  %v5827_v7 = vmul.f32 0.01, %v5565_v44 }
 0xa87   :  { %v5569_v45 = vpop.f32.mrf.mxu1  ;;  %v6061_v8 = vsel %vm2276_vm4, %v5961_v55, 0.0  ;;  %v13489_v25 = vpop.f32.mrf.mxu0  ;;  %v11380_v55 = vld [vmem:[%s15405_s5 + $0x10] sm:$0xff]  }
 0xa88   :  { %v5570_v47 = vadd.f32 %v5569_v45, %v13353_v5  ;;  %v5891_v27 = vsel %vm5763_vm3, %v5565_v44, %v5827_v7  ;;  %6062 = vadd.xlane.f32.xlu0 %v6061_v8  ;;  %10906 = vmatprep.subr.bf16.mxu1 %v11380_v55 }
 0xa89   :  { %v5571_v17 = vpop.f32.mrf.mxu1  ;;  %v5962_v9 = vmul.f32 %v13383_v53, %v5891_v27  ;;  %v7857_v57 = vpack.c.bf16 %v5891_v27, %v5890_v54  ;;  %v5410_v23 = vpop.f32.mrf.mxu0  ;;  %10907 = vmatpush3.bf16.msra.mxu1 %v11380_v55 }
 0xa8a   :  { %vm5764_vm5 = vcmp.gt.f32.partialorder %v5570_v47, 0.0  ;;  %v5828_v49 = vmul.f32 0.01, %v5570_v47 }
 0xa8b   :  { %v5572_v62 = vpop.f32.mrf.mxu1  ;;  %v6064_v56 = vsel %vm2276_vm4, %v5962_v9, 0.0  ;;  %v13494_v18 = vpop.f32.mrf.mxu0  ;;  %10857 = vmatmul.mubr.msk.bf16.gmra.mxu0 %vm2276_vm4, %v7857_v57 }
 0xa8c   :  { %v5573_v51 = vadd.f32 %v5572_v62, %v13355_v37  ;;  %6065 = vadd.xlane.f32.xlu1 %v6064_v56  ;;  %v5892_v5 = vsel %vm5764_vm5, %v5570_v47, %v5828_v49 }
 0xa8d   :  { %v5574_v19 = vpop.f32.mrf.mxu1  ;;  %v5963_v50 = vmul.f32 %v13383_v53, %v5892_v5  ;;  %v5413_v35 = vpop.f32.mrf.mxu0 }
 0xa8e   :  { %vm5765_vm6 = vcmp.gt.f32.partialorder %v5573_v51, 0.0  ;;  %v5829_v40 = vmul.f32 0.01, %v5573_v51 }
 0xa8f   :  { %v5577_v58 = vpop.f32.mrf.mxu1  ;;  %v6067_v26 = vsel %vm2276_vm4, %v5963_v50, 0.0  ;;  %v13503_v20 = vpop.f32.mrf.mxu0 }
 0xa90   :  { %v5578_v37 = vadd.f32 %v5577_v58, %v13357_v39  ;;  %v5893_v11 = vsel %vm5765_vm6, %v5573_v51, %v5829_v40  ;;  %6068 = vadd.xlane.f32.xlu0 %v6067_v26 }
 0xa91   :  { %v5579_v29 = vpop.f32.mrf.mxu1  ;;  %v5964_v13 = vmul.f32 %v13383_v53, %v5893_v11  ;;  %v7858_v44 = vpack.c.bf16 %v5893_v11, %v5892_v5  ;;  %v5418_v54 = vpop.f32.mrf.mxu0 }
 0xa92   :  { %vm5766_vm7 = vcmp.gt.f32.partialorder %v5578_v37, 0.0  ;;  %v5830_v28 = vmul.f32 0.01, %v5578_v37 }
 0xa93   :  { %v5580_v30 = vpop.f32.mrf.mxu1  ;;  %v6070_v7 = vsel %vm2276_vm4, %v5964_v13, 0.0  ;;  %v13511_v45 = vpop.f32.mrf.mxu0  ;;  %10860 = vmatprep.mubr.msk.bf16.mxu0 %vm2276_vm4, %v7858_v44 }
 0xa94   :  { %v5581_v39 = vadd.f32 %v5580_v30, %v13359_v12  ;;  %6071 = vadd.xlane.f32.xlu1 %v6070_v7  ;;  %v5894_v8 = vsel %vm5766_vm7, %v5578_v37, %v5830_v28 }
 0xa95   :  { %v5582_v47 = vpop.f32.mrf.mxu1  ;;  %v5965_v27 = vmul.f32 %v13383_v53, %v5894_v8  ;;  %v5421_v17 = vpop.f32.mrf.mxu0 }
 0xa96   :  { %vm5767_vm8 = vcmp.gt.f32.partialorder %v5581_v39, 0.0  ;;  %v5831_v9 = vmul.f32 0.01, %v5581_v39 }
 0xa97   :  { %v5585_v57 = vpop.f32.mrf.mxu1  ;;  %v6073_v23 = vsel %vm2276_vm4, %v5965_v27, 0.0  ;;  %v13517_v49 = vpop.f32.mrf.mxu0 }
 0xa98   :  { %v5586_v62 = vadd.f32 %v5585_v57, %v13361_v32  ;;  %v5895_v56 = vsel %vm5767_vm8, %v5581_v39, %v5831_v9  ;;  %6074 = vadd.xlane.f32.xlu0 %v6073_v23 }
 0xa99   :  { %v5587_v12 = vpop.f32.mrf.mxu1  ;;  %v5966_v51 = vmul.f32 %v13383_v53, %v5895_v56  ;;  %v7859_v5 = vpack.c.bf16 %v5895_v56, %v5894_v8  ;;  %v5426_v19 = vpop.f32.mrf.mxu0 }
 0xa9a   :  { %vm5768_vm9 = vcmp.gt.f32.partialorder %v5586_v62, 0.0  ;;  %v5832_v50 = vmul.f32 0.01, %v5586_v62 }
 0xa9b   :  { %v5588_v35 = vpop.f32.mrf.mxu1  ;;  %v6076_v3 = vsel %vm2276_vm4, %v5966_v51, 0.0  ;;  %v13522_v40 = vpop.f32.mrf.mxu0  ;;  %10861 = vmatmul.mubr.msk.bf16.gmra.mxu0 %vm2276_vm4, %v7859_v5 }
 0xa9c   :  { %v5589_v58 = vadd.f32 %v5588_v35, %v13363_v14  ;;  %6077 = vadd.xlane.f32.xlu1 %v6076_v3  ;;  %v5896_v32 = vsel %vm5768_vm9, %v5586_v62, %v5832_v50 }
 0xa9d   :  { %v5590_v26 = vpop.f32.mrf.mxu1  ;;  %v5967_v37 = vmul.f32 %v13383_v53, %v5896_v32  ;;  %v5429_v11 = vpop.f32.mrf.mxu0 }
 0xa9e   :  { %vm5769_vm10 = vcmp.gt.f32.partialorder %v5589_v58, 0.0  ;;  %v5833_v29 = vmul.f32 0.01, %v5589_v58 }
 0xa9f   :  { %v5593_v13 = vpop.f32.mrf.mxu1  ;;  %v6079_v44 = vsel %vm2276_vm4, %v5967_v37, 0.0  ;;  %v13528_v54 = vpop.f32.mrf.mxu0 }
 0xaa0   :  { %v5594_v28 = vadd.f32 %v5593_v13, %v13365_v41  ;;  %v5897_v55 = vsel %vm5769_vm10, %v5589_v58, %v5833_v29  ;;  %6080 = vadd.xlane.f32.xlu0 %v6079_v44 }
 0xaa1   :  { %v5595_v30 = vpop.f32.mrf.mxu1  ;;  %v5968_v14 = vmul.f32 %v13383_v53, %v5897_v55  ;;  %v7860_v7 = vpack.c.bf16 %v5897_v55, %v5896_v32  ;;  %v5434_v39 = vpop.f32.mrf.mxu0 }
 0xaa2   :  { %vm5770_vm11 = vcmp.gt.f32.partialorder %v5594_v28, 0.0  ;;  %v5834_v8 = vmul.f32 0.01, %v5594_v28 }
 0xaa3   :  { %v5596_v47 = vpop.f32.mrf.mxu1  ;;  %v6082_v27 = vsel %vm2276_vm4, %v5968_v14, 0.0  ;;  %v13533_v17 = vpop.f32.mrf.mxu0  ;;  %10864 = vmatprep.mubr.msk.bf16.mxu0 %vm2276_vm4, %v7860_v7 }
 0xaa4   :  { %v5597_v9 = vadd.f32 %v5596_v47, %v13367_v21  ;;  %6083 = vadd.xlane.f32.xlu1 %v6082_v27  ;;  %v5898_v41 = vsel %vm5770_vm11, %v5594_v28, %v5834_v8 }
 0xaa5   :  { %v5598_v57 = vpop.f32.mrf.mxu1  ;;  %v5969_v23 = vmul.f32 %v13383_v53, %v5898_v41  ;;  %v5437_v62 = vpop.f32.mrf.mxu0 }
 0xaa6   :  { %vm5771_vm12 = vcmp.gt.f32.partialorder %v5597_v9, 0.0  ;;  %v5835_v56 = vmul.f32 0.01, %v5597_v9 }
 0xaa7   :  { %v5601_v12 = vpop.f32.mrf.mxu1  ;;  %v6085_v51 = vsel %vm2276_vm4, %v5969_v23, 0.0  ;;  %v13539_v5 = vpop.f32.mrf.mxu0 }
 0xaa8   :  { %v5602_v19 = vadd.f32 %v5601_v12, %v13369_v33  ;;  %v5899_v50 = vsel %vm5771_vm12, %v5597_v9, %v5835_v56  ;;  %6086 = vadd.xlane.f32.xlu0 %v6085_v51 }
 0xaa9   :  { %v5603_v35 = vpop.f32.mrf.mxu1  ;;  %v5970_v21 = vmul.f32 %v13383_v53, %v5899_v50  ;;  %v7861_v3 = vpack.c.bf16 %v5899_v50, %v5898_v41  ;;  %v5442_v58 = vpop.f32.mrf.mxu0 }
 0xaaa   :  { %vm5772_vm13 = vcmp.gt.f32.partialorder %v5602_v19, 0.0  ;;  %v5836_v32 = vmul.f32 0.01, %v5602_v19 }
 0xaab   :  { %v5604_v26 = vpop.f32.mrf.mxu1  ;;  %v6088_v37 = vsel %vm2276_vm4, %v5970_v21, 0.0  ;;  %v13544_v11 = vpop.f32.mrf.mxu0  ;;  %10865 = vmatmul.mubr.msk.bf16.gmra.mxu0 %vm2276_vm4, %v7861_v3 }
 0xaac   :  { %v5605_v29 = vadd.f32 %v5604_v26, %v13371_v42  ;;  %6089 = vadd.xlane.f32.xlu1 %v6088_v37  ;;  %v5900_v33 = vsel %vm5772_vm13, %v5602_v19, %v5836_v32 }
 0xaad   :  { %v5606_v13 = vpop.f32.mrf.mxu1  ;;  %v5971_v44 = vmul.f32 %v13383_v53, %v5900_v33  ;;  %v5445_v28 = vpop.f32.mrf.mxu0 }
 0xaae   :  { %vm5773_vm14 = vcmp.gt.f32.partialorder %v5605_v29, 0.0  ;;  %v5837_v55 = vmul.f32 0.01, %v5605_v29 }
 0xaaf   :  { %v5609_v30 = vpop.f32.mrf.mxu1  ;;  %v6091_v14 = vsel %vm2276_vm4, %v5971_v44, 0.0  ;;  %v13550_v7 = vpop.f32.mrf.mxu0 }
 0xab0   :  { %v5610_v39 = vadd.f32 %v5609_v30, %v13373_v4  ;;  %v5901_v8 = vsel %vm5773_vm14, %v5605_v29, %v5837_v55  ;;  %6092 = vadd.xlane.f32.xlu0 %v6091_v14 }
 0xab1   :  { %v5611_v47 = vpop.f32.mrf.mxu1  ;;  %v5972_v42 = vmul.f32 %v13383_v53, %v5901_v8  ;;  %v7862_v27 = vpack.c.bf16 %v5901_v8, %v5900_v33  ;;  %v5450_v9 = vpop.f32.mrf.mxu0 }
 0xab2   :  { %vm5774_vm15 = vcmp.gt.f32.partialorder %v5610_v39, 0.0  ;;  %v5838_v41 = vmul.f32 0.01, %v5610_v39 }
 0xab3   :  { %v5612_v57 = vpop.f32.mrf.mxu1  ;;  %v6094_v23 = vsel %vm2276_vm4, %v5972_v42, 0.0  ;;  %10868 = vmatprep.mubr.msk.bf16.mxu0 %vm2276_vm4, %v7862_v27  ;;  %v13556_v62 = vpop.f32.mrf.mxu0 }
 0xab4   :  { %v5613_v56 = vadd.f32 %v5612_v57, %v13375_v38  ;;  %6095 = vadd.xlane.f32.xlu1 %v6094_v23  ;;  %v5902_v4 = vsel %vm5774_vm15, %v5610_v39, %v5838_v41 }
 0xab5   :  { %v5614_v12 = vpop.f32.mrf.mxu1  ;;  %v5973_v51 = vmul.f32 %v13383_v53, %v5902_v4  ;;  %v5453_v19 = vpop.f32.mrf.mxu0 }
 0xab6   :  { %vm5775_vm0 = vcmp.gt.f32.partialorder %v5613_v56, 0.0  ;;  %v5839_v50 = vmul.f32 0.01, %v5613_v56 }
 0xab7   :  { %v5617_v35 = vpop.f32.mrf.mxu1  ;;  %v6097_v21 = vsel %vm2276_vm4, %v5973_v51, 0.0 }
 0xab8   :  { %v5618_v3 = vadd.f32 %v5617_v35, %v13377_v22  ;;  %v5903_v58 = vsel %vm5775_vm0, %v5613_v56, %v5839_v50  ;;  %6098 = vadd.xlane.f32.xlu0 %v6097_v21 }
 0xab9   :  { %v5619_v32 = vpop.f32.mrf.mxu1  ;;  %v5974_v26 = vmul.f32 %v13383_v53, %v5903_v58  ;;  %v7863_v37 = vpack.c.bf16 %v5903_v58, %v5902_v4 }
 0xaba   :  { %vm5776_vm1 = vcmp.gt.f32.partialorder %v5618_v3, 0.0  ;;  %v5840_v38 = vmul.f32 0.01, %v5618_v3 }
 0xabb   :  { %v5620_v29 = vpop.f32.mrf.mxu1  ;;  %v6100_v33 = vsel %vm2276_vm4, %v5974_v26, 0.0  ;;  %10869 = vmatmul.mubr.msk.bf16.gmra.mxu0 %vm2276_vm4, %v7863_v37 }
 0xabc   :  { %v5621_v13 = vadd.f32 %v5620_v29, %v13385_v16  ;;  %6101 = vadd.xlane.f32.xlu1 %v6100_v33  ;;  %v5904_v44 = vsel %vm5776_vm1, %v5618_v3, %v5840_v38 }
 0xabd   :  { %v5622_v28 = vpop.f32.mrf.mxu1  ;;  %v5975_v22 = vmul.f32 %v13383_v53, %v5904_v44 }
 0xabe   :  { %vm5777_vm2 = vcmp.gt.f32.partialorder %v5621_v13, 0.0  ;;  %v5841_v55 = vmul.f32 0.01, %v5621_v13 }
 0xabf   :  { %v5625_v30 = vpop.f32.mrf.mxu1  ;;  %v6103_v14 = vsel %vm2276_vm4, %v5975_v22, 0.0 }
 0xac0   :  { %v5626_v39 = vadd.f32 %v5625_v30, %v13390_v46  ;;  %v5905_v8 = vsel %vm5777_vm2, %v5621_v13, %v5841_v55  ;;  %6104 = vadd.xlane.f32.xlu0 %v6103_v14 }
 0xac1   :  { %v5627_v47 = vpop.f32.mrf.mxu1  ;;  %v5976_v42 = vmul.f32 %v13383_v53, %v5905_v8  ;;  %v7864_v27 = vpack.c.bf16 %v5905_v8, %v5904_v44 }
 0xac2   :  { %vm5778_vm3 = vcmp.gt.f32.partialorder %v5626_v39, 0.0  ;;  %v5842_v16 = vmul.f32 0.01, %v5626_v39 }
 0xac3   :  { %v5628_v9 = vpop.f32.mrf.mxu1  ;;  %v6106_v41 = vsel %vm2276_vm4, %v5976_v42, 0.0  ;;  %10872 = vmatprep.mubr.msk.bf16.mxu0 %vm2276_vm4, %v7864_v27 }
 0xac4   :  { %v5629_v57 = vadd.f32 %v5628_v9, %v13395_v43  ;;  %6107 = vadd.xlane.f32.xlu1 %v6106_v41  ;;  %v5906_v23 = vsel %vm5778_vm3, %v5626_v39, %v5842_v16 }
 0xac5   :  { %v5630_v56 = vpop.f32.mrf.mxu1  ;;  %v5977_v46 = vmul.f32 %v13383_v53, %v5906_v23 }
 0xac6   :  { %vm5779_vm5 = vcmp.gt.f32.partialorder %v5629_v57, 0.0  ;;  %v5843_v4 = vmul.f32 0.01, %v5629_v57 }
 0xac7   :  { %v5633_v12 = vpop.f32.mrf.mxu1  ;;  %v6109_v51 = vsel %vm2276_vm4, %v5977_v46, 0.0 }
 0xac8   :  { %v5634_v19 = vadd.f32 %v5633_v12, %v13401_v63  ;;  %v5907_v50 = vsel %vm5779_vm5, %v5629_v57, %v5843_v4  ;;  %6110 = vadd.xlane.f32.xlu0 %v6109_v51 }
 0xac9   :  { %v5635_v35 = vpop.f32.mrf.mxu1  ;;  %v5978_v21 = vmul.f32 %v13383_v53, %v5907_v50  ;;  %v7865_v3 = vpack.c.bf16 %v5907_v50, %v5906_v23 }
 0xaca   :  { %vm5780_vm6 = vcmp.gt.f32.partialorder %v5634_v19, 0.0  ;;  %v5844_v43 = vmul.f32 0.01, %v5634_v19 }
 0xacb   :  { %v5636_v58 = vpop.f32.mrf.mxu1  ;;  %v6112_v32 = vsel %vm2276_vm4, %v5978_v21, 0.0  ;;  %10873 = vmatmul.mubr.msk.bf16.gmra.mxu0 %vm2276_vm4, %v7865_v3 }
 0xacc   :  { %v5637_v26 = vadd.f32 %v5636_v58, %v13406_v59  ;;  %6113 = vadd.xlane.f32.xlu1 %v6112_v32  ;;  %v5908_v37 = vsel %vm5780_vm6, %v5634_v19, %v5844_v43 }
 0xacd   :  { %v5638_v38 = vpop.f32.mrf.mxu1  ;;  %v5979_v63 = vmul.f32 %v13383_v53, %v5908_v37 }
 0xace   :  { %vm5781_vm7 = vcmp.gt.f32.partialorder %v5637_v26, 0.0  ;;  %v5845_v29 = vmul.f32 0.01, %v5637_v26 }
 0xacf   :  { %v5641_v33 = vpop.f32.mrf.mxu1  ;;  %v6115_v13 = vsel %vm2276_vm4, %v5979_v63, 0.0 }
 0xad0   :  { %v5642_v44 = vadd.f32 %v5641_v33, %v13412_v60  ;;  %v5909_v28 = vsel %vm5781_vm7, %v5637_v26, %v5845_v29  ;;  %6116 = vadd.xlane.f32.xlu0 %v6115_v13 }
 0xad1   :  { %v5643_v22 = vpop.f32.mrf.mxu1  ;;  %v5980_v55 = vmul.f32 %v13383_v53, %v5909_v28  ;;  %v7866_v30 = vpack.c.bf16 %v5909_v28, %v5908_v37 }
 0xad2   :  { %vm5782_vm8 = vcmp.gt.f32.partialorder %v5642_v44, 0.0  ;;  %v5846_v59 = vmul.f32 0.01, %v5642_v44 }
 0xad3   :  { %v5644_v14 = vpop.f32.mrf.mxu1  ;;  %v6118_v39 = vsel %vm2276_vm4, %v5980_v55, 0.0  ;;  %10876 = vmatprep.mubr.msk.bf16.mxu0 %vm2276_vm4, %v7866_v30 }
 0xad4   :  { %v5645_v8 = vadd.f32 %v5644_v14, %v13417_v61  ;;  %6119 = vadd.xlane.f32.xlu1 %v6118_v39  ;;  %v5910_v47 = vsel %vm5782_vm8, %v5642_v44, %v5846_v59  ;;  %v13607_v14 = vld [vmem:[%s15404_s4] ss:$0 sm:$0xff] }
 0xad5   :  { %v5646_v42 = vpop.f32.mrf.mxu1  ;;  %v5981_v60 = vmul.f32 %v13383_v53, %v5910_v47 }
 0xad6   :  { %vm5783_vm9 = vcmp.gt.f32.partialorder %v5645_v8, 0.0  ;;  %v5847_v27 = vmul.f32 0.01, %v5645_v8 }
 0xad7   :  { %v5649_v16 = vpop.f32.mrf.mxu1  ;;  %v6121_v9 = vsel %vm2276_vm4, %v5981_v60, 0.0 }
 0xad8   :  { %v5650_v41 = vadd.f32 %v5649_v16, %v13423_v52  ;;  %v5911_v57 = vsel %vm5783_vm9, %v5645_v8, %v5847_v27  ;;  %6122 = vadd.xlane.f32.xlu0 %v6121_v9 }
 0xad9   :  { %v5651_v23 = vpop.f32.mrf.mxu1  ;;  %v5982_v56 = vmul.f32 %v13383_v53, %v5911_v57  ;;  %v7867_v46 = vpack.c.bf16 %v5911_v57, %v5910_v47 }
 0xada   :  { %vm5784_vm10 = vcmp.gt.f32.partialorder %v5650_v41, 0.0  ;;  %v5848_v61 = vmul.f32 0.01, %v5650_v41 }
 0xadb   :  { %v5652_v4 = vpop.f32.mrf.mxu1  ;;  %v6124_v12 = vsel %vm2276_vm4, %v5982_v56, 0.0  ;;  %10877 = vmatmul.mubr.msk.bf16.gmra.mxu0 %vm2276_vm4, %v7867_v46 }
 0xadc   :  { %v5653_v51 = vadd.f32 %v5652_v4, %v13428_v34  ;;  %6125 = vadd.xlane.f32.xlu1 %v6124_v12  ;;  %v5912_v19 = vsel %vm5784_vm10, %v5650_v41, %v5848_v61 }
 0xadd   :  { %v5654_v50 = vpop.f32.mrf.mxu1  ;;  %v5983_v52 = vmul.f32 %v13383_v53, %v5912_v19 }
 0xade   :  { %vm5785_vm11 = vcmp.gt.f32.partialorder %v5653_v51, 0.0  ;;  %v5849_v35 = vmul.f32 0.01, %v5653_v51 }
 0xadf   :  { %v5657_v21 = vpop.f32.mrf.mxu1  ;;  %v6127_v3 = vsel %vm2276_vm4, %v5983_v52, 0.0 }
 0xae0   :  { %v5658_v43 = vadd.f32 %v5657_v21, %v13434_v2  ;;  %v5913_v58 = vsel %vm5785_vm11, %v5653_v51, %v5849_v35  ;;  %6128 = vadd.xlane.f32.xlu0 %v6127_v3 }
 0xae1   :  { %v5659_v32 = vpop.f32.mrf.mxu1  ;;  %v5984_v26 = vmul.f32 %v13383_v53, %v5913_v58  ;;  %v7868_v37 = vpack.c.bf16 %v5913_v58, %v5912_v19 }
 0xae2   :  { %vm5786_vm12 = vcmp.gt.f32.partialorder %v5658_v43, 0.0  ;;  %v5850_v34 = vmul.f32 0.01, %v5658_v43 }
 0xae3   :  { %v5660_v38 = vpop.f32.mrf.mxu1  ;;  %v6130_v63 = vsel %vm2276_vm4, %v5984_v26, 0.0  ;;  %10880 = vmatprep.mubr.msk.bf16.mxu0 %vm2276_vm4, %v7868_v37 }
 0xae4   :  { %v5661_v29 = vadd.f32 %v5660_v38, %v13439_v10  ;;  %6131 = vadd.xlane.f32.xlu1 %v6130_v63  ;;  %v5914_v33 = vsel %vm5786_vm12, %v5658_v43, %v5850_v34 }
 0xae5   :  { %v5662_v13 = vpop.f32.mrf.mxu1  ;;  %v5985_v2 = vmul.f32 %v13383_v53, %v5914_v33 }
 0xae6   :  { %vm5787_vm13 = vcmp.gt.f32.partialorder %v5661_v29, 0.0  ;;  %v5851_v44 = vmul.f32 0.01, %v5661_v29 }
 0xae7   :  { %v5665_v28 = vpop.f32.mrf.mxu1  ;;  %v6133_v22 = vsel %vm2276_vm4, %v5985_v2, 0.0 }
 0xae8   :  { %v5666_v55 = vadd.f32 %v5665_v28, %v13445_v36  ;;  %v5915_v30 = vsel %vm5787_vm13, %v5661_v29, %v5851_v44  ;;  %6134 = vadd.xlane.f32.xlu0 %v6133_v22 }
 0xae9   :  { %v5667_v59 = vpop.f32.mrf.mxu1  ;;  %v5986_v10 = vmul.f32 %v13607_v14, %v5915_v30  ;;  %v7869_v39 = vpack.c.bf16 %v5915_v30, %v5914_v33 }
 0xaea   :  { %vm5788_vm14 = vcmp.gt.f32.partialorder %v5666_v55, 0.0  ;;  %v5852_v53 = vmul.f32 0.01, %v5666_v55 }
 0xaeb   :  { %v5668_v8 = vpop.f32.mrf.mxu1  ;;  %v6136_v47 = vsel %vm2276_vm4, %v5986_v10, 0.0  ;;  %10881 = vmatmul.mubr.msk.bf16.gmra.mxu0 %vm2276_vm4, %v7869_v39  ;;  %v13631_v10 = vpop.xlane.xlu0 %6008 }
 0xaec   :  { %v5669_v36 = vadd.f32 %v5668_v8, %v13450_v31  ;;  %6137 = vadd.xlane.f32.xlu1 %v6136_v47  ;;  %v5916_v42 = vsel %vm5788_vm14, %v5666_v55, %v5852_v53  ;;  %v13636_v8 = vpop.xlane.xlu1 %6014  ;;  %vm6274_vm14 = vcmask 130112  }
 0xaed   :  { %v5670_v60 = vpop.f32.mrf.mxu1  ;;  %v5987_v27 = vmul.f32 %v13607_v14, %v5916_v42 }
 0xaee   :  { %vm5789_vm15 = vcmp.gt.f32.partialorder %v5669_v36, 0.0  ;;  %v5853_v16 = vmul.f32 0.01, %v5669_v36 }
 0xaef   :  { %v5673_v9 = vpop.f32.mrf.mxu1  ;;  %v6139_v41 = vsel %vm2276_vm4, %v5987_v27, 0.0 }
 0xaf0   :  { %v5674_v57 = vadd.f32 %v5673_v9, %v13456_v0  ;;  %v5917_v23 = vsel %vm5789_vm15, %v5669_v36, %v5853_v16  ;;  %6140 = vadd.xlane.f32.xlu0 %v6139_v41  ;;  %vm6555_vm15 = vcmask 1041409  }
 0xaf1   :  { %v5675_v56 = vpop.f32.mrf.mxu1  ;;  %v5988_v46 = vmul.f32 %v13607_v14, %v5917_v23  ;;  %v7870_v61 = vpack.c.bf16 %v5917_v23, %v5916_v42 }
 0xaf2   :  { %vm5790_vm0 = vcmp.gt.f32.partialorder %v5674_v57, 0.0  ;;  %v5854_v31 = vmul.f32 0.01, %v5674_v57 }
 0xaf3   :  { %v5676_v4 = vpop.f32.mrf.mxu1  ;;  %v6142_v12 = vsel %vm2276_vm4, %v5988_v46, 0.0  ;;  %10884 = vmatprep.mubr.msk.bf16.mxu0 %vm2276_vm4, %v7870_v61  ;;  %v13644_v46 = vpop.xlane.xlu1 %6017 }
 0xaf4   :  { %v5677_v51 = vadd.f32 %v5676_v4, %v13461_v24  ;;  %6143 = vadd.xlane.f32.xlu1 %v6142_v12  ;;  %v5918_v19 = vsel %vm5790_vm0, %v5674_v57, %v5854_v31  ;;  %v13641_v57 = vpop.xlane.xlu0 %6011  ;;  %vm6557_vm0 = vcmask 1042434  }
 0xaf5   :  { %v5678_v50 = vpop.f32.mrf.mxu1  ;;  %v5989_v0 = vmul.f32 %v13607_v14, %v5918_v19 }
 0xaf6   :  { %vm5791_vm1 = vcmp.gt.f32.partialorder %v5677_v51, 0.0  ;;  %v5855_v52 = vmul.f32 0.01, %v5677_v51 }
 0xaf7   :  { %v5681_v35 = vpop.f32.mrf.mxu1  ;;  %v6145_v21 = vsel %vm2276_vm4, %v5989_v0, 0.0 }
 0xaf8   :  { %v5682_v3 = vadd.f32 %v5681_v35, %v13467_v48  ;;  %v5919_v43 = vsel %vm5791_vm1, %v5677_v51, %v5855_v52  ;;  %6146 = vadd.xlane.f32.xlu0 %v6145_v21  ;;  %v13652_v52 = vpop.xlane.xlu1 %6023 }
 0xaf9   :  { %v5683_v58 = vpop.f32.mrf.mxu1  ;;  %v5990_v32 = vmul.f32 %v13607_v14, %v5919_v43  ;;  %v7871_v26 = vpack.c.bf16 %v5919_v43, %v5918_v19  ;;  %v13649_v19 = vpop.xlane.xlu0 %6020 }
 0xafa   :  { %vm5792_vm2 = vcmp.gt.f32.partialorder %v5682_v3, 0.0  ;;  %v5856_v24 = vmul.f32 0.01, %v5682_v3 }
 0xafb   :  { %v5684_v37 = vpop.f32.mrf.mxu1  ;;  %v6148_v34 = vsel %vm2276_vm4, %v5990_v32, 0.0  ;;  %10885 = vmatmul.mubr.msk.bf16.gmra.mxu0 %vm2276_vm4, %v7871_v26 }
 0xafc   :  { %v5685_v38 = vadd.f32 %v5684_v37, %v13472_v6  ;;  %6149 = vadd.xlane.f32.xlu1 %v6148_v34  ;;  %v5920_v63 = vsel %vm5792_vm2, %v5682_v3, %v5856_v24  ;;  %vm6559_vm2 = vcmask 1043459  }
 0xafd   :  { %v5686_v29 = vpop.f32.mrf.mxu1  ;;  %v5991_v48 = vmul.f32 %v13607_v14, %v5920_v63  ;;  %v13656_v26 = vpop.xlane.xlu0 %6026 }
 0xafe   :  { %vm5793_vm3 = vcmp.gt.f32.partialorder %v5685_v38, 0.0  ;;  %v5857_v33 = vmul.f32 0.01, %v5685_v38 }
 0xaff   :  { %v5689_v13 = vpop.f32.mrf.mxu1  ;;  %v6151_v2 = vsel %vm2276_vm4, %v5991_v48, 0.0 }
 0xb00   :  { %v5690_v44 = vadd.f32 %v5689_v13, %v13478_v1  ;;  %6152 = vadd.xlane.f32.xlu0 %v6151_v2  ;;  %v5921_v28 = vsel %vm5793_vm3, %v5685_v38, %v5857_v33  ;;  %v13659_v38 = vpop.xlane.xlu1 %6029 }
 0xb01   :  { %v5691_v22 = vpop.f32.mrf.mxu1  ;;  %v5992_v55 = vmul.f32 %v13607_v14, %v5921_v28  ;;  %v7872_v30 = vpack.c.bf16 %v5921_v28, %v5920_v63 }
 0xb02   :  { %vm5794_vm5 = vcmp.gt.f32.partialorder %v5690_v44, 0.0  ;;  %v5858_v6 = vmul.f32 0.01, %v5690_v44 }
 0xb03   :  { %v5692_v59 = vpop.f32.mrf.mxu1  ;;  %v6154_v39 = vsel %vm2276_vm4, %v5992_v55, 0.0  ;;  %10888 = vmatprep.mubr.msk.bf16.mxu0 %vm2276_vm4, %v7872_v30  ;;  %v13664_v55 = vpop.xlane.xlu0 %6032 }
 0xb04   :  { %v5693_v53 = vadd.f32 %v5692_v59, %v13483_v15  ;;  %v5922_v1 = vsel %vm5794_vm5, %v5690_v44, %v5858_v6  ;;  %6155 = vadd.xlane.f32.xlu1 %v6154_v39  ;;  %v13667_v39 = vpop.xlane.xlu1 %6035  ;;  %vm6561_vm5 = vcmask 1044484  }
 0xb05   :  { %v5694_v47 = vpop.f32.mrf.mxu1  ;;  %v5993_v36 = vmul.f32 %v13607_v14, %v5922_v1 }
 0xb06   :  { %vm5795_vm6 = vcmp.gt.f32.partialorder %v5693_v53, 0.0  ;;  %v5859_v42 = vmul.f32 0.01, %v5693_v53 }
 0xb07   :  { %v5697_v60 = vpop.f32.mrf.mxu1  ;;  %v6157_v27 = vsel %vm2276_vm4, %v5993_v36, 0.0 }
 0xb08   :  { %v5698_v16 = vadd.f32 %v5697_v60, %v13489_v25  ;;  %6158 = vadd.xlane.f32.xlu0 %v6157_v27  ;;  %v5923_v9 = vsel %vm5795_vm6, %v5693_v53, %v5859_v42  ;;  %v6263_v42 = vlaneseq  ;;  %v13673_v27 = vpop.xlane.xlu0 %6038  ;;  %vm6563_vm6 = vcmask 1045509  }
 0xb09   :  { %v5699_v41 = vpop.f32.mrf.mxu1  ;;  %v5994_v15 = vmul.f32 %v13607_v14, %v5923_v9  ;;  %v7873_v23 = vpack.c.bf16 %v5923_v9, %v5922_v1 }
 0xb0a   :  { %vm5796_vm7 = vcmp.gt.f32.partialorder %v5698_v16, 0.0  ;;  %v5860_v56 = vmul.f32 0.01, %v5698_v16 }
 0xb0b   :  { %v5700_v61 = vpop.f32.mrf.mxu1  ;;  %v6160_v31 = vsel %vm2276_vm4, %v5994_v15, 0.0  ;;  %v10842_v4 = vpop.f32.mrf.mxu0  ;;  %10889 = vmatmul.mubr.msk.bf16.gmra.mxu0 %vm2276_vm4, %v7873_v23 }
 0xb0c   :  { %v5701_v25 = vadd.f32 %v5700_v61, %v13494_v18  ;;  %v5924_v12 = vsel %vm5796_vm7, %v5698_v16, %v5860_v56  ;;  %6161 = vadd.xlane.f32.xlu1 %v6160_v31  ;;  %v8283_v28 = vmax.f32 %v10842_v4, 0.0  ;;  %v13676_v15 = vpop.xlane.xlu1 %6041  ;;  %v6264_v4 = vand.u32 127, %v6263_v42 }
 0xb0d   :  { %v5702_v51 = vpop.f32.mrf.mxu1  ;;  %v5995_v50 = vmul.f32 %v13607_v14, %v5924_v12  ;;  %v8026_v35 = vpop.f32.mrf.mxu0  ;;  %vm6565_vm7 = vcmask 1046534  }
 0xb0e   :  { %vm5797_vm8 = vcmp.gt.f32.partialorder %v5701_v25, 0.0  ;;  %v5861_v0 = vmul.f32 0.01, %v5701_v25  ;;  %v8281_v13 = vmax.f32 %v8026_v35, 0.0 }
 0xb0f   :  { %v5705_v21 = vpop.f32.mrf.mxu1  ;;  %v6163_v3 = vsel %vm2276_vm4, %v5995_v50, 0.0  ;;  %v10843_v18 = vpop.f32.mrf.mxu0  ;;  %v13684_v50 = vshrl.u32 %v6263_v42, 7 }
 0xb10   :  { %v5706_v43 = vadd.f32 %v5705_v21, %v13503_v20  ;;  %6164 = vadd.xlane.f32.xlu0 %v6163_v3  ;;  %v5925_v58 = vsel %vm5797_vm8, %v5701_v25, %v5861_v0  ;;  %v8284_v63 = vmax.f32 %v10843_v18, 0.0  ;;  %v13686_v35 = vpop.xlane.xlu1 %6047  ;;  %v6269_v3 = vadd.s32 4294967288, %v6264_v4 }
 0xb11   :  { %v5707_v32 = vpop.f32.mrf.mxu1  ;;  %v5996_v24 = vmul.f32 %v13607_v14, %v5925_v58  ;;  %v7874_v37 = vpack.c.bf16 %v5925_v58, %v5924_v12  ;;  %v8029_v29 = vpop.f32.mrf.mxu0 }
 0xb12   :  { %vm5798_vm9 = vcmp.gt.f32.partialorder %v5706_v43, 0.0  ;;  %v5862_v34 = vmul.f32 0.01, %v5706_v43  ;;  %v8282_v20 = vmax.f32 %v8029_v29, 0.0  ;;  %v8346_v53 = vpack.c.bf16 %v8284_v63, %v8283_v28  ;;  %v13681_v12 = vpop.xlane.xlu0 %6044 }
 0xb13   :  { %v5708_v48 = vpop.f32.mrf.mxu1  ;;  %v6166_v33 = vsel %vm2276_vm4, %v5996_v24, 0.0  ;;  %10892 = vmatprep.mubr.msk.bf16.mxu0 %vm2276_vm4, %v7874_v37  ;;  %v13694_v29 = vsub.s32 %v6264_v4, %v13684_v50 }
 0xb14   :  { %v5709_v2 = vadd.f32 %v5708_v48, %v13511_v45  ;;  %v5926_v44 = vsel %vm5798_vm9, %v5706_v43, %v5862_v34  ;;  %6167 = vadd.xlane.f32.xlu1 %v6166_v33  ;;  %v8345_v6 = vpack.c.bf16 %v8282_v20, %v8281_v13  ;;  %v13696_v33 = vpop.xlane.xlu1 %6053  ;;  %vm6567_vm9 = vcmask 1047559  }
 0xb15   :  { %v5710_v22 = vpop.f32.mrf.mxu1  ;;  %v5997_v30 = vmul.f32 %v13607_v14, %v5926_v44  ;;  %v6268_v4 = vrot.slane %v13631_v10, %v13694_v29 }
 0xb16   :  { %vm5799_vm10 = vcmp.gt.f32.partialorder %v5709_v2, 0.0  ;;  %v5863_v59 = vmul.f32 0.01, %v5709_v2  ;;  %10908 = vmatprep.mubr.msk.bf16.mxu1 %vm2276_vm4, %v8345_v6  ;;  %v13690_v37 = vpop.xlane.xlu0 %6050 }
 0xb17   :  { %v5713_v1 = vpop.f32.mrf.mxu1  ;;  %v6169_v47 = vsel %vm2276_vm4, %v5997_v30, 0.0  ;;  %10909 = vmatmul.mubr.msk.bf16.vlgmr.msra.gmra.mxu1 %vm2276_vm4, %v8346_v53 }
 0xb18   :  { %v5714_v45 = vadd.f32 %v5713_v1, %v13517_v49  ;;  %6170 = vadd.xlane.f32.xlu0 %v6169_v47  ;;  %v5927_v36 = vsel %vm5799_vm10, %v5709_v2, %v5863_v59  ;;  %v13707_v42 = vpop.xlane.xlu1 %6059 }
 0xb19   :  { %v5715_v60 = vpop.f32.mrf.mxu1  ;;  %v5998_v16 = vmul.f32 %v13607_v14, %v5927_v36  ;;  %v7875_v9 = vpack.c.bf16 %v5927_v36, %v5926_v44 }
 0xb1a   :  { %vm5800_vm11 = vcmp.gt.f32.partialorder %v5714_v45, 0.0  ;;  %v5864_v41 = vmul.f32 0.01, %v5714_v45  ;;  %v13709_v60 = vpop.xlane.xlu0 %6056 }
 0xb1b   :  { %v5716_v23 = vpop.f32.mrf.mxu1  ;;  %v6172_v56 = vsel %vm2276_vm4, %v5998_v16, 0.0  ;;  %v10846_v61 = vpop.f32.mrf.mxu0  ;;  %10893 = vmatmul.mubr.msk.bf16.gmra.mxu0 %vm2276_vm4, %v7875_v9  ;;  %15546 = vst [vmem:[#allocation22_spill] sm:$0xff] %v13709_v60 }
 0xb1c   :  { %v5717_v49 = vadd.f32 %v5716_v23, %v13522_v40  ;;  %v5928_v31 = vsel %vm5800_vm11, %v5714_v45, %v5864_v41  ;;  %6173 = vadd.xlane.f32.xlu1 %v6172_v56  ;;  %v8287_v59 = vmax.f32 %v10846_v61, 0.0 }
 0xb1d   :  { %v5718_v25 = vpop.f32.mrf.mxu1  ;;  %v5999_v51 = vmul.f32 %v13607_v14, %v5928_v31  ;;  %v8042_v21 = vpop.f32.mrf.mxu0 }
 0xb1e   :  { %vm5801_vm12 = vcmp.gt.f32.partialorder %v5717_v49, 0.0  ;;  %v5865_v0 = vmul.f32 0.01, %v5717_v49  ;;  %v8285_v28 = vmax.f32 %v8042_v21, 0.0  ;;  %v6288_v25 = vrot.slane %v13649_v19, %v13694_v29 }
 0xb1f   :  { %v5721_v43 = vpop.f32.mrf.mxu1  ;;  %v6175_v58 = vsel %vm2276_vm4, %v5999_v51, 0.0  ;;  %v10847_v32 = vpop.f32.mrf.mxu0 }
 0xb20   :  { %v5722_v40 = vadd.f32 %v5721_v43, %v13528_v54  ;;  %6176 = vadd.xlane.f32.xlu0 %v6175_v58  ;;  %v5929_v18 = vsel %vm5801_vm12, %v5717_v49, %v5865_v0  ;;  %v8288_v13 = vmax.f32 %v10847_v32, 0.0  ;;  %v13699_v54 = vsub.s32 %v6269_v3, %v13684_v50  ;;  %v13731_v58 = vpop.xlane.xlu1 %6065 }
 0xb21   :  { %v5723_v24 = vpop.f32.mrf.mxu1  ;;  %v6000_v34 = vmul.f32 %v13607_v14, %v5929_v18  ;;  %v7876_v63 = vpack.c.bf16 %v5929_v18, %v5928_v31  ;;  %v8045_v20 = vpop.f32.mrf.mxu0  ;;  %v6297_v43 = vrot.slane %v13656_v26, %v13694_v29  ;;  %vm6594_vm12 = vcmask 130048  }
 0xb22   :  { %vm5802_vm13 = vcmp.gt.f32.partialorder %v5722_v40, 0.0  ;;  %v5866_v48 = vmul.f32 0.01, %v5722_v40  ;;  %v8286_v22 = vmax.f32 %v8045_v20, 0.0  ;;  %v6283_v45 = vrot.slane %v13644_v46, %v13699_v54 }
 0xb23   :  { %v5724_v2 = vpop.f32.mrf.mxu1  ;;  %v6178_v44 = vsel %vm2276_vm4, %v6000_v34, 0.0  ;;  %10896 = vmatprep.mubr.msk.bf16.mxu0 %vm2276_vm4, %v7876_v63  ;;  %v8348_v16 = vpack.c.bf16 %v8288_v13, %v8287_v59  ;;  %v6273_v9 = vrot.slane %v13641_v57, %v13699_v54  ;;  %v6292_v41 = vrot.slane %v13652_v52, %v13699_v54 }
 0xb24   :  { %v5725_v30 = vadd.f32 %v5724_v2, %v13533_v17  ;;  %v5930_v6 = vsel %vm5802_vm13, %v5722_v40, %v5866_v48  ;;  %6179 = vadd.xlane.f32.xlu1 %v6178_v44  ;;  %v8347_v47 = vpack.c.bf16 %v8286_v22, %v8285_v28  ;;  %v6279_v17 = vrot.slane %v13636_v8, %v13694_v29  ;;  %v13733_v40 = vpop.xlane.xlu0 %6062 }
 0xb25   :  { %v5726_v53 = vpop.f32.mrf.mxu1  ;;  %v6001_v1 = vmul.f32 %v13607_v14, %v5930_v6  ;;  %v6301_v61 = vrot.slane %v13659_v38, %v13699_v54  ;;  %15547 = vst [vmem:[#allocation21_spill] sm:$0xff] %v13733_v40  ;;  %v6275_v18 = vsel %vm6274_vm14, %v6273_v9, %v6268_v4  ;;  %v6293_v32 = vsel %vm6274_vm14, %v6292_v41, %v6288_v25 }
 0xb26   :  { %vm5803_vm1 = vcmp.gt.f32.partialorder %v5725_v30, 0.0  ;;  %v5867_v36 = vmul.f32 0.01, %v5725_v30  ;;  %10912 = vmatprep.mubr.msk.bf16.mxu1 %vm2276_vm4, %v8347_v47  ;;  %v6284_v3 = vsel %vm6274_vm14, %v6283_v45, %v6279_v17  ;;  %v6310_v13 = vrot.slane %v13667_v39, %v13699_v54 }
 0xb27   :  { %v5729_v23 = vpop.f32.mrf.mxu1  ;;  %v6181_v56 = vsel %vm2276_vm4, %v6001_v1, 0.0  ;;  %10913 = vmatmul.mubr.msk.bf16.gmra.mxu1 %vm2276_vm4, %v8348_v16  ;;  %v6302_v48 = vsel %vm6274_vm14, %v6301_v61, %v6297_v43  ;;  %v6556_v44 = vsel %vm6555_vm15, %v6284_v3, %v6275_v18  ;;  %v6319_v28 = vrot.slane %v13676_v15, %v13699_v54  ;;  %v13752_v1 = vpop.xlane.xlu1 %6071 }
 0xb28   :  { %v5730_v49 = vadd.f32 %v5729_v23, %v13539_v5  ;;  %6182 = vadd.xlane.f32.xlu0 %v6181_v56  ;;  %v5931_v31 = vsel %vm5803_vm1, %v5725_v30, %v5867_v36  ;;  %v6306_v59 = vrot.slane %v13664_v55, %v13694_v29  ;;  %v6315_v45 = vrot.slane %v13673_v27, %v13694_v29  ;;  %v13757_v16 = vpop.xlane.xlu0 %6068 }
 0xb29   :  { %v5731_v51 = vpop.f32.mrf.mxu1  ;;  %v6002_v0 = vmul.f32 %v13607_v14, %v5931_v31  ;;  %v7877_v21 = vpack.c.bf16 %v5931_v31, %v5930_v6  ;;  %v6558_v6 = vsel %vm6557_vm0, %v6293_v32, %v6556_v44  ;;  %15548 = vst [vmem:[#allocation6_spill] sm:$0xff] %v13757_v16  ;;  %v6328_v41 = vrot.slane %v13686_v35, %v13699_v54 }
 0xb2a   :  { %vm5804_vm3 = vcmp.gt.f32.partialorder %v5730_v49, 0.0  ;;  %v5868_v5 = vmul.f32 0.01, %v5730_v49  ;;  %v6560_v47 = vsel %vm6559_vm2, %v6302_v48, %v6558_v6  ;;  %v6311_v9 = vsel %vm6274_vm14, %v6310_v13, %v6306_v59 }
 0xb2b   :  { %v5732_v24 = vpop.f32.mrf.mxu1  ;;  %v6184_v34 = vsel %vm2276_vm4, %v6002_v0, 0.0  ;;  %v13738_v63 = vpop.f32.mrf.mxu0  ;;  %10897 = vmatmul.mubr.msk.bf16.gmra.mxu0 %vm2276_vm4, %v7877_v21  ;;  %v6337_v31 = vrot.slane %v13696_v33, %v13699_v54  ;;  %v6324_v0 = vrot.slane %v13681_v12, %v13694_v29  ;;  %vm9774_vm13 = vcmask 31744  }
 0xb2c   :  { %v5733_v20 = vadd.f32 %v5732_v24, %v13544_v11  ;;  %v5932_v2 = vsel %vm5804_vm3, %v5730_v49, %v5868_v5  ;;  %6185 = vadd.xlane.f32.xlu1 %v6184_v34  ;;  %v6320_v49 = vsel %vm6274_vm14, %v6319_v28, %v6315_v45  ;;  %v13770_v3 = vpop.xlane.xlu1 %6077  ;;  %v6333_v5 = vrot.slane %v13690_v37, %v13694_v29  ;;  %v13774_v18 = vpop.xlane.xlu0 %6074 }
 0xb2d   :  { %v5734_v22 = vpop.f32.mrf.mxu1  ;;  %v6003_v30 = vmul.f32 %v13607_v14, %v5932_v2  ;;  %v8058_v11 = vpop.f32.mrf.mxu0  ;;  %15549 = vst [vmem:[#allocation5_spill] sm:$0xff] %v13774_v18  ;;  %v8291_v44 = vmax.f32 %v13738_v63, 0.0 }
 0xb2e   :  { %vm5805_vm8 = vcmp.gt.f32.partialorder %v5733_v20, 0.0  ;;  %v5869_v53 = vmul.f32 0.01, %v5733_v20  ;;  %v8289_v34 = vmax.f32 %v8058_v11, 0.0  ;;  %v6338_v22 = vsel %vm6274_vm14, %v6337_v31, %v6333_v5 }
 0xb2f   :  { %v5737_v36 = vpop.f32.mrf.mxu1  ;;  %v6187_v17 = vsel %vm2276_vm4, %v6003_v30, 0.0  ;;  %v10851_v61 = vpop.f32.mrf.mxu0  ;;  %v6562_v30 = vsel %vm6561_vm5, %v6311_v9, %v6560_v47 }
 0xb30   :  { %v5738_v23 = vadd.f32 %v5737_v36, %v13550_v7  ;;  %6188 = vadd.xlane.f32.xlu0 %v6187_v17  ;;  %v5933_v56 = vsel %vm5805_vm8, %v5733_v20, %v5869_v53  ;;  %v8292_v7 = vmax.f32 %v10851_v61, 0.0  ;;  %v6329_v20 = vsel %vm6274_vm14, %v6328_v41, %v6324_v0  ;;  %v13784_v53 = vpop.xlane.xlu1 %6083  ;;  %v13788_v17 = vpop.xlane.xlu0 %6080 }
 0xb31   :  { %v5739_v4 = vpop.f32.mrf.mxu1  ;;  %v6004_v25 = vmul.f32 %v13607_v14, %v5933_v56  ;;  %v7878_v51 = vpack.c.bf16 %v5933_v56, %v5932_v2  ;;  %v8061_v43 = vpop.f32.mrf.mxu0  ;;  %v6564_v11 = vsel %vm6563_vm6, %v6320_v49, %v6562_v30  ;;  %15550 = vst [vmem:[#allocation8_spill] sm:$0xff] %v13788_v17 }
 0xb32   :  { %vm5806_vm10 = vcmp.gt.f32.partialorder %v5738_v23, 0.0  ;;  %v5870_v21 = vmul.f32 0.01, %v5738_v23  ;;  %v8290_v48 = vmax.f32 %v8061_v43, 0.0  ;;  %v8350_v36 = vpack.c.bf16 %v8292_v7, %v8291_v44 }
 0xb33   :  { %v5740_v32 = vpop.f32.mrf.mxu1  ;;  %v6190_v24 = vsel %vm2276_vm4, %v6004_v25, 0.0  ;;  %10900 = vmatprep.mubr.msk.bf16.mxu0 %vm2276_vm4, %v7878_v51  ;;  %v6566_v63 = vsel %vm6565_vm7, %v6329_v20, %v6564_v11  ;;  %v6346_v25 = vrot.slane %v13707_v42, %v13699_v54  ;;  %v6355_v51 = vrot.slane %v13731_v58, %v13699_v54 }
 0xb34   :  { %v5934_v13 = vsel %vm5806_vm10, %v5738_v23, %v5870_v21  ;;  %v5741_v2 = vadd.f32 %v5740_v32, %v13556_v62  ;;  %6191 = vadd.xlane.f32.xlu1 %v6190_v24  ;;  %v8349_v6 = vpack.c.bf16 %v8290_v48, %v8289_v34  ;;  %v6568_v47 = vsel %vm6567_vm9, %v6338_v22, %v6566_v63  ;;  %v13798_v49 = vpop.xlane.xlu0 %6086 }
 0xb35   :  { %v6005_v28 = vmul.f32 %v13607_v14, %v5934_v13  ;;  %v5742_v59 = vpop.f32.mrf.mxu1  ;;  %v13795_v56 = vpop.xlane.xlu1 %6089  ;;  %v6595_v61 = vsel %vm6594_vm12, %v6568_v47, -inf  ;;  %15551 = vst [vmem:[#allocation10_spill] sm:$0xff] %v13798_v49  ;;  %v6342_v21 = vrot.slane %v13709_v60, %v13694_v29  ;;  %v6351_v7 = vrot.slane %v13733_v40, %v13694_v29 }
 0xb36   :  { %vm5807_vm11 = vcmp.gt.f32.partialorder %v5741_v2, 0.0  ;;  %v5871_v45 = vmul.f32 0.01, %v5741_v2  ;;  %10916 = vmatprep.mubr.msk.bf16.mxu1 %vm2276_vm4, %v8349_v6  ;;  %v6373_v43 = vrot.slane %v13770_v3, %v13699_v54  ;;  %v6360_v32 = vrot.slane %v13757_v16, %v13694_v29 }
 0xb37   :  { %v6193_v62 = vsel %vm2276_vm4, %v6005_v28, 0.0  ;;  %10917 = vmatmul.mubr.msk.bf16.gmra.mxu1 %vm2276_vm4, %v8350_v36  ;;  %v6382_v24 = vrot.slane %v13784_v53, %v13699_v54  ;;  %v6356_v20 = vsel %vm6274_vm14, %v6355_v51, %v6351_v7  ;;  %v6391_v44 = vrot.slane %v13795_v56, %v13699_v54 }
 0xb38   :  { %6194 = vadd.xlane.f32.xlu0 %v6193_v62  ;;  %v5935_v9 = vsel %vm5807_vm11, %v5741_v2, %v5871_v45  ;;  %v6369_v2 = vrot.slane %v13774_v18, %v13694_v29  ;;  %v6378_v22 = vrot.slane %v13788_v17, %v13694_v29  ;;  %v6387_v45 = vrot.slane %v13798_v49, %v13694_v29 }
 0xb39   :  { %v6006_v41 = vmul.f32 %v13607_v14, %v5935_v9  ;;  %v7879_v23 = vpack.c.bf16 %v5935_v9, %v5934_v13  ;;  %v6364_v14 = vrot.slane %v13752_v1, %v13699_v54  ;;  %v13820_v34 = vpop.xlane.xlu0 %6092  ;;  %v6347_v13 = vsel %vm6274_vm14, %v6346_v25, %v6342_v21 }
 0xb3a   :  { %15552 = vst [vmem:[#allocation7_spill] sm:$0xff] %v13820_v34  ;;  %v6374_v11 = vsel %vm6274_vm14, %v6373_v43, %v6369_v2  ;;  %v6569_v63 = vsel %vm6555_vm15, %v6356_v20, %v6347_v13  ;;  %v6383_v47 = vsel %vm6274_vm14, %v6382_v24, %v6378_v22  ;;  %v6396_v9 = vrot.slane %v13820_v34, %v13694_v29 }
 0xb3b   :  { %v6196_v31 = vsel %vm2276_vm4, %v6006_v41, 0.0  ;;  %v10854_v4 = vpop.f32.mrf.mxu0  ;;  %10901 = vmatmul.mubr.msk.bf16.gmra.mxu0 %vm2276_vm4, %v7879_v23  ;;  %v6365_v28 = vsel %vm6274_vm14, %v6364_v14, %v6360_v32  ;;  %v14031_v60 = vsub.s32 7, %v13684_v50 }
 0xb3c   :  { %6596 = vmax.xlane.f32.xlu0 %v6595_v61  ;;  %6197 = vadd.xlane.f32.xlu1 %v6196_v31  ;;  %v8295_v23 = vmax.f32 %v10854_v4, 0.0  ;;  %v6570_v61 = vsel %vm6557_vm0, %v6365_v28, %v6569_v63  ;;  %v6392_v31 = vsel %vm6274_vm14, %v6391_v44, %v6387_v45 }
 0xb3d   :  { %v8074_v0 = vpop.f32.mrf.mxu0  ;;  %v13814_v5 = vpop.xlane.xlu1 %6095  ;;  %v6571_v51 = vsel %vm6559_vm2, %v6374_v11, %v6570_v61 }
 0xb3e   :  { %v6400_v30 = vrot.slane %v13814_v5, %v13699_v54  ;;  %v8293_v36 = vmax.f32 %v8074_v0, 0.0  ;;  %v6572_v4 = vsel %vm6561_vm5, %v6383_v47, %v6571_v51 }
 0xb3f   :  { %v10855_v48 = vpop.f32.mrf.mxu0  ;;  %v6573_v32 = vsel %vm6563_vm6, %v6392_v31, %v6572_v4 }
 0xb40   :  { %v8296_v6 = vmax.f32 %v10855_v48, 0.0  ;;  %v6401_v0 = vsel %vm6274_vm14, %v6400_v30, %v6396_v9 }
 0xb41   :  { %v8077_v59 = vpop.f32.mrf.mxu0  ;;  %v13840_v41 = vpop.xlane.xlu0 %6098  ;;  %v6574_v48 = vsel %vm6565_vm7, %v6401_v0, %v6573_v32 }
 0xb42   :  { %v8294_v62 = vmax.f32 %v8077_v59, 0.0  ;;  %15553 = vst [vmem:[#allocation9_spill] sm:$0xff] %v13840_v41  ;;  %v8352_v21 = vpack.c.bf16 %v8296_v6, %v8295_v23  ;;  %v6405_v43 = vrot.slane %v13840_v41, %v13694_v29 }
 0xb44   :  { %v8351_v25 = vpack.c.bf16 %v8294_v62, %v8293_v36 }
 0xb45   :  { %v13845_v14 = vpop.xlane.xlu1 %6101 }
 0xb46   :  { %v6409_v7 = vrot.slane %v13845_v14, %v13699_v54  ;;  %10920 = vmatprep.mubr.msk.bf16.mxu1 %vm2276_vm4, %v8351_v25 }
 0xb47   :  { %10921 = vmatmul.mubr.msk.bf16.gmra.mxu1 %vm2276_vm4, %v8352_v21 }
 0xb48   :  { %v6410_v24 = vsel %vm6274_vm14, %v6409_v7, %v6405_v43 }
 0xb49   :  { %v6575_v13 = vsel %vm6567_vm9, %v6410_v24, %v6574_v48  ;;  %v13865_v7 = vpop.xlane.xlu0 %6104  ;;  %v11381_v24 = vld [vmem:[%s15405_s5 + $0x28] sm:$0xff]  }
 0xb4a   :  { %v6598_v20 = vsel %vm6594_vm12, %v6575_v13, -inf  ;;  %10972 = vmatprep.subr.bf16.mxu0 %v11381_v24 }
 0xb4b   :  { %6599 = vmax.xlane.f32.xlu1 %v6598_v20  ;;  %v10858_v2 = vpop.f32.mrf.mxu0  ;;  %10973 = vmatpush3.bf16.msra.mxu0 %v11381_v24 }
 0xb4c   :  { %v8299_v11 = vmax.f32 %v10858_v2, 0.0 }
 0xb4d   :  { %v8090_v44 = vpop.f32.mrf.mxu0  ;;  %v13862_v21 = vpop.xlane.xlu1 %6107 }
 0xb4e   :  { %v8297_v6 = vmax.f32 %v8090_v44, 0.0  ;;  %15554 = vst [vmem:[#allocation12_spill] sm:$0xff] %v13862_v21  ;;  %v11382_v44 = vld [vmem:[%s15405_s5 + $0x20] sm:$0xff]  }
 0xb4f   :  { %v10859_v28 = vpop.f32.mrf.mxu0  ;;  %10974 = vmatprep.subr.bf16.mxu0 %v11382_v44 }
 0xb50   :  { %v8300_v22 = vmax.f32 %v10859_v28, 0.0  ;;  %10975 = vmatpush3.bf16.msra.mxu0 %v11382_v44 }
 0xb51   :  { %v8093_v30 = vpop.f32.mrf.mxu0  ;;  %v13870_v4 = vpop.xlane.xlu0 %6110 }
 0xb52   :  { %v8298_v59 = vmax.f32 %v8093_v30, 0.0  ;;  %v8354_v36 = vpack.c.bf16 %v8300_v22, %v8299_v11  ;;  %v6423_v24 = vrot.slane %v13870_v4, %v13694_v29 }
 0xb54   :  { %v8353_v45 = vpack.c.bf16 %v8298_v59, %v8297_v6 }
 0xb55   :  { %v13868_v43 = vpop.xlane.xlu1 %6113 }
 0xb56   :  { %10924 = vmatprep.mubr.msk.bf16.mxu1 %vm2276_vm4, %v8353_v45  ;;  %15555 = vst [vmem:[#allocation14_spill] sm:$0xff] %v13868_v43 }
 0xb57   :  { %10925 = vmatmul.mubr.msk.bf16.gmra.mxu1 %vm2276_vm4, %v8354_v36 }
 0xb59   :  { %v13877_v20 = vpop.xlane.xlu0 %6116 }
 0xb5a   :  { %15557 = vst [vmem:[#allocation13_spill] sm:$0xff] %v13877_v20  ;;  %v6432_v44 = vrot.slane %v13877_v20, %v13694_v29 }
 0xb5b   :  { %v10862_v62 = vpop.f32.mrf.mxu0 }
 0xb5c   :  { %v8303_v25 = vmax.f32 %v10862_v62, 0.0 }
 0xb5d   :  { %v8106_v63 = vpop.f32.mrf.mxu0  ;;  %v13875_v13 = vpop.xlane.xlu1 %6119 }
 0xb5e   :  { %v8301_v61 = vmax.f32 %v8106_v63, 0.0  ;;  %15556 = vst [vmem:[#allocation11_spill] sm:$0xff] %v13875_v13 }
 0xb5f   :  { %v10863_v47 = vpop.f32.mrf.mxu0 }
 0xb60   :  { %v8304_v9 = vmax.f32 %v10863_v47, 0.0 }
 0xb61   :  { %v8109_v23 = vpop.f32.mrf.mxu0  ;;  %v13884_v11 = vpop.xlane.xlu0 %6122 }
 0xb62   :  { %v8302_v31 = vmax.f32 %v8109_v23, 0.0  ;;  %v8356_v0 = vpack.c.bf16 %v8304_v9, %v8303_v25  ;;  %15559 = vst [vmem:[#allocation18_spill] sm:$0xff] %v13884_v11  ;;  %v6427_v25 = vrot.slane %v13868_v43, %v13699_v54 }
 0xb64   :  { %v8355_v51 = vpack.c.bf16 %v8302_v31, %v8301_v61  ;;  %v6418_v31 = vrot.slane %v13862_v21, %v13699_v54 }
 0xb65   :  { %v13882_v30 = vpop.xlane.xlu1 %6125 }
 0xb66   :  { %10928 = vmatprep.mubr.msk.bf16.mxu1 %vm2276_vm4, %v8355_v51  ;;  %15558 = vst [vmem:[#allocation16_spill] sm:$0xff] %v13882_v30  ;;  %v6436_v51 = vrot.slane %v13875_v13, %v13699_v54 }
 0xb67   :  { %10929 = vmatmul.mubr.msk.bf16.gmra.mxu1 %vm2276_vm4, %v8356_v0 }
 0xb69   :  { %v13889_v47 = vpop.xlane.xlu0 %6128 }
 0xb6a   :  { %15561 = vst [vmem:[#allocation17_spill] sm:$0xff] %v13889_v47  ;;  %v6450_v13 = vrot.slane %v13889_v47, %v13694_v29  ;;  %v14028_v47 = vsub.s32 3, %v13684_v50 }
 0xb6b   :  { %v10866_v32 = vpop.f32.mrf.mxu0 }
 0xb6c   :  { %v8307_v45 = vmax.f32 %v10866_v32, 0.0  ;;  %v6414_v32 = vrot.slane %v13865_v7, %v13694_v29 }
 0xb6d   :  { %v8122_v48 = vpop.f32.mrf.mxu0  ;;  %v13886_v63 = vpop.xlane.xlu1 %6131 }
 0xb6e   :  { %v8305_v6 = vmax.f32 %v8122_v48, 0.0  ;;  %15560 = vst [vmem:[#allocation15_spill] sm:$0xff] %v13886_v63  ;;  %v6445_v48 = vrot.slane %v13882_v30, %v13699_v54  ;;  %v6437_v30 = vsel %vm6274_vm14, %v6436_v51, %v6432_v44 }
 0xb6f   :  { %v10867_v2 = vpop.f32.mrf.mxu0 }
 0xb70   :  { %v8308_v28 = vmax.f32 %v10867_v2, 0.0 }
 0xb71   :  { %v8125_v22 = vpop.f32.mrf.mxu0  ;;  %v13894_v23 = vpop.xlane.xlu0 %6134 }
 0xb72   :  { %v8306_v59 = vmax.f32 %v8125_v22, 0.0  ;;  %v8358_v62 = vpack.c.bf16 %v8308_v28, %v8307_v45  ;;  %15563 = vst [vmem:[#allocation19_spill] sm:$0xff] %v13894_v23  ;;  %v6454_v28 = vrot.slane %v13886_v63, %v13699_v54  ;;  %v6428_v45 = vsel %vm6274_vm14, %v6427_v25, %v6423_v24 }
 0xb73   :  { %v6459_v25 = vrot.slane %v13894_v23, %v13694_v29 }
 0xb74   :  { %v8357_v36 = vpack.c.bf16 %v8306_v59, %v8305_v6  ;;  %v6419_v59 = vsel %vm6274_vm14, %v6418_v31, %v6414_v32 }
 0xb75   :  { %v13892_v9 = vpop.xlane.xlu1 %6137  ;;  %v6576_v41 = vsel %vm6555_vm15, %v6428_v45, %v6419_v59 }
 0xb76   :  { %10932 = vmatprep.mubr.msk.bf16.mxu1 %vm2276_vm4, %v8357_v36  ;;  %15562 = vst [vmem:[#allocation20_spill] sm:$0xff] %v13892_v9  ;;  %v6441_v36 = vrot.slane %v13884_v11, %v13694_v29 }
 0xb77   :  { %10933 = vmatmul.mubr.msk.bf16.gmra.mxu1 %vm2276_vm4, %v8358_v62  ;;  %v6463_v62 = vrot.slane %v13892_v9, %v13699_v54  ;;  %v6455_v9 = vsel %vm6274_vm14, %v6454_v28, %v6450_v13 }
 0xb78   :  { %v6446_v31 = vsel %vm6274_vm14, %v6445_v48, %v6441_v36 }
 0xb79   :  { %v13914_v22 = vpop.xlane.xlu0 %6140  ;;  %v6464_v49 = vsel %vm6274_vm14, %v6463_v62, %v6459_v25 }
 0xb7a   :  { %15565 = vst [vmem:[#allocation24_spill] sm:$0xff] %v13914_v22  ;;  %v6468_v51 = vrot.slane %v13914_v22, %v13694_v29 }
 0xb7b   :  { %v10870_v61 = vpop.f32.mrf.mxu0 }
 0xb7c   :  { %v8311_v34 = vmax.f32 %v10870_v61, 0.0 }
 0xb7d   :  { %v8138_v0 = vpop.f32.mrf.mxu0  ;;  %v13908_v2 = vpop.xlane.xlu1 %6143 }
 0xb7e   :  { %15564 = vst [vmem:[#allocation23_spill] sm:$0xff] %v13908_v2  ;;  %v6472_v63 = vrot.slane %v13908_v2, %v13699_v54  ;;  %v8309_v32 = vmax.f32 %v8138_v0, 0.0 }
 0xb7f   :  { %v10871_v6 = vpop.f32.mrf.mxu0 }
 0xb80   :  { %v8312_v43 = vmax.f32 %v10871_v6, 0.0  ;;  %v6577_v6 = vsel %vm6557_vm0, %v6437_v30, %v6576_v41 }
 0xb81   :  { %v8141_v21 = vpop.f32.mrf.mxu0  ;;  %v13934_v44 = vpop.xlane.xlu0 %6146  ;;  %v6578_v36 = vsel %vm6559_vm2, %v6446_v31, %v6577_v6 }
 0xb82   :  { %v8310_v24 = vmax.f32 %v8141_v21, 0.0  ;;  %15566 = vst [vmem:[#allocation25_spill] sm:$0xff] %v13934_v44  ;;  %v6473_v21 = vsel %vm6274_vm14, %v6472_v63, %v6468_v51  ;;  %v8360_v0 = vpack.c.bf16 %v8312_v43, %v8311_v34  ;;  %v6477_v28 = vrot.slane %v13934_v44, %v13694_v29 }
 0xb83   :  { %v6579_v61 = vsel %vm6561_vm5, %v6455_v9, %v6578_v36 }
 0xb84   :  { %v8359_v48 = vpack.c.bf16 %v8310_v24, %v8309_v32  ;;  %v6580_v41 = vsel %vm6563_vm6, %v6464_v49, %v6579_v61 }
 0xb85   :  { %v13939_v17 = vpop.xlane.xlu1 %6149  ;;  %v6581_v59 = vsel %vm6565_vm7, %v6473_v21, %v6580_v41 }
 0xb86   :  { %15567 = vst [vmem:[#allocation26_spill] sm:$0xff] %v13939_v17  ;;  %v6481_v13 = vrot.slane %v13939_v17, %v13699_v54  ;;  %10936 = vmatprep.mubr.msk.bf16.mxu1 %vm2276_vm4, %v8359_v48 }
 0xb87   :  { %10937 = vmatmul.mubr.msk.bf16.gmra.mxu1 %vm2276_vm4, %v8360_v0 }
 0xb88   :  { %v6482_v30 = vsel %vm6274_vm14, %v6481_v13, %v6477_v28 }
 0xb89   :  { %v6582_v34 = vsel %vm6567_vm9, %v6482_v30, %v6581_v59  ;;  %v13956_v30 = vpop.xlane.xlu0 %6152 }
 0xb8a   :  { %v6601_v43 = vsel %vm6594_vm12, %v6582_v34, -inf }
 0xb8b   :  { %6602 = vmax.xlane.f32.xlu0 %v6601_v43  ;;  %v10874_v63 = vpop.f32.mrf.mxu0 }
 0xb8c   :  { %v8315_v24 = vmax.f32 %v10874_v63, 0.0 }
 0xb8d   :  { %v8154_v45 = vpop.f32.mrf.mxu0 }
 0xb8e   :  { %v8313_v25 = vmax.f32 %v8154_v45, 0.0 }
 0xb8f   :  { %v10875_v62 = vpop.f32.mrf.mxu0 }
 0xb90   :  { %v8316_v31 = vmax.f32 %v10875_v62, 0.0 }
 0xb91   :  { %v8157_v9 = vpop.f32.mrf.mxu0  ;;  %v13960_v34 = vpop.xlane.xlu0 %6158 }
 0xb92   :  { %v8314_v32 = vmax.f32 %v8157_v9, 0.0  ;;  %v8362_v51 = vpack.c.bf16 %v8316_v31, %v8315_v24 }
 0xb94   :  { %v8361_v49 = vpack.c.bf16 %v8314_v32, %v8313_v25 }
 0xb96   :  { %10940 = vmatprep.mubr.msk.bf16.mxu1 %vm2276_vm4, %v8361_v49 }
 0xb97   :  { %10941 = vmatmul.mubr.msk.bf16.gmra.mxu1 %vm2276_vm4, %v8362_v51 }
 0xb99   :  { %v13962_v63 = vpop.xlane.xlu0 %6164 }
 0xb9b   :  { %v10878_v6 = vpop.f32.mrf.mxu0 }
 0xb9c   :  { %v8319_v61 = vmax.f32 %v10878_v6, 0.0 }
 0xb9d   :  { %v8170_v48 = vpop.f32.mrf.mxu0 }
 0xb9e   :  { %v8317_v13 = vmax.f32 %v8170_v48, 0.0 }
 0xb9f   :  { %v10879_v36 = vpop.f32.mrf.mxu0 }
 0xba0   :  { %v8320_v21 = vmax.f32 %v10879_v36, 0.0  ;;  %v13970_v36 = vpop.xlane.xlu1 %6155 }
 0xba1   :  { %v8173_v0 = vpop.f32.mrf.mxu0  ;;  %v13964_v31 = vpop.xlane.xlu0 %6170 }
 0xba2   :  { %v8318_v28 = vmax.f32 %v8173_v0, 0.0  ;;  %v8364_v59 = vpack.c.bf16 %v8320_v21, %v8319_v61 }
 0xba4   :  { %v8363_v41 = vpack.c.bf16 %v8318_v28, %v8317_v13  ;;  %v13974_v13 = vpop.xlane.xlu1 %6161 }
 0xba6   :  { %10944 = vmatprep.mubr.msk.bf16.mxu1 %vm2276_vm4, %v8363_v41 }
 0xba7   :  { %10945 = vmatmul.mubr.msk.bf16.gmra.mxu1 %vm2276_vm4, %v8364_v59 }
 0xba8   :  { %v13978_v59 = vpop.xlane.xlu1 %6167 }
 0xba9   :  { %v13966_v6 = vpop.xlane.xlu0 %6176 }
 0xbab   :  { %v10882_v43 = vpop.f32.mrf.mxu0 }
 0xbac   :  { %v8323_v49 = vmax.f32 %v10882_v43, 0.0 }
 0xbad   :  { %v8186_v45 = vpop.f32.mrf.mxu0 }
 0xbae   :  { %v8321_v32 = vmax.f32 %v8186_v45, 0.0 }
 0xbaf   :  { %v10883_v62 = vpop.f32.mrf.mxu0 }
 0xbb0   :  { %v8324_v9 = vmax.f32 %v10883_v62, 0.0 }
 0xbb1   :  { %v8189_v25 = vpop.f32.mrf.mxu0  ;;  %v13972_v21 = vpop.xlane.xlu0 %6182 }
 0xbb2   :  { %v8322_v24 = vmax.f32 %v8189_v25, 0.0  ;;  %v8366_v48 = vpack.c.bf16 %v8324_v9, %v8323_v49  ;;  %15568 = vst [vmem:[#allocation27_spill] sm:$0xff] %v13972_v21  ;;  %v13983_v9 = vsub.s32 0, %v13684_v50 }
 0xbb4   :  { %v8365_v51 = vpack.c.bf16 %v8322_v24, %v8321_v32  ;;  %v13986_v24 = vsub.s32 1, %v13684_v50 }
 0xbb6   :  { %10948 = vmatprep.mubr.msk.bf16.mxu1 %vm2276_vm4, %v8365_v51  ;;  %v13988_v51 = vpop.xlane.xlu1 %6173 }
 0xbb7   :  { %10949 = vmatmul.mubr.msk.bf16.gmra.mxu1 %vm2276_vm4, %v8366_v48 }
 0xbb9   :  { %v13976_v28 = vpop.xlane.xlu0 %6188 }
 0xbba   :  { %15569 = vst [vmem:[#allocation28_spill] sm:$0xff] %v13976_v28 }
 0xbbb   :  { %v10886_v0 = vpop.f32.mrf.mxu0 }
 0xbbc   :  { %v8327_v49 = vmax.f32 %v10886_v0, 0.0 }
 0xbbd   :  { %v8202_v61 = vpop.f32.mrf.mxu0 }
 0xbbe   :  { %v8325_v25 = vmax.f32 %v8202_v61, 0.0  ;;  %v13997_v61 = vpop.xlane.xlu1 %6179 }
 0xbbf   :  { %v10887_v41 = vpop.f32.mrf.mxu0 }
 0xbc0   :  { %v8328_v45 = vmax.f32 %v10887_v41, 0.0  ;;  %v13993_v41 = vsub.s32 4, %v13684_v50 }
 0xbc1   :  { %v13980_v43 = vpop.xlane.xlu0 %6194  ;;  %v8205_v62 = vpop.f32.mrf.mxu0 }
 0xbc2   :  { %15570 = vst [vmem:[#allocation29_spill] sm:$0xff] %v13980_v43  ;;  %v8326_v32 = vmax.f32 %v8205_v62, 0.0  ;;  %v8368_v22 = vpack.c.bf16 %v8328_v45, %v8327_v49  ;;  %v14005_v45 = vsub.s32 5, %v13684_v50  ;;  %v14013_v16 = vpop.xlane.xlu1 %6185 }
 0xbc3   :  { %15571 = vst [vmem:[#allocation30_spill] sm:$0xff] %v14013_v16 }
 0xbc4   :  { %v8367_v48 = vpack.c.bf16 %v8326_v32, %v8325_v25  ;;  %v14002_v25 = vsub.s32 2, %v13684_v50 }
 0xbc5   :  { %v6597_v44 = vpop.xlane.xlu0 %6596 }
 0xbc6   :  { %v6614_v17 = vrot.slane %v6597_v44, %v13983_v9  ;;  %10952 = vmatprep.mubr.msk.bf16.mxu1 %vm2276_vm4, %v8367_v48  ;;  %v6618_v18 = vrot.slane %v6597_v44, %v13986_v24  ;;  %v14008_v32 = vrot.slane %v6597_v44, %v13993_v41  ;;  %v14021_v23 = vrot.slane %v6597_v44, %v14005_v45 }
 0xbc7   :  { %10953 = vmatmul.mubr.msk.bf16.gmra.mxu1 %vm2276_vm4, %v8368_v22  ;;  %v6626_v43 = vrot.slane %v6597_v44, %v14028_v47  ;;  %v14043_v28 = vrot.slane %v6597_v44, %v14031_v60 }
 0xbc8   :  { %v6771_v0 = vsub.f32 %v13631_v10, %v6614_v17  ;;  %v6772_v62 = vsub.f32 %v13641_v57, %v6614_v17  ;;  %v6773_v49 = vsub.f32 %v13636_v8, %v6618_v18  ;;  %v14016_v10 = vsub.s32 6, %v13684_v50 }
 0xbc9   :  { %v6622_v57 = vrot.slane %v6597_v44, %v14002_v25  ;;  %v6774_v17 = vsub.f32 %v13644_v46, %v6618_v18  ;;  %v6780_v8 = vsub.f32 %v13667_v39, %v14008_v32  ;;  %v6782_v39 = vsub.f32 %v13676_v15, %v14021_v23 }
 0xbca   :  { %v6835_v22 = vmul.f32 1.442695, %v6771_v0  ;;  %v6837_v2 = vmul.f32 1.442695, %v6772_v62  ;;  %v6839_v40 = vmul.f32 1.442695, %v6773_v49  ;;  %v14025_v62 = vpop.xlane.xlu1 %6191  ;;  %v6777_v20 = vsub.f32 %v13656_v26, %v6626_v43 }
 0xbcb   :  { %v14011_v48 = vpop.f32.mrf.mxu0  ;;  %15572 = vst [vmem:[#allocation31_spill] sm:$0xff] %v14025_v62  ;;  %v6775_v46 = vsub.f32 %v13649_v19, %v6622_v57  ;;  %v6841_v18 = vmul.f32 1.442695, %v6774_v17  ;;  %v6776_v50 = vsub.f32 %v13652_v52, %v6622_v57  ;;  %v6857_v21 = vmul.f32 1.442695, %v6782_v39 }
 0xbcc   :  { %11385 = vpow2.f32 %v6835_v22  ;;  %v14035_v22 = vrot.slane %v6597_v44, %v14016_v10  ;;  %v6786_v44 = vsub.f32 %v13696_v33, %v14043_v28  ;;  %v6778_v33 = vsub.f32 %v13659_v38, %v6626_v43 }
 0xbcd   :  { %11387 = vpow2.f32 %v6837_v2  ;;  %v8218_v0 = vpop.f32.mrf.mxu0  ;;  %v6853_v2 = vmul.f32 1.442695, %v6780_v8  ;;  %v6843_v19 = vmul.f32 1.442695, %v6775_v46 }
 0xbce   :  { %11389 = vpow2.f32 %v6839_v40  ;;  %v14039_v11 = vpop.xlane.xlu1 %6197  ;;  %v6784_v17 = vsub.f32 %v13686_v35, %v14035_v22  ;;  %v8329_v26 = vmax.f32 %v8218_v0, 0.0  ;;  %v6865_v16 = vmul.f32 1.442695, %v6786_v44 }
 0xbcf   :  { %v10891_v49 = vpop.f32.mrf.mxu0  ;;  %15573 = vst [vmem:[#allocation32_spill] sm:$0xff] %v14039_v11  ;;  %11391 = vpow2.f32 %v6841_v18  ;;  %v6845_v11 = vmul.f32 1.442695, %v6776_v50  ;;  %v8331_v50 = vmax.f32 %v14011_v48, 0.0 }
 0xbd0   :  { %11393 = vpow2.f32 %v6853_v2  ;;  %v6861_v35 = vmul.f32 1.442695, %v6784_v17  ;;  %v8332_v39 = vmax.f32 %v10891_v49, 0.0  ;;  %v6847_v17 = vmul.f32 1.442695, %v6777_v20 }
 0xbd1   :  { %v8221_v15 = vpop.f32.mrf.mxu0  ;;  %11395 = vpow2.f32 %v6843_v19  ;;  %v6849_v20 = vmul.f32 1.442695, %v6778_v33 }
 0xbd2   :  { %v8330_v52 = vmax.f32 %v8221_v15, 0.0  ;;  %11397 = vpow2.f32 %v6857_v21 }
 0xbd3   :  { %11399 = vpow2.f32 %v6845_v11  ;;  %v6779_v11 = vsub.f32 %v13664_v55, %v14008_v32 }
 0xbd4   :  { %v14048_v40 = vpop.xlane.xlu1 %6599  ;;  %v8369_v49 = vpack.c.bf16 %v8330_v52, %v8329_v26  ;;  %11401 = vpow2.f32 %v6861_v35 }
 0xbd5   :  { %v14059_v18 = vrot.slane %v14048_v40, %v13983_v9  ;;  %v14069_v15 = vrot.slane %v14048_v40, %v13986_v24  ;;  %11403 = vpow2.f32 %v6847_v17  ;;  %v6781_v17 = vsub.f32 %v13673_v27, %v14021_v23 }
 0xbd6   :  { %10956 = vmatprep.mubr.msk.bf16.mxu1 %vm2276_vm4, %v8369_v49  ;;  %11405 = vpow2.f32 %v6865_v16 }
 0xbd7   :  { %v14050_v8 = vpop.f32.mrf.mxu1  ;;  %v6788_v0 = vsub.f32 %v13707_v42, %v14059_v18  ;;  %v14082_v42 = vrot.slane %v14048_v40, %v14002_v25  ;;  %v6790_v44 = vsub.f32 %v13731_v58, %v14069_v15  ;;  %11407 = vpow2.f32 %v6849_v20 }
 0xbd8   :  { %v8781_v58 = vmax.f32 %v14050_v8, 0.0 }
 0xbd9   :  { %v8524_v57 = vpop.f32.mrf.mxu1  ;;  %v14055_v46 = vpop.eup %11385  ;;  %v6792_v27 = vsub.f32 %v13752_v1, %v14082_v42  ;;  %v6873_v23 = vmul.f32 1.442695, %v6790_v44  ;;  %v6855_v1 = vmul.f32 1.442695, %v6781_v17 }
 0xbda   :  { %15574 = vst [vmem:[#allocation33_spill] sm:$0xff] %v14055_v46  ;;  %v14061_v62 = vpop.eup %11387  ;;  %7028 = vperm.xlu0 %11145, %v14055_v46   ;;  %v8370_v46 = vpack.c.bf16 %v8332_v39, %v8331_v50  ;;  %v6869_v39 = vmul.f32 1.442695, %v6788_v0  ;;  %v8779_v55 = vmax.f32 %v8524_v57, 0.0 }
 0xbdb   :  { %v10894_v2 = vpop.f32.mrf.mxu0  ;;  %15575 = vst [vmem:[#allocation34_spill] sm:$0xff] %v14061_v62  ;;  %7031 = vperm.xlu1 %11146, %v14061_v62   ;;  %v10911_v19 = vpop.f32.mrf.mxu1 }
 0xbdc   :  { %v14073_v43 = vpop.eup %11389  ;;  %10957 = vmatmul.mubr.msk.bf16.gmra.mxu1 %vm2276_vm4, %v8370_v46  ;;  %v8782_v32 = vmax.f32 %v10911_v19, 0.0  ;;  %v8335_v16 = vmax.f32 %v10894_v2, 0.0  ;;  %11409 = vpow2.f32 %v6869_v39  ;;  %v6783_v2 = vsub.f32 %v13681_v12, %v14035_v22 }
 0xbdd   :  { %v8234_v21 = vpop.f32.mrf.mxu0  ;;  %15576 = vst [vmem:[#allocation35_spill] sm:$0xff] %v14073_v43  ;;  %v8527_v48 = vpop.f32.mrf.mxu1  ;;  %v6877_v22 = vmul.f32 1.442695, %v6792_v27 }
 0xbde   :  { %v14086_v35 = vpop.eup %11391  ;;  %v8333_v33 = vmax.f32 %v8234_v21, 0.0  ;;  %v8780_v46 = vmax.f32 %v8527_v48, 0.0  ;;  %v14099_v21 = vrot.slane %v14048_v40, %v14028_v47  ;;  %v14113_v48 = vrot.slane %v14048_v40, %v13993_v41 }
 0xbdf   :  { %v10895_v38 = vpop.f32.mrf.mxu0  ;;  %7034 = vperm.xlu1 %11146, %v14073_v43   ;;  %15577 = vst [vmem:[#allocation36_spill] sm:$0xff] %v14086_v35  ;;  %v14088_v26 = vpop.eup %11393  ;;  %v6851_v43 = vmul.f32 1.442695, %v6779_v11  ;;  %v8844_v11 = vpack.c.bf16 %v8782_v32, %v8781_v58  ;;  %v6785_v32 = vsub.f32 %v13690_v37, %v14043_v28 }
 0xbe0   :  { %15578 = vst [vmem:[#allocation37_spill] sm:$0xff] %v14088_v26  ;;  %v8336_v50 = vmax.f32 %v10895_v38, 0.0  ;;  %7055 = vperm.xlu0 %11145, %v14088_v26   ;;  %v8843_v57 = vpack.c.bf16 %v8780_v46, %v8779_v55  ;;  %v14095_v0 = vpop.eup %11395  ;;  %v6794_v12 = vsub.f32 %v13770_v3, %v14099_v21  ;;  %v6796_v3 = vsub.f32 %v13784_v53, %v14113_v48 }
 0xbe1   :  { %v8237_v52 = vpop.f32.mrf.mxu0  ;;  %15579 = vst [vmem:[#allocation38_spill] sm:$0xff] %v14095_v0  ;;  %v14103_v38 = vpop.eup %11397  ;;  %11411 = vpow2.f32 %v6851_v43 }
 0xbe2   :  { %v8334_v49 = vmax.f32 %v8237_v52, 0.0  ;;  %15580 = vst [vmem:[#allocation39_spill] sm:$0xff] %v14103_v38  ;;  %v8372_v20 = vpack.c.bf16 %v8336_v50, %v8335_v16  ;;  %10976 = vmatprep.mubr.msk.bf16.mxu0 %vm2276_vm4, %v8843_v57  ;;  %v14117_v44 = vpop.eup %11399  ;;  %11413 = vpow2.f32 %v6873_v23  ;;  %v14129_v50 = vrot.slane %v14048_v40, %v14005_v45 }
 0xbe3   :  { %7037 = vperm.xlu1 %11146, %v14086_v35   ;;  %10977 = vmatmul.mubr.msk.bf16.vlgmr.msra.gmra.mxu0 %vm2276_vm4, %v8844_v11  ;;  %15581 = vst [vmem:[#allocation40_spill] sm:$0xff] %v14117_v44  ;;  %v14121_v55 = vpop.eup %11401  ;;  %11415 = vpow2.f32 %v6855_v1  ;;  %v6881_v37 = vmul.f32 1.442695, %v6794_v12  ;;  %v6863_v23 = vmul.f32 1.442695, %v6785_v32  ;;  %v14139_v11 = vrot.slane %v14048_v40, %v14016_v10  ;;  %v15603_v35 = vld [vmem:[#allocation28_spill] sm:$0xff] }
 0xbe4   :  { %v8371_v19 = vpack.c.bf16 %v8334_v49, %v8333_v33  ;;  %7061 = vperm.xlu0 %11145, %v14103_v38   ;;  %15582 = vst [vmem:[#allocation41_spill] sm:$0xff] %v14121_v55  ;;  %v6859_v33 = vmul.f32 1.442695, %v6783_v2  ;;  %v14133_v58 = vpop.eup %11403  ;;  %11417 = vpow2.f32 %v6877_v22  ;;  %v6540_v62 = vrot.slane %v15603_v35, %v13694_v29 }
 0xbe5   :  { %15583 = vst [vmem:[#allocation42_spill] sm:$0xff] %v14133_v58 }
 0xbe6   :  { %10960 = vmatprep.mubr.msk.bf16.mxu1 %vm2276_vm4, %v8371_v19  ;;  %v14135_v19 = vpop.eup %11405  ;;  %11419 = vpow2.f32 %v6859_v33 }
 0xbe7   :  { %v10914_v8 = vpop.f32.mrf.mxu1  ;;  %7040 = vperm.xlu1 %11146, %v14095_v0   ;;  %10961 = vmatmul.mubr.msk.bf16.gmra.mxu1 %vm2276_vm4, %v8372_v20  ;;  %15584 = vst [vmem:[#allocation43_spill] sm:$0xff] %v14135_v19  ;;  %v14143_v1 = vpop.eup %11407  ;;  %11421 = vpow2.f32 %v6881_v37 }
 0xbe8   :  { %7067 = vperm.xlu0 %11145, %v14121_v55   ;;  %v8785_v27 = vmax.f32 %v10914_v8, 0.0  ;;  %15585 = vst [vmem:[#allocation44_spill] sm:$0xff] %v14143_v1  ;;  %v6798_v8 = vsub.f32 %v13795_v56, %v14129_v50  ;;  %11423 = vpow2.f32 %v6863_v23  ;;  %v14158_v56 = vrot.slane %v14048_v40, %v14031_v60 }
 0xbe9   :  { %v8540_v52 = vpop.f32.mrf.mxu1 }
 0xbea   :  { %v8783_v28 = vmax.f32 %v8540_v52, 0.0  ;;  %v6802_v40 = vsub.f32 %v13845_v14, %v14158_v56 }
 0xbeb   :  { %v10898_v39 = vpop.f32.mrf.mxu0  ;;  %v10915_v43 = vpop.f32.mrf.mxu1  ;;  %7043 = vperm.xlu1 %11146, %v14117_v44  }
 0xbec   :  { %v8786_v49 = vmax.f32 %v10915_v43, 0.0  ;;  %7073 = vperm.xlu0 %11145, %v14135_v19   ;;  %v6885_v43 = vmul.f32 1.442695, %v6796_v3  ;;  %v8339_v32 = vmax.f32 %v10898_v39, 0.0  ;;  %v6800_v39 = vsub.f32 %v13814_v5, %v14139_v11 }
 0xbed   :  { %v8250_v46 = vpop.f32.mrf.mxu0  ;;  %v8543_v17 = vpop.f32.mrf.mxu1  ;;  %v6889_v3 = vmul.f32 1.442695, %v6798_v8 }
 0xbee   :  { %v8784_v16 = vmax.f32 %v8543_v17, 0.0  ;;  %v8846_v52 = vpack.c.bf16 %v8786_v49, %v8785_v27  ;;  %v8337_v12 = vmax.f32 %v8250_v46, 0.0  ;;  %v14148_v17 = vpop.eup %11409  ;;  %11425 = vpow2.f32 %v6885_v43 }
 0xbef   :  { %v10899_v57 = vpop.f32.mrf.mxu0  ;;  %7046 = vperm.xlu1 %11146, %v14133_v58   ;;  %15586 = vst [vmem:[#allocation45_spill] sm:$0xff] %v14148_v17  ;;  %v14154_v46 = vpop.eup %11411  ;;  %11427 = vpow2.f32 %v6889_v3 }
 0xbf0   :  { %v8845_v53 = vpack.c.bf16 %v8784_v16, %v8783_v28  ;;  %v8340_v20 = vmax.f32 %v10899_v57, 0.0  ;;  %7079 = vperm.xlu0 %11145, %v14148_v17   ;;  %15587 = vst [vmem:[#allocation46_spill] sm:$0xff] %v14154_v46  ;;  %v14163_v49 = vpop.eup %11413  ;;  %v6893_v57 = vmul.f32 1.442695, %v6800_v39 }
 0xbf1   :  { %v8253_v2 = vpop.f32.mrf.mxu0  ;;  %15588 = vst [vmem:[#allocation47_spill] sm:$0xff] %v14163_v49  ;;  %v14167_v16 = vpop.eup %11415 }
 0xbf2   :  { %v8338_v22 = vmax.f32 %v8253_v2, 0.0  ;;  %10980 = vmatprep.mubr.msk.bf16.mxu0 %vm2276_vm4, %v8845_v53  ;;  %v8374_v33 = vpack.c.bf16 %v8340_v20, %v8339_v32  ;;  %15589 = vst [vmem:[#allocation48_spill] sm:$0xff] %v14167_v16  ;;  %11429 = vpow2.f32 %v6893_v57 }
 0xbf3   :  { %10981 = vmatmul.mubr.msk.bf16.gmra.mxu0 %vm2276_vm4, %v8846_v52  ;;  %7049 = vperm.xlu1 %11146, %v14143_v1   ;;  %v6897_v52 = vmul.f32 1.442695, %v6802_v40 }
 0xbf4   :  { %v8373_v19 = vpack.c.bf16 %v8338_v22, %v8337_v12  ;;  %7085 = vperm.xlu0 %11145, %v14163_v49  }
 0xbf5   :  { %11431 = vpow2.f32 %v6897_v52 }
 0xbf6   :  { %10964 = vmatprep.mubr.msk.bf16.mxu1 %vm2276_vm4, %v8373_v19  ;;  %v14171_v19 = vpop.eup %11417 }
 0xbf7   :  { %10965 = vmatmul.mubr.msk.bf16.gmra.mxu1 %vm2276_vm4, %v8374_v33  ;;  %v10918_v37 = vpop.f32.mrf.mxu1  ;;  %7052 = vperm.xlu1 %11146, %v14154_v46   ;;  %15590 = vst [vmem:[#allocation49_spill] sm:$0xff] %v14171_v19  ;;  %v14175_v2 = vpop.eup %11419  ;;  %v15599_v46 = vld [vmem:[#allocation31_spill] sm:$0xff] }
 0xbf8   :  { %7091 = vperm.xlu0 %11145, %v14171_v19   ;;  %15591 = vst [vmem:[#allocation50_spill] sm:$0xff] %v14175_v2  ;;  %v14177_v8 = vpop.eup %11421  ;;  %v8789_v43 = vmax.f32 %v10918_v37, 0.0  ;;  %v6544_v1 = vrot.slane %v15599_v46, %v13699_v54  ;;  %v15605_v19 = vld [vmem:[#allocation18_spill] sm:$0xff] }
 0xbf9   :  { %v8556_v28 = vpop.f32.mrf.mxu1  ;;  %15592 = vst [vmem:[#allocation51_spill] sm:$0xff] %v14177_v8  ;;  %v14181_v38 = vpop.eup %11423 }
 0xbfa   :  { %v8787_v12 = vmax.f32 %v8556_v28, 0.0  ;;  %15593 = vst [vmem:[#allocation52_spill] sm:$0xff] %v14181_v38 }
 0xbfb   :  { %v10902_v5 = vpop.f32.mrf.mxu0  ;;  %v10919_v27 = vpop.f32.mrf.mxu1  ;;  %7058 = vperm.xlu1 %11146, %v14167_v16   ;;  %v15598_v16 = vld [vmem:[#allocation30_spill] sm:$0xff] }
 0xbfc   :  { %v8790_v53 = vmax.f32 %v10919_v27, 0.0  ;;  %7097 = vperm.xlu0 %11145, %v14177_v8   ;;  %v8343_v40 = vmax.f32 %v10902_v5, 0.0  ;;  %v14184_v28 = vpop.eup %11425  ;;  %v6535_v26 = vrot.slane %v15598_v16, %v13699_v54 }
 0xbfd   :  { %v8266_v23 = vpop.f32.mrf.mxu0  ;;  %v8559_v20 = vpop.f32.mrf.mxu1  ;;  %15594 = vst [vmem:[#allocation53_spill] sm:$0xff] %v14184_v28 }
 0xbfe   :  { %v8788_v22 = vmax.f32 %v8559_v20, 0.0  ;;  %v8848_v3 = vpack.c.bf16 %v8790_v53, %v8789_v43  ;;  %v8341_v27 = vmax.f32 %v8266_v23, 0.0  ;;  %v14191_v53 = vpop.eup %11427 }
 0xbff   :  { %v10903_v14 = vpop.f32.mrf.mxu0  ;;  %7064 = vperm.xlu1 %11146, %v14175_v2   ;;  %15595 = vst [vmem:[#allocation54_spill] sm:$0xff] %v14191_v53  ;;  %v14194_v52 = vpop.eup %11429 }
 0xc00   :  { %v8847_v32 = vpack.c.bf16 %v8788_v22, %v8787_v12  ;;  %v8344_v33 = vmax.f32 %v10903_v14, 0.0  ;;  %7103 = vperm.xlu0 %11145, %v14184_v28   ;;  %15596 = vst [vmem:[#allocation55_spill] sm:$0xff] %v14194_v52  ;;  %v6545_v28 = vsel %vm6274_vm14, %v6544_v1, %v6540_v62 }
 0xc01   :  { %v8269_v39 = vpop.f32.mrf.mxu0 }
 0xc02   :  { %v8342_v55 = vmax.f32 %v8269_v39, 0.0  ;;  %10984 = vmatprep.mubr.msk.bf16.mxu0 %vm2276_vm4, %v8847_v32  ;;  %v8376_v37 = vpack.c.bf16 %v8344_v33, %v8343_v40  ;;  %v14197_v32 = vpop.eup %11431  ;;  %v6495_v40 = vrot.slane %v13960_v34, %v13694_v29 }
 0xc03   :  { %10985 = vmatmul.mubr.msk.bf16.gmra.mxu0 %vm2276_vm4, %v8848_v3  ;;  %7070 = vperm.xlu1 %11146, %v14181_v38   ;;  %15597 = vst [vmem:[#allocation56_spill] sm:$0xff] %v14197_v32  ;;  %v6499_v3 = vrot.slane %v13974_v13, %v13699_v54  ;;  %v6526_v38 = vrot.slane %v13997_v61, %v13699_v54 }
 0xc04   :  { %v8375_v57 = vpack.c.bf16 %v8342_v55, %v8341_v27  ;;  %7109 = vperm.xlu0 %11145, %v14191_v53   ;;  %v6508_v27 = vrot.slane %v13978_v59, %v13699_v54 }
 0xc06   :  { %10968 = vmatprep.mubr.msk.bf16.mxu1 %vm2276_vm4, %v8375_v57  ;;  %v6490_v57 = vrot.slane %v13970_v36, %v13699_v54 }
 0xc07   :  { %v10922_v23 = vpop.f32.mrf.mxu1  ;;  %10969 = vmatmul.mubr.msk.bf16.gmra.mxu1 %vm2276_vm4, %v8376_v37 }
 0xc08   :  { %7115 = vperm.xlu0 %11145, %v14194_v52   ;;  %v8793_v43 = vmax.f32 %v10922_v23, 0.0  ;;  %v6504_v23 = vrot.slane %v13962_v63, %v13694_v29 }
 0xc09   :  { %v8572_v5 = vpop.f32.mrf.mxu1 }
 0xc0a   :  { %v8791_v22 = vmax.f32 %v8572_v5, 0.0 }
 0xc0b   :  { %v10923_v20 = vpop.f32.mrf.mxu1 }
 0xc0c   :  { %v8794_v55 = vmax.f32 %v10923_v20, 0.0  ;;  %7121 = vperm.xlu0 %11145, %v14197_v32  }
 0xc0d   :  { %v8575_v12 = vpop.f32.mrf.mxu1 }
 0xc0e   :  { %v8792_v14 = vmax.f32 %v8575_v12, 0.0  ;;  %v8850_v39 = vpack.c.bf16 %v8794_v55, %v8793_v43  ;;  %v6486_v55 = vrot.slane %v13956_v30, %v13694_v29  ;;  %v6500_v12 = vsel %vm6274_vm14, %v6499_v3, %v6495_v40 }
 0xc0f   :  { %v6513_v3 = vrot.slane %v13964_v31, %v13694_v29 }
 0xc10   :  { %v8849_v33 = vpack.c.bf16 %v8792_v14, %v8791_v22  ;;  %v6509_v22 = vsel %vm6274_vm14, %v6508_v27, %v6504_v23  ;;  %v6517_v14 = vrot.slane %v13988_v51, %v13699_v54 }
 0xc12   :  { %10988 = vmatprep.mubr.msk.bf16.mxu0 %vm2276_vm4, %v8849_v33 }
 0xc13   :  { %10989 = vmatmul.mubr.msk.bf16.gmra.mxu0 %vm2276_vm4, %v8850_v39  ;;  %v6491_v39 = vsel %vm6274_vm14, %v6490_v57, %v6486_v55  ;;  %v6518_v55 = vsel %vm6274_vm14, %v6517_v14, %v6513_v3  ;;  %v15602_v3 = vld [vmem:[#allocation27_spill] sm:$0xff] }
 0xc14   :  { %v14210_v37 = vpop.xlane.xlu0 %6602  ;;  %v6583_v27 = vsel %vm6555_vm15, %v6500_v12, %v6491_v39 }
 0xc15   :  { %v14216_v5 = vrot.slane %v14210_v37, %v13983_v9  ;;  %v14220_v20 = vrot.slane %v14210_v37, %v13986_v24  ;;  %v14235_v2 = vrot.slane %v14210_v37, %v14002_v25  ;;  %v6584_v57 = vsel %vm6557_vm0, %v6509_v22, %v6583_v27  ;;  %v15601_v22 = vld [vmem:[#allocation13_spill] sm:$0xff] }
 0xc16   :  { %v14255_v0 = vrot.slane %v14210_v37, %v14028_v47  ;;  %v6531_v27 = vrot.slane %v15602_v3, %v13694_v29  ;;  %v14271_v8 = vrot.slane %v14210_v37, %v13993_v41 }
 0xc17   :  { %v6803_v43 = vsub.f32 %v13865_v7, %v14216_v5  ;;  %v10926_v33 = vpop.f32.mrf.mxu1  ;;  %v6805_v40 = vsub.f32 %v13870_v4, %v14220_v20  ;;  %v6522_v7 = vrot.slane %v13966_v6, %v13694_v29  ;;  %v15600_v4 = vld [vmem:[#allocation32_spill] sm:$0xff]  ;;  %v6807_v14 = vsub.f32 %v15601_v22, %v14235_v2 }
 0xc18   :  { %v6553_v39 = vrot.slane %v15600_v4, %v13699_v54  ;;  %v6536_v53 = vsel %vm6274_vm14, %v6535_v26, %v6531_v27  ;;  %v8797_v27 = vmax.f32 %v10926_v33, 0.0  ;;  %v14294_v33 = vrot.slane %v14210_v37, %v14016_v10 }
 0xc19   :  { %v8588_v23 = vpop.f32.mrf.mxu1  ;;  %v6899_v58 = vmul.f32 1.442695, %v6803_v43  ;;  %v6527_v12 = vsel %vm6274_vm14, %v6526_v38, %v6522_v7  ;;  %v6903_v43 = vmul.f32 1.442695, %v6805_v40  ;;  %v6585_v38 = vsel %vm6559_vm2, %v6518_v55, %v6584_v57  ;;  %v15604_v7 = vld [vmem:[#allocation29_spill] sm:$0xff] }
 0xc1a   :  { %v6549_v32 = vrot.slane %v15604_v7, %v13694_v29  ;;  %v6586_v22 = vsel %vm6561_vm5, %v6527_v12, %v6585_v38  ;;  %v6907_v40 = vmul.f32 1.442695, %v6807_v14  ;;  %v8795_v55 = vmax.f32 %v8588_v23, 0.0  ;;  %v15606_v12 = vld [vmem:[#allocation22_spill] sm:$0xff]  ;;  %v15609_v23 = vld [vmem:[#allocation19_spill] sm:$0xff] }
 0xc1b   :  { %v10927_v44 = vpop.f32.mrf.mxu1  ;;  %11433 = vpow2.f32 %v6899_v58  ;;  %v6809_v58 = vsub.f32 %v15605_v19, %v14255_v0  ;;  %v6587_v26 = vsel %vm6563_vm6, %v6536_v53, %v6586_v22  ;;  %v6787_v38 = vsub.f32 %v15606_v12, %v14059_v18 }
 0xc1c   :  { %v6554_v57 = vsel %vm6274_vm14, %v6553_v39, %v6549_v32  ;;  %11435 = vpow2.f32 %v6903_v43  ;;  %v8798_v49 = vmax.f32 %v10927_v44, 0.0  ;;  %v6588_v62 = vsel %vm6565_vm7, %v6545_v28, %v6587_v26  ;;  %v15607_v32 = vld [vmem:[#allocation17_spill] sm:$0xff] }
 0xc1d   :  { %v8591_v52 = vpop.f32.mrf.mxu1  ;;  %v6589_v7 = vsel %vm6567_vm9, %v6554_v57, %v6588_v62  ;;  %v14283_v19 = vrot.slane %v14210_v37, %v14005_v45  ;;  %v6811_v44 = vsub.f32 %v15607_v32, %v14271_v8  ;;  %11437 = vpow2.f32 %v6907_v40  ;;  %v15608_v28 = vld [vmem:[#allocation21_spill] sm:$0xff]  ;;  %v15612_v57 = vld [vmem:[#allocation23_spill] sm:$0xff] }
 0xc1e   :  { %v8796_v17 = vmax.f32 %v8591_v52, 0.0  ;;  %v8852_v4 = vpack.c.bf16 %v8798_v49, %v8797_v27  ;;  %v6911_v52 = vmul.f32 1.442695, %v6809_v58  ;;  %v6789_v18 = vsub.f32 %v15608_v28, %v14069_v15  ;;  %v15611_v15 = vld [vmem:[#allocation6_spill] sm:$0xff]  ;;  %v15614_v32 = vld [vmem:[#allocation5_spill] sm:$0xff] }
 0xc1f   :  { %v6867_v53 = vmul.f32 1.442695, %v6787_v38  ;;  %v6604_v49 = vsel %vm6594_vm12, %v6589_v7, -inf  ;;  %v6813_v39 = vsub.f32 %v15609_v23, %v14283_v19  ;;  %v6915_v14 = vmul.f32 1.442695, %v6811_v44  ;;  %v15615_v28 = vld [vmem:[#allocation26_spill] sm:$0xff] }
 0xc20   :  { %v8851_v1 = vpack.c.bf16 %v8796_v17, %v8795_v55  ;;  %11439 = vpow2.f32 %v6911_v52  ;;  %v6791_v58 = vsub.f32 %v15611_v15, %v14082_v42  ;;  %v6871_v7 = vmul.f32 1.442695, %v6789_v18  ;;  %v15619_v15 = vld [vmem:[#allocation10_spill] sm:$0xff] }
 0xc21   :  { %11441 = vpow2.f32 %v6867_v53  ;;  %v14305_v40 = vrot.slane %v14210_v37, %v14031_v60  ;;  %v6816_v55 = vsub.f32 %v15612_v57, %v14294_v33  ;;  %v6919_v26 = vmul.f32 1.442695, %v6813_v39 }
 0xc22   :  { %10992 = vmatprep.mubr.msk.bf16.mxu0 %vm2276_vm4, %v8851_v1  ;;  %11443 = vpow2.f32 %v6915_v14  ;;  %v6793_v44 = vsub.f32 %v15614_v32, %v14099_v21  ;;  %v6875_v37 = vmul.f32 1.442695, %v6791_v58  ;;  %v6797_v58 = vsub.f32 %v15619_v15, %v14129_v50  ;;  %v15621_v50 = vld [vmem:[#allocation7_spill] sm:$0xff] }
 0xc23   :  { %10993 = vmatmul.mubr.msk.bf16.gmra.mxu0 %vm2276_vm4, %v8852_v4  ;;  %11445 = vpow2.f32 %v6871_v7  ;;  %v6818_v18 = vsub.f32 %v15615_v28, %v14305_v40  ;;  %v6925_v53 = vmul.f32 1.442695, %v6816_v55 }
 0xc24   :  { %11447 = vpow2.f32 %v6919_v26  ;;  %v6879_v39 = vmul.f32 1.442695, %v6793_v44  ;;  %v11384_v44 = vld [vmem:[%s15406_s6] sm:$0xff]  }
 0xc25   :  { %11449 = vpow2.f32 %v6875_v37  ;;  %v6929_v14 = vmul.f32 1.442695, %v6818_v18  ;;  %v15623_v18 = vld [vmem:[#allocation9_spill] sm:$0xff] }
 0xc26   :  { %11451 = vpow2.f32 %v6925_v53  ;;  %v6801_v53 = vsub.f32 %v15623_v18, %v14158_v56  ;;  %v15625_v56 = vld [vmem:[#allocation12_spill] sm:$0xff] }
 0xc27   :  { %v10930_v17 = vpop.f32.mrf.mxu1  ;;  %6605 = vmax.xlane.f32.xlu1 %v6604_v49  ;;  %11453 = vpow2.f32 %v6879_v39  ;;  %v6804_v15 = vsub.f32 %v15625_v56, %v14216_v5 }
 0xc28   :  { %v14298_v22 = vpop.eup %11433  ;;  %v8801_v42 = vmax.f32 %v10930_v17, 0.0  ;;  %v15617_v17 = vld [vmem:[#allocation8_spill] sm:$0xff]  ;;  %11455 = vpow2.f32 %v6929_v14 }
 0xc29   :  { %v8604_v43 = vpop.f32.mrf.mxu1  ;;  %15610 = vst [vmem:[#allocation30_spill] sm:$0xff] %v14298_v22  ;;  %7124 = vperm.xlu0 %11145, %v14298_v22   ;;  %v14309_v1 = vpop.eup %11435  ;;  %v6795_v21 = vsub.f32 %v15617_v17, %v14113_v48  ;;  %v11383_v48 = vld [vmem:[%s15406_s6 + $0x8] sm:$0xff]  }
 0xc2a   :  { %15613 = vst [vmem:[#allocation31_spill] sm:$0xff] %v14309_v1  ;;  %v8799_v12 = vmax.f32 %v8604_v43, 0.0  ;;  %v14316_v23 = vpop.eup %11437  ;;  %11040 = vmatprep.subr.bf16.mxu1 %v11383_v48 }
 0xc2b   :  { %v10931_v4 = vpop.f32.mrf.mxu1  ;;  %15616 = vst [vmem:[#allocation13_spill] sm:$0xff] %v14316_v23  ;;  %v6883_v7 = vmul.f32 1.442695, %v6795_v21  ;;  %11041 = vmatpush3.bf16.msra.mxu1 %v11383_v48  ;;  %v15628_v48 = vld [vmem:[#allocation14_spill] sm:$0xff] }
 0xc2c   :  { %v8802_v27 = vmax.f32 %v10931_v4, 0.0  ;;  %11042 = vmatprep.subr.bf16.mxu1 %v11384_v44 }
 0xc2d   :  { %v8607_v62 = vpop.f32.mrf.mxu1  ;;  %7130 = vperm.xlu0 %11145, %v14309_v1   ;;  %v14323_v43 = vpop.eup %11439  ;;  %11457 = vpow2.f32 %v6883_v7 }
 0xc2e   :  { %v8800_v38 = vmax.f32 %v8607_v62, 0.0  ;;  %v8854_v49 = vpack.c.bf16 %v8802_v27, %v8801_v42  ;;  %15618 = vst [vmem:[#allocation27_spill] sm:$0xff] %v14323_v43  ;;  %v14328_v57 = vpop.eup %11441  ;;  %v6799_v62 = vsub.f32 %v15621_v50, %v14139_v11  ;;  %v6901_v50 = vmul.f32 1.442695, %v6804_v15  ;;  %v15634_v15 = vld [vmem:[#allocation15_spill] sm:$0xff] }
 0xc2f   :  { %v14333_v26 = vpop.eup %11443  ;;  %11043 = vmatpush3.bf16.msra.mxu1 %v11384_v44 }
 0xc30   :  { %v8853_v52 = vpack.c.bf16 %v8800_v38, %v8799_v12  ;;  %15620 = vst [vmem:[#allocation28_spill] sm:$0xff] %v14333_v26  ;;  %v6887_v12 = vmul.f32 1.442695, %v6797_v58  ;;  %v14339_v38 = vpop.eup %11445 }
 0xc31   :  { %7136 = vperm.xlu0 %11145, %v14316_v23   ;;  %v14344_v37 = vpop.eup %11447 }
 0xc32   :  { %10996 = vmatprep.mubr.msk.bf16.mxu0 %vm2276_vm4, %v8853_v52  ;;  %15622 = vst [vmem:[#allocation18_spill] sm:$0xff] %v14344_v37  ;;  %11459 = vpow2.f32 %v6887_v12  ;;  %v14350_v21 = vpop.eup %11449 }
 0xc33   :  { %10997 = vmatmul.mubr.msk.bf16.gmra.mxu0 %vm2276_vm4, %v8854_v49  ;;  %v6891_v49 = vmul.f32 1.442695, %v6799_v62  ;;  %v14352_v14 = vpop.eup %11451 }
 0xc34   :  { %15624 = vst [vmem:[#allocation22_spill] sm:$0xff] %v14352_v14  ;;  %v14360_v58 = vpop.eup %11453 }
 0xc35   :  { %7142 = vperm.xlu0 %11145, %v14323_v43   ;;  %11461 = vpow2.f32 %v6891_v49  ;;  %15626 = vst [vmem:[#allocation17_spill] sm:$0xff] %v14360_v58  ;;  %v14362_v7 = vpop.eup %11455  ;;  %v15632_v49 = vld [vmem:[#allocation16_spill] sm:$0xff] }
 0xc36   :  { %15627 = vst [vmem:[#allocation21_spill] sm:$0xff] %v14362_v7 }
 0xc37   :  { %v10934_v4 = vpop.f32.mrf.mxu1 }
 0xc38   :  { %7076 = vperm.xlu1 %11146, %v14328_v57   ;;  %v8805_v11 = vmax.f32 %v10934_v4, 0.0  ;;  %v6895_v4 = vmul.f32 1.442695, %v6801_v53 }
 0xc39   :  { %v8620_v55 = vpop.f32.mrf.mxu1  ;;  %7148 = vperm.xlu0 %11145, %v14333_v26  }
 0xc3a   :  { %v8803_v52 = vmax.f32 %v8620_v55, 0.0  ;;  %11463 = vpow2.f32 %v6895_v4  ;;  %v14368_v62 = vpop.eup %11457 }
 0xc3b   :  { %v10935_v27 = vpop.f32.mrf.mxu1  ;;  %15629 = vst [vmem:[#allocation19_spill] sm:$0xff] %v14368_v62  ;;  %11465 = vpow2.f32 %v6901_v50 }
 0xc3c   :  { %v8806_v42 = vmax.f32 %v10935_v27, 0.0  ;;  %7082 = vperm.xlu1 %11146, %v14339_v38   ;;  %v6806_v27 = vsub.f32 %v15628_v48, %v14220_v20  ;;  %v6812_v48 = vsub.f32 %v15634_v15, %v14271_v8 }
 0xc3d   :  { %v8623_v32 = vpop.f32.mrf.mxu1  ;;  %7154 = vperm.xlu0 %11145, %v14344_v37  }
 0xc3e   :  { %v8804_v28 = vmax.f32 %v8623_v32, 0.0  ;;  %v8856_v39 = vpack.c.bf16 %v8806_v42, %v8805_v11  ;;  %v15630_v42 = vld [vmem:[#allocation11_spill] sm:$0xff]  ;;  %v6905_v44 = vmul.f32 1.442695, %v6806_v27 }
 0xc3f   :  { %v6808_v32 = vsub.f32 %v15630_v42, %v14235_v2  ;;  %v6917_v42 = vmul.f32 1.442695, %v6812_v48 }
 0xc40   :  { %v8855_v17 = vpack.c.bf16 %v8804_v28, %v8803_v52  ;;  %7088 = vperm.xlu1 %11146, %v14350_v21   ;;  %v14373_v52 = vpop.eup %11459  ;;  %11467 = vpow2.f32 %v6905_v44 }
 0xc41   :  { %7163 = vperm.xlu0 %11145, %v14352_v14   ;;  %15631 = vst [vmem:[#allocation6_spill] sm:$0xff] %v14373_v52 }
 0xc42   :  { %11000 = vmatprep.mubr.msk.bf16.mxu0 %vm2276_vm4, %v8855_v17  ;;  %v6810_v17 = vsub.f32 %v15632_v49, %v14255_v0  ;;  %v14378_v56 = vpop.eup %11461 }
 0xc43   :  { %11001 = vmatmul.mubr.msk.bf16.gmra.mxu0 %vm2276_vm4, %v8856_v39  ;;  %v6909_v39 = vmul.f32 1.442695, %v6808_v32  ;;  %15633 = vst [vmem:[#allocation23_spill] sm:$0xff] %v14378_v56 }
 0xc44   :  { %7094 = vperm.xlu1 %11146, %v14360_v58  }
 0xc45   :  { %7169 = vperm.xlu0 %11145, %v14362_v7   ;;  %11469 = vpow2.f32 %v6909_v39 }
 0xc47   :  { %v10938_v55 = vpop.f32.mrf.mxu1  ;;  %v14385_v27 = vpop.eup %11463 }
 0xc48   :  { %7100 = vperm.xlu1 %11146, %v14368_v62   ;;  %v8809_v53 = vmax.f32 %v10938_v55, 0.0  ;;  %v6913_v55 = vmul.f32 1.442695, %v6810_v17  ;;  %15635 = vst [vmem:[#allocation5_spill] sm:$0xff] %v14385_v27 }
 0xc49   :  { %v8636_v12 = vpop.f32.mrf.mxu1 }
 0xc4a   :  { %v8807_v18 = vmax.f32 %v8636_v12, 0.0  ;;  %v15636_v12 = vld [vmem:[#allocation20_spill] sm:$0xff]  ;;  %11471 = vpow2.f32 %v6913_v55 }
 0xc4b   :  { %v10939_v5 = vpop.f32.mrf.mxu1  ;;  %11473 = vpow2.f32 %v6917_v42 }
 0xc4c   :  { %v8810_v28 = vmax.f32 %v10939_v5, 0.0  ;;  %7106 = vperm.xlu1 %11146, %v14373_v52   ;;  %v6814_v5 = vsub.f32 %v15636_v12, %v14283_v19 }
 0xc4d   :  { %v8639_v11 = vpop.f32.mrf.mxu1 }
 0xc4e   :  { %v8808_v20 = vmax.f32 %v8639_v11, 0.0  ;;  %v8858_v2 = vpack.c.bf16 %v8810_v28, %v8809_v53  ;;  %v14391_v28 = vpop.eup %11465  ;;  %v15638_v53 = vld [vmem:[#allocation24_spill] sm:$0xff]  ;;  %v6921_v19 = vmul.f32 1.442695, %v6814_v5 }
 0xc4f   :  { %15637 = vst [vmem:[#allocation26_spill] sm:$0xff] %v14391_v28  ;;  %v6815_v49 = vsub.f32 %v15638_v53, %v14294_v33  ;;  %v14398_v39 = vpop.eup %11467 }
 0xc50   :  { %v8857_v4 = vpack.c.bf16 %v8808_v20, %v8807_v18  ;;  %7112 = vperm.xlu1 %11146, %v14378_v56   ;;  %15639 = vst [vmem:[#allocation8_spill] sm:$0xff] %v14398_v39  ;;  %11475 = vpow2.f32 %v6921_v19 }
 0xc52   :  { %11004 = vmatprep.mubr.msk.bf16.mxu0 %vm2276_vm4, %v8857_v4  ;;  %v14403_v33 = vpop.eup %11469 }
 0xc53   :  { %11005 = vmatmul.mubr.msk.bf16.gmra.mxu0 %vm2276_vm4, %v8858_v2  ;;  %15641 = vst [vmem:[#allocation10_spill] sm:$0xff] %v14403_v33 }
 0xc54   :  { %7118 = vperm.xlu1 %11146, %v14385_v27  }
 0xc55   :  { %v7029_v0 = vpop.permute.xlu0 %7028 }
 0xc56   :  { %v7032_v32 = vpop.permute.xlu1 %7031  ;;  %v7222_v44 = vrot.slane %v7029_v0, %v13694_v29  ;;  %v15640_v0 = vld [vmem:[#allocation25_spill] sm:$0xff] }
 0xc57   :  { %v10942_v50 = vpop.f32.mrf.mxu1  ;;  %v7226_v8 = vrot.slane %v7032_v32, %v13699_v54  ;;  %v6817_v12 = vsub.f32 %v15640_v0, %v14305_v40  ;;  %v6923_v32 = vmul.f32 1.442695, %v6815_v49  ;;  %v14412_v49 = vpop.eup %11471 }
 0xc58   :  { %7127 = vperm.xlu1 %11146, %v14391_v28   ;;  %v8813_v55 = vmax.f32 %v10942_v50, 0.0  ;;  %15642 = vst [vmem:[#allocation7_spill] sm:$0xff] %v14412_v49 }
 0xc59   :  { %v8652_v11 = vpop.f32.mrf.mxu1  ;;  %v7227_v18 = vsel %vm6274_vm14, %v7226_v8, %v7222_v44  ;;  %11477 = vpow2.f32 %v6923_v32  ;;  %v6927_v40 = vmul.f32 1.442695, %v6817_v12 }
 0xc5a   :  { %v7035_v17 = vpop.permute.xlu1 %7034  ;;  %v8811_v15 = vmax.f32 %v8652_v11, 0.0 }
 0xc5b   :  { %v10943_v20 = vpop.f32.mrf.mxu1  ;;  %v7231_v5 = vrot.slane %v7035_v17, %v13694_v29  ;;  %11479 = vpow2.f32 %v6927_v40  ;;  %v7056_v0 = vpop.permute.xlu0 %7055 }
 0xc5c   :  { %v8814_v4 = vmax.f32 %v10943_v20, 0.0  ;;  %7133 = vperm.xlu1 %11146, %v14398_v39  }
 0xc5d   :  { %v8655_v2 = vpop.f32.mrf.mxu1 }
 0xc5e   :  { %v8812_v48 = vmax.f32 %v8655_v2, 0.0  ;;  %v7038_v44 = vpop.permute.xlu1 %7037  ;;  %v8860_v20 = vpack.c.bf16 %v8814_v4, %v8813_v55  ;;  %v14415_v4 = vpop.eup %11473 }
 0xc5f   :  { %v7235_v42 = vrot.slane %v7038_v44, %v13699_v54  ;;  %15643 = vst [vmem:[#allocation9_spill] sm:$0xff] %v14415_v4  ;;  %v14422_v44 = vpop.eup %11475 }
 0xc60   :  { %v8859_v8 = vpack.c.bf16 %v8812_v48, %v8811_v15  ;;  %7139 = vperm.xlu1 %11146, %v14403_v33   ;;  %15644 = vst [vmem:[#allocation12_spill] sm:$0xff] %v14422_v44 }
 0xc61   :  { %v7236_v50 = vsel %vm6274_vm14, %v7235_v42, %v7231_v5 }
 0xc62   :  { %11008 = vmatprep.mubr.msk.bf16.mxu0 %vm2276_vm4, %v8859_v8  ;;  %v7507_v11 = vsel %vm6555_vm15, %v7236_v50, %v7227_v18  ;;  %v7041_v53 = vpop.permute.xlu1 %7040 }
 0xc63   :  { %11009 = vmatmul.mubr.msk.bf16.gmra.mxu0 %vm2276_vm4, %v8860_v20  ;;  %v7240_v2 = vrot.slane %v7041_v53, %v13694_v29 }
 0xc64   :  { %7145 = vperm.xlu1 %11146, %v14412_v49  }
 0xc66   :  { %v7044_v17 = vpop.permute.xlu1 %7043 }
 0xc67   :  { %v10946_v19 = vpop.f32.mrf.mxu1  ;;  %v7244_v15 = vrot.slane %v7044_v17, %v13699_v54  ;;  %v14425_v17 = vpop.eup %11477 }
 0xc68   :  { %7151 = vperm.xlu1 %11146, %v14415_v4   ;;  %v8817_v50 = vmax.f32 %v10946_v19, 0.0  ;;  %15645 = vst [vmem:[#allocation14_spill] sm:$0xff] %v14425_v17 }
 0xc69   :  { %v8668_v48 = vpop.f32.mrf.mxu1  ;;  %v7245_v55 = vsel %vm6274_vm14, %v7244_v15, %v7240_v2 }
 0xc6a   :  { %v7508_v12 = vsel %vm6557_vm0, %v7245_v55, %v7507_v11  ;;  %v7047_v32 = vpop.permute.xlu1 %7046  ;;  %v8815_v42 = vmax.f32 %v8668_v48, 0.0  ;;  %v7062_v11 = vpop.permute.xlu0 %7061 }
 0xc6b   :  { %v10947_v18 = vpop.f32.mrf.mxu1  ;;  %v7249_v2 = vrot.slane %v7047_v32, %v13694_v29 }
 0xc6c   :  { %v8818_v8 = vmax.f32 %v10947_v18, 0.0  ;;  %7157 = vperm.xlu1 %11146, %v14422_v44   ;;  %v14434_v18 = vpop.eup %11479 }
 0xc6d   :  { %v8671_v5 = vpop.f32.mrf.mxu1  ;;  %15646 = vst [vmem:[#allocation11_spill] sm:$0xff] %v14434_v18 }
 0xc6e   :  { %v8816_v20 = vmax.f32 %v8671_v5, 0.0  ;;  %v7050_v40 = vpop.permute.xlu1 %7049  ;;  %v8862_v7 = vpack.c.bf16 %v8818_v8, %v8817_v50  ;;  %v7262_v5 = vrot.slane %v7056_v0, %v13699_v54 }
 0xc6f   :  { %v7253_v15 = vrot.slane %v7050_v40, %v13699_v54 }
 0xc70   :  { %v8861_v53 = vpack.c.bf16 %v8816_v20, %v8815_v42  ;;  %7160 = vperm.xlu1 %11146, %v14425_v17   ;;  %v7068_v20 = vpop.permute.xlu0 %7067 }
 0xc71   :  { %v7254_v55 = vsel %vm6274_vm14, %v7253_v15, %v7249_v2 }
 0xc72   :  { %11012 = vmatprep.mubr.msk.bf16.mxu0 %vm2276_vm4, %v8861_v53  ;;  %v7509_v19 = vsel %vm6559_vm2, %v7254_v55, %v7508_v12  ;;  %v7053_v48 = vpop.permute.xlu1 %7052 }
 0xc73   :  { %11013 = vmatmul.mubr.msk.bf16.gmra.mxu0 %vm2276_vm4, %v8862_v7  ;;  %v7258_v32 = vrot.slane %v7053_v48, %v13694_v29  ;;  %v7271_v7 = vrot.slane %v7062_v11, %v13699_v54  ;;  %v7280_v48 = vrot.slane %v7068_v20, %v13699_v54 }
 0xc74   :  { %7166 = vperm.xlu1 %11146, %v14434_v18   ;;  %v7074_v14 = vpop.permute.xlu0 %7073 }
 0xc75   :  { %v7263_v8 = vsel %vm6274_vm14, %v7262_v5, %v7258_v32 }
 0xc76   :  { %v7510_v50 = vsel %vm6561_vm5, %v7263_v8, %v7509_v19  ;;  %v7059_v40 = vpop.permute.xlu1 %7058 }
 0xc77   :  { %v10950_v42 = vpop.f32.mrf.mxu1  ;;  %v7267_v12 = vrot.slane %v7059_v40, %v13694_v29 }
 0xc78   :  { %v8821_v17 = vmax.f32 %v10950_v42, 0.0 }
 0xc79   :  { %v8684_v53 = vpop.f32.mrf.mxu1  ;;  %v7272_v2 = vsel %vm6274_vm14, %v7271_v7, %v7267_v12  ;;  %v7289_v12 = vrot.slane %v7074_v14, %v13699_v54 }
 0xc7a   :  { %v7065_v0 = vpop.permute.xlu1 %7064  ;;  %v7511_v55 = vsel %vm6563_vm6, %v7272_v2, %v7510_v50  ;;  %v8819_v19 = vmax.f32 %v8684_v53, 0.0 }
 0xc7b   :  { %v10951_v15 = vpop.f32.mrf.mxu1  ;;  %v7276_v5 = vrot.slane %v7065_v0, %v13694_v29 }
 0xc7c   :  { %v8822_v32 = vmax.f32 %v10951_v15, 0.0 }
 0xc7d   :  { %v8687_v18 = vpop.f32.mrf.mxu1  ;;  %v7281_v11 = vsel %vm6274_vm14, %v7280_v48, %v7276_v5 }
 0xc7e   :  { %v8820_v8 = vmax.f32 %v8687_v18, 0.0  ;;  %v7071_v40 = vpop.permute.xlu1 %7070  ;;  %v7512_v7 = vsel %vm6565_vm7, %v7281_v11, %v7511_v55  ;;  %v8864_v2 = vpack.c.bf16 %v8822_v32, %v8821_v17  ;;  %v14459_v17 = vpop.permute.xlu0 %7079 }
 0xc7f   :  { %v7285_v50 = vrot.slane %v7071_v40, %v13694_v29 }
 0xc80   :  { %v8863_v44 = vpack.c.bf16 %v8820_v8, %v8819_v19 }
 0xc81   :  { %v7290_v20 = vsel %vm6274_vm14, %v7289_v12, %v7285_v50 }
 0xc82   :  { %11016 = vmatprep.mubr.msk.bf16.mxu0 %vm2276_vm4, %v8863_v44  ;;  %v14455_v18 = vsel %vm6567_vm9, %v7290_v20, %v7512_v7  ;;  %v14461_v12 = vpop.permute.xlu0 %7085 }
 0xc83   :  { %11017 = vmatmul.mubr.msk.bf16.gmra.mxu0 %vm2276_vm4, %v8864_v2 }
 0xc87   :  { %v10954_v53 = vpop.f32.mrf.mxu1 }
 0xc88   :  { %v8825_v14 = vmax.f32 %v10954_v53, 0.0 }
 0xc89   :  { %v8700_v42 = vpop.f32.mrf.mxu1 }
 0xc8a   :  { %v8823_v55 = vmax.f32 %v8700_v42, 0.0 }
 0xc8b   :  { %v10955_v15 = vpop.f32.mrf.mxu1 }
 0xc8c   :  { %v8826_v0 = vmax.f32 %v10955_v15, 0.0 }
 0xc8d   :  { %v8703_v48 = vpop.f32.mrf.mxu1 }
 0xc8e   :  { %v8824_v5 = vmax.f32 %v8703_v48, 0.0  ;;  %v8866_v8 = vpack.c.bf16 %v8826_v0, %v8825_v14 }
 0xc90   :  { %v8865_v19 = vpack.c.bf16 %v8824_v5, %v8823_v55  ;;  %v14465_v5 = vpop.permute.xlu0 %7091 }
 0xc92   :  { %11020 = vmatprep.mubr.msk.bf16.mxu0 %vm2276_vm4, %v8865_v19 }
 0xc93   :  { %11021 = vmatmul.mubr.msk.bf16.gmra.mxu0 %vm2276_vm4, %v8866_v8 }
 0xc9c   :  { %v10958_v44 = vpop.f32.mrf.mxu1 }
 0xc9d   :  { %v8829_v20 = vmax.f32 %v10958_v44, 0.0 }
 0xc9e   :  { %v8716_v32 = vpop.f32.mrf.mxu1 }
 0xc9f   :  { %v8827_v50 = vmax.f32 %v8716_v32, 0.0 }
 0xca0   :  { %v10959_v11 = vpop.f32.mrf.mxu1 }
 0xca1   :  { %v8830_v40 = vmax.f32 %v10959_v11, 0.0 }
 0xca2   :  { %v8719_v7 = vpop.f32.mrf.mxu1 }
 0xca3   :  { %v8828_v2 = vmax.f32 %v8719_v7, 0.0  ;;  %v10978_v53 = vpop.f32.mrf.mxu0  ;;  %v8868_v15 = vpack.c.bf16 %v8830_v40, %v8829_v20  ;;  %v14473_v40 = vpop.permute.xlu0 %7097 }
 0xca5   :  { %v8867_v42 = vpack.c.bf16 %v8828_v2, %v8827_v50  ;;  %v9022_v48 = vpop.f32.mrf.mxu0 }
 0xca6   :  { %v9277_v52 = vmax.f32 %v9022_v48, 0.0 }
 0xca7   :  { %v10962_v0 = vpop.f32.mrf.mxu1  ;;  %11024 = vmatprep.mubr.msk.bf16.mxu0 %vm2276_vm4, %v8867_v42  ;;  %v10979_v14 = vpop.f32.mrf.mxu0 }
 0xca8   :  { %11025 = vmatmul.mubr.msk.bf16.gmra.mxu0 %vm2276_vm4, %v8868_v15  ;;  %v14489_v23 = vpop.permute.xlu0 %7103  ;;  %v8833_v62 = vmax.f32 %v10962_v0, 0.0 }
 0xca9   :  { %v8732_v55 = vpop.f32.mrf.mxu1  ;;  %v9025_v11 = vpop.f32.mrf.mxu0 }
 0xcaa   :  { %v8831_v58 = vmax.f32 %v8732_v55, 0.0 }
 0xcab   :  { %v10963_v19 = vpop.f32.mrf.mxu1 }
 0xcac   :  { %v8834_v22 = vmax.f32 %v10963_v19, 0.0 }
 0xcad   :  { %v8735_v2 = vpop.f32.mrf.mxu1 }
 0xcb0   :  { %v14467_v8 = vpop.xlane.xlu1 %6605 }
 0xcb1   :  { %v6710_v32 = vrot.slane %v14467_v8, %v13983_v9  ;;  %v6714_v44 = vrot.slane %v14467_v8, %v13986_v24  ;;  %v6718_v15 = vrot.slane %v14467_v8, %v14002_v25  ;;  %v6722_v39 = vrot.slane %v14467_v8, %v14028_v47 }
 0xcb2   :  { %v6730_v0 = vrot.slane %v14467_v8, %v14005_v45 }
 0xcb3   :  { %v6819_v7 = vsub.f32 %v13956_v30, %v6710_v32  ;;  %v6820_v50 = vsub.f32 %v13970_v36, %v6710_v32  ;;  %v14477_v20 = vpop.f32.mrf.mxu0  ;;  %v6821_v37 = vsub.f32 %v13960_v34, %v6714_v44  ;;  %v6822_v26 = vsub.f32 %v13974_v13, %v6714_v44 }
 0xcb4   :  { %v14479_v42 = vpop.permute.xlu1 %7076  ;;  %v9278_v36 = vmax.f32 %v9025_v11, 0.0  ;;  %v6823_v1 = vsub.f32 %v13962_v63, %v6718_v15  ;;  %v6824_v28 = vsub.f32 %v13978_v59, %v6718_v15  ;;  %v8832_v44 = vmax.f32 %v8735_v2, 0.0 }
 0xcb5   :  { %v6931_v49 = vmul.f32 1.442695, %v6819_v7  ;;  %v6933_v43 = vmul.f32 1.442695, %v6820_v50  ;;  %v9038_v33 = vpop.f32.mrf.mxu0  ;;  %v6935_v34 = vmul.f32 1.442695, %v6821_v37  ;;  %v6726_v11 = vrot.slane %v14467_v8, %v13993_v41 }
 0xcb6   :  { %v6937_v13 = vmul.f32 1.442695, %v6822_v26  ;;  %v9279_v7 = vmax.f32 %v10978_v53, 0.0  ;;  %v9280_v50 = vmax.f32 %v10979_v14, 0.0  ;;  %v6825_v37 = vsub.f32 %v13964_v31, %v6722_v39  ;;  %v14501_v14 = vpop.permute.xlu0 %7109 }
 0xcb7   :  { %v14484_v4 = vpop.f32.mrf.mxu1  ;;  %11481 = vpow2.f32 %v6931_v49  ;;  %v10983_v27 = vpop.f32.mrf.mxu0  ;;  %v6826_v59 = vsub.f32 %v13988_v51, %v6722_v39  ;;  %v6941_v26 = vmul.f32 1.442695, %v6824_v28  ;;  %v9341_v49 = vpack.c.bf16 %v9278_v36, %v9277_v52 }
 0xcb8   :  { %v14487_v30 = vpop.permute.xlu1 %7082  ;;  %11483 = vpow2.f32 %v6933_v43  ;;  %v6939_v43 = vmul.f32 1.442695, %v6823_v1  ;;  %v8869_v53 = vpack.c.bf16 %v8832_v44, %v8831_v58  ;;  %v9342_v19 = vpack.c.bf16 %v9280_v50, %v9279_v7 }
 0xcb9   :  { %v8748_v32 = vpop.f32.mrf.mxu1  ;;  %11485 = vpow2.f32 %v6935_v34  ;;  %v8870_v2 = vpack.c.bf16 %v8834_v22, %v8833_v62  ;;  %v9041_v15 = vpop.f32.mrf.mxu0  ;;  %v6827_v48 = vsub.f32 %v13966_v6, %v6726_v11  ;;  %11044 = vmatprep.mubr.msk.bf16.mxu1 %vm2276_vm4, %v9341_v49  ;;  %v6828_v51 = vsub.f32 %v13997_v61, %v6726_v11 }
 0xcba   :  { %11487 = vpow2.f32 %v6937_v13  ;;  %11028 = vmatprep.mubr.msk.bf16.mxu0 %vm2276_vm4, %v8869_v53  ;;  %v6943_v1 = vmul.f32 1.442695, %v6825_v37  ;;  %11045 = vmatmul.mubr.msk.bf16.vlgmr.msra.gmra.mxu1 %vm2276_vm4, %v9342_v19  ;;  %v6945_v22 = vmul.f32 1.442695, %v6826_v59  ;;  %v9281_v58 = vmax.f32 %v9038_v33, 0.0 }
 0xcbb   :  { %v10967_v63 = vpop.f32.mrf.mxu1  ;;  %11489 = vpow2.f32 %v6939_v43  ;;  %11029 = vmatmul.mubr.msk.bf16.gmra.mxu0 %vm2276_vm4, %v8870_v2  ;;  %v9282_v62 = vmax.f32 %v9041_v15, 0.0  ;;  %v9284_v52 = vmax.f32 %v10983_v27, 0.0  ;;  %v8835_v28 = vmax.f32 %v8748_v32, 0.0 }
 0xcbc   :  { %v14497_v56 = vpop.permute.xlu1 %7088  ;;  %11491 = vpow2.f32 %v6941_v26  ;;  %v8838_v39 = vmax.f32 %v10967_v63, 0.0  ;;  %v6734_v34 = vrot.slane %v14467_v8, %v14016_v10  ;;  %v6829_v61 = vsub.f32 %v15602_v3, %v6730_v0  ;;  %v14524_v63 = vpop.permute.xlu0 %7115 }
 0xcbd   :  { %v8751_v31 = vpop.f32.mrf.mxu1  ;;  %v6947_v13 = vmul.f32 1.442695, %v6827_v48  ;;  %v9343_v7 = vpack.c.bf16 %v9282_v62, %v9281_v58  ;;  %11493 = vpow2.f32 %v6943_v1  ;;  %v9283_v33 = vmax.f32 %v14477_v20, 0.0 }
 0xcbe   :  { %v8836_v36 = vmax.f32 %v8751_v31, 0.0  ;;  %v8837_v11 = vmax.f32 %v14484_v4, 0.0  ;;  %v6830_v59 = vsub.f32 %v15598_v16, %v6730_v0  ;;  %11495 = vpow2.f32 %v6945_v22 }
 0xcbf   :  { %v6949_v3 = vmul.f32 1.442695, %v6828_v51  ;;  %11048 = vmatprep.mubr.msk.bf16.mxu1 %vm2276_vm4, %v9343_v7  ;;  %v9344_v20 = vpack.c.bf16 %v9284_v52, %v9283_v33  ;;  %v6738_v53 = vrot.slane %v14467_v8, %v14031_v60  ;;  %v6832_v19 = vsub.f32 %v15599_v46, %v6734_v34 }
 0xcc0   :  { %v14506_v55 = vpop.permute.xlu1 %7094  ;;  %v8871_v37 = vpack.c.bf16 %v8836_v36, %v8835_v28  ;;  %v8872_v49 = vpack.c.bf16 %v8838_v39, %v8837_v11  ;;  %11497 = vpow2.f32 %v6947_v13  ;;  %v6951_v15 = vmul.f32 1.442695, %v6829_v61  ;;  %v14546_v28 = vpop.permute.xlu0 %7121  ;;  %v15647_v39 = vld [vmem:[#allocation32_spill] sm:$0xff]  ;;  %v15648_v11 = vld [vmem:[#allocation29_spill] sm:$0xff] }
 0xcc1   :  { %v6831_v8 = vsub.f32 %v15603_v35, %v6734_v34  ;;  %11499 = vpow2.f32 %v6949_v3  ;;  %v6953_v46 = vmul.f32 1.442695, %v6830_v59  ;;  %v6834_v36 = vsub.f32 %v15647_v39, %v6738_v53 }
 0xcc2   :  { %11032 = vmatprep.mubr.msk.bf16.mxu0 %vm2276_vm4, %v8871_v37  ;;  %11049 = vmatmul.mubr.msk.bf16.gmra.mxu1 %vm2276_vm4, %v9344_v20  ;;  %11501 = vpow2.f32 %v6951_v15  ;;  %v6957_v34 = vmul.f32 1.442695, %v6832_v19  ;;  %v6833_v37 = vsub.f32 %v15648_v11, %v6738_v53 }
 0xcc3   :  { %v14513_v6 = vpop.f32.mrf.mxu0  ;;  %11033 = vmatmul.mubr.msk.bf16.gmra.mxu0 %vm2276_vm4, %v8872_v49  ;;  %11503 = vpow2.f32 %v6953_v46  ;;  %v6955_v59 = vmul.f32 1.442695, %v6831_v8 }
 0xcc4   :  { %v14518_v44 = vpop.permute.xlu1 %7100  ;;  %v14522_v32 = vpop.eup %11481  ;;  %v9287_v7 = vmax.f32 %v14513_v6, 0.0  ;;  %11505 = vpow2.f32 %v6957_v34 }
 0xcc5   :  { %v9054_v50 = vpop.f32.mrf.mxu0  ;;  %v14528_v26 = vpop.eup %11483  ;;  %7172 = vperm.xlu0 %11145, %v14522_v32   ;;  %11507 = vpow2.f32 %v6955_v59 }
 0xcc6   :  { %7175 = vperm.xlu1 %11146, %v14528_v26   ;;  %v9285_v0 = vmax.f32 %v9054_v50, 0.0  ;;  %v14540_v51 = vpop.eup %11485 }
 0xcc7   :  { %v10970_v27 = vpop.f32.mrf.mxu1  ;;  %v10987_v43 = vpop.f32.mrf.mxu0 }
 0xcc8   :  { %v14536_v16 = vpop.permute.xlu1 %7106  ;;  %v14543_v1 = vpop.eup %11487  ;;  %v9288_v22 = vmax.f32 %v10987_v43, 0.0  ;;  %v8841_v50 = vmax.f32 %v10970_v27, 0.0  ;;  %v6961_v27 = vmul.f32 1.442695, %v6834_v36 }
 0xcc9   :  { %v8764_v4 = vpop.f32.mrf.mxu1  ;;  %v9057_v2 = vpop.f32.mrf.mxu0  ;;  %7178 = vperm.xlu0 %11145, %v14540_v51  }
 0xcca   :  { %v9286_v48 = vmax.f32 %v9057_v2, 0.0  ;;  %7181 = vperm.xlu1 %11146, %v14543_v1   ;;  %v8839_v13 = vmax.f32 %v8764_v4, 0.0  ;;  %v14554_v33 = vpop.eup %11489  ;;  %v9346_v20 = vpack.c.bf16 %v9288_v22, %v9287_v7  ;;  %v14560_v4 = vpop.permute.xlu0 %7124  ;;  %v6959_v2 = vmul.f32 1.442695, %v6833_v37 }
 0xccb   :  { %v10971_v31 = vpop.f32.mrf.mxu1  ;;  %v14557_v43 = vpop.eup %11491  ;;  %11509 = vpow2.f32 %v6961_v27 }
 0xccc   :  { %v9345_v58 = vpack.c.bf16 %v9286_v48, %v9285_v0  ;;  %v8842_v62 = vmax.f32 %v10971_v31, 0.0  ;;  %v14550_v61 = vpop.permute.xlu1 %7112  ;;  %v14568_v19 = vpop.eup %11493  ;;  %11511 = vpow2.f32 %v6959_v2 }
 0xccd   :  { %v8767_v52 = vpop.f32.mrf.mxu1  ;;  %7184 = vperm.xlu0 %11145, %v14554_v33   ;;  %v14570_v15 = vpop.eup %11495 }
 0xcce   :  { %v8840_v35 = vmax.f32 %v8767_v52, 0.0  ;;  %11052 = vmatprep.mubr.msk.bf16.mxu1 %vm2276_vm4, %v9345_v58  ;;  %v8874_v49 = vpack.c.bf16 %v8842_v62, %v8841_v50  ;;  %7187 = vperm.xlu1 %11146, %v14557_v43   ;;  %v14576_v8 = vpop.eup %11497  ;;  %v14578_v46 = vpop.permute.xlu0 %7130 }
 0xccf   :  { %11053 = vmatmul.mubr.msk.bf16.gmra.mxu1 %vm2276_vm4, %v9346_v20  ;;  %v14580_v22 = vpop.eup %11499 }
 0xcd0   :  { %v8873_v3 = vpack.c.bf16 %v8840_v35, %v8839_v13  ;;  %v14563_v6 = vpop.permute.xlu1 %7118  ;;  %15649 = vst [vmem:[#allocation16_spill] sm:$0xff] %v14580_v22  ;;  %v14586_v35 = vpop.eup %11501 }
 0xcd1   :  { %7190 = vperm.xlu0 %11145, %v14568_v19   ;;  %15650 = vst [vmem:[#allocation15_spill] sm:$0xff] %v14586_v35  ;;  %v14588_v7 = vpop.eup %11503 }
 0xcd2   :  { %11036 = vmatprep.mubr.msk.bf16.mxu0 %vm2276_vm4, %v8873_v3  ;;  %7193 = vperm.xlu1 %11146, %v14570_v15   ;;  %15651 = vst [vmem:[#allocation20_spill] sm:$0xff] %v14588_v7  ;;  %v14591_v11 = vpop.permute.xlu0 %7136  ;;  %v14598_v59 = vpop.eup %11505 }
 0xcd3   :  { %v10990_v53 = vpop.f32.mrf.mxu0  ;;  %11037 = vmatmul.mubr.msk.bf16.gmra.mxu0 %vm2276_vm4, %v8874_v49  ;;  %15652 = vst [vmem:[#allocation24_spill] sm:$0xff] %v14598_v59  ;;  %v14600_v3 = vpop.eup %11507 }
 0xcd4   :  { %v14574_v48 = vpop.permute.xlu1 %7127  ;;  %v9291_v13 = vmax.f32 %v10990_v53, 0.0  ;;  %15653 = vst [vmem:[#allocation25_spill] sm:$0xff] %v14600_v3 }
 0xcd5   :  { %v9070_v0 = vpop.f32.mrf.mxu0  ;;  %7196 = vperm.xlu0 %11145, %v14576_v8  }
 0xcd6   :  { %7199 = vperm.xlu1 %11146, %v14580_v22   ;;  %v9289_v39 = vmax.f32 %v9070_v0, 0.0  ;;  %v14608_v27 = vpop.permute.xlu0 %7142  ;;  %v7307_v22 = vrot.slane %v14461_v12, %v13699_v54  ;;  %v7325_v12 = vrot.slane %v14473_v40, %v13699_v54 }
 0xcd7   :  { %v10991_v31 = vpop.f32.mrf.mxu0 }
 0xcd8   :  { %v9292_v58 = vmax.f32 %v10991_v31, 0.0  ;;  %v14584_v52 = vpop.permute.xlu1 %7133  ;;  %v14606_v49 = vpop.eup %11509 }
 0xcd9   :  { %v9073_v62 = vpop.f32.mrf.mxu0  ;;  %7202 = vperm.xlu0 %11145, %v14586_v35   ;;  %15654 = vst [vmem:[#allocation32_spill] sm:$0xff] %v14606_v49  ;;  %v14610_v53 = vpop.eup %11511 }
 0xcda   :  { %v9290_v36 = vmax.f32 %v9073_v62, 0.0  ;;  %v9348_v50 = vpack.c.bf16 %v9292_v58, %v9291_v13  ;;  %7205 = vperm.xlu1 %11146, %v14588_v7   ;;  %15655 = vst [vmem:[#allocation29_spill] sm:$0xff] %v14610_v53  ;;  %v14616_v58 = vpop.permute.xlu0 %7148 }
 0xcdc   :  { %v9347_v34 = vpack.c.bf16 %v9290_v36, %v9289_v39  ;;  %v14594_v37 = vpop.permute.xlu1 %7139 }
 0xcdd   :  { %7211 = vperm.xlu0 %11145, %v14598_v59  }
 0xcde   :  { %11056 = vmatprep.mubr.msk.bf16.mxu1 %vm2276_vm4, %v9347_v34  ;;  %7208 = vperm.xlu1 %11146, %v14600_v3   ;;  %v7303_v3 = vrot.slane %v14487_v30, %v13694_v29  ;;  %v14622_v7 = vpop.permute.xlu0 %7154  ;;  %v7298_v30 = vrot.slane %v14459_v17, %v13699_v54 }
 0xcdf   :  { %11057 = vmatmul.mubr.msk.bf16.gmra.mxu1 %vm2276_vm4, %v9348_v50 }
 0xce0   :  { %v14604_v20 = vpop.permute.xlu1 %7145 }
 0xce1   :  { %7217 = vperm.xlu0 %11145, %v14606_v49  }
 0xce2   :  { %7214 = vperm.xlu1 %11146, %v14610_v53   ;;  %v7312_v53 = vrot.slane %v14497_v56, %v13694_v29  ;;  %v7330_v56 = vrot.slane %v14518_v44, %v13694_v29  ;;  %v7361_v44 = vrot.slane %v14546_v28, %v13699_v54  ;;  %v7393_v28 = vrot.slane %v14608_v27, %v13694_v29 }
 0xce3   :  { %v10994_v2 = vpop.f32.mrf.mxu0 }
 0xce4   :  { %v14614_v0 = vpop.permute.xlu1 %7151  ;;  %v9295_v59 = vmax.f32 %v10994_v2, 0.0  ;;  %v7316_v2 = vrot.slane %v14465_v5, %v13699_v54  ;;  %v7352_v5 = vrot.slane %v14524_v63, %v13699_v54 }
 0xce5   :  { %v9086_v31 = vpop.f32.mrf.mxu0 }
 0xce6   :  { %v9293_v13 = vmax.f32 %v9086_v31, 0.0  ;;  %v7294_v31 = vrot.slane %v14479_v42, %v13694_v29  ;;  %v7334_v42 = vrot.slane %v14489_v23, %v13699_v54  ;;  %v7317_v40 = vsel %vm6274_vm14, %v7316_v2, %v7312_v53 }
 0xce7   :  { %v10995_v62 = vpop.f32.mrf.mxu0  ;;  %v7375_v23 = vrot.slane %v14578_v46, %v13694_v29  ;;  %v7402_v46 = vrot.slane %v14616_v58, %v13694_v29  ;;  %v7388_v58 = vrot.slane %v14594_v37, %v13699_v54 }
 0xce8   :  { %v9296_v39 = vmax.f32 %v10995_v62, 0.0  ;;  %v14618_v50 = vpop.permute.xlu1 %7157  ;;  %v7321_v62 = vrot.slane %v14506_v55, %v13694_v29  ;;  %v7343_v55 = vrot.slane %v14501_v14, %v13699_v54  ;;  %v7384_v14 = vrot.slane %v14591_v11, %v13694_v29 }
 0xce9   :  { %v9089_v36 = vpop.f32.mrf.mxu0  ;;  %v7335_v53 = vsel %vm6274_vm14, %v7334_v42, %v7330_v56 }
 0xcea   :  { %v9294_v34 = vmax.f32 %v9089_v36, 0.0  ;;  %v9350_v35 = vpack.c.bf16 %v9296_v39, %v9295_v59  ;;  %v7308_v59 = vsel %vm6274_vm14, %v7307_v22, %v7303_v3  ;;  %v7299_v22 = vsel %vm6274_vm14, %v7298_v30, %v7294_v31 }
 0xceb   :  { %v7326_v3 = vsel %vm6274_vm14, %v7325_v12, %v7321_v62  ;;  %v7514_v39 = vsel %vm6555_vm15, %v7308_v59, %v7299_v22  ;;  %v7339_v36 = vrot.slane %v14536_v16, %v13694_v29  ;;  %v7411_v31 = vrot.slane %v14622_v7, %v13694_v29 }
 0xcec   :  { %v9349_v49 = vpack.c.bf16 %v9294_v34, %v9293_v13  ;;  %v7515_v11 = vsel %vm6557_vm0, %v7317_v40, %v7514_v39  ;;  %v7348_v13 = vrot.slane %v14550_v61, %v13694_v29  ;;  %v7379_v34 = vrot.slane %v14584_v52, %v13699_v54 }
 0xced   :  { %v7516_v62 = vsel %vm6559_vm2, %v7326_v3, %v7515_v11  ;;  %v7357_v16 = vrot.slane %v14563_v6, %v13694_v29  ;;  %v7370_v61 = vrot.slane %v14574_v48, %v13699_v54  ;;  %v7397_v52 = vrot.slane %v14604_v20, %v13699_v54 }
 0xcee   :  { %11060 = vmatprep.mubr.msk.bf16.mxu1 %vm2276_vm4, %v9349_v49  ;;  %v7161_v49 = vpop.permute.xlu1 %7160  ;;  %v7517_v30 = vsel %vm6561_vm5, %v7335_v53, %v7516_v62  ;;  %v7344_v7 = vsel %vm6274_vm14, %v7343_v55, %v7339_v36  ;;  %v7406_v12 = vrot.slane %v14614_v0, %v13699_v54  ;;  %v7353_v37 = vsel %vm6274_vm14, %v7352_v5, %v7348_v13 }
 0xcef   :  { %11061 = vmatmul.mubr.msk.bf16.gmra.mxu1 %vm2276_vm4, %v9350_v35  ;;  %v7366_v35 = vrot.slane %v14560_v4, %v13694_v29  ;;  %v7164_v4 = vpop.permute.xlu0 %7163  ;;  %v7380_v40 = vsel %vm6274_vm14, %v7379_v34, %v7375_v23  ;;  %v7415_v48 = vrot.slane %v14618_v50, %v13699_v54  ;;  %v7389_v20 = vsel %vm6274_vm14, %v7388_v58, %v7384_v14 }
 0xcf0   :  { %v7420_v39 = vrot.slane %v7161_v49, %v13694_v29  ;;  %v7362_v55 = vsel %vm6274_vm14, %v7361_v44, %v7357_v16  ;;  %v7424_v23 = vrot.slane %v7164_v4, %v13699_v54  ;;  %v7518_v14 = vsel %vm6563_vm6, %v7344_v7, %v7517_v30 }
 0xcf1   :  { %v7371_v0 = vsel %vm6274_vm14, %v7370_v61, %v7366_v35  ;;  %v7416_v35 = vsel %vm6274_vm14, %v7415_v48, %v7411_v31 }
 0xcf2   :  { %v7167_v42 = vpop.permute.xlu1 %7166  ;;  %v7521_v50 = vsel %vm6555_vm15, %v7380_v40, %v7371_v0  ;;  %v7425_v11 = vsel %vm6274_vm14, %v7424_v23, %v7420_v39 }
 0xcf3   :  { %v10998_v17 = vpop.f32.mrf.mxu0  ;;  %v7170_v3 = vpop.permute.xlu0 %7169  ;;  %v7429_v5 = vrot.slane %v7167_v42, %v13694_v29  ;;  %v7522_v49 = vsel %vm6557_vm0, %v7389_v20, %v7521_v50 }
 0xcf4   :  { %v9299_v22 = vmax.f32 %v10998_v17, 0.0  ;;  %v7407_v17 = vsel %vm6274_vm14, %v7406_v12, %v7402_v46  ;;  %v7433_v44 = vrot.slane %v7170_v3, %v13699_v54 }
 0xcf5   :  { %v9102_v63 = vpop.f32.mrf.mxu0 }
 0xcf6   :  { %v9297_v6 = vmax.f32 %v9102_v63, 0.0  ;;  %v7398_v63 = vsel %vm6274_vm14, %v7397_v52, %v7393_v28  ;;  %v7519_v28 = vsel %vm6565_vm7, %v7353_v37, %v7518_v14  ;;  %v7434_v34 = vsel %vm6274_vm14, %v7433_v44, %v7429_v5 }
 0xcf7   :  { %v10999_v27 = vpop.f32.mrf.mxu0  ;;  %v7523_v4 = vsel %vm6559_vm2, %v7398_v63, %v7522_v49  ;;  %v7520_v46 = vsel %vm6567_vm9, %v7362_v55, %v7519_v28 }
 0xcf8   :  { %v9300_v2 = vmax.f32 %v10999_v27, 0.0  ;;  %v7524_v13 = vsel %vm6561_vm5, %v7407_v17, %v7523_v4  ;;  %v7542_v62 = vsel %vm6594_vm12, %v7520_v46, 0.0 }
 0xcf9   :  { %v9105_v56 = vpop.f32.mrf.mxu0  ;;  %v7525_v27 = vsel %vm6563_vm6, %v7416_v35, %v7524_v13 }
 0xcfa   :  { %v9298_v59 = vmax.f32 %v9105_v56, 0.0  ;;  %v9352_v36 = vpack.c.bf16 %v9300_v2, %v9299_v22  ;;  %v7526_v31 = vsel %vm6565_vm7, %v7425_v11, %v7525_v27  ;;  %v7539_v2 = vsel %vm6594_vm12, %v14455_v18, 0.0 }
 0xcfb   :  { %v7527_v58 = vsel %vm6567_vm9, %v7434_v34, %v7526_v31 }
 0xcfc   :  { %v9351_v53 = vpack.c.bf16 %v9298_v59, %v9297_v6  ;;  %v7545_v61 = vsel %vm6594_vm12, %v7527_v58, 0.0 }
 0xcfe   :  { %11064 = vmatprep.mubr.msk.bf16.mxu1 %vm2276_vm4, %v9351_v53 }
 0xcff   :  { %11065 = vmatmul.mubr.msk.bf16.gmra.mxu1 %vm2276_vm4, %v9352_v36 }
 0xd00   :  { %7543 = vadd.xlane.f32.xlu0 %v7542_v62 }
 0xd03   :  { %v11002_v16 = vpop.f32.mrf.mxu0 }
 0xd04   :  { %7546 = vadd.xlane.f32.xlu0 %v7545_v61  ;;  %v9303_v6 = vmax.f32 %v11002_v16, 0.0 }
 0xd05   :  { %v9118_v30 = vpop.f32.mrf.mxu0 }
 0xd06   :  { %7540 = vadd.xlane.f32.xlu1 %v7539_v2  ;;  %v9301_v12 = vmax.f32 %v9118_v30, 0.0 }
 0xd07   :  { %v11003_v52 = vpop.f32.mrf.mxu0 }
 0xd08   :  { %v9304_v56 = vmax.f32 %v11003_v52, 0.0 }
 0xd09   :  { %v9121_v7 = vpop.f32.mrf.mxu0 }
 0xd0a   :  { %v9302_v42 = vmax.f32 %v9121_v7, 0.0  ;;  %v9354_v37 = vpack.c.bf16 %v9304_v56, %v9303_v6 }
 0xd0c   :  { %v9353_v59 = vpack.c.bf16 %v9302_v42, %v9301_v12 }
 0xd0e   :  { %11068 = vmatprep.mubr.msk.bf16.mxu1 %vm2276_vm4, %v9353_v59 }
 0xd0f   :  { %11069 = vmatmul.mubr.msk.bf16.gmra.mxu1 %vm2276_vm4, %v9354_v37 }
 0xd13   :  { %v11006_v40 = vpop.f32.mrf.mxu0 }
 0xd14   :  { %v9307_v18 = vmax.f32 %v11006_v40, 0.0 }
 0xd15   :  { %v9134_v48 = vpop.f32.mrf.mxu0 }
 0xd16   :  { %v9305_v39 = vmax.f32 %v9134_v48, 0.0 }
 0xd17   :  { %v11007_v22 = vpop.f32.mrf.mxu0 }
 0xd18   :  { %v9308_v3 = vmax.f32 %v11007_v22, 0.0 }
 0xd19   :  { %v9137_v20 = vpop.f32.mrf.mxu0 }
 0xd1a   :  { %v9306_v55 = vmax.f32 %v9137_v20, 0.0  ;;  %v9356_v0 = vpack.c.bf16 %v9308_v3, %v9307_v18 }
 0xd1c   :  { %v9355_v53 = vpack.c.bf16 %v9306_v55, %v9305_v39 }
 0xd1e   :  { %11072 = vmatprep.mubr.msk.bf16.mxu1 %vm2276_vm4, %v9355_v53 }
 0xd1f   :  { %11073 = vmatmul.mubr.msk.bf16.gmra.mxu1 %vm2276_vm4, %v9356_v0 }
 0xd23   :  { %v11010_v63 = vpop.f32.mrf.mxu0 }
 0xd24   :  { %v9311_v44 = vmax.f32 %v11010_v63, 0.0 }
 0xd25   :  { %v9150_v5 = vpop.f32.mrf.mxu0 }
 0xd26   :  { %v9309_v17 = vmax.f32 %v9150_v5, 0.0 }
 0xd27   :  { %v11011_v36 = vpop.f32.mrf.mxu0 }
 0xd28   :  { %v9312_v23 = vmax.f32 %v11011_v36, 0.0 }
 0xd29   :  { %v9153_v50 = vpop.f32.mrf.mxu0 }
 0xd2a   :  { %v9310_v14 = vmax.f32 %v9153_v50, 0.0  ;;  %v9358_v35 = vpack.c.bf16 %v9312_v23, %v9311_v44 }
 0xd2c   :  { %v9357_v49 = vpack.c.bf16 %v9310_v14, %v9309_v17 }
 0xd2e   :  { %11076 = vmatprep.mubr.msk.bf16.mxu1 %vm2276_vm4, %v9357_v49 }
 0xd2f   :  { %11077 = vmatmul.mubr.msk.bf16.gmra.mxu1 %vm2276_vm4, %v9358_v35 }
 0xd33   :  { %v11014_v28 = vpop.f32.mrf.mxu0 }
 0xd34   :  { %v9315_v62 = vmax.f32 %v11014_v28, 0.0 }
 0xd35   :  { %v9166_v4 = vpop.f32.mrf.mxu0 }
 0xd36   :  { %v9313_v34 = vmax.f32 %v9166_v4, 0.0 }
 0xd37   :  { %v11015_v11 = vpop.f32.mrf.mxu0 }
 0xd38   :  { %v9316_v46 = vmax.f32 %v11015_v11, 0.0 }
 0xd39   :  { %v9169_v13 = vpop.f32.mrf.mxu0 }
 0xd3a   :  { %v9314_v27 = vmax.f32 %v9169_v13, 0.0  ;;  %v9360_v16 = vpack.c.bf16 %v9316_v46, %v9315_v62 }
 0xd3c   :  { %v9359_v31 = vpack.c.bf16 %v9314_v27, %v9313_v34 }
 0xd3e   :  { %11080 = vmatprep.mubr.msk.bf16.mxu1 %vm2276_vm4, %v9359_v31 }
 0xd3f   :  { %11081 = vmatmul.mubr.msk.bf16.gmra.mxu1 %vm2276_vm4, %v9360_v16 }
 0xd40   :  { %v7173_v30 = vpop.permute.xlu0 %7172 }
 0xd41   :  { %v7176_v61 = vpop.permute.xlu1 %7175  ;;  %v7438_v5 = vrot.slane %v7173_v30, %v13694_v29 }
 0xd42   :  { %v7442_v17 = vrot.slane %v7176_v61, %v13699_v54 }
 0xd43   :  { %v11018_v58 = vpop.f32.mrf.mxu0 }
 0xd44   :  { %v7179_v56 = vpop.permute.xlu0 %7178  ;;  %v9319_v37 = vmax.f32 %v11018_v58, 0.0 }
 0xd45   :  { %v9182_v52 = vpop.f32.mrf.mxu0  ;;  %v7182_v7 = vpop.permute.xlu1 %7181  ;;  %v7447_v23 = vrot.slane %v7179_v56, %v13694_v29 }
 0xd46   :  { %v9317_v6 = vmax.f32 %v9182_v52, 0.0  ;;  %v7451_v36 = vrot.slane %v7182_v7, %v13699_v54 }
 0xd47   :  { %v11019_v2 = vpop.f32.mrf.mxu0 }
 0xd48   :  { %v9320_v12 = vmax.f32 %v11019_v2, 0.0  ;;  %v7185_v40 = vpop.permute.xlu0 %7184  ;;  %v7452_v31 = vsel %vm6274_vm14, %v7451_v36, %v7447_v23 }
 0xd49   :  { %v9185_v42 = vpop.f32.mrf.mxu0  ;;  %v7188_v22 = vpop.permute.xlu1 %7187  ;;  %v7456_v44 = vrot.slane %v7185_v40, %v13694_v29 }
 0xd4a   :  { %v9318_v59 = vmax.f32 %v9185_v42, 0.0  ;;  %v9362_v3 = vpack.c.bf16 %v9320_v12, %v9319_v37  ;;  %v7460_v14 = vrot.slane %v7188_v22, %v13699_v54  ;;  %v7443_v12 = vsel %vm6274_vm14, %v7442_v17, %v7438_v5 }
 0xd4c   :  { %v9361_v48 = vpack.c.bf16 %v9318_v59, %v9317_v6  ;;  %v7191_v20 = vpop.permute.xlu0 %7190  ;;  %v7461_v52 = vsel %vm6274_vm14, %v7460_v14, %v7456_v44  ;;  %v7528_v59 = vsel %vm6555_vm15, %v7452_v31, %v7443_v12 }
 0xd4d   :  { %v7194_v39 = vpop.permute.xlu1 %7193  ;;  %v7465_v11 = vrot.slane %v7191_v20, %v13694_v29  ;;  %v7529_v40 = vsel %vm6557_vm0, %v7461_v52, %v7528_v59 }
 0xd4e   :  { %11084 = vmatprep.mubr.msk.bf16.mxu1 %vm2276_vm4, %v9361_v48  ;;  %v7469_v4 = vrot.slane %v7194_v39, %v13699_v54 }
 0xd4f   :  { %11085 = vmatmul.mubr.msk.bf16.gmra.mxu1 %vm2276_vm4, %v9362_v3 }
 0xd50   :  { %v7197_v18 = vpop.permute.xlu0 %7196  ;;  %v7470_v42 = vsel %vm6274_vm14, %v7469_v4, %v7465_v11 }
 0xd51   :  { %v7200_v53 = vpop.permute.xlu1 %7199  ;;  %v7474_v27 = vrot.slane %v7197_v18, %v13694_v29  ;;  %v7530_v3 = vsel %vm6559_vm2, %v7470_v42, %v7529_v40 }
 0xd52   :  { %v7478_v34 = vrot.slane %v7200_v53, %v13699_v54 }
 0xd53   :  { %v11022_v55 = vpop.f32.mrf.mxu0 }
 0xd54   :  { %v7203_v50 = vpop.permute.xlu0 %7202  ;;  %v9323_v62 = vmax.f32 %v11022_v55, 0.0  ;;  %v7479_v37 = vsel %vm6274_vm14, %v7478_v34, %v7474_v27 }
 0xd55   :  { %v9198_v0 = vpop.f32.mrf.mxu0  ;;  %v7206_v49 = vpop.permute.xlu1 %7205  ;;  %v7483_v58 = vrot.slane %v7203_v50, %v13694_v29  ;;  %v7531_v18 = vsel %vm6561_vm5, %v7479_v37, %v7530_v3 }
 0xd56   :  { %v9321_v46 = vmax.f32 %v9198_v0, 0.0  ;;  %v7487_v16 = vrot.slane %v7206_v49, %v13699_v54 }
 0xd57   :  { %v11023_v63 = vpop.f32.mrf.mxu0 }
 0xd58   :  { %v9324_v35 = vmax.f32 %v11023_v63, 0.0  ;;  %v7212_v30 = vpop.permute.xlu0 %7211  ;;  %v7488_v48 = vsel %vm6274_vm14, %v7487_v16, %v7483_v58 }
 0xd59   :  { %v9201_v28 = vpop.f32.mrf.mxu0  ;;  %v7209_v2 = vpop.permute.xlu1 %7208  ;;  %v7496_v56 = vrot.slane %v7212_v30, %v13699_v54  ;;  %v7532_v0 = vsel %vm6563_vm6, %v7488_v48, %v7531_v18 }
 0xd5a   :  { %v9322_v13 = vmax.f32 %v9201_v28, 0.0  ;;  %v9364_v7 = vpack.c.bf16 %v9324_v35, %v9323_v62  ;;  %v7492_v6 = vrot.slane %v7209_v2, %v13694_v29 }
 0xd5c   :  { %v9363_v61 = vpack.c.bf16 %v9322_v13, %v9321_v46  ;;  %v7218_v22 = vpop.permute.xlu0 %7217  ;;  %v7497_v20 = vsel %vm6274_vm14, %v7496_v56, %v7492_v6 }
 0xd5d   :  { %v7215_v39 = vpop.permute.xlu1 %7214  ;;  %v7505_v55 = vrot.slane %v7218_v22, %v13699_v54  ;;  %v7533_v5 = vsel %vm6565_vm7, %v7497_v20, %v7532_v0 }
 0xd5e   :  { %11088 = vmatprep.mubr.msk.bf16.mxu1 %vm2276_vm4, %v9363_v61  ;;  %v7501_v53 = vrot.slane %v7215_v39, %v13694_v29 }
 0xd5f   :  { %11089 = vmatmul.mubr.msk.bf16.gmra.mxu1 %vm2276_vm4, %v9364_v7 }
 0xd60   :  { %v7506_v63 = vsel %vm6274_vm14, %v7505_v55, %v7501_v53  ;;  %vm7783_vm14 = vcmask 7168  }
 0xd61   :  { %v7534_v36 = vsel %vm6567_vm9, %v7506_v63, %v7533_v5 }
 0xd62   :  { %v7548_v23 = vsel %vm6594_vm12, %v7534_v36, 0.0 }
 0xd63   :  { %7549 = vadd.xlane.f32.xlu1 %v7548_v23 }
 0xd68   :  { %v11026_v50 = vpop.f32.mrf.mxu0 }
 0xd69   :  { %v9327_v28 = vmax.f32 %v11026_v50, 0.0 }
 0xd6a   :  { %v9214_v17 = vpop.f32.mrf.mxu0 }
 0xd6b   :  { %v9325_v49 = vmax.f32 %v9214_v17, 0.0 }
 0xd6c   :  { %v11027_v14 = vpop.f32.mrf.mxu0 }
 0xd6d   :  { %v9328_v44 = vmax.f32 %v11027_v14, 0.0 }
 0xd6e   :  { %v9217_v54 = vpop.f32.mrf.mxu0 }
 0xd6f   :  { %v9326_v35 = vmax.f32 %v9217_v54, 0.0  ;;  %v9366_v4 = vpack.c.bf16 %v9328_v44, %v9327_v28 }
 0xd71   :  { %v9365_v29 = vpack.c.bf16 %v9326_v35, %v9325_v49 }
 0xd73   :  { %11092 = vmatprep.mubr.msk.bf16.mxu1 %vm2276_vm4, %v9365_v29 }
 0xd74   :  { %11093 = vmatmul.mubr.msk.bf16.gmra.mxu1 %vm2276_vm4, %v9366_v4 }
 0xd7a   :  { %v11046_v11 = vpop.f32.mrf.mxu1 }
 0xd7b   :  { %v11030_v46 = vpop.f32.mrf.mxu0  ;;  %9777 = vst.msk [vmem:[%s15407_s7 + $0x10] sm:$0xff] %vm9774_vm13, %v11046_v11 }
 0xd7c   :  { %v9519_v13 = vpop.f32.mrf.mxu1  ;;  %v9331_v52 = vmax.f32 %v11030_v46, 0.0 }
 0xd7d   :  { %v9230_v34 = vpop.f32.mrf.mxu0  ;;  %9775 = vst.msk [vmem:[%s15407_s7] sm:$0xff] %vm9774_vm13, %v9519_v13 }
 0xd7e   :  { %v11047_v27 = vpop.f32.mrf.mxu1  ;;  %v9329_v30 = vmax.f32 %v9230_v34, 0.0 }
 0xd7f   :  { %v11031_v62 = vpop.f32.mrf.mxu0  ;;  %9778 = vst.msk [vmem:[%s15407_s7 + $0x18] sm:$0xff] %vm9774_vm13, %v11047_v27 }
 0xd80   :  { %v9522_v31 = vpop.f32.mrf.mxu1  ;;  %v9332_v16 = vmax.f32 %v11031_v62, 0.0 }
 0xd81   :  { %v9233_v58 = vpop.f32.mrf.mxu0  ;;  %9776 = vst.msk [vmem:[%s15407_s7 + $0x8] sm:$0xff] %vm9774_vm13, %v9522_v31 }
 0xd82   :  { %v9330_v61 = vmax.f32 %v9233_v58, 0.0  ;;  %v11050_v2 = vpop.f32.mrf.mxu1  ;;  %v9368_v42 = vpack.c.bf16 %v9332_v16, %v9331_v52 }
 0xd83   :  { %v11034_v56 = vpop.f32.mrf.mxu0  ;;  %9781 = vst.msk [vmem:[%s15407_s7 + $0x30] sm:$0xff] %vm9774_vm13, %v11050_v2  ;;  %v15657_v2 = vld [vmem:[#allocation47_spill] sm:$0xff] }
 0xd84   :  { %v9367_v7 = vpack.c.bf16 %v9330_v61, %v9329_v30  ;;  %v9535_v6 = vpop.f32.mrf.mxu1  ;;  %v9335_v53 = vmax.f32 %v11034_v56, 0.0  ;;  %v15656_v30 = vld [vmem:[#allocation45_spill] sm:$0xff] }
 0xd85   :  { %9779 = vst.msk [vmem:[%s15407_s7 + $0x20] sm:$0xff] %vm9774_vm13, %v9535_v6  ;;  %v9246_v59 = vpop.f32.mrf.mxu0 }
 0xd86   :  { %11096 = vmatprep.mubr.msk.bf16.mxu1 %vm2276_vm4, %v9367_v7  ;;  %v11051_v37 = vpop.f32.mrf.mxu1  ;;  %v9333_v39 = vmax.f32 %v9246_v59, 0.0  ;;  %v15659_v59 = vld [vmem:[#allocation17_spill] sm:$0xff] }
 0xd87   :  { %11097 = vmatmul.mubr.msk.bf16.gmra.mxu1 %vm2276_vm4, %v9368_v42  ;;  %9782 = vst.msk [vmem:[%s15407_s7 + $0x38] sm:$0xff] %vm9774_vm13, %v11051_v37  ;;  %v11035_v40 = vpop.f32.mrf.mxu0  ;;  %v15658_v42 = vld [vmem:[#allocation49_spill] sm:$0xff] }
 0xd88   :  { %v9538_v22 = vpop.f32.mrf.mxu1  ;;  %v9336_v3 = vmax.f32 %v11035_v40, 0.0  ;;  %v15660_v40 = vld [vmem:[#allocation51_spill] sm:$0xff] }
 0xd89   :  { %v7544_v12 = vpop.xlane.xlu0 %7543  ;;  %9780 = vst.msk [vmem:[%s15407_s7 + $0x28] sm:$0xff] %vm9774_vm13, %v9538_v22  ;;  %v9249_v20 = vpop.f32.mrf.mxu0 }
 0xd8a   :  { %11513 = vrcp.f32 %v7544_v12  ;;  %v9334_v55 = vmax.f32 %v9249_v20, 0.0  ;;  %v9370_v23 = vpack.c.bf16 %v9336_v3, %v9335_v53  ;;  %v15661_v3 = vld [vmem:[#allocation19_spill] sm:$0xff]  ;;  %v15664_v53 = vld [vmem:[#allocation54_spill] sm:$0xff] }
 0xd8c   :  { %v9369_v5 = vpack.c.bf16 %v9334_v55, %v9333_v39  ;;  %v15662_v39 = vld [vmem:[#allocation53_spill] sm:$0xff]  ;;  %v15663_v55 = vld [vmem:[#allocation6_spill] sm:$0xff] }
 0xd8d   :  { %v7547_v48 = vpop.xlane.xlu0 %7546 }
 0xd8e   :  { %11515 = vrcp.f32 %v7547_v48  ;;  %11100 = vmatprep.mubr.msk.bf16.mxu1 %vm2276_vm4, %v9369_v5  ;;  %v15666_v5 = vld [vmem:[#allocation55_spill] sm:$0xff] }
 0xd8f   :  { %v11054_v18 = vpop.f32.mrf.mxu1  ;;  %v7541_v63 = vpop.xlane.xlu1 %7540  ;;  %11101 = vmatmul.mubr.msk.bf16.gmra.mxu1 %vm2276_vm4, %v9370_v23  ;;  %v15667_v23 = vld [vmem:[#allocation5_spill] sm:$0xff] }
 0xd90   :  { %9785 = vst.msk [vmem:[%s15407_s7 + $0x50] sm:$0xff] %vm9774_vm13, %v11054_v18  ;;  %11517 = vrcp.f32 %v7541_v63 }
 0xd91   :  { %v9551_v36 = vpop.f32.mrf.mxu1 }
 0xd92   :  { %9783 = vst.msk [vmem:[%s15407_s7 + $0x40] sm:$0xff] %vm9774_vm13, %v9551_v36 }
 0xd93   :  { %v14804_v0 = vpop.f32.mrf.mxu0  ;;  %v11055_v17 = vpop.f32.mrf.mxu1 }
 0xd94   :  { %9786 = vst.msk [vmem:[%s15407_s7 + $0x58] sm:$0xff] %vm9774_vm13, %v11055_v17  ;;  %v9339_v35 = vmax.f32 %v14804_v0, 0.0 }
 0xd95   :  { %v14810_v50 = vpop.f32.mrf.mxu0  ;;  %v9554_v44 = vpop.f32.mrf.mxu1 }
 0xd96   :  { %9784 = vst.msk [vmem:[%s15407_s7 + $0x48] sm:$0xff] %vm9774_vm13, %v9554_v44  ;;  %v9337_v28 = vmax.f32 %v14810_v50, 0.0  ;;  %v15668_v44 = vld [vmem:[#allocation56_spill] sm:$0xff] }
 0xd97   :  { %v14818_v14 = vpop.f32.mrf.mxu0  ;;  %v11514_v49 = vpop.eup %11513 }
 0xd98   :  { %v9340_v29 = vmax.f32 %v14818_v14, 0.0  ;;  %v7594_v11 = vrot.slane %v11514_v49, %v13983_v9  ;;  %v7598_v46 = vrot.slane %v11514_v49, %v13986_v24  ;;  %v7602_v13 = vrot.slane %v11514_v49, %v14002_v25 }
 0xd99   :  { %v14824_v54 = vpop.f32.mrf.mxu0  ;;  %v7606_v34 = vrot.slane %v11514_v49, %v14028_v47  ;;  %v7610_v27 = vrot.slane %v11514_v49, %v13993_v41  ;;  %v7614_v62 = vrot.slane %v11514_v49, %v14005_v45  ;;  %v7618_v31 = vrot.slane %v11514_v49, %v14016_v10 }
 0xd9a   :  { %v9338_v4 = vmax.f32 %v14824_v54, 0.0  ;;  %v7622_v16 = vrot.slane %v11514_v49, %v14031_v60  ;;  %v7735_v58 = vmul.f32 %v14328_v57, %v7594_v11  ;;  %v7736_v61 = vmul.f32 %v15656_v30, %v7594_v11 }
 0xd9b   :  { %v7737_v52 = vmul.f32 %v14339_v38, %v7598_v46  ;;  %v7738_v56 = vmul.f32 %v15657_v2, %v7598_v46  ;;  %v11516_v7 = vpop.eup %11515  ;;  %v7739_v12 = vmul.f32 %v14350_v21, %v7602_v13  ;;  %v7740_v6 = vmul.f32 %v15658_v42, %v7602_v13  ;;  %v15665_v21 = vld [vmem:[#allocation23_spill] sm:$0xff]  ;;  %v15670_v2 = vld [vmem:[#allocation26_spill] sm:$0xff] }
 0xd9c   :  { %v7741_v37 = vmul.f32 %v15659_v59, %v7606_v34  ;;  %v7742_v48 = vmul.f32 %v15660_v40, %v7606_v34  ;;  %v7743_v20 = vmul.f32 %v15661_v3, %v7610_v27  ;;  %v7744_v57 = vmul.f32 %v15662_v39, %v7610_v27  ;;  %7800 = vst.msk [vmem:[%s15408_s8 + $0x80] sm:$0xff] %vm7783_vm14, %v7735_v58  ;;  %v15673_v40 = vld [vmem:[#allocation13_spill] sm:$0xff]  ;;  %v15676_v39 = vld [vmem:[#allocation7_spill] sm:$0xff] }
 0xd9d   :  { %v7745_v18 = vmul.f32 %v15663_v55, %v7614_v62  ;;  %v7746_v38 = vmul.f32 %v15664_v53, %v7614_v62  ;;  %7801 = vst.msk [vmem:[%s15408_s8 + $0x88] sm:$0xff] %vm7783_vm14, %v7736_v61  ;;  %7802 = vst.msk [vmem:[%s15408_s8 + $0x90] sm:$0xff] %vm7783_vm14, %v7737_v52  ;;  %v7747_v63 = vmul.f32 %v15665_v21, %v7618_v31  ;;  %v15669_v61 = vld [vmem:[#allocation30_spill] sm:$0xff] }
 0xd9e   :  { %7803 = vst.msk [vmem:[%s15408_s8 + $0x98] sm:$0xff] %vm7783_vm14, %v7738_v56  ;;  %v7748_v36 = vmul.f32 %v15666_v5, %v7618_v31  ;;  %v7749_v17 = vmul.f32 %v15667_v23, %v7622_v16  ;;  %v7750_v49 = vmul.f32 %v15668_v44, %v7622_v16  ;;  %7804 = vst.msk [vmem:[%s15408_s8 + $0xa0] sm:$0xff] %vm7783_vm14, %v7739_v12  ;;  %v15671_v12 = vld [vmem:[#allocation31_spill] sm:$0xff] }
 0xd9f   :  { %v11058_v22 = vpop.f32.mrf.mxu1  ;;  %7805 = vst.msk [vmem:[%s15408_s8 + $0xa8] sm:$0xff] %vm7783_vm14, %v7740_v6  ;;  %7806 = vst.msk [vmem:[%s15408_s8 + $0xb0] sm:$0xff] %vm7783_vm14, %v7741_v37  ;;  %v7626_v46 = vrot.slane %v11516_v7, %v13983_v9  ;;  %v7630_v13 = vrot.slane %v11516_v7, %v13986_v24  ;;  %v7634_v34 = vrot.slane %v11516_v7, %v14002_v25  ;;  %v15672_v6 = vld [vmem:[#allocation8_spill] sm:$0xff]  ;;  %v11518_v37 = vpop.eup %11517 }
 0xda0   :  { %9789 = vst.msk [vmem:[%s15407_s7 + $0x70] sm:$0xff] %vm9774_vm13, %v11058_v22  ;;  %v7638_v27 = vrot.slane %v11516_v7, %v14028_v47  ;;  %v7642_v62 = vrot.slane %v11516_v7, %v13993_v41  ;;  %v7646_v31 = vrot.slane %v11516_v7, %v14005_v45  ;;  %v7650_v16 = vrot.slane %v11516_v7, %v14016_v10  ;;  %v15674_v22 = vld [vmem:[#allocation10_spill] sm:$0xff] }
 0xda1   :  { %7807 = vst.msk [vmem:[%s15408_s8 + $0xb8] sm:$0xff] %vm7783_vm14, %v7742_v48  ;;  %v9567_v11 = vpop.f32.mrf.mxu1  ;;  %7808 = vst.msk [vmem:[%s15408_s8 + $0xc0] sm:$0xff] %vm7783_vm14, %v7743_v20  ;;  %v7654_v58 = vrot.slane %v11516_v7, %v14031_v60  ;;  %v7751_v52 = vmul.f32 %v15669_v61, %v7626_v46  ;;  %v7752_v56 = vmul.f32 %v15670_v2, %v7626_v46  ;;  %v15675_v7 = vld [vmem:[#allocation27_spill] sm:$0xff] }
 0xda2   :  { %7809 = vst.msk [vmem:[%s15408_s8 + $0xc8] sm:$0xff] %vm7783_vm14, %v7744_v57  ;;  %7810 = vst.msk [vmem:[%s15408_s8 + $0xd0] sm:$0xff] %vm7783_vm14, %v7745_v18  ;;  %v7753_v42 = vmul.f32 %v15671_v12, %v7630_v13  ;;  %v7754_v59 = vmul.f32 %v15672_v6, %v7630_v13  ;;  %v7755_v48 = vmul.f32 %v15673_v40, %v7634_v34  ;;  %v15677_v18 = vld [vmem:[#allocation28_spill] sm:$0xff]  ;;  %v15683_v46 = vld [vmem:[#allocation11_spill] sm:$0xff] }
 0xda3   :  { %7811 = vst.msk [vmem:[%s15408_s8 + $0xd8] sm:$0xff] %vm7783_vm14, %v7746_v38  ;;  %7812 = vst.msk [vmem:[%s15408_s8 + $0xe0] sm:$0xff] %vm7783_vm14, %v7747_v63  ;;  %v11059_v30 = vpop.f32.mrf.mxu1  ;;  %v7756_v3 = vmul.f32 %v15674_v22, %v7634_v34  ;;  %v7757_v20 = vmul.f32 %v15675_v7, %v7638_v27  ;;  %v7758_v57 = vmul.f32 %v15676_v39, %v7638_v27  ;;  %v15678_v38 = vld [vmem:[#allocation9_spill] sm:$0xff]  ;;  %v15679_v63 = vld [vmem:[#allocation18_spill] sm:$0xff] }
 0xda4   :  { %9787 = vst.msk [vmem:[%s15407_s7 + $0x60] sm:$0xff] %vm9774_vm13, %v9567_v11  ;;  %9790 = vst.msk [vmem:[%s15407_s7 + $0x78] sm:$0xff] %vm9774_vm13, %v11059_v30  ;;  %v7759_v53 = vmul.f32 %v15677_v18, %v7642_v62  ;;  %v7760_v21 = vmul.f32 %v15678_v38, %v7642_v62  ;;  %v7761_v5 = vmul.f32 %v15679_v63, %v7646_v31  ;;  %v15684_v34 = vld [vmem:[#allocation21_spill] sm:$0xff]  ;;  %v15692_v18 = vld [vmem:[#allocation44_spill] sm:$0xff] }
 0xda5   :  { %7813 = vst.msk [vmem:[%s15408_s8 + $0xe8] sm:$0xff] %vm7783_vm14, %v7748_v36  ;;  %7814 = vst.msk [vmem:[%s15408_s8 + $0xf0] sm:$0xff] %vm7783_vm14, %v7749_v17  ;;  %v9570_v55 = vpop.f32.mrf.mxu1  ;;  %v15680_v36 = vld [vmem:[#allocation12_spill] sm:$0xff]  ;;  %v15681_v17 = vld [vmem:[#allocation14_spill] sm:$0xff]  ;;  %v7765_v13 = vmul.f32 %v15683_v46, %v7654_v58  ;;  %v7766_v27 = vmul.f32 %v15684_v34, %v7654_v58  ;;  %v7562_v62 = vrot.slane %v11518_v37, %v13983_v9 }
 0xda6   :  { %7815 = vst.msk [vmem:[%s15408_s8 + $0xf8] sm:$0xff] %vm7783_vm14, %v7750_v49  ;;  %v7762_v23 = vmul.f32 %v15680_v36, %v7646_v31  ;;  %7816 = vst.msk [vmem:[%s15408_s8 + $0x100] sm:$0xff] %vm7783_vm14, %v7751_v52  ;;  %v7763_v44 = vmul.f32 %v15681_v17, %v7650_v16  ;;  %v15682_v49 = vld [vmem:[#allocation22_spill] sm:$0xff]  ;;  %v7566_v31 = vrot.slane %v11518_v37, %v13986_v24  ;;  %v15694_v63 = vld [vmem:[#allocation37_spill] sm:$0xff] }
 0xda7   :  { %7817 = vst.msk [vmem:[%s15408_s8 + $0x108] sm:$0xff] %vm7783_vm14, %v7752_v56  ;;  %7818 = vst.msk [vmem:[%s15408_s8 + $0x110] sm:$0xff] %vm7783_vm14, %v7753_v42  ;;  %v7764_v11 = vmul.f32 %v15682_v49, %v7650_v16  ;;  %v7570_v16 = vrot.slane %v11518_v37, %v14002_v25  ;;  %v7574_v58 = vrot.slane %v11518_v37, %v14028_v47  ;;  %v15685_v56 = vld [vmem:[#allocation33_spill] sm:$0xff]  ;;  %v15686_v42 = vld [vmem:[#allocation34_spill] sm:$0xff] }
 0xda8   :  { %7819 = vst.msk [vmem:[%s15408_s8 + $0x118] sm:$0xff] %vm7783_vm14, %v7754_v59  ;;  %7820 = vst.msk [vmem:[%s15408_s8 + $0x120] sm:$0xff] %vm7783_vm14, %v7755_v48  ;;  %v7578_v30 = vrot.slane %v11518_v37, %v13993_v41  ;;  %v7582_v61 = vrot.slane %v11518_v37, %v14005_v45  ;;  %v7586_v52 = vrot.slane %v11518_v37, %v14016_v10  ;;  %v15687_v59 = vld [vmem:[#allocation35_spill] sm:$0xff]  ;;  %v15688_v48 = vld [vmem:[#allocation36_spill] sm:$0xff] }
 0xda9   :  { %9788 = vst.msk [vmem:[%s15407_s7 + $0x68] sm:$0xff] %vm9774_vm13, %v9570_v55  ;;  %v7590_v2 = vrot.slane %v11518_v37, %v14031_v60  ;;  %v7719_v12 = vmul.f32 %v15685_v56, %v7562_v62  ;;  %v7720_v6 = vmul.f32 %v15686_v42, %v7562_v62  ;;  %v7721_v40 = vmul.f32 %v15687_v59, %v7566_v31  ;;  %v15693_v38 = vld [vmem:[#allocation46_spill] sm:$0xff] }
 0xdaa   :  { %7821 = vst.msk [vmem:[%s15408_s8 + $0x128] sm:$0xff] %vm7783_vm14, %v7756_v3  ;;  %7822 = vst.msk [vmem:[%s15408_s8 + $0x130] sm:$0xff] %vm7783_vm14, %v7757_v20  ;;  %v7722_v22 = vmul.f32 %v15688_v48, %v7566_v31  ;;  %v15689_v3 = vld [vmem:[#allocation38_spill] sm:$0xff]  ;;  %v15690_v20 = vld [vmem:[#allocation40_spill] sm:$0xff]  ;;  %v7728_v37 = vmul.f32 %v15694_v63, %v7578_v30  ;;  %v9371_v31 = vpack.c.bf16 %v9338_v4, %v9337_v28 }
 0xdab   :  { %7823 = vst.msk [vmem:[%s15408_s8 + $0x138] sm:$0xff] %vm7783_vm14, %v7758_v57  ;;  %7824 = vst.msk [vmem:[%s15408_s8 + $0x140] sm:$0xff] %vm7783_vm14, %v7759_v53  ;;  %v7723_v7 = vmul.f32 %v15689_v3, %v7570_v16  ;;  %v7724_v39 = vmul.f32 %v15690_v20, %v7570_v16  ;;  %v15691_v57 = vld [vmem:[#allocation42_spill] sm:$0xff]  ;;  %v7726_v53 = vmul.f32 %v15692_v18, %v7574_v58 }
 0xdac   :  { %7825 = vst.msk [vmem:[%s15408_s8 + $0x148] sm:$0xff] %vm7783_vm14, %v7760_v21  ;;  %7826 = vst.msk [vmem:[%s15408_s8 + $0x150] sm:$0xff] %vm7783_vm14, %v7761_v5  ;;  %v7725_v55 = vmul.f32 %v15691_v57, %v7574_v58  ;;  %v7727_v21 = vmul.f32 %v15693_v38, %v7578_v30  ;;  %v15695_v5 = vld [vmem:[#allocation48_spill] sm:$0xff]  ;;  %v9372_v50 = vpack.c.bf16 %v9340_v29, %v9339_v35  ;;  %11104 = vmatprep.mubr.msk.bf16.mxu1 %vm2276_vm4, %v9371_v31 }
 0xdad   :  { %7827 = vst.msk [vmem:[%s15408_s8 + $0x158] sm:$0xff] %vm7783_vm14, %v7762_v23  ;;  %7828 = vst.msk [vmem:[%s15408_s8 + $0x160] sm:$0xff] %vm7783_vm14, %v7763_v44  ;;  %v7729_v36 = vmul.f32 %v15695_v5, %v7582_v61  ;;  %v15696_v23 = vld [vmem:[#allocation39_spill] sm:$0xff]  ;;  %v15697_v44 = vld [vmem:[#allocation50_spill] sm:$0xff] }
 0xdae   :  { %7829 = vst.msk [vmem:[%s15408_s8 + $0x168] sm:$0xff] %vm7783_vm14, %v7764_v11  ;;  %7830 = vst.msk [vmem:[%s15408_s8 + $0x170] sm:$0xff] %vm7783_vm14, %v7765_v13  ;;  %v7730_v17 = vmul.f32 %v15696_v23, %v7582_v61  ;;  %v7731_v49 = vmul.f32 %v15697_v44, %v7586_v52  ;;  %v15698_v11 = vld [vmem:[#allocation41_spill] sm:$0xff]  ;;  %v15699_v13 = vld [vmem:[#allocation52_spill] sm:$0xff]  ;;  %11105 = vmatmul.mubr.msk.bf16.gmra.mxu1 %vm2276_vm4, %v9372_v50 }
 0xdaf   :  { %7831 = vst.msk [vmem:[%s15408_s8 + $0x178] sm:$0xff] %vm7783_vm14, %v7766_v27  ;;  %7784 = vst.msk [vmem:[%s15408_s8] sm:$0xff] %vm7783_vm14, %v7719_v12  ;;  %v7732_v46 = vmul.f32 %v15698_v11, %v7586_v52  ;;  %v7733_v34 = vmul.f32 %v15699_v13, %v7590_v2  ;;  %v15700_v27 = vld [vmem:[#allocation43_spill] sm:$0xff]  ;;  %v11062_v54 = vpop.f32.mrf.mxu1  ;;  %v15703_v5 = vld [vmem:[#allocation20_spill] sm:$0xff] }
 0xdb0   :  { %7785 = vst.msk [vmem:[%s15408_s8 + $0x8] sm:$0xff] %vm7783_vm14, %v7720_v6  ;;  %7786 = vst.msk [vmem:[%s15408_s8 + $0x10] sm:$0xff] %vm7783_vm14, %v7721_v40  ;;  %v7734_v62 = vmul.f32 %v15700_v27, %v7590_v2  ;;  %v15706_v23 = vld [vmem:[#allocation29_spill] sm:$0xff]  ;;  %v15707_v44 = vld [vmem:[#allocation32_spill] sm:$0xff] }
 0xdb1   :  { %7787 = vst.msk [vmem:[%s15408_s8 + $0x18] sm:$0xff] %vm7783_vm14, %v7722_v22  ;;  %7788 = vst.msk [vmem:[%s15408_s8 + $0x20] sm:$0xff] %vm7783_vm14, %v7723_v7  ;;  %v9583_v28 = vpop.f32.mrf.mxu1 }
 0xdb2   :  { %7789 = vst.msk [vmem:[%s15408_s8 + $0x28] sm:$0xff] %vm7783_vm14, %v7724_v39  ;;  %7790 = vst.msk [vmem:[%s15408_s8 + $0x30] sm:$0xff] %vm7783_vm14, %v7725_v55 }
 0xdb3   :  { %7791 = vst.msk [vmem:[%s15408_s8 + $0x38] sm:$0xff] %vm7783_vm14, %v7726_v53  ;;  %7792 = vst.msk [vmem:[%s15408_s8 + $0x40] sm:$0xff] %vm7783_vm14, %v7727_v21  ;;  %v11063_v0 = vpop.f32.mrf.mxu1 }
 0xdb4   :  { %7793 = vst.msk [vmem:[%s15408_s8 + $0x48] sm:$0xff] %vm7783_vm14, %v7728_v37  ;;  %7794 = vst.msk [vmem:[%s15408_s8 + $0x50] sm:$0xff] %vm7783_vm14, %v7729_v36  ;;  %v15702_v37 = vld [vmem:[#allocation15_spill] sm:$0xff] }
 0xdb5   :  { %7795 = vst.msk [vmem:[%s15408_s8 + $0x58] sm:$0xff] %vm7783_vm14, %v7730_v17  ;;  %7796 = vst.msk [vmem:[%s15408_s8 + $0x60] sm:$0xff] %vm7783_vm14, %v7731_v49  ;;  %v9586_v14 = vpop.f32.mrf.mxu1 }
 0xdb6   :  { %7797 = vst.msk [vmem:[%s15408_s8 + $0x68] sm:$0xff] %vm7783_vm14, %v7732_v46  ;;  %7798 = vst.msk [vmem:[%s15408_s8 + $0x70] sm:$0xff] %vm7783_vm14, %v7733_v34 }
 0xdb7   :  { %7799 = vst.msk [vmem:[%s15408_s8 + $0x78] sm:$0xff] %vm7783_vm14, %v7734_v62 }
 0xdb8   :  { %9793 = vst.msk [vmem:[%s15407_s7 + $0x90] sm:$0xff] %vm9774_vm13, %v11062_v54  ;;  %9791 = vst.msk [vmem:[%s15407_s7 + $0x80] sm:$0xff] %vm9774_vm13, %v9583_v28 }
 0xdb9   :  { %9794 = vst.msk [vmem:[%s15407_s7 + $0x98] sm:$0xff] %vm9774_vm13, %v11063_v0  ;;  %9792 = vst.msk [vmem:[%s15407_s7 + $0x88] sm:$0xff] %vm9774_vm13, %v9586_v14 }
 0xdbf   :  { %v11066_v35 = vpop.f32.mrf.mxu1 }
 0xdc0   :  { %9797 = vst.msk [vmem:[%s15407_s7 + $0xb0] sm:$0xff] %vm9774_vm13, %v11066_v35 }
 0xdc1   :  { %v9599_v29 = vpop.f32.mrf.mxu1 }
 0xdc2   :  { %9795 = vst.msk [vmem:[%s15407_s7 + $0xa0] sm:$0xff] %vm9774_vm13, %v9599_v29 }
 0xdc3   :  { %v11067_v4 = vpop.f32.mrf.mxu1 }
 0xdc4   :  { %9798 = vst.msk [vmem:[%s15407_s7 + $0xb8] sm:$0xff] %vm9774_vm13, %v11067_v4 }
 0xdc5   :  { %v9602_v16 = vpop.f32.mrf.mxu1 }
 0xdc6   :  { %9796 = vst.msk [vmem:[%s15407_s7 + $0xa8] sm:$0xff] %vm9774_vm13, %v9602_v16 }
 0xdcf   :  { %v11070_v58 = vpop.f32.mrf.mxu1 }
 0xdd0   :  { %9801 = vst.msk [vmem:[%s15407_s7 + $0xd0] sm:$0xff] %vm9774_vm13, %v11070_v58 }
 0xdd1   :  { %v9615_v30 = vpop.f32.mrf.mxu1 }
 0xdd2   :  { %9799 = vst.msk [vmem:[%s15407_s7 + $0xc0] sm:$0xff] %vm9774_vm13, %v9615_v30 }
 0xdd3   :  { %v11071_v61 = vpop.f32.mrf.mxu1 }
 0xdd4   :  { %9802 = vst.msk [vmem:[%s15407_s7 + $0xd8] sm:$0xff] %vm9774_vm13, %v11071_v61 }
 0xdd5   :  { %v9618_v52 = vpop.f32.mrf.mxu1 }
 0xdd6   :  { %9800 = vst.msk [vmem:[%s15407_s7 + $0xc8] sm:$0xff] %vm9774_vm13, %v9618_v52 }
 0xddf   :  { %v11074_v2 = vpop.f32.mrf.mxu1 }
 0xde0   :  { %9805 = vst.msk [vmem:[%s15407_s7 + $0xf0] sm:$0xff] %vm9774_vm13, %v11074_v2 }
 0xde1   :  { %v9631_v56 = vpop.f32.mrf.mxu1 }
 0xde2   :  { %9803 = vst.msk [vmem:[%s15407_s7 + $0xe0] sm:$0xff] %vm9774_vm13, %v9631_v56 }
 0xde3   :  { %v11075_v12 = vpop.f32.mrf.mxu1 }
 0xde4   :  { %9806 = vst.msk [vmem:[%s15407_s7 + $0xf8] sm:$0xff] %vm9774_vm13, %v11075_v12 }
 0xde5   :  { %v9634_v42 = vpop.f32.mrf.mxu1 }
 0xde6   :  { %9804 = vst.msk [vmem:[%s15407_s7 + $0xe8] sm:$0xff] %vm9774_vm13, %v9634_v42 }
 0xdec   :  { %v7550_v59 = vpop.xlane.xlu1 %7549 }
 0xded   :  { %11519 = vrcp.f32 %v7550_v59 }
 0xdef   :  { %v11078_v6 = vpop.f32.mrf.mxu1 }
 0xdf0   :  { %9809 = vst.msk [vmem:[%s15407_s7 + $0x110] sm:$0xff] %vm9774_vm13, %v11078_v6 }
 0xdf1   :  { %v9647_v40 = vpop.f32.mrf.mxu1 }
 0xdf2   :  { %9807 = vst.msk [vmem:[%s15407_s7 + $0x100] sm:$0xff] %vm9774_vm13, %v9647_v40 }
 0xdf3   :  { %v11079_v48 = vpop.f32.mrf.mxu1 }
 0xdf4   :  { %9810 = vst.msk [vmem:[%s15407_s7 + $0x118] sm:$0xff] %vm9774_vm13, %v11079_v48 }
 0xdf5   :  { %v9650_v22 = vpop.f32.mrf.mxu1 }
 0xdf6   :  { %9808 = vst.msk [vmem:[%s15407_s7 + $0x108] sm:$0xff] %vm9774_vm13, %v9650_v22 }
 0xdfa   :  { %v11520_v3 = vpop.eup %11519 }
 0xdfb   :  { %v7658_v7 = vrot.slane %v11520_v3, %v13983_v9  ;;  %v7662_v20 = vrot.slane %v11520_v3, %v13986_v24  ;;  %v7666_v39 = vrot.slane %v11520_v3, %v14002_v25  ;;  %v7670_v57 = vrot.slane %v11520_v3, %v14028_v47 }
 0xdfc   :  { %v7674_v18 = vrot.slane %v11520_v3, %v13993_v41  ;;  %v7678_v53 = vrot.slane %v11520_v3, %v14005_v45  ;;  %v7682_v38 = vrot.slane %v11520_v3, %v14016_v10  ;;  %v7686_v21 = vrot.slane %v11520_v3, %v14031_v60 }
 0xdfd   :  { %v7767_v9 = vmul.f32 %v14522_v32, %v7658_v7  ;;  %v7768_v24 = vmul.f32 %v14528_v26, %v7658_v7  ;;  %v7769_v47 = vmul.f32 %v14540_v51, %v7662_v20  ;;  %v7770_v25 = vmul.f32 %v14543_v1, %v7662_v20  ;;  %v15701_v26 = vld [vmem:[#allocation16_spill] sm:$0xff] }
 0xdfe   :  { %v7771_v45 = vmul.f32 %v14554_v33, %v7666_v39  ;;  %v7772_v10 = vmul.f32 %v14557_v43, %v7666_v39  ;;  %v7773_v60 = vmul.f32 %v14568_v19, %v7670_v57  ;;  %v7774_v63 = vmul.f32 %v14570_v15, %v7670_v57  ;;  %v15704_v43 = vld [vmem:[#allocation25_spill] sm:$0xff]  ;;  %v15705_v15 = vld [vmem:[#allocation24_spill] sm:$0xff] }
 0xdff   :  { %v11082_v55 = vpop.f32.mrf.mxu1  ;;  %v7775_v32 = vmul.f32 %v14576_v8, %v7674_v18  ;;  %v7776_v51 = vmul.f32 %v15701_v26, %v7674_v18  ;;  %v7777_v1 = vmul.f32 %v15702_v37, %v7678_v53  ;;  %v7778_v36 = vmul.f32 %v15703_v5, %v7678_v53  ;;  %7832 = vst.msk [vmem:[%s15408_s8 + $0x180] sm:$0xff] %vm7783_vm14, %v7767_v9 }
 0xe00   :  { %9813 = vst.msk [vmem:[%s15407_s7 + $0x130] sm:$0xff] %vm9774_vm13, %v11082_v55  ;;  %v7779_v19 = vmul.f32 %v15704_v43, %v7682_v38  ;;  %v7780_v8 = vmul.f32 %v15705_v15, %v7682_v38  ;;  %v7781_v17 = vmul.f32 %v15706_v23, %v7686_v21  ;;  %v7782_v49 = vmul.f32 %v15707_v44, %v7686_v21 }
 0xe01   :  { %v9663_v41 = vpop.f32.mrf.mxu1  ;;  %7833 = vst.msk [vmem:[%s15408_s8 + $0x188] sm:$0xff] %vm7783_vm14, %v7768_v24  ;;  %7834 = vst.msk [vmem:[%s15408_s8 + $0x190] sm:$0xff] %vm7783_vm14, %v7769_v47 }
 0xe02   :  { %9811 = vst.msk [vmem:[%s15407_s7 + $0x120] sm:$0xff] %vm9774_vm13, %v9663_v41 }
 0xe03   :  { %7835 = vst.msk [vmem:[%s15408_s8 + $0x198] sm:$0xff] %vm7783_vm14, %v7770_v25  ;;  %v11083_v33 = vpop.f32.mrf.mxu1  ;;  %7836 = vst.msk [vmem:[%s15408_s8 + $0x1a0] sm:$0xff] %vm7783_vm14, %v7771_v45 }
 0xe04   :  { %7837 = vst.msk [vmem:[%s15408_s8 + $0x1a8] sm:$0xff] %vm7783_vm14, %v7772_v10  ;;  %7838 = vst.msk [vmem:[%s15408_s8 + $0x1b0] sm:$0xff] %vm7783_vm14, %v7773_v60 }
 0xe05   :  { %7839 = vst.msk [vmem:[%s15408_s8 + $0x1b8] sm:$0xff] %vm7783_vm14, %v7774_v63  ;;  %7840 = vst.msk [vmem:[%s15408_s8 + $0x1c0] sm:$0xff] %vm7783_vm14, %v7775_v32  ;;  %v9666_v11 = vpop.f32.mrf.mxu1 }
 0xe06   :  { %9814 = vst.msk [vmem:[%s15407_s7 + $0x138] sm:$0xff] %vm9774_vm13, %v11083_v33  ;;  %9812 = vst.msk [vmem:[%s15407_s7 + $0x128] sm:$0xff] %vm9774_vm13, %v9666_v11 }
 0xe07   :  { %7841 = vst.msk [vmem:[%s15408_s8 + $0x1c8] sm:$0xff] %vm7783_vm14, %v7776_v51  ;;  %7842 = vst.msk [vmem:[%s15408_s8 + $0x1d0] sm:$0xff] %vm7783_vm14, %v7777_v1 }
 0xe08   :  { %7843 = vst.msk [vmem:[%s15408_s8 + $0x1d8] sm:$0xff] %vm7783_vm14, %v7778_v36  ;;  %7844 = vst.msk [vmem:[%s15408_s8 + $0x1e0] sm:$0xff] %vm7783_vm14, %v7779_v19 }
 0xe09   :  { %7845 = vst.msk [vmem:[%s15408_s8 + $0x1e8] sm:$0xff] %vm7783_vm14, %v7780_v8  ;;  %7846 = vst.msk [vmem:[%s15408_s8 + $0x1f0] sm:$0xff] %vm7783_vm14, %v7781_v17 }
 0xe0a   :  { %7847 = vst.msk [vmem:[%s15408_s8 + $0x1f8] sm:$0xff] %vm7783_vm14, %v7782_v49 }
 0xe0f   :  { %v11086_v46 = vpop.f32.mrf.mxu1 }
 0xe10   :  { %9817 = vst.msk [vmem:[%s15407_s7 + $0x150] sm:$0xff] %vm9774_vm13, %v11086_v46 }
 0xe11   :  { %v9679_v13 = vpop.f32.mrf.mxu1 }
 0xe12   :  { %9815 = vst.msk [vmem:[%s15407_s7 + $0x140] sm:$0xff] %vm9774_vm13, %v9679_v13 }
 0xe13   :  { %v11087_v34 = vpop.f32.mrf.mxu1 }
 0xe14   :  { %9818 = vst.msk [vmem:[%s15407_s7 + $0x158] sm:$0xff] %vm9774_vm13, %v11087_v34 }
 0xe15   :  { %v9682_v27 = vpop.f32.mrf.mxu1 }
 0xe16   :  { %9816 = vst.msk [vmem:[%s15407_s7 + $0x148] sm:$0xff] %vm9774_vm13, %v9682_v27 }
 0xe1f   :  { %v11090_v62 = vpop.f32.mrf.mxu1 }
 0xe20   :  { %9821 = vst.msk [vmem:[%s15407_s7 + $0x170] sm:$0xff] %vm9774_vm13, %v11090_v62 }
 0xe21   :  { %v9695_v31 = vpop.f32.mrf.mxu1 }
 0xe22   :  { %9819 = vst.msk [vmem:[%s15407_s7 + $0x160] sm:$0xff] %vm9774_vm13, %v9695_v31 }
 0xe23   :  { %v11091_v50 = vpop.f32.mrf.mxu1 }
 0xe24   :  { %9822 = vst.msk [vmem:[%s15407_s7 + $0x178] sm:$0xff] %vm9774_vm13, %v11091_v50 }
 0xe25   :  { %v9698_v54 = vpop.f32.mrf.mxu1 }
 0xe26   :  { %9820 = vst.msk [vmem:[%s15407_s7 + $0x168] sm:$0xff] %vm9774_vm13, %v9698_v54 }
 0xe34   :  { %v11094_v28 = vpop.f32.mrf.mxu1 }
 0xe35   :  { %9825 = vst.msk [vmem:[%s15407_s7 + $0x190] sm:$0xff] %vm9774_vm13, %v11094_v28 }
 0xe36   :  { %v9711_v0 = vpop.f32.mrf.mxu1 }
 0xe37   :  { %9823 = vst.msk [vmem:[%s15407_s7 + $0x180] sm:$0xff] %vm9774_vm13, %v9711_v0 }
 0xe38   :  { %v11095_v14 = vpop.f32.mrf.mxu1 }
 0xe39   :  { %9826 = vst.msk [vmem:[%s15407_s7 + $0x198] sm:$0xff] %vm9774_vm13, %v11095_v14 }
 0xe3a   :  { %v9714_v35 = vpop.f32.mrf.mxu1 }
 0xe3b   :  { %9824 = vst.msk [vmem:[%s15407_s7 + $0x188] sm:$0xff] %vm9774_vm13, %v9714_v35 }
 0xe47   :  { %v11098_v29 = vpop.f32.mrf.mxu1 }
 0xe48   :  { %9829 = vst.msk [vmem:[%s15407_s7 + $0x1b0] sm:$0xff] %vm9774_vm13, %v11098_v29 }
 0xe49   :  { %v9727_v4 = vpop.f32.mrf.mxu1 }
 0xe4a   :  { %9827 = vst.msk [vmem:[%s15407_s7 + $0x1a0] sm:$0xff] %vm9774_vm13, %v9727_v4 }
 0xe4b   :  { %v11099_v16 = vpop.f32.mrf.mxu1 }
 0xe4c   :  { %9830 = vst.msk [vmem:[%s15407_s7 + $0x1b8] sm:$0xff] %vm9774_vm13, %v11099_v16 }
 0xe4d   :  { %v9730_v58 = vpop.f32.mrf.mxu1 }
 0xe4e   :  { %9828 = vst.msk [vmem:[%s15407_s7 + $0x1a8] sm:$0xff] %vm9774_vm13, %v9730_v58 }
 0xe4f   :  { %v11102_v30 = vpop.f32.mrf.mxu1 }
 0xe50   :  { %9833 = vst.msk [vmem:[%s15407_s7 + $0x1d0] sm:$0xff] %vm9774_vm13, %v11102_v30 }
 0xe51   :  { %v9743_v61 = vpop.f32.mrf.mxu1 }
 0xe52   :  { %9831 = vst.msk [vmem:[%s15407_s7 + $0x1c0] sm:$0xff] %vm9774_vm13, %v9743_v61 }
 0xe53   :  { %v11103_v52 = vpop.f32.mrf.mxu1 }
 0xe54   :  { %9834 = vst.msk [vmem:[%s15407_s7 + $0x1d8] sm:$0xff] %vm9774_vm13, %v11103_v52 }
 0xe55   :  { %v9746_v2 = vpop.f32.mrf.mxu1 }
 0xe56   :  { %9832 = vst.msk [vmem:[%s15407_s7 + $0x1c8] sm:$0xff] %vm9774_vm13, %v9746_v2 }
 0xe6e   :  { %v11106_v56 = vpop.f32.mrf.mxu1 }
 0xe6f   :  { %9837 = vst.msk [vmem:[%s15407_s7 + $0x1f0] sm:$0xff] %vm9774_vm13, %v11106_v56 }
 0xe70   :  { %v9759_v12 = vpop.f32.mrf.mxu1 }
 0xe71   :  { %9835 = vst.msk [vmem:[%s15407_s7 + $0x1e0] sm:$0xff] %vm9774_vm13, %v9759_v12 }
 0xe72   :  { %v11107_v42 = vpop.f32.mrf.mxu1 }
 0xe73   :  { %9838 = vst.msk [vmem:[%s15407_s7 + $0x1f8] sm:$0xff] %vm9774_vm13, %v11107_v42 }
 0xe74   :  { %v9762_v6 = vpop.f32.mrf.mxu1 }
 0xe75   :  { %9836 = vst.msk [vmem:[%s15407_s7 + $0x1e8] sm:$0xff] %vm9774_vm13, %v9762_v6 }
 0xe76   :  { %9847 = vsyncpa [#allocation3], 1 }

</bundles_post_ra>
